<compile_context>
chip_gen: v6e
topology: v6e:2x2x1
jax: 0.10.0
libtpu: 0.0.40
codegen_flags: <defaults>
</compile_context>

<pallas_src>
import jax
import jax.numpy as jnp
from jax.experimental import pallas as pl
from jax.experimental.pallas import tpu as pltpu


def posenet_feat_kernel(
    xcat_ref,                      # (1, N, 64) bf16 : [x | emb | zero pad]
    w12_ref, b12_ref,              # fused conv1/e_conv1   (64, 128) bf16, (1, 128) f32
    w22_ref, b22_ref,              # fused conv2/e_conv2   (128, 256) bf16, (1, 256) f32
    w3_ref, b3_ref,                # conv3                 (256, 512) bf16, (1, 512) f32
    w4_ref, b4_ref,                # conv4                 (512, 1024) bf16, (1, 1024) f32
    w5a_ref, w5b_ref, w5c_ref, b5_ref,  # conv5 split: (128,512),(256,512),(1024,512) bf16
    out_ref,                       # (1, 512, N) f32
):
    f32 = jnp.float32
    bf16 = jnp.bfloat16
    relu = lambda v: jnp.maximum(v, 0.0)

    xin = xcat_ref[0]                                                     # (N, 64) bf16

    # conv1 + e_conv1 fused via block-diagonal weight -> pointfeat_1 directly.
    pf1 = relu(jnp.dot(xin, w12_ref[...],
                       preferred_element_type=f32) + b12_ref[...])        # (N, 128) f32
    # conv2 + e_conv2 fused -> pointfeat_2 directly.
    pf2 = relu(jnp.dot(pf1.astype(bf16), w22_ref[...],
                       preferred_element_type=f32) + b22_ref[...])        # (N, 256)
    # conv3, conv4
    x3 = relu(jnp.dot(pf2.astype(bf16), w3_ref[...],
                      preferred_element_type=f32) + b3_ref[...])          # (N, 512)
    x4 = relu(jnp.dot(x3.astype(bf16), w4_ref[...],
                      preferred_element_type=f32) + b4_ref[...])          # (N, 1024)

    # AvgPool1d(num_points) as a ones-row matmul on the MXU (scale in f32).
    n = x4.shape[0]
    ones_row = jnp.ones((1, n), dtype=bf16)
    ap = jnp.dot(ones_row, x4.astype(bf16),
                 preferred_element_type=f32) * (1.0 / n)                  # (1, 1024)

    # conv5 with w5 split into pf1 / pf2 / pooled slices.  The pooled
    # contribution is computed once (1, 512) and broadcast by the add; no
    # (N, 1408) concat and no (N, 1024) replicated pooled tensor.
    out = jnp.dot(pf1.astype(bf16), w5a_ref[...], preferred_element_type=f32)
    out = out + jnp.dot(pf2.astype(bf16), w5b_ref[...], preferred_element_type=f32)
    out = out + jnp.dot(ap.astype(bf16), w5c_ref[...], preferred_element_type=f32)
    out = relu(out + b5_ref[...])                                         # (N, 512) f32

    # Write channels-first so the wrapper does not need an output transpose.
    out_ref[0] = out.T.astype(out_ref.dtype)                              # (512, N)


def init_params(key):
    """Deterministic Conv1d (kernel_size=1) params stored as (Cin, Cout) mats."""
    shapes = {
        "w1": (6, 64),     "b1": (1, 64),
        "we1": (32, 64),   "be1": (1, 64),
        "w2": (64, 128),   "b2": (1, 128),
        "we2": (64, 128),  "be2": (1, 128),
        "w3": (256, 512),  "b3": (1, 512),
        "w4": (512, 1024), "b4": (1, 1024),
        "w5": (1408, 512), "b5": (1, 512),
    }
    params = {}
    keys = jax.random.split(key, len(shapes))
    for k_rng, (name, shp) in zip(keys, shapes.items()):
        if name.startswith("w"):
            scale = 1.0 / jnp.sqrt(jnp.float32(shp[0]))
        else:
            scale = 0.1
        params[name] = scale * jax.random.normal(k_rng, shp, jnp.float32)
    return params


def posenet_feat(x_ncl, emb_ncl, params, num_points):
    """x_ncl: (B, 6, N), emb_ncl: (B, 32, N) -> (B, 512, N), matching PyTorch."""
    B, Cx, N = x_ncl.shape
    _, Ce, _ = emb_ncl.shape
    assert N == num_points and Cx == 6 and Ce == 32

    f32, bf16 = jnp.float32, jnp.bfloat16
    p = params

    # ---- Host-side prep (weight fusion would normally be done once) ----
    # Lane-dense fused input [x | emb | zero-pad to 64], channels-last, bf16.
    x_t = jnp.transpose(x_ncl, (0, 2, 1))                     # (B, N, 6)
    e_t = jnp.transpose(emb_ncl, (0, 2, 1))                   # (B, N, 32)
    pad = jnp.zeros((B, N, 64 - 6 - 32), f32)
    xcat = jnp.concatenate([x_t, e_t, pad], axis=-1).astype(bf16)   # (B, N, 64)

    # Block-diagonal fused conv1/e_conv1 weight (64, 128).
    w12 = jnp.zeros((64, 128), f32)
    w12 = w12.at[0:6, 0:64].set(p["w1"]).at[6:38, 64:128].set(p["we1"]).astype(bf16)
    b12 = jnp.concatenate([p["b1"], p["be1"]], axis=-1)             # (1, 128)

    # Block-diagonal fused conv2/e_conv2 weight (128, 256).
    w22 = jnp.zeros((128, 256), f32)
    w22 = w22.at[0:64, 0:128].set(p["w2"]).at[64:128, 128:256].set(p["we2"]).astype(bf16)
    b22 = jnp.concatenate([p["b2"], p["be2"]], axis=-1)             # (1, 256)

    w3, b3 = p["w3"].astype(bf16), p["b3"]
    w4, b4 = p["w4"].astype(bf16), p["b4"]
    # conv5 weight split along its 1408-wide input: [pf1 | pf2 | pooled].
    w5a = p["w5"][0:128, :].astype(bf16)                            # (128, 512)
    w5b = p["w5"][128:384, :].astype(bf16)                          # (256, 512)
    w5c = p["w5"][384:1408, :].astype(bf16)                         # (1024, 512)
    b5 = p["b5"]

    weights = [w12, b12, w22, b22, w3, b3, w4, b4, w5a, w5b, w5c, b5]

    def wspec(arr):
        nd = arr.ndim
        # Constant index_map across the grid -> single-buffer (halves weight VMEM).
        return pl.BlockSpec(arr.shape, lambda b, _nd=nd: (0,) * _nd,
                            pipeline_mode=pl.Buffered(1))

    in_specs = [pl.BlockSpec((1, N, 64), lambda b: (b, 0, 0))] + [wspec(a) for a in weights]

    out = pl.pallas_call(
        posenet_feat_kernel,
        out_shape=jax.ShapeDtypeStruct((B, 512, N), f32),
        grid_spec=pltpu.PrefetchScalarGridSpec(
            num_scalar_prefetch=0,
            grid=(B,),
            in_specs=in_specs,
            out_specs=pl.BlockSpec((1, 512, N), lambda b: (b, 0, 0)),
        ),
        compiler_params=pltpu.CompilerParams(
            dimension_semantics=("parallel",),
            vmem_limit_bytes=64 * 1024 * 1024,
        ),
    )(xcat, *weights)
    return out                                                       # (B, 512, N)


def posenet_feat_ref(x_ncl, emb_ncl, params, num_points):
    """Pure-JAX reference mirroring the PyTorch forward (same bf16 matmul casts)."""
    relu = lambda v: jnp.maximum(v, 0.0)
    bf16, f32 = jnp.bfloat16, jnp.float32

    def lin(a, w, b):
        return relu(jnp.dot(a.astype(bf16), w.astype(bf16),
                            preferred_element_type=f32) + b)

    x = jnp.transpose(x_ncl, (0, 2, 1))
    emb = jnp.transpose(emb_ncl, (0, 2, 1))
    p = params
    x1 = lin(x, p["w1"], p["b1"])
    e1 = lin(emb, p["we1"], p["be1"])
    pf1 = jnp.concatenate([x1, e1], axis=-1)
    x2 = lin(x1, p["w2"], p["b2"])
    e2 = lin(e1, p["we2"], p["be2"])
    pf2 = jnp.concatenate([x2, e2], axis=-1)
    x3 = lin(pf2, p["w3"], p["b3"])
    x4 = lin(x3, p["w4"], p["b4"])
    ap = jnp.mean(x4, axis=1, keepdims=True)
    ap_rep = jnp.broadcast_to(ap, (x4.shape[0], num_points, 1024))
    feat = jnp.concatenate([pf1, pf2, ap_rep], axis=-1)
    out = lin(feat, p["w5"], p["b5"])
    return jnp.transpose(out, (0, 2, 1))


if __name__ == "__main__":
    key = jax.random.PRNGKey(0)
    k_p, k_x, k_e = jax.random.split(key, 3)

    B = 2               # >= 2 independent "parallel" grid steps (feeds both v7x TCs)
    NUM_POINTS = 256    # 256 rows per matmul = one full MXU pass on v6e/v7x

    params = init_params(k_p)
    x = jax.random.normal(k_x, (B, 6, NUM_POINTS), jnp.float32)
    emb = jax.random.normal(k_e, (B, 32, NUM_POINTS), jnp.float32)

    fwd = jax.jit(posenet_feat, static_argnums=3)
    out = jax.block_until_ready(fwd(x, emb, params, NUM_POINTS))
    assert out.shape == (B, 512, NUM_POINTS), out.shape

    ref = jax.block_until_ready(posenet_feat_ref(x, emb, params, NUM_POINTS))
    max_err = float(jnp.max(jnp.abs(out - ref)))
    assert jnp.allclose(out, ref, atol=2e-2, rtol=2e-2), f"mismatch vs reference: {max_err}"

    print("KERNEL_OK")
</pallas_src>

<mosaic_0001>
module attributes {stable_mosaic.version = 11 : i64} {
  func.func @posenet_feat_kernel(%arg0: i32, %arg1: memref<1x256x64xbf16, #tpu.memory_space<vmem>>, %arg2: memref<64x128xbf16, #tpu.memory_space<vmem>>, %arg3: memref<1x128xf32, #tpu.memory_space<vmem>>, %arg4: memref<128x256xbf16, #tpu.memory_space<vmem>>, %arg5: memref<1x256xf32, #tpu.memory_space<vmem>>, %arg6: memref<256x512xbf16, #tpu.memory_space<vmem>>, %arg7: memref<1x512xf32, #tpu.memory_space<vmem>>, %arg8: memref<512x1024xbf16, #tpu.memory_space<vmem>>, %arg9: memref<1x1024xf32, #tpu.memory_space<vmem>>, %arg10: memref<128x512xbf16, #tpu.memory_space<vmem>>, %arg11: memref<256x512xbf16, #tpu.memory_space<vmem>>, %arg12: memref<1024x512xbf16, #tpu.memory_space<vmem>>, %arg13: memref<1x512xf32, #tpu.memory_space<vmem>>, %arg14: memref<1x512x256xf32, #tpu.memory_space<vmem>>) attributes {dimension_semantics = [#tpu.dimension_semantics<parallel>], iteration_bounds = array<i64: 2>, scalar_prefetch = 0 : i64, scratch_operands = 0 : i64, tpu.core_type = #tpu.core_type<tc>, window_params = [{transform_indices = @transform_0, window_bounds = array<i64: 1, 256, 64>}, {pipeline_mode = #tpu.pipeline_mode<synchronous>, transform_indices = @transform_1, window_bounds = array<i64: 64, 128>}, {pipeline_mode = #tpu.pipeline_mode<synchronous>, transform_indices = @transform_2, window_bounds = array<i64: 1, 128>}, {pipeline_mode = #tpu.pipeline_mode<synchronous>, transform_indices = @transform_3, window_bounds = array<i64: 128, 256>}, {pipeline_mode = #tpu.pipeline_mode<synchronous>, transform_indices = @transform_4, window_bounds = array<i64: 1, 256>}, {pipeline_mode = #tpu.pipeline_mode<synchronous>, transform_indices = @transform_5, window_bounds = array<i64: 256, 512>}, {pipeline_mode = #tpu.pipeline_mode<synchronous>, transform_indices = @transform_6, window_bounds = array<i64: 1, 512>}, {pipeline_mode = #tpu.pipeline_mode<synchronous>, transform_indices = @transform_7, window_bounds = array<i64: 512, 1024>}, {pipeline_mode = #tpu.pipeline_mode<synchronous>, transform_indices = @transform_8, window_bounds = array<i64: 1, 1024>}, {pipeline_mode = #tpu.pipeline_mode<synchronous>, transform_indices = @transform_9, window_bounds = array<i64: 128, 512>}, {pipeline_mode = #tpu.pipeline_mode<synchronous>, transform_indices = @transform_10, window_bounds = array<i64: 256, 512>}, {pipeline_mode = #tpu.pipeline_mode<synchronous>, transform_indices = @transform_11, window_bounds = array<i64: 1024, 512>}, {pipeline_mode = #tpu.pipeline_mode<synchronous>, transform_indices = @transform_12, window_bounds = array<i64: 1, 512>}, {transform_indices = @transform_13, window_bounds = array<i64: 1, 512, 256>}]} {
    %c0 = arith.constant 0 : index
    %c0_0 = arith.constant 0 : index
    %c0_1 = arith.constant 0 : index
    %0 = vector.load %arg1[%c0, %c0_0, %c0_1] : memref<1x256x64xbf16, #tpu.memory_space<vmem>>, vector<1x256x64xbf16>
    %1 = vector.shape_cast %0 : vector<1x256x64xbf16> to vector<256x64xbf16>
    %c0_2 = arith.constant 0 : index
    %c0_3 = arith.constant 0 : index
    %2 = vector.load %arg2[%c0_2, %c0_3] : memref<64x128xbf16, #tpu.memory_space<vmem>>, vector<64x128xbf16>
    %cst = arith.constant dense<0.000000e+00> : vector<256x128xf32>
    %3 = tpu.matmul %1, %2, %cst {dimension_numbers = #tpu.dot_dimension_numbers<[1], [0], [0], [1], [0, 0, 1, 1], [], []>} : vector<256x64xbf16>, vector<64x128xbf16>, vector<256x128xf32> -> vector<256x128xf32>
    %c0_4 = arith.constant 0 : index
    %c0_5 = arith.constant 0 : index
    %4 = vector.load %arg3[%c0_4, %c0_5] : memref<1x128xf32, #tpu.memory_space<vmem>>, vector<1x128xf32>
    %5 = vector.broadcast %4 : vector<1x128xf32> to vector<256x128xf32>
    %6 = arith.addf %3, %5 : vector<256x128xf32>
    %cst_6 = arith.constant 0.000000e+00 : f32
    %7 = vector.broadcast %cst_6 : f32 to vector<256x128xf32>
    %8 = arith.maximumf %6, %7 : vector<256x128xf32>
    %9 = arith.truncf %8 : vector<256x128xf32> to vector<256x128xbf16>
    %c0_7 = arith.constant 0 : index
    %c0_8 = arith.constant 0 : index
    %10 = vector.load %arg4[%c0_7, %c0_8] : memref<128x256xbf16, #tpu.memory_space<vmem>>, vector<128x256xbf16>
    %cst_9 = arith.constant dense<0.000000e+00> : vector<256x256xf32>
    %11 = tpu.matmul %9, %10, %cst_9 {dimension_numbers = #tpu.dot_dimension_numbers<[1], [0], [0], [1], [0, 0, 1, 1], [], []>} : vector<256x128xbf16>, vector<128x256xbf16>, vector<256x256xf32> -> vector<256x256xf32>
    %c0_10 = arith.constant 0 : index
    %c0_11 = arith.constant 0 : index
    %12 = vector.load %arg5[%c0_10, %c0_11] : memref<1x256xf32, #tpu.memory_space<vmem>>, vector<1x256xf32>
    %13 = vector.broadcast %12 : vector<1x256xf32> to vector<256x256xf32>
    %14 = arith.addf %11, %13 : vector<256x256xf32>
    %cst_12 = arith.constant 0.000000e+00 : f32
    %15 = vector.broadcast %cst_12 : f32 to vector<256x256xf32>
    %16 = arith.maximumf %14, %15 : vector<256x256xf32>
    %17 = arith.truncf %16 : vector<256x256xf32> to vector<256x256xbf16>
    %c0_13 = arith.constant 0 : index
    %c0_14 = arith.constant 0 : index
    %18 = vector.load %arg6[%c0_13, %c0_14] : memref<256x512xbf16, #tpu.memory_space<vmem>>, vector<256x512xbf16>
    %cst_15 = arith.constant dense<0.000000e+00> : vector<256x512xf32>
    %19 = tpu.matmul %17, %18, %cst_15 {dimension_numbers = #tpu.dot_dimension_numbers<[1], [0], [0], [1], [0, 0, 1, 1], [], []>} : vector<256x256xbf16>, vector<256x512xbf16>, vector<256x512xf32> -> vector<256x512xf32>
    %c0_16 = arith.constant 0 : index
    %c0_17 = arith.constant 0 : index
    %20 = vector.load %arg7[%c0_16, %c0_17] : memref<1x512xf32, #tpu.memory_space<vmem>>, vector<1x512xf32>
    %21 = vector.broadcast %20 : vector<1x512xf32> to vector<256x512xf32>
    %22 = arith.addf %19, %21 : vector<256x512xf32>
    %cst_18 = arith.constant 0.000000e+00 : f32
    %23 = vector.broadcast %cst_18 : f32 to vector<256x512xf32>
    %24 = arith.maximumf %22, %23 : vector<256x512xf32>
    %25 = arith.truncf %24 : vector<256x512xf32> to vector<256x512xbf16>
    %c0_19 = arith.constant 0 : index
    %c0_20 = arith.constant 0 : index
    %26 = vector.load %arg8[%c0_19, %c0_20] : memref<512x1024xbf16, #tpu.memory_space<vmem>>, vector<512x1024xbf16>
    %cst_21 = arith.constant dense<0.000000e+00> : vector<256x1024xf32>
    %27 = tpu.matmul %25, %26, %cst_21 {dimension_numbers = #tpu.dot_dimension_numbers<[1], [0], [0], [1], [0, 0, 1, 1], [], []>} : vector<256x512xbf16>, vector<512x1024xbf16>, vector<256x1024xf32> -> vector<256x1024xf32>
    %c0_22 = arith.constant 0 : index
    %c0_23 = arith.constant 0 : index
    %28 = vector.load %arg9[%c0_22, %c0_23] : memref<1x1024xf32, #tpu.memory_space<vmem>>, vector<1x1024xf32>
    %29 = vector.broadcast %28 : vector<1x1024xf32> to vector<256x1024xf32>
    %30 = arith.addf %27, %29 : vector<256x1024xf32>
    %cst_24 = arith.constant 0.000000e+00 : f32
    %31 = vector.broadcast %cst_24 : f32 to vector<256x1024xf32>
    %32 = arith.maximumf %30, %31 : vector<256x1024xf32>
    %cst_25 = arith.constant 1.000000e+00 : bf16
    %33 = vector.broadcast %cst_25 : bf16 to vector<1x256xbf16>
    %34 = arith.truncf %32 : vector<256x1024xf32> to vector<256x1024xbf16>
    %cst_26 = arith.constant dense<0.000000e+00> : vector<1x1024xf32>
    %35 = tpu.matmul %33, %34, %cst_26 {dimension_numbers = #tpu.dot_dimension_numbers<[1], [0], [0], [1], [0, 0, 1, 1], [], []>} : vector<1x256xbf16>, vector<256x1024xbf16>, vector<1x1024xf32> -> vector<1x1024xf32>
    %cst_27 = arith.constant 3.906250e-03 : f32
    %36 = vector.broadcast %cst_27 : f32 to vector<1x1024xf32>
    %37 = arith.mulf %35, %36 : vector<1x1024xf32>
    %38 = arith.truncf %8 : vector<256x128xf32> to vector<256x128xbf16>
    %c0_28 = arith.constant 0 : index
    %c0_29 = arith.constant 0 : index
    %39 = vector.load %arg10[%c0_28, %c0_29] : memref<128x512xbf16, #tpu.memory_space<vmem>>, vector<128x512xbf16>
    %cst_30 = arith.constant dense<0.000000e+00> : vector<256x512xf32>
    %40 = tpu.matmul %38, %39, %cst_30 {dimension_numbers = #tpu.dot_dimension_numbers<[1], [0], [0], [1], [0, 0, 1, 1], [], []>} : vector<256x128xbf16>, vector<128x512xbf16>, vector<256x512xf32> -> vector<256x512xf32>
    %41 = arith.truncf %16 : vector<256x256xf32> to vector<256x256xbf16>
    %c0_31 = arith.constant 0 : index
    %c0_32 = arith.constant 0 : index
    %42 = vector.load %arg11[%c0_31, %c0_32] : memref<256x512xbf16, #tpu.memory_space<vmem>>, vector<256x512xbf16>
    %cst_33 = arith.constant dense<0.000000e+00> : vector<256x512xf32>
    %43 = tpu.matmul %41, %42, %cst_33 {dimension_numbers = #tpu.dot_dimension_numbers<[1], [0], [0], [1], [0, 0, 1, 1], [], []>} : vector<256x256xbf16>, vector<256x512xbf16>, vector<256x512xf32> -> vector<256x512xf32>
    %44 = arith.addf %40, %43 : vector<256x512xf32>
    %45 = arith.truncf %37 : vector<1x1024xf32> to vector<1x1024xbf16>
    %c0_34 = arith.constant 0 : index
    %c0_35 = arith.constant 0 : index
    %46 = vector.load %arg12[%c0_34, %c0_35] : memref<1024x512xbf16, #tpu.memory_space<vmem>>, vector<1024x512xbf16>
    %cst_36 = arith.constant dense<0.000000e+00> : vector<1x512xf32>
    %47 = tpu.matmul %45, %46, %cst_36 {dimension_numbers = #tpu.dot_dimension_numbers<[1], [0], [0], [1], [0, 0, 1, 1], [], []>} : vector<1x1024xbf16>, vector<1024x512xbf16>, vector<1x512xf32> -> vector<1x512xf32>
    %48 = vector.broadcast %47 : vector<1x512xf32> to vector<256x512xf32>
    %49 = arith.addf %44, %48 : vector<256x512xf32>
    %c0_37 = arith.constant 0 : index
    %c0_38 = arith.constant 0 : index
    %50 = vector.load %arg13[%c0_37, %c0_38] : memref<1x512xf32, #tpu.memory_space<vmem>>, vector<1x512xf32>
    %51 = vector.broadcast %50 : vector<1x512xf32> to vector<256x512xf32>
    %52 = arith.addf %49, %51 : vector<256x512xf32>
    %cst_39 = arith.constant 0.000000e+00 : f32
    %53 = vector.broadcast %cst_39 : f32 to vector<256x512xf32>
    %54 = arith.maximumf %52, %53 : vector<256x512xf32>
    %55 = tpu.transpose %54, [1, 0] : vector<256x512xf32> -> vector<512x256xf32>
    %c0_40 = arith.constant 0 : index
    %c0_41 = arith.constant 0 : index
    %c0_42 = arith.constant 0 : index
    %56 = vector.load %arg14[%c0_40, %c0_41, %c0_42] : memref<1x512x256xf32, #tpu.memory_space<vmem>>, vector<1x512x256xf32>
    %57 = vector.shape_cast %56 : vector<1x512x256xf32> to vector<512x256xf32>
    %58 = vector.shape_cast %55 : vector<512x256xf32> to vector<1x512x256xf32>
    tpu.vector_store %arg14[%c0_40, %c0_41, %c0_42], %58 {strides = array<i32>} : memref<1x512x256xf32, #tpu.memory_space<vmem>>, vector<1x512x256xf32>,
    return
  }
  func.func @transform_0(%arg0: i32) -> (i32, i32, i32) {
    %c0_i32 = arith.constant 0 : i32
    %c0_i32_0 = arith.constant 0 : i32
    %c0_i32_1 = arith.constant 0 : i32
    return %arg0, %c0_i32, %c0_i32_0 : i32, i32, i32
  }
  func.func @transform_1(%arg0: i32) -> (i32, i32) {
    %c0_i32 = arith.constant 0 : i32
    %c0_i32_0 = arith.constant 0 : i32
    %c0_i32_1 = arith.constant 0 : i32
    return %c0_i32, %c0_i32_0 : i32, i32
  }
  func.func @transform_2(%arg0: i32) -> (i32, i32) {
    %c0_i32 = arith.constant 0 : i32
    %c0_i32_0 = arith.constant 0 : i32
    %c0_i32_1 = arith.constant 0 : i32
    return %c0_i32, %c0_i32_0 : i32, i32
  }
  func.func @transform_3(%arg0: i32) -> (i32, i32) {
    %c0_i32 = arith.constant 0 : i32
    %c0_i32_0 = arith.constant 0 : i32
    %c0_i32_1 = arith.constant 0 : i32
    return %c0_i32, %c0_i32_0 : i32, i32
  }
  func.func @transform_4(%arg0: i32) -> (i32, i32) {
    %c0_i32 = arith.constant 0 : i32
    %c0_i32_0 = arith.constant 0 : i32
    %c0_i32_1 = arith.constant 0 : i32
    return %c0_i32, %c0_i32_0 : i32, i32
  }
  func.func @transform_5(%arg0: i32) -> (i32, i32) {
    %c0_i32 = arith.constant 0 : i32
    %c0_i32_0 = arith.constant 0 : i32
    %c0_i32_1 = arith.constant 0 : i32
    return %c0_i32, %c0_i32_0 : i32, i32
  }
  func.func @transform_6(%arg0: i32) -> (i32, i32) {
    %c0_i32 = arith.constant 0 : i32
    %c0_i32_0 = arith.constant 0 : i32
    %c0_i32_1 = arith.constant 0 : i32
    return %c0_i32, %c0_i32_0 : i32, i32
  }
  func.func @transform_7(%arg0: i32) -> (i32, i32) {
    %c0_i32 = arith.constant 0 : i32
    %c0_i32_0 = arith.constant 0 : i32
    %c0_i32_1 = arith.constant 0 : i32
    return %c0_i32, %c0_i32_0 : i32, i32
  }
  func.func @transform_8(%arg0: i32) -> (i32, i32) {
    %c0_i32 = arith.constant 0 : i32
    %c0_i32_0 = arith.constant 0 : i32
    %c0_i32_1 = arith.constant 0 : i32
    return %c0_i32, %c0_i32_0 : i32, i32
  }
  func.func @transform_9(%arg0: i32) -> (i32, i32) {
    %c0_i32 = arith.constant 0 : i32
    %c0_i32_0 = arith.constant 0 : i32
    %c0_i32_1 = arith.constant 0 : i32
    return %c0_i32, %c0_i32_0 : i32, i32
  }
  func.func @transform_10(%arg0: i32) -> (i32, i32) {
    %c0_i32 = arith.constant 0 : i32
    %c0_i32_0 = arith.constant 0 : i32
    %c0_i32_1 = arith.constant 0 : i32
    return %c0_i32, %c0_i32_0 : i32, i32
  }
  func.func @transform_11(%arg0: i32) -> (i32, i32) {
    %c0_i32 = arith.constant 0 : i32
    %c0_i32_0 = arith.constant 0 : i32
    %c0_i32_1 = arith.constant 0 : i32
    return %c0_i32, %c0_i32_0 : i32, i32
  }
  func.func @transform_12(%arg0: i32) -> (i32, i32) {
    %c0_i32 = arith.constant 0 : i32
    %c0_i32_0 = arith.constant 0 : i32
    %c0_i32_1 = arith.constant 0 : i32
    return %c0_i32, %c0_i32_0 : i32, i32
  }
  func.func @transform_13(%arg0: i32) -> (i32, i32, i32) {
    %c0_i32 = arith.constant 0 : i32
    %c0_i32_0 = arith.constant 0 : i32
    %c0_i32_1 = arith.constant 0 : i32
    return %arg0, %c0_i32, %c0_i32_0 : i32, i32, i32
  }
}

</mosaic_0001>

<bundles_post_ra>
// kernel: posenet_feat.1
= control target key start
LH: loop header
LB: loop body
LE: loop exit
PB: predicated region body
PF: predicated region fallthrough
CT: control target
= control target key end

     0   :  { %18 = vsyncpa [#allocation3], 0  ;;  %s18099_s0 = inlined_call_operand.vmem [shape: bf16[2,256,64], index: 0, kind: input, shape index: {}]   ;;  %s18100_s1 = inlined_call_operand.vmem [shape: bf16[64,128], index: 1, kind: input, shape index: {}]   ;;  %s18101_s2 = inlined_call_operand.vmem [shape: f32[1,128], index: 2, kind: input, shape index: {}]   ;;  %s18102_s3 = inlined_call_operand.vmem [shape: bf16[128,256], index: 3, kind: input, shape index: {}]   ;;  %s18103_s4 = inlined_call_operand.vmem [shape: f32[1,256], index: 4, kind: input, shape index: {}]   ;;  %s18104_s5 = inlined_call_operand.vmem [shape: bf16[256,512], index: 5, kind: input, shape index: {}]   ;;  %s18105_s6 = inlined_call_operand.vmem [shape: f32[1,512], index: 6, kind: input, shape index: {}]   ;;  %s18106_s7 = inlined_call_operand.vmem [shape: bf16[512,1024], index: 7, kind: input, shape index: {}]   ;;  %s18107_s8 = inlined_call_operand.vmem [shape: f32[1,1024], index: 8, kind: input, shape index: {}]   ;;  %s18108_s9 = inlined_call_operand.vmem [shape: bf16[128,512], index: 9, kind: input, shape index: {}]   ;;  %s18109_s10 = inlined_call_operand.vmem [shape: bf16[256,512], index: 10, kind: input, shape index: {}]   ;;  %s18110_s11 = inlined_call_operand.vmem [shape: bf16[1024,512], index: 11, kind: input, shape index: {}]   ;;  %s18111_s12 = inlined_call_operand.vmem [shape: f32[1,512], index: 12, kind: input, shape index: {}]   ;;  %s18112_s13 = inlined_call_operand.hbm [shape: f32[2,512,256], index: 13, kind: output, shape index: {}]  }
   0x1   :  { %20 = vsyncpa [#allocation3 + $0x1], 0  ;;  %s11660_s25 = smov 0   ;;  %s11662_s26 = smov 0  }
   0x2   :  { %s11664_s27 = smov 0   ;;  %s11666_s28 = smov 0  }
   0x3 LB: > { %18313 = sst [smem:[#allocation5_spill]] %s11579_s27  ;;  %s11681_s29 = sadd.s32 4294967295, %s11583_s28   ;;  %s11583_s28 = sphi %s11666_s28, %s19305_s28   ;;  %s11579_s27 = sphi %s11664_s27, %s19307_s27   ;;  %s11575_s26 = sphi %s11662_s26, %s19309_s26   ;;  %s11571_s25 = sphi %s11660_s25, %s19308_s25  }
   0x4   : > { %s10011_s30 = sadd.s32 4294967294, %s11583_s28   ;;  %s11685_s14 = sadd.s32 1, %s11583_s28  }
   0x5   : > { %18314 = sst [smem:[#allocation6_spill]] %s11685_s14  ;;  %s311_s15 = sadd.s32 1, %s11579_s27 }
   0x6   : > { %s308_s16 = ssub.s32 %s11583_s28, %s11685_s14  ;;  %p321_p0 = scmp.ne.s32.totalorder %s11579_s27, %s11575_s26 }
   0x7   : > { %p309_p1 = scmp.eq.s32.totalorder %s308_s16, 0  ;;  %p322_p2 = scmp.eq.s32.totalorder %s11681_s29, 1 }
   0x8   : > { %p327_p3 = scmp.ne.s32.totalorder %s11575_s26, %s11571_s25  ;;  %p328_p4 = scmp.eq.s32.totalorder %s10011_s30, 1 }
   0x9   : > { %s11696_s17 = scalar_select %p309_p1, %s11579_s27, %s311_s15  }
   0xa   : > { %p11698_p5 = por %p322_p2, %p321_p0  ;;  %p11702_p6 = por %p328_p4, %p327_p3 }
   0xb   : > { %18315 = sst [smem:[#allocation7_spill]] %s11696_s17  ;;  %p10014_p7 = scmp.ge.s32.totalorder %s11583_s28, 1 }
   0xc   : > { %p390_p8 = scmp.lt.s32.totalorder %s11583_s28, 3 }
   0xe   : > { %p391_p9 = pnand %p10014_p7, %p390_p8 }
  0x10   : > { %394 = sbr.rel (%p391_p9) target bundleno = 2400 (0x960), region = 72 }
  0x15   : > { %v10853_v0 = vld [vmem:[%s18100_s1 + $0x18] sm:$0xff]   ;;  %p434_p10 = scmp.lt.s32.totalorder %s11681_s29, 1  ;;  %v10854_v1 = vld [vmem:[%s18100_s1 + $0x10] sm:$0xff]   ;;  %v10855_v2 = vld [vmem:[%s18100_s1 + $0x8] sm:$0xff]   ;;  %vm592_vm0 = vcmask 523264   ;;  %v18116_v36 = vmov 0  }
  0x16   : > { %10770 = vmatprep.subr.bf16.mxu0 %v10853_v0  ;;  %v10873_v3 = vld [vmem:[%s18102_s3 + $0x74] ss:$8 sps:$4 sm:$0xff]   ;;  %v10875_v4 = vld [vmem:[%s18102_s3 + $0x70] ss:$8 sps:$4 sm:$0xff]   ;;  %v10856_v6 = vld [vmem:[%s18100_s1] sm:$0xff]   ;;  %990 = vmatprep.mubr.bf16.mxu1 %v18116_v36  ;;  %s431_s15 = sand.u32 1, %s11575_s26  }
  0x17   : > { %s435_s24 = scalar_select %p434_p10, %s11681_s29, 1  ;;  %10771 = vmatpush3.bf16.msra.mxu0 %v10853_v0  ;;  %958 = vmatprep.subr.bf16.mxu1 %v10873_v3  ;;  %v10876_v10 = vld [vmem:[%s18102_s3 + $0x64] ss:$8 sps:$4 sm:$0xff]   ;;  %v10878_v11 = vld [vmem:[%s18102_s3 + $0x60] ss:$8 sps:$4 sm:$0xff]  }
  0x18   : > { %10772 = vmatprep.subr.bf16.mxu0 %v10854_v1  ;;  %959 = vmatpush1.bf16.msra.mxu1 %v10875_v4  ;;  %v10879_v13 = vld [vmem:[%s18102_s3 + $0x54] ss:$8 sps:$4 sm:$0xff]   ;;  %v10881_v14 = vld [vmem:[%s18102_s3 + $0x50] ss:$8 sps:$4 sm:$0xff]   ;;  %v10882_v15 = vld [vmem:[%s18102_s3 + $0x44] ss:$8 sps:$4 sm:$0xff]  }
  0x19   : > { %s10748_s16 = sshll.u32 %s435_s24, 7  ;;  %960 = vmatprep.subr.bf16.mxu1 %v10876_v10  ;;  %v10884_v16 = vld [vmem:[%s18102_s3 + $0x40] ss:$8 sps:$4 sm:$0xff]   ;;  %v10885_v18 = vld [vmem:[%s18102_s3 + $0x34] ss:$8 sps:$4 sm:$0xff]   ;;  %s10749_s20 = sshll.u32 %s11681_s29, 14 }
  0x1a   : > { %s11725_s14 = scalar_lea.vmem %s18099_s0, %s10748_s16  ;;  %v10887_v20 = vld [vmem:[%s18102_s3 + $0x30] ss:$8 sps:$4 sm:$0xff]   ;;  %v10888_v30 = vld [vmem:[%s18102_s3 + $0x24] ss:$8 sps:$4 sm:$0xff]   ;;  %v10890_v31 = vld [vmem:[%s18102_s3 + $0x20] ss:$8 sps:$4 sm:$0xff]   ;;  %s18052_s27 = scalar_lea.hbm %s18112_s13, %s10749_s20 }
  0x1b   : > { %v10857_v5 = vld [vmem:[%s11725_s14] sm:$0xff]   ;;  %10773 = vmatpush3.bf16.msra.mxu0 %v10854_v1  ;;  %v10858_v7 = vld [vmem:[%s11725_s14 + $0x8] sm:$0xff]   ;;  %v10859_v8 = vld [vmem:[%s11725_s14 + $0x10] sm:$0xff]   ;;  %s10015_s16 = sshll.u32 %s431_s15, 10  ;;  %s18059_s17 = scalar_lea.sflag [#allocation3], %s431_s15 }
  0x1c   : > { %10774 = vmatprep.subr.bf16.mxu0 %v10855_v2  ;;  %10778 = vmatprep.mubr.msk.bf16.mxu0 %vm592_vm0, %v10857_v5  ;;  %v10860_v9 = vld [vmem:[%s11725_s14 + $0x18] sm:$0xff]   ;;  %v10861_v12 = vld [vmem:[%s11725_s14 + $0x20] sm:$0xff]   ;;  %v10862_v17 = vld [vmem:[%s11725_s14 + $0x28] sm:$0xff]   ;;  %s11587_s24 = smov [#allocation2]  }
  0x1d   : > { %961 = vmatpush1.bf16.msra.mxu1 %v10878_v11  ;;  %v10863_v19 = vld [vmem:[%s11725_s14 + $0x30] sm:$0xff]   ;;  %v10864_v21 = vld [vmem:[%s11725_s14 + $0x38] sm:$0xff]   ;;  %v10865_v22 = vld [vmem:[%s11725_s14 + $0x40] sm:$0xff]   ;;  %s11527_s30 = sshll.u32 %s11587_s24, 4  ;;  %s11528_s30 = int_to_ptr.vmem [resolvable:$false] %s11527_s30 }
  0x1e   : > { %962 = vmatprep.subr.bf16.mxu1 %v10879_v13  ;;  %v10866_v23 = vld [vmem:[%s11725_s14 + $0x48] sm:$0xff]   ;;  %v10867_v24 = vld [vmem:[%s11725_s14 + $0x50] sm:$0xff]   ;;  %v10868_v25 = vld [vmem:[%s11725_s14 + $0x58] sm:$0xff]  }
  0x1f   : > { %10775 = vmatpush3.bf16.msra.mxu0 %v10855_v2  ;;  %v10869_v26 = vld [vmem:[%s11725_s14 + $0x60] sm:$0xff]   ;;  %v10870_v27 = vld [vmem:[%s11725_s14 + $0x68] sm:$0xff]   ;;  %v10871_v28 = vld [vmem:[%s11725_s14 + $0x70] sm:$0xff]  }
  0x20   : > { %10776 = vmatprep.subr.bf16.mxu0 %v10856_v6  ;;  %v10872_v29 = vld [vmem:[%s11725_s14 + $0x78] sm:$0xff]   ;;  %v10894_v34 = vld [vmem:[%s18102_s3 + $0x4] ss:$8 sps:$4 sm:$0xff]   ;;  %v10896_v35 = vld [vmem:[%s18102_s3] ss:$8 sps:$4 sm:$0xff]   ;;  %s17701_s14 = scalar_lea.vmem [#allocation2], %s10015_s16 }
  0x21   : > { %963 = vmatpush1.bf16.msra.mxu1 %v10881_v14  ;;  %v10891_v32 = vld [vmem:[%s18102_s3 + $0x14] ss:$8 sps:$4 sm:$0xff]   ;;  %v10893_v33 = vld [vmem:[%s18102_s3 + $0x10] ss:$8 sps:$4 sm:$0xff]   ;;  %v11814_v40 = vld [vmem:[%s18101_s2] ss:$0 sm:$0xff] }
  0x22   : > { %964 = vmatprep.subr.bf16.mxu1 %v10882_v15  ;;  %v10899_v37 = vld [vmem:[%s18104_s5 + $0xec] ss:$16 sps:$4 sm:$0xff]   ;;  %v10921_v45 = vld [vmem:[%s18104_s5 + $0xe0] ss:$16 sps:$4 sm:$0xff]   ;;  %v10923_v47 = vld [vmem:[%s18104_s5 + $0xe4] ss:$16 sps:$4 sm:$0xff]  }
  0x23   : > { %10777 = vmatpush3.bf16.msra.mxu0 %v10856_v6  ;;  %v10929_v50 = vld [vmem:[%s18104_s5 + $0xc4] ss:$16 sps:$4 sm:$0xff]   ;;  %v10897_v52 = vld [vmem:[%s18104_s5 + $0xe8] ss:$16 sps:$4 sm:$0xff]   ;;  %v10902_v55 = vld [vmem:[%s18104_s5 + $0xcc] ss:$16 sps:$4 sm:$0xff]  }
  0x24   : > { %1653 = vmatprep.subr.bf16.mxu0 %v10923_v47  ;;  %v10927_v56 = vld [vmem:[%s18104_s5 + $0xc0] ss:$16 sps:$4 sm:$0xff]   ;;  %v10932_v58 = vld [vmem:[%s18104_s5 + $0xa4] ss:$16 sps:$4 sm:$0xff]   ;;  %v10900_v60 = vld [vmem:[%s18104_s5 + $0xc8] ss:$16 sps:$4 sm:$0xff]  }
  0x25   : > { %965 = vmatpush1.bf16.msra.mxu1 %v10884_v16  ;;  %v10905_v62 = vld [vmem:[%s18104_s5 + $0xac] ss:$16 sps:$4 sm:$0xff]   ;;  %v10930_v63 = vld [vmem:[%s18104_s5 + $0xa0] ss:$16 sps:$4 sm:$0xff]   ;;  %v10938_v1 = vld [vmem:[%s18104_s5 + $0x84] ss:$16 sps:$4 sm:$0xff]  }
  0x26   : > { %10779 = vmatmul.mubr.msk.bf16.vlgmr.msra.gmra.mxu0 %vm592_vm0, %v10858_v7  ;;  %966 = vmatprep.subr.bf16.mxu1 %v10885_v18  ;;  %v10903_v3 = vld [vmem:[%s18104_s5 + $0xa8] ss:$16 sps:$4 sm:$0xff]   ;;  %v10908_v7 = vld [vmem:[%s18104_s5 + $0x8c] ss:$16 sps:$4 sm:$0xff]   ;;  %v10941_v10 = vld [vmem:[%s18104_s5 + $0x64] ss:$16 sps:$4 sm:$0xff]  }
  0x27   : > { %10782 = vmatprep.mubr.msk.bf16.mxu0 %vm592_vm0, %v10859_v8  ;;  %1654 = vmatpush1.bf16.msra.mxu0 %v10921_v45  ;;  %v10936_v8 = vld [vmem:[%s18104_s5 + $0x80] ss:$16 sps:$4 sm:$0xff]   ;;  %v10906_v11 = vld [vmem:[%s18104_s5 + $0x88] ss:$16 sps:$4 sm:$0xff]   ;;  %v10911_v14 = vld [vmem:[%s18104_s5 + $0x6c] ss:$16 sps:$4 sm:$0xff]  }
  0x28   : > { %1655 = vmatprep.subr.bf16.mxu0 %v10929_v50  ;;  %v10939_v15 = vld [vmem:[%s18104_s5 + $0x60] ss:$16 sps:$4 sm:$0xff]   ;;  %v10909_v18 = vld [vmem:[%s18104_s5 + $0x68] ss:$16 sps:$4 sm:$0xff]   ;;  %s9949_s21 = sshll.u32 %s17701_s14, 4  ;;  %s11529_s16 = scalar_lea.vmem %s11528_s30, 32768  ;;  %s18054_s21 = int_to_ptr.vmem [resolvable:$true] %s9949_s21 }
  0x29   : > { %967 = vmatpush1.bf16.msra.mxu1 %v10887_v20  ;;  %v10957_v47 = vld [vmem:[%s18104_s5 + $0x1e0] ss:$16 sps:$4 sm:$0xff]   ;;  %v10924_v50 = vld [vmem:[%s18104_s5 + $0x1e8] ss:$16 sps:$4 sm:$0xff]   ;;  %s11523_s29 = scalar_lea.vmem %s18054_s21, 16384  ;;  %p11530_p0 = scmp.lt.s32.totalorder %s18054_s21, %s11528_s30 }
  0x2a   : > { %968 = vmatprep.subr.bf16.mxu1 %v10888_v30  ;;  %v10948_v30 = vld [vmem:[%s18104_s5 + $0x20] ss:$16 sps:$4 sm:$0xff]   ;;  %p11524_p11 = scmp.ne.s32.totalorder %s18054_s21, %s11523_s29  ;;  %p11531_p1 = scmp.lt.s32.totalorder %s11529_s16, %s11523_s29 }
  0x2b   : > { %1656 = vmatpush1.bf16.msra.mxu0 %v10927_v56  ;;  %v10963_v56 = vld [vmem:[%s18104_s5 + $0x1c0] ss:$16 sps:$4 sm:$0xff]  }
  0x2c   : > { %1657 = vmatprep.subr.bf16.mxu0 %v10932_v58  ;;  %v10968_v58 = vld [vmem:[%s18104_s5 + $0x1a4] ss:$16 sps:$4 sm:$0xff]   ;;  %p11525_p12 = pnand %p11524_p11, %p11698_p5  ;;  %p11532_p2 = por %p11531_p1, %p11530_p0 }
  0x2d   : > { %969 = vmatpush1.bf16.msra.mxu1 %v10890_v31 }
  0x2e   : > { %10783 = vmatmul.mubr.msk.bf16.gmra.mxu0 %vm592_vm0, %v10860_v9  ;;  %970 = vmatprep.subr.bf16.mxu1 %v10891_v32  ;;  %v10956_v32 = vld [vmem:[%s18104_s5 + $0x4] ss:$16 sps:$4 sm:$0xff]   ;;  %p11526_p13 = pneg %p11525_p12 }
  0x2f   : > { %10786 = vmatprep.mubr.msk.bf16.mxu0 %vm592_vm0, %v10861_v12  ;;  %1658 = vmatpush1.bf16.msra.mxu0 %v10930_v63  ;;  %v10966_v63 = vld [vmem:[%s18104_s5 + $0x1a0] ss:$16 sps:$4 sm:$0xff]  }
  0x30   : > { %1659 = vmatprep.subr.bf16.mxu0 %v10938_v1  ;;  %v10974_v1 = vld [vmem:[%s18104_s5 + $0x184] ss:$16 sps:$4 sm:$0xff]   ;;  %p11533_p3 = pnand %p11532_p2, %p11526_p13 }
  0x31   : > { %971 = vmatpush1.bf16.msra.mxu1 %v10893_v33  ;;  %v10915_v33 = vld [vmem:[%s18104_s5 + $0x28] ss:$16 sps:$4 sm:$0xff]  }
  0x32   : > { %972 = vmatprep.subr.bf16.mxu1 %v10894_v34 }
  0x33   : > { %1660 = vmatpush1.bf16.msra.mxu0 %v10936_v8  ;;  %v10972_v8 = vld [vmem:[%s18104_s5 + $0x180] ss:$16 sps:$4 sm:$0xff]  }
  0x34   : > { %1661 = vmatprep.subr.bf16.mxu0 %v10941_v10  ;;  %v10977_v10 = vld [vmem:[%s18104_s5 + $0x164] ss:$16 sps:$4 sm:$0xff]  }
  0x35   : > { %973 = vmatpush1.bf16.msra.mxu1 %v10896_v35 }
  0x36   : > { %10787 = vmatmul.mubr.msk.bf16.gmra.mxu0 %vm592_vm0, %v10862_v17  ;;  %1846 = vmatprep.subr.bf16.mxu1 %v10899_v37  ;;  %v10947_v17 = vld [vmem:[%s18104_s5 + $0x44] ss:$16 sps:$4 sm:$0xff]  }
  0x37   : > { %10790 = vmatprep.mubr.msk.bf16.mxu0 %vm592_vm0, %v10863_v19  ;;  %1662 = vmatpush1.bf16.msra.mxu0 %v10939_v15  ;;  %v10975_v15 = vld [vmem:[%s18104_s5 + $0x160] ss:$16 sps:$4 sm:$0xff]  }
  0x38   : > { %1663 = vmatprep.subr.bf16.mxu0 %v10947_v17  ;;  %v10960_v17 = vld [vmem:[%s18104_s5 + $0x168] ss:$16 sps:$4 sm:$0xff]  }
  0x3e   : > { %10791 = vmatmul.mubr.msk.bf16.gmra.mxu0 %vm592_vm0, %v10864_v21 }
  0x3f   : > { %10794 = vmatprep.mubr.msk.bf16.mxu0 %vm592_vm0, %v10865_v22  ;;  %v10914_v22 = vld [vmem:[%s18104_s5 + $0x4c] ss:$16 sps:$4 sm:$0xff]  }
  0x46   : > { %10795 = vmatmul.mubr.msk.bf16.gmra.mxu0 %vm592_vm0, %v10866_v23  ;;  %v10945_v23 = vld [vmem:[%s18104_s5 + $0x40] ss:$16 sps:$4 sm:$0xff]  }
  0x47   : > { %10798 = vmatprep.mubr.msk.bf16.mxu0 %vm592_vm0, %v10867_v24  ;;  %1664 = vmatpush1.bf16.msra.mxu0 %v10945_v23 }
  0x4e   : > { %10799 = vmatmul.mubr.msk.bf16.gmra.mxu0 %vm592_vm0, %v10868_v25  ;;  %v10950_v25 = vld [vmem:[%s18104_s5 + $0x24] ss:$16 sps:$4 sm:$0xff]  }
  0x4f   : > { %10802 = vmatprep.mubr.msk.bf16.mxu0 %vm592_vm0, %v10869_v26  ;;  %v10912_v26 = vld [vmem:[%s18104_s5 + $0x48] ss:$16 sps:$4 sm:$0xff]   ;;  %1665 = vmatprep.subr.bf16.mxu0 %v10950_v25 }
  0x50   : > { %1666 = vmatpush1.bf16.msra.mxu0 %v10948_v30 }
  0x51   : > { %1667 = vmatprep.subr.bf16.mxu0 %v10956_v32 }
  0x56   : > { %10803 = vmatmul.mubr.msk.bf16.gmra.mxu0 %vm592_vm0, %v10870_v27 }
  0x57   : > { %10806 = vmatprep.mubr.msk.bf16.mxu0 %vm592_vm0, %v10871_v28 }
  0x5e   : > { %10807 = vmatmul.mubr.msk.bf16.gmra.mxu0 %vm592_vm0, %v10872_v29  ;;  %v10917_v29 = vld [vmem:[%s18104_s5 + $0x2c] ss:$16 sps:$4 sm:$0xff]  }
  0xe6   : > { %v10780_v38 = vpop.f32.mrf.mxu0 }
  0xe7   : > { %v684_v59 = vadd.f32 %v10780_v38, %v11814_v40  ;;  %v10920_v38 = vld [vmem:[%s18104_s5 + $0xc] ss:$16 sps:$4 sm:$0xff]  }
  0xe8   : > { %v675_v39 = vpop.f32.mrf.mxu0 }
  0xe9   : > { %v676_v42 = vadd.f32 %v11814_v40, %v675_v39  ;;  %v804_v2 = vmax.f32 %v684_v59, 0.0  ;;  %v10954_v39 = vld [vmem:[%s18104_s5] ss:$16 sps:$4 sm:$0xff]   ;;  %v10933_v59 = vld [vmem:[%s18104_s5 + $0x1c8] ss:$16 sps:$4 sm:$0xff]  }
  0xea   : > { %v10781_v41 = vpop.f32.mrf.mxu0  ;;  %1668 = vmatpush1.bf16.msra.mxu0 %v10954_v39 }
  0xeb   : > { %v802_v48 = vmax.f32 %v676_v42, 0.0  ;;  %v687_v53 = vadd.f32 %v10781_v41, %v11814_v40  ;;  %v10959_v42 = vld [vmem:[%s18104_s5 + $0x1e4] ss:$16 sps:$4 sm:$0xff]  }
  0xec   : > { %v678_v43 = vpop.f32.mrf.mxu0  ;;  %1669 = vmatprep.subr.bf16.mxu0 %v10959_v42  ;;  %v10983_v42 = vld [vmem:[%s18104_s5 + $0x144] ss:$16 sps:$4 sm:$0xff]  }
  0xed   : > { %v679_v44 = vadd.f32 %v11814_v40, %v678_v43  ;;  %v805_v61 = vmax.f32 %v687_v53, 0.0  ;;  %v10918_v43 = vld [vmem:[%s18104_s5 + $0x8] ss:$16 sps:$4 sm:$0xff]  }
  0xee   : > { %v10784_v46 = vpop.f32.mrf.mxu0  ;;  %1670 = vmatpush2.bf16.msra.mxu0 %v10957_v47  ;;  %v10978_v47 = vld [vmem:[%s18104_s5 + $0x128] ss:$16 sps:$4 sm:$0xff]  }
  0xef   : > { %v803_v49 = vmax.f32 %v679_v44, 0.0  ;;  %v11860_v4 = vpack.c.bf16 %v805_v61, %v804_v2  ;;  %v700_v19 = vadd.f32 %v10784_v46, %v11814_v40  ;;  %v10926_v46 = vld [vmem:[%s18104_s5 + $0x1ec] ss:$16 sps:$4 sm:$0xff]   ;;  %v10942_v2 = vld [vmem:[%s18104_s5 + $0x1a8] ss:$16 sps:$4 sm:$0xff]  }
  0xf0   : > { %v691_v51 = vpop.f32.mrf.mxu0 }
  0xf1   : > { %v11831_v54 = vpack.c.bf16 %v803_v49, %v802_v48  ;;  %18319 = vst [vmem:[#allocation9_spill] sm:$0xff] %v11860_v4  ;;  %v692_v5 = vadd.f32 %v11814_v40, %v691_v51  ;;  %v808_v27 = vmax.f32 %v700_v19, 0.0  ;;  %v10965_v49 = vld [vmem:[%s18104_s5 + $0x1c4] ss:$16 sps:$4 sm:$0xff]  }
  0xf2   : > { %v10785_v57 = vpop.f32.mrf.mxu0  ;;  %1671 = vmatprep.subr.bf16.mxu0 %v10965_v49  ;;  %v10986_v49 = vld [vmem:[%s18104_s5 + $0x124] ss:$16 sps:$4 sm:$0xff]  }
  0xf3   : > { %18318 = vst [vmem:[#allocation8_spill] sm:$0xff] %v11831_v54  ;;  %991 = vmatmul.mubr.bf16.vlgmr.msra.gmra.mxu1 %v11831_v54  ;;  %v806_v12 = vmax.f32 %v692_v5, 0.0  ;;  %v703_v20 = vadd.f32 %v10785_v57, %v11814_v40  ;;  %1672 = vmatpush2.bf16.msra.mxu0 %v10963_v56 }
  0xf4   : > { %1000 = vmatprep.mubr.bf16.mxu1 %v18116_v36  ;;  %1847 = vmatpush1.bf16.msra.mxu1 %v10897_v52  ;;  %v694_v0 = vpop.f32.mrf.mxu0 }
  0xf5   : > { %1848 = vmatprep.subr.bf16.mxu1 %v10902_v55  ;;  %v695_v6 = vadd.f32 %v11814_v40, %v694_v0  ;;  %v809_v28 = vmax.f32 %v703_v20, 0.0  ;;  %v10935_v55 = vld [vmem:[%s18104_s5 + $0x1cc] ss:$16 sps:$4 sm:$0xff]   ;;  %1673 = vmatprep.subr.bf16.mxu0 %v10968_v58  ;;  %v10992_v58 = vld [vmem:[%s18104_s5 + $0x104] ss:$16 sps:$4 sm:$0xff]  }
  0xf6   : > { %v11870_v9 = vpop.f32.mrf.mxu0 }
  0xf7   : > { %v807_v13 = vmax.f32 %v695_v6, 0.0  ;;  %v11922_v34 = vpack.c.bf16 %v809_v28, %v808_v27  ;;  %v716_v51 = vadd.f32 %v11870_v9, %v11814_v40  ;;  %1674 = vmatpush2.bf16.msra.mxu0 %v10966_v63 }
  0xf8   : > { %1849 = vmatpush1.bf16.msra.mxu1 %v10900_v60  ;;  %v707_v16 = vpop.f32.mrf.mxu0  ;;  %1675 = vmatprep.subr.bf16.mxu0 %v10974_v1 }
  0xf9   : > { %1850 = vmatprep.subr.bf16.mxu1 %v10905_v62  ;;  %v11894_v21 = vpack.c.bf16 %v807_v13, %v806_v12  ;;  %18321 = vst [vmem:[#allocation11_spill] sm:$0xff] %v11922_v34  ;;  %v708_v35 = vadd.f32 %v11814_v40, %v707_v16  ;;  %v812_v60 = vmax.f32 %v716_v51, 0.0  ;;  %v10944_v62 = vld [vmem:[%s18104_s5 + $0x1ac] ss:$16 sps:$4 sm:$0xff]  }
  0xfa   : > { %v10789_v24 = vpop.f32.mrf.mxu0 }
  0xfb   : > { %1001 = vmatmul.mubr.bf16.gmra.mxu1 %v11860_v4  ;;  %18320 = vst [vmem:[#allocation10_spill] sm:$0xff] %v11894_v21  ;;  %v810_v44 = vmax.f32 %v708_v35, 0.0  ;;  %v719_v52 = vadd.f32 %v10789_v24, %v11814_v40  ;;  %1676 = vmatpush2.bf16.msra.mxu0 %v10972_v8  ;;  %v10969_v24 = vld [vmem:[%s18104_s5 + $0x148] ss:$16 sps:$4 sm:$0xff]  }
  0xfc   : > { %1010 = vmatprep.mubr.bf16.mxu1 %v18116_v36  ;;  %1851 = vmatpush1.bf16.msra.mxu1 %v10903_v3  ;;  %v710_v31 = vpop.f32.mrf.mxu0 }
  0xfd   : > { %1852 = vmatprep.subr.bf16.mxu1 %v10908_v7  ;;  %v711_v37 = vadd.f32 %v11814_v40, %v710_v31  ;;  %v813_v61 = vmax.f32 %v719_v52, 0.0  ;;  %v10953_v7 = vld [vmem:[%s18104_s5 + $0x18c] ss:$16 sps:$4 sm:$0xff]   ;;  %1677 = vmatprep.subr.bf16.mxu0 %v10977_v10 }
  0xfe   : > { %v11932_v41 = vpop.f32.mrf.mxu0 }
  0xff   : > { %v811_v45 = vmax.f32 %v711_v37, 0.0  ;;  %v11985_v3 = vpack.c.bf16 %v813_v61, %v812_v60  ;;  %1678 = vmatpush2.bf16.msra.mxu0 %v10975_v15  ;;  %v10990_v60 = vld [vmem:[%s18104_s5 + $0x100] ss:$16 sps:$4 sm:$0xff]  }
 0x100   : > { %1853 = vmatpush1.bf16.msra.mxu1 %v10906_v11  ;;  %v723_v48 = vpop.f32.mrf.mxu0  ;;  %v10951_v11 = vld [vmem:[%s18104_s5 + $0x188] ss:$16 sps:$4 sm:$0xff]   ;;  %1679 = vmatprep.subr.bf16.mxu0 %v10983_v42 }
 0x101   : > { %1854 = vmatprep.subr.bf16.mxu1 %v10911_v14  ;;  %v11957_v53 = vpack.c.bf16 %v811_v45, %v810_v44  ;;  %18323 = vst [vmem:[#allocation13_spill] sm:$0xff] %v11985_v3  ;;  %v724_v5 = vadd.f32 %v11814_v40, %v723_v48  ;;  %v10962_v14 = vld [vmem:[%s18104_s5 + $0x16c] ss:$16 sps:$4 sm:$0xff]  }
 0x102   : > { %v10793_v57 = vpop.f32.mrf.mxu0  ;;  %v10980_v48 = vld [vmem:[%s18104_s5 + $0x12c] ss:$16 sps:$4 sm:$0xff]  }
 0x103   : > { %1011 = vmatmul.mubr.bf16.gmra.mxu1 %v11894_v21  ;;  %18322 = vst [vmem:[#allocation12_spill] sm:$0xff] %v11957_v53  ;;  %v814_v12 = vmax.f32 %v724_v5, 0.0  ;;  %v735_v19 = vadd.f32 %v10793_v57, %v11814_v40  ;;  %v10989_v57 = vld [vmem:[%s18104_s5 + $0x10c] ss:$16 sps:$4 sm:$0xff]  }
 0x104   : > { %1020 = vmatprep.mubr.bf16.mxu1 %v18116_v36  ;;  %1855 = vmatpush1.bf16.msra.mxu1 %v10909_v18  ;;  %v726_v0 = vpop.f32.mrf.mxu0  ;;  %v732_v18 = vadd.f32 %v11932_v41, %v11814_v40 }
 0x105   : > { %1856 = vmatprep.subr.bf16.mxu1 %v10914_v22  ;;  %v727_v6 = vadd.f32 %v11814_v40, %v726_v0  ;;  %v10971_v22 = vld [vmem:[%s18104_s5 + $0x14c] ss:$16 sps:$4 sm:$0xff]  }
 0x106   : > { %v10796_v9 = vpop.f32.mrf.mxu0  ;;  %v816_v25 = vmax.f32 %v732_v18, 0.0 }
 0x107   : > { %v815_v13 = vmax.f32 %v727_v6, 0.0  ;;  %v748_v37 = vadd.f32 %v10796_v9, %v11814_v40 }
 0x108   : > { %1857 = vmatpush1.bf16.msra.mxu1 %v10912_v26  ;;  %v739_v16 = vpop.f32.mrf.mxu0  ;;  %v817_v26 = vmax.f32 %v735_v19, 0.0 }
 0x109   : > { %1858 = vmatprep.subr.bf16.mxu1 %v10917_v29  ;;  %v12015_v20 = vpack.c.bf16 %v815_v13, %v814_v12  ;;  %v740_v29 = vadd.f32 %v11814_v40, %v739_v16  ;;  %v820_v44 = vmax.f32 %v748_v37, 0.0 }
 0x10a   : > { %v10797_v23 = vpop.f32.mrf.mxu0  ;;  %v12025_v28 = vpack.c.bf16 %v817_v26, %v816_v25 }
 0x10b   : > { %1021 = vmatmul.mubr.bf16.gmra.mxu1 %v11922_v34  ;;  %18324 = vst [vmem:[#allocation14_spill] sm:$0xff] %v12015_v20  ;;  %v818_v32 = vmax.f32 %v740_v29, 0.0 }
 0x10c   : > { %1030 = vmatprep.mubr.bf16.mxu1 %v18116_v36  ;;  %1859 = vmatpush1.bf16.msra.mxu1 %v10915_v33  ;;  %v742_v27 = vpop.f32.mrf.mxu0  ;;  %18325 = vst [vmem:[#allocation15_spill] sm:$0xff] %v12025_v28 }
 0x10d   : > { %1860 = vmatprep.subr.bf16.mxu1 %v10920_v38  ;;  %v743_v30 = vadd.f32 %v11814_v40, %v742_v27  ;;  %v751_v38 = vadd.f32 %v10797_v23, %v11814_v40 }
 0x10e   : > { %v10800_v31 = vpop.f32.mrf.mxu0 }
 0x10f   : > { %v819_v33 = vmax.f32 %v743_v30, 0.0  ;;  %v821_v45 = vmax.f32 %v751_v38, 0.0  ;;  %v764_v0 = vadd.f32 %v10800_v31, %v11814_v40 }
 0x110   : > { %1861 = vmatpush1.bf16.msra.mxu1 %v10918_v43  ;;  %v755_v35 = vpop.f32.mrf.mxu0  ;;  %v10981_v43 = vld [vmem:[%s18104_s5 + $0x140] ss:$16 sps:$4 sm:$0xff]  }
 0x111   : > { %1862 = vmatprep.subr.bf16.mxu1 %v10926_v46  ;;  %v12033_v39 = vpack.c.bf16 %v819_v33, %v818_v32  ;;  %1680 = vmatpush2.bf16.msra.mxu0 %v10981_v43  ;;  %v12055_v51 = vpack.c.bf16 %v821_v45, %v820_v44  ;;  %v756_v52 = vadd.f32 %v11814_v40, %v755_v35  ;;  %v824_v6 = vmax.f32 %v764_v0, 0.0  ;;  %v2415_v43 = vld [vmem:[%s18106_s7 + $0x5c0] sm:$0xff] }
 0x112   : > { %v10801_v41 = vpop.f32.mrf.mxu0  ;;  %1681 = vmatprep.subr.bf16.mxu0 %v10986_v49  ;;  %v2419_v44 = vld [vmem:[%s18106_s7 + $0x5e0] sm:$0xff] }
 0x113   : > { %1031 = vmatmul.mubr.bf16.gmra.mxu1 %v11957_v53  ;;  %18326 = vst [vmem:[#allocation16_spill] sm:$0xff] %v12033_v39  ;;  %18327 = vst [vmem:[#allocation17_spill] sm:$0xff] %v12055_v51  ;;  %v822_v61 = vmax.f32 %v756_v52, 0.0  ;;  %v767_v1 = vadd.f32 %v10801_v41, %v11814_v40  ;;  %v2287_v41 = vld [vmem:[%s18106_s7 + $0x1c0] sm:$0xff]  ;;  %v10320_v45 = vcombine.high %v2415_v43, %v2419_v44 }
 0x114   : > { %1040 = vmatprep.mubr.bf16.mxu1 %v18116_v36  ;;  %1863 = vmatpush2.bf16.msra.mxu1 %v10924_v50  ;;  %v758_v46 = vpop.f32.mrf.mxu0  ;;  %v10984_v50 = vld [vmem:[%s18104_s5 + $0x120] ss:$16 sps:$4 sm:$0xff]  }
 0x115   : > { %1864 = vmatprep.subr.bf16.mxu1 %v10935_v55  ;;  %v759_v55 = vadd.f32 %v11814_v40, %v758_v46  ;;  %1682 = vmatpush2.bf16.msra.mxu0 %v10984_v50  ;;  %v868_v46 = vlaneseq  ;;  %v866_v50 = vld [vmem:[%s18103_s4] sm:$0x3] }
 0x116   : > { %v10804_v56 = vpop.f32.mrf.mxu0  ;;  %1683 = vmatprep.subr.bf16.mxu0 %v10992_v58 }
 0x117   : > { %v780_v16 = vadd.f32 %v10804_v56, %v11814_v40 }
 0x118   : > { %1865 = vmatpush2.bf16.msra.mxu1 %v10933_v59  ;;  %v10987_v59 = vld [vmem:[%s18104_s5 + $0x108] ss:$16 sps:$4 sm:$0xff]   ;;  %v771_v63 = vpop.f32.mrf.mxu0 }
 0x119   : > { %1866 = vmatprep.subr.bf16.mxu1 %v10944_v62  ;;  %v823_v62 = vmax.f32 %v759_v55, 0.0  ;;  %1684 = vmatpush2.bf16.msra.mxu0 %v10990_v60  ;;  %v772_v10 = vadd.f32 %v11814_v40, %v771_v63 }
 0x11a   : > { %v10805_v5 = vpop.f32.mrf.mxu0 }
 0x11b   : > { %1041 = vmatmul.mubr.bf16.gmra.mxu1 %v11985_v3  ;;  %v826_v13 = vmax.f32 %v772_v10, 0.0  ;;  %v2407_v10 = vld [vmem:[%s18106_s7 + $0x580] sm:$0xff] }
 0x11c   : > { %1050 = vmatprep.mubr.bf16.mxu1 %v18116_v36  ;;  %1867 = vmatpush2.bf16.msra.mxu1 %v10942_v2  ;;  %v12075_v2 = vpack.c.bf16 %v823_v62, %v822_v61  ;;  %v774_v8 = vpop.f32.mrf.mxu0 }
 0x11d   : > { %1868 = vmatprep.subr.bf16.mxu1 %v10953_v7  ;;  %v825_v7 = vmax.f32 %v767_v1, 0.0 }
 0x11e   : > { %18328 = vst [vmem:[#allocation18_spill] sm:$0xff] %v12075_v2  ;;  %v10808_v12 = vpop.f32.mrf.mxu0 }
 0x11f   : > { %v12079_v9 = vpack.c.bf16 %v825_v7, %v824_v6  ;;  %v796_v31 = vadd.f32 %v10808_v12, %v11814_v40 }
 0x120   : > { %1869 = vmatpush2.bf16.msra.mxu1 %v10951_v11  ;;  %v775_v11 = vadd.f32 %v11814_v40, %v774_v8  ;;  %v787_v15 = vpop.f32.mrf.mxu0  ;;  %v2283_v8 = vld [vmem:[%s18106_s7 + $0x1a0] sm:$0xff] }
 0x121   : > { %1870 = vmatprep.subr.bf16.mxu1 %v10962_v14  ;;  %18329 = vst [vmem:[#allocation19_spill] sm:$0xff] %v12079_v9  ;;  %v788_v26 = vadd.f32 %v11814_v40, %v787_v15  ;;  %v832_v35 = vmax.f32 %v796_v31, 0.0  ;;  %v2403_v31 = vld [vmem:[%s18106_s7 + $0x560] sm:$0xff] }
 0x122   : > { %v827_v14 = vmax.f32 %v775_v11, 0.0  ;;  %v10809_v19 = vpop.f32.mrf.mxu0  ;;  %v2411_v11 = vld [vmem:[%s18106_s7 + $0x5a0] sm:$0xff] }
 0x123   : > { %1051 = vmatmul.mubr.bf16.gmra.mxu1 %v12015_v20  ;;  %v830_v29 = vmax.f32 %v788_v26, 0.0  ;;  %v799_v32 = vadd.f32 %v10809_v19, %v11814_v40 }
 0x124   : > { %1060 = vmatprep.mubr.bf16.mxu1 %v18116_v36  ;;  %1871 = vmatpush2.bf16.msra.mxu1 %v10960_v17  ;;  %v783_v17 = vadd.f32 %v10805_v5, %v11814_v40  ;;  %v12087_v18 = vpack.c.bf16 %v827_v14, %v826_v13  ;;  %v2279_v5 = vld [vmem:[%s18106_s7 + $0x180] sm:$0xff] }
 0x125   : > { %1872 = vmatprep.subr.bf16.mxu1 %v10971_v22  ;;  %v828_v22 = vmax.f32 %v780_v16, 0.0  ;;  %v833_v37 = vmax.f32 %v799_v32, 0.0  ;;  %v10319_v16 = vcombine.low %v2415_v43, %v2419_v44 }
 0x126   : > { %18330 = vst [vmem:[#allocation20_spill] sm:$0xff] %v12087_v18  ;;  %v829_v23 = vmax.f32 %v783_v17, 0.0 }
 0x127   : > { %v12103_v38 = vpack.c.bf16 %v833_v37, %v832_v35 }
 0x128   : > { %1873 = vmatpush2.bf16.msra.mxu1 %v10969_v24  ;;  %v790_v24 = vpop.f32.mrf.mxu0  ;;  %v12091_v25 = vpack.c.bf16 %v829_v23, %v828_v22  ;;  %v10184_v22 = vcombine.high %v2279_v5, %v2283_v8  ;;  %v10312_v23 = vcombine.high %v2407_v10, %v2411_v11 }
 0x129   : > { %1874 = vmatprep.subr.bf16.mxu1 %v10980_v48  ;;  %v791_v27 = vadd.f32 %v11814_v40, %v790_v24  ;;  %18333 = vst [vmem:[#allocation23_spill] sm:$0xff] %v12103_v38  ;;  %v2291_v40 = vld [vmem:[%s18106_s7 + $0x1e0] sm:$0xff] }
 0x12a   : > { %18331 = vst [vmem:[#allocation21_spill] sm:$0xff] %v12091_v25  ;;  %v10192_v42 = vcombine.high %v2287_v41, %v2291_v40  ;;  %v10191_v15 = vcombine.low %v2287_v41, %v2291_v40  ;;  %v2271_v24 = vld [vmem:[%s18106_s7 + $0x140] sm:$0xff]  ;;  %v10183_v41 = vcombine.low %v2279_v5, %v2283_v8  ;;  %v10311_v40 = vcombine.low %v2407_v10, %v2411_v11 }
 0x12b   : > { %1061 = vmatmul.mubr.bf16.gmra.mxu1 %v12025_v28  ;;  %v831_v30 = vmax.f32 %v791_v27, 0.0  ;;  %v2255_v8 = vld [vmem:[%s18106_s7 + $0xc0] sm:$0xff] }
 0x12c   : > { %1070 = vmatprep.mubr.bf16.mxu1 %v18116_v36  ;;  %1875 = vmatpush2.bf16.msra.mxu1 %v10978_v47  ;;  %v12118_v47 = vshrl.u32 %v868_v46, 7  ;;  %v2263_v46 = vld [vmem:[%s18106_s7 + $0x100] sm:$0xff] }
 0x12d   : > { %1876 = vmatprep.subr.bf16.mxu1 %v10989_v57  ;;  %v12099_v33 = vpack.c.bf16 %v831_v30, %v830_v29  ;;  %3809 = vmatprep.subr.bf16.mxu0 %v10192_v42  ;;  %v2275_v29 = vld [vmem:[%s18106_s7 + $0x160] sm:$0xff] }
 0x12e   : > { %18334 = vst [vmem:[#allocation24_spill] sm:$0xff] %v12118_v47  ;;  %v12121_v48 = vsub.s32 1, %v12118_v47  ;;  %v12124_v49 = vsub.s32 0, %v12118_v47  ;;  %v2399_v30 = vld [vmem:[%s18106_s7 + $0x540] sm:$0xff]  ;;  %v10176_v44 = vcombine.high %v2271_v24, %v2275_v29 }
 0x12f   : > { %18332 = vst [vmem:[#allocation22_spill] sm:$0xff] %v12099_v33 }
 0x130   : > { %1877 = vmatpush2.bf16.msra.mxu1 %v10987_v59  ;;  %18335 = vst [vmem:[#allocation25_spill] sm:$0xff] %v12121_v48  ;;  %18336 = vst [vmem:[#allocation26_spill] sm:$0xff] %v12124_v49  ;;  %v12130_v55 = vrot.slane %v866_v50, %v12121_v48  ;;  %v12133_v56 = vrot.slane %v866_v50, %v12124_v49 }
 0x131   : > { %4002 = vmatprep.subr.bf16.mxu1 %v10320_v45  ;;  %v10304_v45 = vcombine.high %v2399_v30, %v2403_v31 }
 0x133   : > { %1071 = vmatmul.mubr.bf16.gmra.mxu1 %v12033_v39 }
 0x134   : > { %1080 = vmatprep.mubr.bf16.mxu1 %v18116_v36 }
 0x13b   : > { %1081 = vmatmul.mubr.bf16.gmra.mxu1 %v12055_v51 }
 0x13c   : > { %1090 = vmatprep.mubr.bf16.mxu1 %v18116_v36 }
 0x143   : > { %1091 = vmatmul.mubr.bf16.gmra.mxu1 %v12075_v2 }
 0x144   : > { %1100 = vmatprep.mubr.bf16.mxu1 %v18116_v36 }
 0x14b   : > { %1101 = vmatmul.mubr.bf16.gmra.mxu1 %v12079_v9 }
 0x14c   : > { %1110 = vmatprep.mubr.bf16.mxu1 %v18116_v36 }
 0x153   : > { %1111 = vmatmul.mubr.bf16.gmra.mxu1 %v12087_v18 }
 0x154   : > { %1120 = vmatprep.mubr.bf16.mxu1 %v18116_v36 }
 0x15b   : > { %1121 = vmatmul.mubr.bf16.gmra.mxu1 %v12091_v25 }
 0x15c   : > { %1130 = vmatprep.mubr.bf16.mxu1 %v18116_v36 }
 0x163   : > { %1131 = vmatmul.mubr.bf16.gmra.mxu1 %v12099_v33 }
 0x164   : > { %1140 = vmatprep.mubr.bf16.mxu1 %v18116_v36 }
 0x16b   : > { %1141 = vmatmul.mubr.bf16.gmra.mxu1 %v12103_v38 }
 0x1b3   : > { %v992_v52 = vpop.f32.mrf.mxu1 }
 0x1b4   : > { %v993_v61 = vadd.f32 %v992_v52, %v12133_v56 }
 0x1b5   : > { %v994_v57 = vpop.f32.mrf.mxu1 }
 0x1b6   : > { %v995_v59 = vadd.f32 %v994_v57, %v12130_v55  ;;  %v1151_v12 = vmax.f32 %v993_v61, 0.0  ;;  %v2267_v57 = vld [vmem:[%s18106_s7 + $0x120] sm:$0xff] }
 0x1b7   : > { %v996_v58 = vpop.f32.mrf.mxu1 }
 0x1b8   : > { %v997_v60 = vadd.f32 %v996_v58, %v12133_v56  ;;  %v1152_v6 = vmax.f32 %v995_v59, 0.0  ;;  %v2391_v58 = vld [vmem:[%s18106_s7 + $0x500] sm:$0xff] }
 0x1b9   : > { %v998_v62 = vpop.f32.mrf.mxu1  ;;  %v2395_v59 = vld [vmem:[%s18106_s7 + $0x520] sm:$0xff] }
 0x1ba   : > { %v999_v63 = vadd.f32 %v998_v62, %v12130_v55  ;;  %v1153_v0 = vmax.f32 %v997_v60, 0.0 }
 0x1bb   : > { %v1002_v1 = vpop.f32.mrf.mxu1 }
 0x1bc   : > { %v1154_v7 = vmax.f32 %v999_v63, 0.0  ;;  %v12153_v17 = vpack.c.bf16 %v1153_v0, %v1151_v12  ;;  %v1003_v32 = vadd.f32 %v1002_v1, %v12133_v56  ;;  %v10175_v63 = vcombine.low %v2271_v24, %v2275_v29  ;;  %v2259_v12 = vld [vmem:[%s18106_s7 + $0xe0] sm:$0xff] }
 0x1bd   : > { %v1004_v13 = vpop.f32.mrf.mxu1  ;;  %v10303_v0 = vcombine.low %v2399_v30, %v2403_v31  ;;  %v10295_v24 = vcombine.low %v2391_v58, %v2395_v59  ;;  %v10160_v29 = vcombine.high %v2255_v8, %v2259_v12  ;;  %v2247_v31 = vld [vmem:[%s18106_s7 + $0x80] sm:$0xff] }
 0x1be   : > { %v12151_v14 = vpack.c.bf16 %v1154_v7, %v1152_v6  ;;  %18338 = vst [vmem:[#allocation28_spill] sm:$0xff] %v12153_v17  ;;  %v1005_v26 = vadd.f32 %v1004_v13, %v12130_v55  ;;  %v1155_v60 = vmax.f32 %v1003_v32, 0.0  ;;  %v10168_v6 = vcombine.high %v2263_v46, %v2267_v57  ;;  %v2383_v13 = vld [vmem:[%s18106_s7 + $0x4c0] sm:$0xff] }
 0x1bf   : > { %v1006_v19 = vpop.f32.mrf.mxu1  ;;  %v10296_v7 = vcombine.high %v2391_v58, %v2395_v59  ;;  %v2239_v59 = vld [vmem:[%s18106_s7 + $0x40] sm:$0xff] }
 0x1c0   : > { %18337 = vst [vmem:[#allocation27_spill] sm:$0xff] %v12151_v14  ;;  %v1007_v27 = vadd.f32 %v1006_v19, %v12133_v56  ;;  %1685 = vmatprep.mubr.bf16.mxu0 %v12151_v14  ;;  %1878 = vmatprep.mubr.bf16.mxu1 %v12151_v14  ;;  %v1156_v50 = vmax.f32 %v1005_v26, 0.0 }
 0x1c1   : > { %v1008_v35 = vpop.f32.mrf.mxu1  ;;  %1686 = vmatmul.mubr.bf16.vlgmr.msra.gmra.mxu0 %v12153_v17  ;;  %1879 = vmatmul.mubr.bf16.vlgmr.msra.gmra.mxu1 %v12153_v17 }
 0x1c2   : > { %v1009_v37 = vadd.f32 %v1008_v35, %v12130_v55  ;;  %3810 = vmatpush1.bf16.msra.mxu0 %v10191_v15  ;;  %4003 = vmatpush1.bf16.msra.mxu1 %v10319_v16  ;;  %v1157_v42 = vmax.f32 %v1007_v27, 0.0  ;;  %v2387_v15 = vld [vmem:[%s18106_s7 + $0x4e0] sm:$0xff] }
 0x1c3   : > { %v1012_v43 = vpop.f32.mrf.mxu1  ;;  %3811 = vmatprep.subr.bf16.mxu0 %v10184_v22  ;;  %4004 = vmatprep.subr.bf16.mxu1 %v10312_v23  ;;  %v10167_v23 = vcombine.low %v2263_v46, %v2267_v57  ;;  %v10288_v30 = vcombine.high %v2383_v13, %v2387_v15  ;;  %v10287_v46 = vcombine.low %v2383_v13, %v2387_v15 }
 0x1c4   : > { %v1158_v52 = vmax.f32 %v1009_v37, 0.0  ;;  %v12189_v1 = vpack.c.bf16 %v1157_v42, %v1155_v60  ;;  %v1013_v16 = vadd.f32 %v1012_v43, %v12133_v56  ;;  %v2251_v37 = vld [vmem:[%s18106_s7 + $0xa0] sm:$0xff] }
 0x1c5   : > { %v1014_v61 = vpop.f32.mrf.mxu1  ;;  %v10152_v57 = vcombine.high %v2247_v31, %v2251_v37 }
 0x1c6   : > { %v12187_v62 = vpack.c.bf16 %v1158_v52, %v1156_v50  ;;  %3812 = vmatpush1.bf16.msra.mxu0 %v10183_v41  ;;  %4005 = vmatpush1.bf16.msra.mxu1 %v10311_v40  ;;  %18340 = vst [vmem:[#allocation30_spill] sm:$0xff] %v12189_v1  ;;  %v1015_v10 = vadd.f32 %v1014_v61, %v12130_v55  ;;  %v2375_v41 = vld [vmem:[%s18106_s7 + $0x480] sm:$0xff]  ;;  %v1159_v42 = vmax.f32 %v1013_v16, 0.0 }
 0x1c7   : > { %v1016_v5 = vpop.f32.mrf.mxu1  ;;  %3813 = vmatprep.subr.bf16.mxu0 %v10176_v44  ;;  %4006 = vmatprep.subr.bf16.mxu1 %v10304_v45  ;;  %v2379_v40 = vld [vmem:[%s18106_s7 + $0x4a0] sm:$0xff]  ;;  %v10159_v45 = vcombine.low %v2255_v8, %v2259_v12 }
 0x1c8   : > { %18339 = vst [vmem:[#allocation29_spill] sm:$0xff] %v12187_v62  ;;  %v1017_v11 = vadd.f32 %v1016_v5, %v12133_v56  ;;  %1695 = vmatprep.mubr.bf16.mxu0 %v12187_v62  ;;  %1888 = vmatprep.mubr.bf16.mxu1 %v12187_v62  ;;  %v1160_v32 = vmax.f32 %v1015_v10, 0.0  ;;  %v10280_v58 = vcombine.high %v2375_v41, %v2379_v40  ;;  %v2371_v5 = vld [vmem:[%s18106_s7 + $0x460] sm:$0xff] }
 0x1c9   : > { %v1018_v19 = vpop.f32.mrf.mxu1  ;;  %1696 = vmatmul.mubr.bf16.gmra.mxu0 %v12189_v1  ;;  %1889 = vmatmul.mubr.bf16.gmra.mxu1 %v12189_v1  ;;  %v10151_v10 = vcombine.low %v2247_v31, %v2251_v37 }
 0x1ca   : > { %v1019_v22 = vadd.f32 %v1018_v19, %v12130_v55  ;;  %3814 = vmatpush1.bf16.msra.mxu0 %v10175_v63  ;;  %4007 = vmatpush1.bf16.msra.mxu1 %v10303_v0  ;;  %v1161_v26 = vmax.f32 %v1017_v11, 0.0  ;;  %v2243_v63 = vld [vmem:[%s18106_s7 + $0x60] sm:$0xff]  ;;  %v10279_v11 = vcombine.low %v2375_v41, %v2379_v40 }
 0x1cb   : > { %v1022_v27 = vpop.f32.mrf.mxu1  ;;  %3815 = vmatprep.subr.bf16.mxu0 %v10168_v6  ;;  %4008 = vmatprep.subr.bf16.mxu1 %v10296_v7  ;;  %v2367_v0 = vld [vmem:[%s18106_s7 + $0x440] sm:$0xff]  ;;  %v10144_v15 = vcombine.high %v2239_v59, %v2243_v63 }
 0x1cc   : > { %v1162_v35 = vmax.f32 %v1019_v22, 0.0  ;;  %v12225_v50 = vpack.c.bf16 %v1161_v26, %v1159_v42  ;;  %v1023_v6 = vadd.f32 %v1022_v27, %v12133_v56  ;;  %v10272_v16 = vcombine.high %v2367_v0, %v2371_v5  ;;  %v2231_v19 = vld [vmem:[%s18106_s7] sm:$0xff] }
 0x1cd   : > { %v1024_v43 = vpop.f32.mrf.mxu1  ;;  %v2359_v26 = vld [vmem:[%s18106_s7 + $0x400] sm:$0xff] }
 0x1ce   : > { %v12223_v44 = vpack.c.bf16 %v1162_v35, %v1160_v32  ;;  %3816 = vmatpush1.bf16.msra.mxu0 %v10167_v23  ;;  %4009 = vmatpush1.bf16.msra.mxu1 %v10295_v24  ;;  %18342 = vst [vmem:[#allocation32_spill] sm:$0xff] %v12225_v50  ;;  %v1025_v60 = vadd.f32 %v1024_v43, %v12130_v55  ;;  %v2235_v24 = vld [vmem:[%s18106_s7 + $0x20] sm:$0xff] }
 0x1cf   : > { %v1026_v52 = vpop.f32.mrf.mxu1  ;;  %3817 = vmatprep.subr.bf16.mxu0 %v10160_v29  ;;  %4010 = vmatprep.subr.bf16.mxu1 %v10288_v30  ;;  %v2363_v27 = vld [vmem:[%s18106_s7 + $0x420] sm:$0xff]  ;;  %v1163_v29 = vmax.f32 %v1023_v6, 0.0  ;;  %v10143_v32 = vcombine.low %v2239_v59, %v2243_v63  ;;  %v10271_v35 = vcombine.low %v2367_v0, %v2371_v5  ;;  %v10136_v40 = vcombine.high %v2231_v19, %v2235_v24 }
 0x1d0   : > { %18341 = vst [vmem:[#allocation31_spill] sm:$0xff] %v12223_v44  ;;  %v1027_v61 = vadd.f32 %v1026_v52, %v12133_v56  ;;  %1705 = vmatprep.mubr.bf16.mxu0 %v12223_v44  ;;  %1898 = vmatprep.mubr.bf16.mxu1 %v12223_v44  ;;  %v1164_v22 = vmax.f32 %v1025_v60, 0.0  ;;  %v10264_v42 = vcombine.high %v2359_v26, %v2363_v27  ;;  %v2351_v43 = vld [vmem:[%s18106_s7 + $0x3c0] sm:$0xff] }
 0x1d1   : > { %v1028_v7 = vpop.f32.mrf.mxu1  ;;  %1706 = vmatmul.mubr.bf16.gmra.mxu0 %v12225_v50  ;;  %1899 = vmatmul.mubr.bf16.gmra.mxu1 %v12225_v50  ;;  %v2355_v52 = vld [vmem:[%s18106_s7 + $0x3e0] sm:$0xff]  ;;  %v10135_v63 = vcombine.low %v2231_v19, %v2235_v24  ;;  %v10263_v0 = vcombine.low %v2359_v26, %v2363_v27 }
 0x1d2   : > { %v1029_v8 = vadd.f32 %v1028_v7, %v12130_v55  ;;  %3818 = vmatpush1.bf16.msra.mxu0 %v10159_v45  ;;  %4011 = vmatpush1.bf16.msra.mxu1 %v10287_v46  ;;  %v1165_v12 = vmax.f32 %v1027_v61, 0.0  ;;  %v10256_v7 = vcombine.high %v2351_v43, %v2355_v52  ;;  %v10255_v24 = vcombine.low %v2351_v43, %v2355_v52  ;;  %v2463_v43 = vld [vmem:[%s18106_s7 + $0x740] sm:$0xff] }
 0x1d3   : > { %v1032_v13 = vpop.f32.mrf.mxu1  ;;  %3819 = vmatprep.subr.bf16.mxu0 %v10152_v57  ;;  %4012 = vmatprep.subr.bf16.mxu1 %v10280_v58  ;;  %v2479_v57 = vld [vmem:[%s18106_s7 + $0x7c0] sm:$0xff] }
 0x1d4   : > { %v1166_v23 = vmax.f32 %v1029_v8, 0.0  ;;  %v12261_v37 = vpack.c.bf16 %v1165_v12, %v1163_v29  ;;  %v2483_v58 = vld [vmem:[%s18106_s7 + $0x7e0] sm:$0xff]  ;;  %v1033_v59 = vadd.f32 %v1032_v13, %v12133_v56 }
 0x1d5   : > { %v1034_v30 = vpop.f32.mrf.mxu1  ;;  %v10384_v8 = vcombine.high %v2479_v57, %v2483_v58  ;;  %v2347_v13 = vld [vmem:[%s18106_s7 + $0x3a0] sm:$0xff]  ;;  %v10383_v26 = vcombine.low %v2479_v57, %v2483_v58 }
 0x1d6   : > { %v12259_v31 = vpack.c.bf16 %v1166_v23, %v1164_v22  ;;  %3820 = vmatpush1.bf16.msra.mxu0 %v10151_v10  ;;  %4013 = vmatpush1.bf16.msra.mxu1 %v10279_v11  ;;  %18344 = vst [vmem:[#allocation34_spill] sm:$0xff] %v12261_v37  ;;  %v1035_v45 = vadd.f32 %v1034_v30, %v12130_v55  ;;  %v2343_v10 = vld [vmem:[%s18106_s7 + $0x380] sm:$0xff]  ;;  %v1167_v19 = vmax.f32 %v1033_v59, 0.0 }
 0x1d7   : > { %v1036_v41 = vpop.f32.mrf.mxu1  ;;  %3821 = vmatprep.subr.bf16.mxu0 %v10144_v15  ;;  %4014 = vmatprep.subr.bf16.mxu1 %v10272_v16  ;;  %v2471_v15 = vld [vmem:[%s18106_s7 + $0x780] sm:$0xff]  ;;  %v10248_v30 = vcombine.high %v2343_v10, %v2347_v13  ;;  %v10247_v58 = vcombine.low %v2343_v10, %v2347_v13 }
 0x1d8   : > { %18343 = vst [vmem:[#allocation33_spill] sm:$0xff] %v12259_v31  ;;  %v1037_v46 = vadd.f32 %v1036_v41, %v12133_v56  ;;  %1715 = vmatprep.mubr.bf16.mxu0 %v12259_v31  ;;  %1908 = vmatprep.mubr.bf16.mxu1 %v12259_v31  ;;  %v1168_v11 = vmax.f32 %v1035_v45, 0.0  ;;  %v2475_v16 = vld [vmem:[%s18106_s7 + $0x7a0] sm:$0xff] }
 0x1d9   : > { %v1038_v60 = vpop.f32.mrf.mxu1  ;;  %1716 = vmatmul.mubr.bf16.gmra.mxu0 %v12261_v37  ;;  %1909 = vmatmul.mubr.bf16.gmra.mxu1 %v12261_v37  ;;  %v2467_v45 = vld [vmem:[%s18106_s7 + $0x760] sm:$0xff]  ;;  %v10375_v59 = vcombine.low %v2471_v15, %v2475_v16 }
 0x1da   : > { %v1039_v61 = vadd.f32 %v1038_v60, %v12130_v55  ;;  %3822 = vmatpush1.bf16.msra.mxu0 %v10143_v32  ;;  %4015 = vmatpush1.bf16.msra.mxu1 %v10271_v35  ;;  %v1169_v5 = vmax.f32 %v1037_v46, 0.0  ;;  %v10376_v32 = vcombine.high %v2471_v15, %v2475_v16  ;;  %v2335_v35 = vld [vmem:[%s18106_s7 + $0x340] sm:$0xff] }
 0x1db   : > { %v1042_v6 = vpop.f32.mrf.mxu1  ;;  %3823 = vmatprep.subr.bf16.mxu0 %v10136_v40  ;;  %4016 = vmatprep.subr.bf16.mxu1 %v10264_v42  ;;  %v2339_v42 = vld [vmem:[%s18106_s7 + $0x360] sm:$0xff] }
 0x1dc   : > { %v1170_v12 = vmax.f32 %v1039_v61, 0.0  ;;  %v12297_v27 = vpack.c.bf16 %v1169_v5, %v1167_v19  ;;  %v1043_v46 = vadd.f32 %v1042_v6, %v12133_v56  ;;  %v2327_v5 = vld [vmem:[%s18106_s7 + $0x300] sm:$0xff]  ;;  %v10239_v16 = vcombine.low %v2335_v35, %v2339_v42 }
 0x1dd   : > { %v1044_v22 = vpop.f32.mrf.mxu1  ;;  %v2455_v10 = vld [vmem:[%s18106_s7 + $0x700] sm:$0xff]  ;;  %v10367_v19 = vcombine.low %v2463_v43, %v2467_v45 }
 0x1de   : > { %v12295_v23 = vpack.c.bf16 %v1170_v12, %v1168_v11  ;;  %3824 = vmatpush1.bf16.msra.mxu0 %v10135_v63  ;;  %4017 = vmatpush1.bf16.msra.mxu1 %v10263_v0  ;;  %18346 = vst [vmem:[#allocation36_spill] sm:$0xff] %v12297_v27  ;;  %v1045_v41 = vadd.f32 %v1044_v22, %v12130_v55  ;;  %v2459_v11 = vld [vmem:[%s18106_s7 + $0x720] sm:$0xff]  ;;  %v1171_v12 = vmax.f32 %v1043_v46, 0.0 }
 0x1df   : > { %v1046_v29 = vpop.f32.mrf.mxu1  ;;  %3825 = vmatprep.subr.bf16.mxu0 %v10256_v7  ;;  %4018 = vmatprep.subr.bf16.mxu1 %v10384_v8  ;;  %v10240_v63 = vcombine.high %v2335_v35, %v2339_v42  ;;  %v10368_v0 = vcombine.high %v2463_v43, %v2467_v45  ;;  %v2331_v8 = vld [vmem:[%s18106_s7 + $0x320] sm:$0xff] }
 0x1e0   : > { %18345 = vst [vmem:[#allocation35_spill] sm:$0xff] %v12295_v23  ;;  %v1047_v40 = vadd.f32 %v1046_v29, %v12133_v56  ;;  %1725 = vmatprep.mubr.bf16.mxu0 %v12295_v23  ;;  %1918 = vmatprep.mubr.bf16.mxu1 %v12295_v23  ;;  %v1172_v6 = vmax.f32 %v1045_v41, 0.0  ;;  %v10360_v29 = vcombine.high %v2455_v10, %v2459_v11  ;;  %v2323_v35 = vld [vmem:[%s18106_s7 + $0x2e0] sm:$0xff] }
 0x1e1   : > { %v1048_v52 = vpop.f32.mrf.mxu1  ;;  %1726 = vmatmul.mubr.bf16.gmra.mxu0 %v12297_v27  ;;  %1919 = vmatmul.mubr.bf16.gmra.mxu1 %v12297_v27  ;;  %v2451_v42 = vld [vmem:[%s18106_s7 + $0x6e0] sm:$0xff] }
 0x1e2   : > { %v1049_v57 = vadd.f32 %v1048_v52, %v12130_v55  ;;  %3826 = vmatpush2.bf16.msra.mxu0 %v10255_v24  ;;  %4019 = vmatpush2.bf16.msra.mxu1 %v10383_v26  ;;  %v1173_v60 = vmax.f32 %v1047_v40, 0.0  ;;  %v10232_v26 = vcombine.high %v2327_v5, %v2331_v8  ;;  %v2447_v40 = vld [vmem:[%s18106_s7 + $0x6c0] sm:$0xff]  ;;  %v10231_v52 = vcombine.low %v2327_v5, %v2331_v8 }
 0x1e3   : > { %v1052_v61 = vpop.f32.mrf.mxu1  ;;  %3827 = vmatprep.subr.bf16.mxu0 %v10248_v30  ;;  %4020 = vmatprep.subr.bf16.mxu1 %v10376_v32  ;;  %v2319_v30 = vld [vmem:[%s18106_s7 + $0x2c0] sm:$0xff] }
 0x1e4   : > { %v1174_v7 = vmax.f32 %v1049_v57, 0.0  ;;  %v12333_v22 = vpack.c.bf16 %v1173_v60, %v1171_v12  ;;  %v1053_v43 = vadd.f32 %v1052_v61, %v12133_v56  ;;  %v10359_v57 = vcombine.low %v2455_v10, %v2459_v11  ;;  %v2311_v61 = vld [vmem:[%s18106_s7 + $0x280] sm:$0xff] }
 0x1e5   : > { %v1054_v13 = vpop.f32.mrf.mxu1  ;;  %v10224_v60 = vcombine.high %v2319_v30, %v2323_v35  ;;  %v2439_v5 = vld [vmem:[%s18106_s7 + $0x680] sm:$0xff] }
 0x1e6   : > { %v12331_v15 = vpack.c.bf16 %v1174_v7, %v1172_v6  ;;  %3828 = vmatpush2.bf16.msra.mxu0 %v10247_v58  ;;  %4021 = vmatpush2.bf16.msra.mxu1 %v10375_v59  ;;  %18348 = vst [vmem:[#allocation38_spill] sm:$0xff] %v12333_v22  ;;  %v1055_v32 = vadd.f32 %v1054_v13, %v12130_v55  ;;  %v2315_v7 = vld [vmem:[%s18106_s7 + $0x2a0] sm:$0xff]  ;;  %v1175_v10 = vmax.f32 %v1053_v43, 0.0 }
 0x1e7   : > { %v1056_v24 = vpop.f32.mrf.mxu1  ;;  %3829 = vmatprep.subr.bf16.mxu0 %v10240_v63  ;;  %4022 = vmatprep.subr.bf16.mxu1 %v10368_v0  ;;  %v10352_v63 = vcombine.high %v2447_v40, %v2451_v42  ;;  %v2443_v8 = vld [vmem:[%s18106_s7 + $0x6a0] sm:$0xff]  ;;  %v10223_v13 = vcombine.low %v2319_v30, %v2323_v35 }
 0x1e8   : > { %18347 = vst [vmem:[#allocation37_spill] sm:$0xff] %v12331_v15  ;;  %v1057_v41 = vadd.f32 %v1056_v24, %v12133_v56  ;;  %1735 = vmatprep.mubr.bf16.mxu0 %v12331_v15  ;;  %1928 = vmatprep.mubr.bf16.mxu1 %v12331_v15  ;;  %v1176_v0 = vmax.f32 %v1055_v32, 0.0  ;;  %v2303_v30 = vld [vmem:[%s18106_s7 + $0x240] sm:$0xff] }
 0x1e9   : > { %v1058_v45 = vpop.f32.mrf.mxu1  ;;  %1736 = vmatmul.mubr.bf16.gmra.mxu0 %v12333_v22  ;;  %1929 = vmatmul.mubr.bf16.gmra.mxu1 %v12333_v22  ;;  %v2307_v35 = vld [vmem:[%s18106_s7 + $0x260] sm:$0xff] }
 0x1ea   : > { %v1059_v46 = vadd.f32 %v1058_v45, %v12130_v55  ;;  %3830 = vmatpush2.bf16.msra.mxu0 %v10239_v16  ;;  %4023 = vmatpush2.bf16.msra.mxu1 %v10367_v19  ;;  %v1177_v58 = vmax.f32 %v1057_v41, 0.0  ;;  %v10351_v16 = vcombine.low %v2447_v40, %v2451_v42  ;;  %v10215_v45 = vcombine.low %v2311_v61, %v2315_v7 }
 0x1eb   : > { %v1062_v59 = vpop.f32.mrf.mxu1  ;;  %3831 = vmatprep.subr.bf16.mxu0 %v10232_v26  ;;  %4024 = vmatprep.subr.bf16.mxu1 %v10360_v29  ;;  %v10216_v26 = vcombine.high %v2311_v61, %v2315_v7  ;;  %v10344_v29 = vcombine.high %v2439_v5, %v2443_v8 }
 0x1ec   : > { %v1178_v6 = vmax.f32 %v1059_v46, 0.0  ;;  %v12369_v19 = vpack.c.bf16 %v1177_v58, %v1175_v10  ;;  %v1063_v40 = vadd.f32 %v1062_v59, %v12133_v56  ;;  %v10343_v46 = vcombine.low %v2439_v5, %v2443_v8 }
 0x1ed   : > { %v1064_v11 = vpop.f32.mrf.mxu1  ;;  %v10208_v58 = vcombine.high %v2303_v30, %v2307_v35  ;;  %v10207_v10 = vcombine.low %v2303_v30, %v2307_v35 }
 0x1ee   : > { %v12367_v12 = vpack.c.bf16 %v1178_v6, %v1176_v0  ;;  %3832 = vmatpush2.bf16.msra.mxu0 %v10231_v52  ;;  %4025 = vmatpush2.bf16.msra.mxu1 %v10359_v57  ;;  %18350 = vst [vmem:[#allocation40_spill] sm:$0xff] %v12369_v19  ;;  %v1065_v32 = vadd.f32 %v1064_v11, %v12130_v55  ;;  %v1179_v0 = vmax.f32 %v1063_v40, 0.0 }
 0x1ef   : > { %v1066_v24 = vpop.f32.mrf.mxu1  ;;  %3833 = vmatprep.subr.bf16.mxu0 %v10224_v60  ;;  %4026 = vmatprep.subr.bf16.mxu1 %v10352_v63 }
 0x1f0   : > { %18349 = vst [vmem:[#allocation39_spill] sm:$0xff] %v12367_v12  ;;  %v1067_v41 = vadd.f32 %v1066_v24, %v12133_v56  ;;  %1745 = vmatprep.mubr.bf16.mxu0 %v12367_v12  ;;  %1938 = vmatprep.mubr.bf16.mxu1 %v12367_v12  ;;  %v1180_v60 = vmax.f32 %v1065_v32, 0.0 }
 0x1f1   : > { %v1068_v42 = vpop.f32.mrf.mxu1  ;;  %1746 = vmatmul.mubr.bf16.gmra.mxu0 %v12369_v19  ;;  %1939 = vmatmul.mubr.bf16.gmra.mxu1 %v12369_v19 }
 0x1f2   : > { %v1069_v43 = vadd.f32 %v1068_v42, %v12130_v55  ;;  %3834 = vmatpush2.bf16.msra.mxu0 %v10223_v13  ;;  %4027 = vmatpush2.bf16.msra.mxu1 %v10351_v16  ;;  %v1181_v52 = vmax.f32 %v1067_v41, 0.0 }
 0x1f3   : > { %v1072_v57 = vpop.f32.mrf.mxu1  ;;  %3835 = vmatprep.subr.bf16.mxu0 %v10216_v26  ;;  %4028 = vmatprep.subr.bf16.mxu1 %v10344_v29 }
 0x1f4   : > { %v1182_v63 = vmax.f32 %v1069_v43, 0.0  ;;  %v12387_v11 = vpack.c.bf16 %v1181_v52, %v1179_v0  ;;  %v1073_v5 = vadd.f32 %v1072_v57, %v12133_v56 }
 0x1f5   : > { %v1074_v59 = vpop.f32.mrf.mxu1 }
 0x1f6   : > { %v12385_v6 = vpack.c.bf16 %v1182_v63, %v1180_v60  ;;  %3836 = vmatpush2.bf16.msra.mxu0 %v10215_v45  ;;  %4029 = vmatpush2.bf16.msra.mxu1 %v10343_v46  ;;  %18352 = vst [vmem:[#allocation42_spill] sm:$0xff] %v12387_v11  ;;  %v1075_v61 = vadd.f32 %v1074_v59, %v12130_v55  ;;  %v1183_v41 = vmax.f32 %v1073_v5, 0.0  ;;  %v2431_v59 = vld [vmem:[%s18106_s7 + $0x640] sm:$0xff] }
 0x1f7   : > { %v1076_v13 = vpop.f32.mrf.mxu1  ;;  %3837 = vmatprep.subr.bf16.mxu0 %v10208_v58 }
 0x1f8   : > { %18351 = vst [vmem:[#allocation41_spill] sm:$0xff] %v12385_v6  ;;  %v1077_v7 = vadd.f32 %v1076_v13, %v12133_v56  ;;  %1755 = vmatprep.mubr.bf16.mxu0 %v12385_v6  ;;  %1948 = vmatprep.mubr.bf16.mxu1 %v12385_v6  ;;  %v1184_v29 = vmax.f32 %v1075_v61, 0.0 }
 0x1f9   : > { %v1078_v8 = vpop.f32.mrf.mxu1  ;;  %1756 = vmatmul.mubr.bf16.gmra.mxu0 %v12387_v11  ;;  %1949 = vmatmul.mubr.bf16.gmra.mxu1 %v12387_v11 }
 0x1fa   : > { %v1079_v16 = vadd.f32 %v1078_v8, %v12130_v55  ;;  %3838 = vmatpush2.bf16.msra.mxu0 %v10207_v10  ;;  %v1185_v24 = vmax.f32 %v1077_v7, 0.0  ;;  %v2435_v10 = vld [vmem:[%s18106_s7 + $0x660] sm:$0xff] }
 0x1fb   : > { %v1082_v26 = vpop.f32.mrf.mxu1  ;;  %v10336_v7 = vcombine.high %v2431_v59, %v2435_v10  ;;  %v10335_v8 = vcombine.low %v2431_v59, %v2435_v10 }
 0x1fc   : > { %v1186_v32 = vmax.f32 %v1079_v16, 0.0  ;;  %v12399_v40 = vpack.c.bf16 %v1185_v24, %v1183_v41  ;;  %v1083_v46 = vadd.f32 %v1082_v26, %v12133_v56  ;;  %v2299_v41 = vld [vmem:[%s18106_s7 + $0x220] sm:$0xff] }
 0x1fd   : > { %v1084_v30 = vpop.f32.mrf.mxu1  ;;  %4030 = vmatprep.subr.bf16.mxu1 %v10336_v7 }
 0x1fe   : > { %v12397_v35 = vpack.c.bf16 %v1186_v32, %v1184_v29  ;;  %18354 = vst [vmem:[#allocation44_spill] sm:$0xff] %v12399_v40  ;;  %v1085_v43 = vadd.f32 %v1084_v30, %v12130_v55  ;;  %v1187_v13 = vmax.f32 %v1083_v46, 0.0  ;;  %v2295_v32 = vld [vmem:[%s18106_s7 + $0x200] sm:$0xff]  ;;  %4031 = vmatpush2.bf16.msra.mxu1 %v10335_v8 }
 0x1ff   : > { %v1086_v42 = vpop.f32.mrf.mxu1  ;;  %v2427_v46 = vld [vmem:[%s18106_s7 + $0x620] sm:$0xff] }
 0x200   : > { %18353 = vst [vmem:[#allocation43_spill] sm:$0xff] %v12397_v35  ;;  %v1087_v45 = vadd.f32 %v1086_v42, %v12133_v56  ;;  %1765 = vmatprep.mubr.bf16.mxu0 %v12397_v35  ;;  %1958 = vmatprep.mubr.bf16.mxu1 %v12397_v35  ;;  %v1188_v63 = vmax.f32 %v1085_v43, 0.0  ;;  %v10200_v43 = vcombine.high %v2295_v32, %v2299_v41 }
 0x201   : > { %v1088_v52 = vpop.f32.mrf.mxu1  ;;  %1766 = vmatmul.mubr.bf16.gmra.mxu0 %v12399_v40  ;;  %1959 = vmatmul.mubr.bf16.gmra.mxu1 %v12399_v40 }
 0x202   : > { %v1089_v57 = vadd.f32 %v1088_v52, %v12130_v55  ;;  %v1189_v58 = vmax.f32 %v1087_v45, 0.0  ;;  %v2423_v45 = vld [vmem:[%s18106_s7 + $0x600] sm:$0xff]  ;;  %3839 = vmatprep.subr.bf16.mxu0 %v10200_v43 }
 0x203   : > { %v1092_v60 = vpop.f32.mrf.mxu1 }
 0x204   : > { %v1190_v0 = vmax.f32 %v1089_v57, 0.0  ;;  %v12417_v16 = vpack.c.bf16 %v1189_v58, %v1187_v13  ;;  %v1093_v30 = vadd.f32 %v1092_v60, %v12133_v56  ;;  %v10199_v57 = vcombine.low %v2295_v32, %v2299_v41 }
 0x205   : > { %v1094_v61 = vpop.f32.mrf.mxu1  ;;  %v10328_v58 = vcombine.high %v2423_v45, %v2427_v46 }
 0x206   : > { %v12415_v5 = vpack.c.bf16 %v1190_v0, %v1188_v63  ;;  %18356 = vst [vmem:[#allocation46_spill] sm:$0xff] %v12417_v16  ;;  %v1095_v26 = vadd.f32 %v1094_v61, %v12130_v55  ;;  %v10327_v0 = vcombine.low %v2423_v45, %v2427_v46  ;;  %3840 = vmatpush2.bf16.msra.mxu0 %v10199_v57  ;;  %v1191_v13 = vmax.f32 %v1093_v30, 0.0  ;;  %v12459_v46 = vld [vmem:[%s18106_s7 + $0x1e8] sm:$0xff] }
 0x207   : > { %v1096_v24 = vpop.f32.mrf.mxu1  ;;  %4032 = vmatprep.subr.bf16.mxu1 %v10328_v58 }
 0x208   : > { %18355 = vst [vmem:[#allocation45_spill] sm:$0xff] %v12415_v5  ;;  %v1097_v29 = vadd.f32 %v1096_v24, %v12133_v56  ;;  %1775 = vmatprep.mubr.bf16.mxu0 %v12415_v5  ;;  %1968 = vmatprep.mubr.bf16.mxu1 %v12415_v5  ;;  %v1192_v59 = vmax.f32 %v1095_v26, 0.0 }
 0x209   : > { %v1098_v42 = vpop.f32.mrf.mxu1  ;;  %1776 = vmatmul.mubr.bf16.gmra.mxu0 %v12417_v16  ;;  %1969 = vmatmul.mubr.bf16.gmra.mxu1 %v12417_v16 }
 0x20a   : > { %v1099_v52 = vadd.f32 %v1098_v42, %v12130_v55  ;;  %v1193_v60 = vmax.f32 %v1097_v29, 0.0  ;;  %4033 = vmatpush2.bf16.msra.mxu1 %v10327_v0  ;;  %v12473_v0 = vld [vmem:[%s18106_s7 + $0x5e8] sm:$0xff] }
 0x20b   : > { %v1102_v63 = vpop.f32.mrf.mxu1 }
 0x20c   : > { %v1194_v10 = vmax.f32 %v1099_v52, 0.0  ;;  %v12441_v24 = vpack.c.bf16 %v1193_v60, %v1191_v13  ;;  %v1103_v26 = vadd.f32 %v1102_v63, %v12133_v56  ;;  %v12468_v63 = vld [vmem:[%s18106_s7 + $0x5c8] sm:$0xff] }
 0x20d   : > { %v1104_v61 = vpop.f32.mrf.mxu1 }
 0x20e   : > { %v12439_v7 = vpack.c.bf16 %v1194_v10, %v1192_v59  ;;  %18358 = vst [vmem:[#allocation48_spill] sm:$0xff] %v12441_v24  ;;  %v1105_v8 = vadd.f32 %v1104_v61, %v12130_v55  ;;  %v1195_v52 = vmax.f32 %v1103_v26, 0.0 }
 0x20f   : > { %v1106_v36 = vpop.f32.mrf.mxu1 }
 0x210   : > { %18357 = vst [vmem:[#allocation47_spill] sm:$0xff] %v12439_v7  ;;  %v1107_v32 = vadd.f32 %v1106_v36, %v12133_v56  ;;  %1785 = vmatprep.mubr.bf16.mxu0 %v12439_v7  ;;  %1978 = vmatprep.mubr.bf16.mxu1 %v12439_v7  ;;  %v1196_v43 = vmax.f32 %v1105_v8, 0.0  ;;  %v12454_v36 = vld [vmem:[%s18106_s7 + $0x1c8] sm:$0xff]  ;;  %v10322_v8 = vcombine.high %v12468_v63, %v12473_v0 }
 0x211   : > { %v1108_v29 = vpop.f32.mrf.mxu1  ;;  %1786 = vmatmul.mubr.bf16.gmra.mxu0 %v12441_v24  ;;  %1979 = vmatmul.mubr.bf16.gmra.mxu1 %v12441_v24  ;;  %v10194_v60 = vcombine.high %v12454_v36, %v12459_v46  ;;  %v12655_v24 = vld [vmem:[%s18106_s7 + $0x108] sm:$0xff] }
 0x212   : > { %v1109_v41 = vadd.f32 %v1108_v29, %v12130_v55  ;;  %v1197_v30 = vmax.f32 %v1107_v32, 0.0  ;;  %4388 = vmatprep.subr.bf16.mxu1 %v10322_v8 }
 0x213   : > { %v1112_v42 = vpop.f32.mrf.mxu1  ;;  %4195 = vmatprep.subr.bf16.mxu0 %v10194_v60 }
 0x214   : > { %v1198_v45 = vmax.f32 %v1109_v41, 0.0  ;;  %v12479_v13 = vpack.c.bf16 %v1197_v30, %v1195_v52  ;;  %v1113_v29 = vadd.f32 %v1112_v42, %v12133_v56 }
 0x215   : > { %v1114_v57 = vpop.f32.mrf.mxu1 }
 0x216   : > { %v12475_v59 = vpack.c.bf16 %v1198_v45, %v1196_v43  ;;  %18360 = vst [vmem:[#allocation50_spill] sm:$0xff] %v12479_v13  ;;  %v1115_v32 = vadd.f32 %v1114_v57, %v12130_v55  ;;  %v1199_v60 = vmax.f32 %v1113_v29, 0.0 }
 0x217   : > { %v1116_v61 = vpop.f32.mrf.mxu1 }
 0x218   : > { %18359 = vst [vmem:[#allocation49_spill] sm:$0xff] %v12475_v59  ;;  %v1117_v26 = vadd.f32 %v1116_v61, %v12133_v56  ;;  %1795 = vmatprep.mubr.bf16.mxu0 %v12475_v59  ;;  %1988 = vmatprep.mubr.bf16.mxu1 %v12475_v59  ;;  %v1200_v52 = vmax.f32 %v1115_v32, 0.0 }
 0x219   : > { %v1118_v41 = vpop.f32.mrf.mxu1  ;;  %1796 = vmatmul.mubr.bf16.gmra.mxu0 %v12479_v13  ;;  %1989 = vmatmul.mubr.bf16.gmra.mxu1 %v12479_v13  ;;  %v18375_v13 = vcombine.low %v12468_v63, %v12473_v0 }
 0x21a   : > { %v1119_v30 = vadd.f32 %v1118_v41, %v12130_v55  ;;  %v1201_v43 = vmax.f32 %v1117_v26, 0.0 }
 0x21b   : > { %v1122_v45 = vpop.f32.mrf.mxu1 }
 0x21c   : > { %v1202_v57 = vmax.f32 %v1119_v30, 0.0  ;;  %v12493_v58 = vpack.c.bf16 %v1201_v43, %v1199_v60  ;;  %v1123_v8 = vadd.f32 %v1122_v45, %v12133_v56 }
 0x21d   : > { %v1124_v61 = vpop.f32.mrf.mxu1 }
 0x21e   : > { %v12491_v10 = vpack.c.bf16 %v1202_v57, %v1200_v52  ;;  %18362 = vst [vmem:[#allocation52_spill] sm:$0xff] %v12493_v58  ;;  %v1125_v42 = vadd.f32 %v1124_v61, %v12130_v55  ;;  %v1203_v52 = vmax.f32 %v1123_v8, 0.0 }
 0x21f   : > { %v1126_v38 = vpop.f32.mrf.mxu1 }
 0x220   : > { %18361 = vst [vmem:[#allocation51_spill] sm:$0xff] %v12491_v10  ;;  %v1127_v33 = vadd.f32 %v1126_v38, %v12133_v56  ;;  %1805 = vmatprep.mubr.bf16.mxu0 %v12491_v10  ;;  %1998 = vmatprep.mubr.bf16.mxu1 %v12491_v10  ;;  %v1204_v30 = vmax.f32 %v1125_v42, 0.0  ;;  %v18374_v10 = vcombine.low %v12454_v36, %v12459_v46  ;;  %v12665_v36 = vld [vmem:[%s18106_s7 + $0x508] sm:$0xff] }
 0x221   : > { %v1128_v26 = vpop.f32.mrf.mxu1  ;;  %1806 = vmatmul.mubr.bf16.gmra.mxu0 %v12493_v58  ;;  %1999 = vmatmul.mubr.bf16.gmra.mxu1 %v12493_v58 }
 0x222   : > { %v1129_v32 = vadd.f32 %v1128_v26, %v12130_v55  ;;  %v1205_v29 = vmax.f32 %v1127_v33, 0.0 }
 0x223   : > { %v1132_v41 = vpop.f32.mrf.mxu1 }
 0x224   : > { %v1206_v43 = vmax.f32 %v1129_v32, 0.0  ;;  %v12505_v60 = vpack.c.bf16 %v1205_v29, %v1203_v52  ;;  %v1133_v33 = vadd.f32 %v1132_v41, %v12133_v56 }
 0x225   : > { %v1134_v57 = vpop.f32.mrf.mxu1 }
 0x226   : > { %v12503_v38 = vpack.c.bf16 %v1206_v43, %v1204_v30  ;;  %18364 = vst [vmem:[#allocation54_spill] sm:$0xff] %v12505_v60  ;;  %v1135_v45 = vadd.f32 %v1134_v57, %v12130_v55  ;;  %v1207_v43 = vmax.f32 %v1133_v33, 0.0 }
 0x227   : > { %v1136_v61 = vpop.f32.mrf.mxu1 }
 0x228   : > { %18363 = vst [vmem:[#allocation53_spill] sm:$0xff] %v12503_v38  ;;  %v1137_v25 = vadd.f32 %v1136_v61, %v12133_v56  ;;  %1815 = vmatprep.mubr.bf16.mxu0 %v12503_v38  ;;  %2008 = vmatprep.mubr.bf16.mxu1 %v12503_v38  ;;  %v1208_v29 = vmax.f32 %v1135_v45, 0.0 }
 0x229   : > { %v1138_v26 = vpop.f32.mrf.mxu1  ;;  %1816 = vmatmul.mubr.bf16.gmra.mxu0 %v12505_v60  ;;  %2009 = vmatmul.mubr.bf16.gmra.mxu1 %v12505_v60 }
 0x22a   : > { %v1139_v42 = vadd.f32 %v1138_v26, %v12130_v55  ;;  %v1209_v8 = vmax.f32 %v1137_v25, 0.0 }
 0x22b   : > { %v1142_v32 = vpop.f32.mrf.mxu1 }
 0x22c   : > { %v1210_v30 = vmax.f32 %v1139_v42, 0.0  ;;  %v12517_v61 = vpack.c.bf16 %v1209_v8, %v1207_v43  ;;  %v1143_v25 = vadd.f32 %v1142_v32, %v12133_v56 }
 0x22d   : > { %v1144_v52 = vpop.f32.mrf.mxu1 }
 0x22e   : > { %v12515_v57 = vpack.c.bf16 %v1210_v30, %v1208_v29  ;;  %18366 = vst [vmem:[#allocation56_spill] sm:$0xff] %v12517_v61  ;;  %v1145_v41 = vadd.f32 %v1144_v52, %v12130_v55  ;;  %v1211_v29 = vmax.f32 %v1143_v25, 0.0 }
 0x22f   : > { %v1146_v18 = vpop.f32.mrf.mxu1 }
 0x230   : > { %18365 = vst [vmem:[#allocation55_spill] sm:$0xff] %v12515_v57  ;;  %v1147_v9 = vadd.f32 %v1146_v18, %v12133_v56  ;;  %1825 = vmatprep.mubr.bf16.mxu0 %v12515_v57  ;;  %2018 = vmatprep.mubr.bf16.mxu1 %v12515_v57  ;;  %v1212_v42 = vmax.f32 %v1145_v41, 0.0  ;;  %v12536_v56 = vsub.s32 3, %v12118_v47 }
 0x231   : > { %v1148_v26 = vpop.f32.mrf.mxu1  ;;  %1826 = vmatmul.mubr.bf16.gmra.mxu0 %v12517_v61  ;;  %2019 = vmatmul.mubr.bf16.gmra.mxu1 %v12517_v61 }
 0x232   : > { %v1149_v45 = vadd.f32 %v1148_v26, %v12130_v55  ;;  %v1213_v33 = vmax.f32 %v1147_v9, 0.0  ;;  %18369 = vst [vmem:[#allocation59_spill] sm:$0xff] %v12536_v56  ;;  %v12539_v9 = vsub.s32 2, %v12118_v47  ;;  %v1311_v55 = vld [vmem:[%s18105_s6] sm:$0xf] }
 0x233   : > { %v12545_v52 = vrot.slane %v1311_v55, %v12121_v48  ;;  %v12548_v41 = vrot.slane %v1311_v55, %v12536_v56  ;;  %v12551_v25 = vrot.slane %v1311_v55, %v12124_v49 }
 0x234   : > { %v1214_v8 = vmax.f32 %v1149_v45, 0.0  ;;  %v12529_v18 = vpack.c.bf16 %v1213_v33, %v1211_v29  ;;  %18370 = vst [vmem:[#allocation60_spill] sm:$0xff] %v12539_v9  ;;  %v12554_v26 = vrot.slane %v1311_v55, %v12539_v9 }
 0x236   : > { %v12527_v30 = vpack.c.bf16 %v1214_v8, %v1212_v42  ;;  %18368 = vst [vmem:[#allocation58_spill] sm:$0xff] %v12529_v18 }
 0x238   : > { %18367 = vst [vmem:[#allocation57_spill] sm:$0xff] %v12527_v30  ;;  %1835 = vmatprep.mubr.bf16.mxu0 %v12527_v30  ;;  %2028 = vmatprep.mubr.bf16.mxu1 %v12527_v30 }
 0x239   : > { %1836 = vmatmul.mubr.bf16.gmra.mxu0 %v12529_v18  ;;  %2029 = vmatmul.mubr.bf16.gmra.mxu1 %v12529_v18 }
 0x281   : > { %v1687_v32 = vpop.f32.mrf.mxu0  ;;  %v1880_v43 = vpop.f32.mrf.mxu1 }
 0x282   : > { %v1688_v28 = vadd.f32 %v1687_v32, %v12551_v25  ;;  %v1881_v20 = vadd.f32 %v1880_v43, %v12554_v26 }
 0x283   : > { %v1689_v45 = vpop.f32.mrf.mxu0  ;;  %v1882_v33 = vpop.f32.mrf.mxu1 }
 0x284   : > { %v1690_v29 = vadd.f32 %v1689_v45, %v12545_v52  ;;  %v1883_v2 = vadd.f32 %v1882_v33, %v12548_v41  ;;  %v12567_v45 = vld [vmem:[%s18106_s7 + $0x188] sm:$0xff]  ;;  %v2039_v30 = vmax.f32 %v1688_v28, 0.0  ;;  %v2041_v61 = vmax.f32 %v1881_v20, 0.0 }
 0x285   : > { %v1691_v42 = vpop.f32.mrf.mxu0  ;;  %v1884_v8 = vpop.f32.mrf.mxu1  ;;  %v12572_v33 = vld [vmem:[%s18106_s7 + $0x1a8] sm:$0xff] }
 0x286   : > { %v1692_v51 = vadd.f32 %v1691_v42, %v12551_v25  ;;  %v1885_v39 = vadd.f32 %v1884_v8, %v12554_v26  ;;  %v2040_v21 = vmax.f32 %v1690_v29, 0.0  ;;  %v2042_v4 = vmax.f32 %v1883_v2, 0.0  ;;  %v12602_v20 = vld [vmem:[%s18106_s7 + $0x168] sm:$0xff] }
 0x287   : > { %v1693_v3 = vpop.f32.mrf.mxu0  ;;  %v1886_v53 = vpop.f32.mrf.mxu1  ;;  %v10185_v57 = vcombine.low %v12567_v45, %v12572_v33  ;;  %v10186_v58 = vcombine.high %v12567_v45, %v12572_v33 }
 0x288   : > { %v1694_v55 = vadd.f32 %v1693_v3, %v12545_v52  ;;  %v1887_v34 = vadd.f32 %v1886_v53, %v12548_v41  ;;  %v2043_v42 = vmax.f32 %v1692_v51, 0.0  ;;  %v2045_v32 = vmax.f32 %v1885_v39, 0.0  ;;  %v12577_v3 = vld [vmem:[%s18106_s7 + $0x588] sm:$0xff] }
 0x289   : > { %v1697_v8 = vpop.f32.mrf.mxu0  ;;  %v1890_v43 = vpop.f32.mrf.mxu1  ;;  %v12582_v53 = vld [vmem:[%s18106_s7 + $0x5a8] sm:$0xff] }
 0x28a   : > { %v2044_v54 = vmax.f32 %v1694_v55, 0.0  ;;  %v2046_v18 = vmax.f32 %v1887_v34, 0.0  ;;  %v12597_v34 = vld [vmem:[%s18106_s7 + $0x148] sm:$0xff] }
 0x28b   : > { %v1699_v51 = vpop.f32.mrf.mxu0  ;;  %v1892_v39 = vpop.f32.mrf.mxu1  ;;  %v10178_v59 = vcombine.high %v12597_v34, %v12602_v20 }
 0x28c   : > { %v12586_v60 = vpack.c.bf16 %v2044_v54, %v2040_v21  ;;  %v12588_v38 = vpack.c.bf16 %v2046_v18, %v2042_v4  ;;  %v12604_v54 = vpack.c.bf16 %v2043_v42, %v2039_v30  ;;  %v12606_v4 = vpack.c.bf16 %v2045_v32, %v2041_v61  ;;  %v12619_v61 = vld [vmem:[%s18106_s7 + $0x548] sm:$0xff] }
 0x28d   : > { %v1700_v21 = vadd.f32 %v1699_v51, %v12545_v52  ;;  %v1701_v28 = vpop.f32.mrf.mxu0  ;;  %v1894_v2 = vpop.f32.mrf.mxu1  ;;  %v10314_v18 = vcombine.high %v12577_v3, %v12582_v53  ;;  %v1893_v55 = vadd.f32 %v1892_v39, %v12548_v41  ;;  %v12624_v30 = vld [vmem:[%s18106_s7 + $0x568] sm:$0xff]  ;;  %v1698_v42 = vadd.f32 %v1697_v8, %v12551_v25  ;;  %v12640_v8 = vld [vmem:[%s18106_s7 + $0x1f0] sm:$0xff] }
 0x28e   : > { %18371 = vst [vmem:[#allocation61_spill] sm:$0xff] %v12588_v38  ;;  %18372 = vst [vmem:[#allocation62_spill] sm:$0xff] %v12604_v54  ;;  %v1702_v45 = vadd.f32 %v1701_v28, %v12551_v25  ;;  %v1895_v33 = vadd.f32 %v1894_v2, %v12554_v26  ;;  %3841 = vmatprep.mubr.bf16.mxu0 %v12586_v60  ;;  %4034 = vmatprep.mubr.bf16.mxu1 %v12588_v38  ;;  %v12635_v2 = vld [vmem:[%s18106_s7 + $0x1d0] sm:$0xff] }
 0x28f   : > { %18373 = vst [vmem:[#allocation63_spill] sm:$0xff] %v12606_v4  ;;  %v1891_v32 = vadd.f32 %v1890_v43, %v12554_v26  ;;  %v1703_v51 = vpop.f32.mrf.mxu0  ;;  %v1896_v39 = vpop.f32.mrf.mxu1  ;;  %3842 = vmatmul.mubr.bf16.vlgmr.msra.gmra.mxu0 %v12604_v54  ;;  %4035 = vmatmul.mubr.bf16.vlgmr.msra.gmra.mxu1 %v12606_v4  ;;  %v10177_v28 = vcombine.low %v12597_v34, %v12602_v20  ;;  %v12672_v34 = vld [vmem:[%s18106_s7 + $0x528] sm:$0xff]  ;;  %v2047_v16 = vmax.f32 %v1698_v42, 0.0 }
 0x290   : > { %v1704_v43 = vadd.f32 %v1703_v51, %v12545_v52  ;;  %v1897_v29 = vadd.f32 %v1896_v39, %v12548_v41  ;;  %4196 = vmatpush1.bf16.msra.mxu0 %v18374_v10  ;;  %4389 = vmatpush1.bf16.msra.mxu1 %v18375_v13  ;;  %v12660_v51 = vld [vmem:[%s18106_s7 + $0x128] sm:$0xff]  ;;  %v2051_v46 = vmax.f32 %v1702_v45, 0.0  ;;  %v2053_v63 = vmax.f32 %v1895_v33, 0.0  ;;  %v12679_v45 = vld [vmem:[%s18106_s7 + $0x5d0] sm:$0xff] }
 0x291   : > { %v1707_v0 = vpop.f32.mrf.mxu0  ;;  %v1900_v10 = vpop.f32.mrf.mxu1  ;;  %4197 = vmatprep.subr.bf16.mxu0 %v10186_v58  ;;  %4390 = vmatprep.subr.bf16.mxu1 %v10314_v18  ;;  %v10305_v13 = vcombine.low %v12619_v61, %v12624_v30  ;;  %v12684_v58 = vld [vmem:[%s18106_s7 + $0x5f0] sm:$0xff]  ;;  %v2048_v18 = vmax.f32 %v1700_v21, 0.0  ;;  %v2050_v33 = vmax.f32 %v1893_v55, 0.0  ;;  %v2049_v5 = vmax.f32 %v1891_v32, 0.0 }
 0x292   : > { %v2052_v39 = vmax.f32 %v1704_v43, 0.0  ;;  %v2054_v7 = vmax.f32 %v1897_v29, 0.0  ;;  %v10306_v20 = vcombine.high %v12619_v61, %v12624_v30  ;;  %v10170_v21 = vcombine.high %v12655_v24, %v12660_v51 }
 0x293   : > { %v1709_v40 = vpop.f32.mrf.mxu0  ;;  %v1902_v35 = vpop.f32.mrf.mxu1  ;;  %v10298_v29 = vcombine.high %v12665_v36, %v12672_v34  ;;  %v12698_v55 = vpack.c.bf16 %v2051_v46, %v2047_v16  ;;  %v12700_v42 = vpack.c.bf16 %v2053_v63, %v2049_v5  ;;  %v18380_v43 = vcombine.low %v12577_v3, %v12582_v53  ;;  %v12719_v5 = vld [vmem:[%s18106_s7 + $0xe8] sm:$0xff] }
 0x294   : > { %v12690_v6 = vpack.c.bf16 %v2052_v39, %v2048_v18  ;;  %v12692_v19 = vpack.c.bf16 %v2054_v7, %v2050_v33  ;;  %4198 = vmatpush1.bf16.msra.mxu0 %v10185_v57  ;;  %v1710_v61 = vadd.f32 %v1709_v40, %v12545_v52  ;;  %v1903_v7 = vadd.f32 %v1902_v35, %v12548_v41  ;;  %v12714_v40 = vld [vmem:[%s18106_s7 + $0xc8] sm:$0xff] }
 0x295   : > { %18378 = vst [vmem:[#allocation66_spill] sm:$0xff] %v12698_v55  ;;  %18379 = vst [vmem:[#allocation67_spill] sm:$0xff] %v12700_v42  ;;  %v1711_v30 = vpop.f32.mrf.mxu0  ;;  %v1904_v32 = vpop.f32.mrf.mxu1  ;;  %4391 = vmatpush1.bf16.msra.mxu1 %v18380_v43  ;;  %4199 = vmatprep.subr.bf16.mxu0 %v10178_v59  ;;  %v1708_v35 = vadd.f32 %v1707_v0, %v12551_v25  ;;  %v1901_v16 = vadd.f32 %v1900_v10, %v12554_v26  ;;  %v12734_v10 = vld [vmem:[%s18106_s7 + $0x4c8] sm:$0xff] }
 0x296   : > { %18376 = vst [vmem:[#allocation64_spill] sm:$0xff] %v12690_v6  ;;  %18377 = vst [vmem:[#allocation65_spill] sm:$0xff] %v12692_v19  ;;  %v1712_v57 = vadd.f32 %v1711_v30, %v12551_v25  ;;  %v1905_v18 = vadd.f32 %v1904_v32, %v12554_v26  ;;  %3851 = vmatprep.mubr.bf16.mxu0 %v12690_v6  ;;  %4044 = vmatprep.mubr.bf16.mxu1 %v12692_v19  ;;  %v2388_v33 = vld [vmem:[%s18106_s7 + $0x4e8] sm:$0xff]  ;;  %v2058_v43 = vmax.f32 %v1903_v7, 0.0 }
 0x297   : > { %v1713_v59 = vpop.f32.mrf.mxu0  ;;  %v1906_v3 = vpop.f32.mrf.mxu1  ;;  %3852 = vmatmul.mubr.bf16.gmra.mxu0 %v12698_v55  ;;  %4045 = vmatmul.mubr.bf16.gmra.mxu1 %v12700_v42  ;;  %v10169_v53 = vcombine.low %v12655_v24, %v12660_v51  ;;  %v10297_v0 = vcombine.low %v12665_v36, %v12672_v34  ;;  %v12742_v24 = vld [vmem:[%s18106_s7 + $0x88] sm:$0xff]  ;;  %v10161_v36 = vcombine.low %v12714_v40, %v12719_v5 }
 0x298   : > { %v1714_v46 = vadd.f32 %v1713_v59, %v12545_v52  ;;  %v1907_v63 = vadd.f32 %v1906_v3, %v12548_v41  ;;  %4200 = vmatpush1.bf16.msra.mxu0 %v10177_v28  ;;  %4392 = vmatprep.subr.bf16.mxu1 %v10306_v20  ;;  %v2059_v51 = vmax.f32 %v1712_v57, 0.0  ;;  %v2061_v28 = vmax.f32 %v1905_v18, 0.0  ;;  %v12751_v30 = vld [vmem:[%s18106_s7 + $0xa8] sm:$0xff] }
 0x299   : > { %v1717_v20 = vpop.f32.mrf.mxu0  ;;  %v1910_v39 = vpop.f32.mrf.mxu1  ;;  %4393 = vmatpush1.bf16.msra.mxu1 %v10305_v13  ;;  %4201 = vmatprep.subr.bf16.mxu0 %v10170_v21  ;;  %v10162_v34 = vcombine.high %v12714_v40, %v12719_v5  ;;  %v12756_v32 = vld [vmem:[%s18106_s7 + $0x488] sm:$0xff]  ;;  %v2056_v21 = vmax.f32 %v1710_v61, 0.0  ;;  %v2055_v40 = vmax.f32 %v1708_v35, 0.0  ;;  %v2057_v5 = vmax.f32 %v1901_v16, 0.0 }
 0x29a   : > { %v12761_v13 = vld [vmem:[%s18106_s7 + $0x4a8] sm:$0xff]  ;;  %v2060_v57 = vmax.f32 %v1714_v46, 0.0  ;;  %v2062_v18 = vmax.f32 %v1907_v63, 0.0  ;;  %4394 = vmatprep.subr.bf16.mxu1 %v10298_v29  ;;  %v10289_v11 = vcombine.low %v12734_v10, %v2388_v33  ;;  %v10290_v12 = vcombine.high %v12734_v10, %v2388_v33 }
 0x29b   : > { %v1719_v59 = vpop.f32.mrf.mxu0  ;;  %v1912_v3 = vpop.f32.mrf.mxu1  ;;  %v10154_v61 = vcombine.high %v12742_v24, %v12751_v30  ;;  %v10282_v7 = vcombine.high %v12756_v32, %v12761_v13  ;;  %v12773_v29 = vpack.c.bf16 %v2059_v51, %v2055_v40  ;;  %v12775_v35 = vpack.c.bf16 %v2061_v28, %v2057_v5  ;;  %v12786_v51 = vld [vmem:[%s18106_s7 + $0x48] sm:$0xff] }
 0x29c   : > { %v12765_v22 = vpack.c.bf16 %v2060_v57, %v2056_v21  ;;  %v12767_v15 = vpack.c.bf16 %v2062_v18, %v2058_v43  ;;  %4202 = vmatpush1.bf16.msra.mxu0 %v10169_v53  ;;  %v1720_v16 = vadd.f32 %v1719_v59, %v12545_v52  ;;  %v1913_v10 = vadd.f32 %v1912_v3, %v12548_v41  ;;  %v2372_v5 = vld [vmem:[%s18106_s7 + $0x468] sm:$0xff] }
 0x29d   : > { %v1721_v46 = vpop.f32.mrf.mxu0  ;;  %v1914_v63 = vpop.f32.mrf.mxu1  ;;  %4395 = vmatpush1.bf16.msra.mxu1 %v10297_v0  ;;  %4203 = vmatprep.subr.bf16.mxu0 %v10162_v34  ;;  %v12791_v0 = vld [vmem:[%s18106_s7 + $0x68] sm:$0xff]  ;;  %v1718_v28 = vadd.f32 %v1717_v20, %v12551_v25  ;;  %v1911_v34 = vadd.f32 %v1910_v39, %v12554_v26  ;;  %v10153_v57 = vcombine.low %v12742_v24, %v12751_v30 }
 0x29e   : > { %v1722_v53 = vadd.f32 %v1721_v46, %v12551_v25  ;;  %v1915_v33 = vadd.f32 %v1914_v63, %v12554_v26  ;;  %3861 = vmatprep.mubr.bf16.mxu0 %v12765_v22  ;;  %4054 = vmatprep.mubr.bf16.mxu1 %v12767_v15  ;;  %v10281_v20 = vcombine.low %v12756_v32, %v12761_v13  ;;  %v12806_v39 = vld [vmem:[%s18106_s7 + $0x448] sm:$0xff]  ;;  %v2066_v63 = vmax.f32 %v1913_v10, 0.0 }
 0x29f   : > { %v1723_v21 = vpop.f32.mrf.mxu0  ;;  %v1916_v43 = vpop.f32.mrf.mxu1  ;;  %3862 = vmatmul.mubr.bf16.gmra.mxu0 %v12773_v29  ;;  %4055 = vmatmul.mubr.bf16.gmra.mxu1 %v12775_v35  ;;  %v12814_v24 = vld [vmem:[%s18106_s7 + $0x8] sm:$0xff]  ;;  %v10145_v32 = vcombine.low %v12786_v51, %v12791_v0  ;;  %v10146_v13 = vcombine.high %v12786_v51, %v12791_v0  ;;  %v2063_v51 = vmax.f32 %v1718_v28, 0.0  ;;  %v2065_v0 = vmax.f32 %v1911_v34, 0.0 }
 0x2a0   : > { %v1724_v18 = vadd.f32 %v1723_v21, %v12545_v52  ;;  %v1917_v40 = vadd.f32 %v1916_v43, %v12548_v41  ;;  %4204 = vmatpush1.bf16.msra.mxu0 %v10161_v36  ;;  %4396 = vmatprep.subr.bf16.mxu1 %v10290_v12  ;;  %v2067_v30 = vmax.f32 %v1722_v53, 0.0  ;;  %v2069_v36 = vmax.f32 %v1915_v33, 0.0  ;;  %v12823_v3 = vld [vmem:[%s18106_s7 + $0x28] sm:$0xff] }
 0x2a1   : > { %v1727_v12 = vpop.f32.mrf.mxu0  ;;  %v1920_v59 = vpop.f32.mrf.mxu1  ;;  %4397 = vmatpush1.bf16.msra.mxu1 %v10289_v11  ;;  %4205 = vmatprep.subr.bf16.mxu0 %v10154_v61  ;;  %v12828_v46 = vld [vmem:[%s18106_s7 + $0x408] sm:$0xff]  ;;  %v2064_v61 = vmax.f32 %v1720_v16, 0.0  ;;  %v10273_v27 = vcombine.low %v12806_v39, %v2372_v5  ;;  %v10274_v23 = vcombine.high %v12806_v39, %v2372_v5  ;;  %v10138_v16 = vcombine.high %v12814_v24, %v12823_v3 }
 0x2a2   : > { %v12833_v11 = vld [vmem:[%s18106_s7 + $0x428] sm:$0xff]  ;;  %v2068_v53 = vmax.f32 %v1724_v18, 0.0  ;;  %v2070_v33 = vmax.f32 %v1917_v40, 0.0  ;;  %4398 = vmatprep.subr.bf16.mxu1 %v10282_v7  ;;  %v12845_v7 = vpack.c.bf16 %v2067_v30, %v2063_v51  ;;  %v12847_v28 = vpack.c.bf16 %v2069_v36, %v2065_v0 }
 0x2a3   : > { %v1729_v21 = vpop.f32.mrf.mxu0  ;;  %v1922_v43 = vpop.f32.mrf.mxu1  ;;  %v10266_v10 = vcombine.high %v12828_v46, %v12833_v11  ;;  %v12858_v30 = vld [vmem:[%s18106_s7 + $0x3c8] sm:$0xff]  ;;  %v1728_v36 = vadd.f32 %v1727_v12, %v12551_v25  ;;  %v10265_v12 = vcombine.low %v12828_v46, %v12833_v11 }
 0x2a4   : > { %v12837_v37 = vpack.c.bf16 %v2068_v53, %v2064_v61  ;;  %v12839_v31 = vpack.c.bf16 %v2070_v33, %v2066_v63  ;;  %4206 = vmatpush1.bf16.msra.mxu0 %v10153_v57  ;;  %v1730_v34 = vadd.f32 %v1729_v21, %v12545_v52  ;;  %v1923_v39 = vadd.f32 %v1922_v43, %v12548_v41  ;;  %v2484_v0 = vld [vmem:[%s18106_s7 + $0x7e8] sm:$0xff] }
 0x2a5   : > { %v1731_v18 = vpop.f32.mrf.mxu0  ;;  %v1924_v40 = vpop.f32.mrf.mxu1  ;;  %4399 = vmatpush1.bf16.msra.mxu1 %v10281_v20  ;;  %4207 = vmatprep.subr.bf16.mxu0 %v10146_v13  ;;  %v12863_v20 = vld [vmem:[%s18106_s7 + $0x3e8] sm:$0xff]  ;;  %v1921_v13 = vadd.f32 %v1920_v59, %v12554_v26  ;;  %v10137_v53 = vcombine.low %v12814_v24, %v12823_v3 }
 0x2a6   : > { %v1732_v57 = vadd.f32 %v1731_v18, %v12551_v25  ;;  %v1925_v5 = vadd.f32 %v1924_v40, %v12554_v26  ;;  %3871 = vmatprep.mubr.bf16.mxu0 %v12837_v37  ;;  %4064 = vmatprep.mubr.bf16.mxu1 %v12839_v31  ;;  %v12878_v59 = vld [vmem:[%s18106_s7 + $0x7c8] sm:$0xff]  ;;  %v10257_v46 = vcombine.low %v12858_v30, %v12863_v20  ;;  %v2074_v40 = vmax.f32 %v1923_v39, 0.0 }
 0x2a7   : > { %v1733_v61 = vpop.f32.mrf.mxu0  ;;  %v1926_v63 = vpop.f32.mrf.mxu1  ;;  %3872 = vmatmul.mubr.bf16.gmra.mxu0 %v12845_v7  ;;  %4065 = vmatmul.mubr.bf16.gmra.mxu1 %v12847_v28  ;;  %v12886_v24 = vld [vmem:[%s18106_s7 + $0x388] sm:$0xff]  ;;  %v10258_v11 = vcombine.high %v12858_v30, %v12863_v20  ;;  %v2071_v30 = vmax.f32 %v1728_v36, 0.0  ;;  %v2073_v20 = vmax.f32 %v1921_v13, 0.0  ;;  %v10385_v50 = vcombine.low %v12878_v59, %v2484_v0 }
 0x2a8   : > { %v1734_v33 = vadd.f32 %v1733_v61, %v12545_v52  ;;  %v1927_v51 = vadd.f32 %v1926_v63, %v12548_v41  ;;  %4208 = vmatpush1.bf16.msra.mxu0 %v10145_v32  ;;  %4400 = vmatprep.subr.bf16.mxu1 %v10274_v23  ;;  %v2075_v3 = vmax.f32 %v1732_v57, 0.0  ;;  %v2077_v32 = vmax.f32 %v1925_v5, 0.0  ;;  %v12895_v43 = vld [vmem:[%s18106_s7 + $0x3a8] sm:$0xff] }
 0x2a9   : > { %v1737_v23 = vpop.f32.mrf.mxu0  ;;  %v1930_v21 = vpop.f32.mrf.mxu1  ;;  %4401 = vmatpush1.bf16.msra.mxu1 %v10273_v27  ;;  %4209 = vmatprep.subr.bf16.mxu0 %v10138_v16  ;;  %v12900_v18 = vld [vmem:[%s18106_s7 + $0x788] sm:$0xff]  ;;  %v2072_v16 = vmax.f32 %v1730_v34, 0.0  ;;  %v10386_v44 = vcombine.high %v12878_v59, %v2484_v0  ;;  %v10250_v34 = vcombine.high %v12886_v24, %v12895_v43 }
 0x2aa   : > { %v12905_v27 = vld [vmem:[%s18106_s7 + $0x7a8] sm:$0xff]  ;;  %v2076_v57 = vmax.f32 %v1734_v33, 0.0  ;;  %v2078_v5 = vmax.f32 %v1927_v51, 0.0  ;;  %4402 = vmatprep.subr.bf16.mxu1 %v10266_v10  ;;  %v12917_v10 = vpack.c.bf16 %v2075_v3, %v2071_v30  ;;  %v12919_v36 = vpack.c.bf16 %v2077_v32, %v2073_v20 }
 0x2ab   : > { %v1739_v61 = vpop.f32.mrf.mxu0  ;;  %v1932_v63 = vpop.f32.mrf.mxu1  ;;  %v10378_v39 = vcombine.high %v12900_v18, %v12905_v27  ;;  %v12930_v3 = vld [vmem:[%s18106_s7 + $0x348] sm:$0xff]  ;;  %v1738_v32 = vadd.f32 %v1737_v23, %v12551_v25  ;;  %v10377_v23 = vcombine.low %v12900_v18, %v12905_v27 }
 0x2ac   : > { %v12909_v1 = vpack.c.bf16 %v2076_v57, %v2072_v16  ;;  %v12911_v62 = vpack.c.bf16 %v2078_v5, %v2074_v40  ;;  %4210 = vmatpush1.bf16.msra.mxu0 %v10137_v53  ;;  %v1740_v13 = vadd.f32 %v1739_v61, %v12545_v52  ;;  %v1933_v59 = vadd.f32 %v1932_v63, %v12548_v41  ;;  %v2468_v20 = vld [vmem:[%s18106_s7 + $0x768] sm:$0xff] }
 0x2ad   : > { %v1741_v33 = vpop.f32.mrf.mxu0  ;;  %v1934_v51 = vpop.f32.mrf.mxu1  ;;  %4403 = vmatpush1.bf16.msra.mxu1 %v10265_v12  ;;  %4211 = vmatprep.subr.bf16.mxu0 %v10258_v11  ;;  %v12935_v12 = vld [vmem:[%s18106_s7 + $0x368] sm:$0xff]  ;;  %v1931_v11 = vadd.f32 %v1930_v21, %v12554_v26  ;;  %v10249_v57 = vcombine.low %v12886_v24, %v12895_v43 }
 0x2ae   : > { %v1742_v53 = vadd.f32 %v1741_v33, %v12551_v25  ;;  %v1935_v0 = vadd.f32 %v1934_v51, %v12554_v26  ;;  %3881 = vmatprep.mubr.bf16.mxu0 %v12909_v1  ;;  %4074 = vmatprep.mubr.bf16.mxu1 %v12911_v62  ;;  %v12950_v21 = vld [vmem:[%s18106_s7 + $0x748] sm:$0xff]  ;;  %v10241_v18 = vcombine.low %v12930_v3, %v12935_v12  ;;  %v2082_v51 = vmax.f32 %v1933_v59, 0.0 }
 0x2af   : > { %v1743_v16 = vpop.f32.mrf.mxu0  ;;  %v1936_v40 = vpop.f32.mrf.mxu1  ;;  %3882 = vmatmul.mubr.bf16.gmra.mxu0 %v12917_v10  ;;  %4075 = vmatmul.mubr.bf16.gmra.mxu1 %v12919_v36  ;;  %v12958_v24 = vld [vmem:[%s18106_s7 + $0x308] sm:$0xff]  ;;  %v10242_v27 = vcombine.high %v12930_v3, %v12935_v12  ;;  %v2079_v3 = vmax.f32 %v1738_v32, 0.0  ;;  %v2081_v12 = vmax.f32 %v1931_v11, 0.0  ;;  %v10369_v17 = vcombine.low %v12950_v21, %v2468_v20 }
 0x2b0   : > { %v1744_v5 = vadd.f32 %v1743_v16, %v12545_v52  ;;  %v1937_v30 = vadd.f32 %v1936_v40, %v12548_v41  ;;  %4212 = vmatpush2.bf16.msra.mxu0 %v10257_v46  ;;  %4404 = vmatprep.subr.bf16.mxu1 %v10386_v44  ;;  %v2083_v43 = vmax.f32 %v1742_v53, 0.0  ;;  %v2085_v46 = vmax.f32 %v1935_v0, 0.0  ;;  %v12967_v63 = vld [vmem:[%s18106_s7 + $0x328] sm:$0xff] }
 0x2b1   : > { %v1747_v44 = vpop.f32.mrf.mxu0  ;;  %v1940_v61 = vpop.f32.mrf.mxu1  ;;  %4405 = vmatpush2.bf16.msra.mxu1 %v10385_v50  ;;  %4213 = vmatprep.subr.bf16.mxu0 %v10250_v34  ;;  %v12972_v33 = vld [vmem:[%s18106_s7 + $0x708] sm:$0xff]  ;;  %v2080_v34 = vmax.f32 %v1740_v13, 0.0  ;;  %v10370_v14 = vcombine.high %v12950_v21, %v2468_v20  ;;  %v10234_v13 = vcombine.high %v12958_v24, %v12967_v63 }
 0x2b2   : > { %v12977_v50 = vld [vmem:[%s18106_s7 + $0x728] sm:$0xff]  ;;  %v2084_v53 = vmax.f32 %v1744_v5, 0.0  ;;  %v2086_v0 = vmax.f32 %v1937_v30, 0.0  ;;  %4406 = vmatprep.subr.bf16.mxu1 %v10378_v39  ;;  %v12989_v39 = vpack.c.bf16 %v2083_v43, %v2079_v3  ;;  %v12991_v32 = vpack.c.bf16 %v2085_v46, %v2081_v12 }
 0x2b3   : > { %v1749_v16 = vpop.f32.mrf.mxu0  ;;  %v1942_v40 = vpop.f32.mrf.mxu1  ;;  %v10362_v59 = vcombine.high %v12972_v33, %v12977_v50  ;;  %v13002_v43 = vld [vmem:[%s18106_s7 + $0x2c8] sm:$0xff]  ;;  %v1748_v46 = vadd.f32 %v1747_v44, %v12551_v25  ;;  %v10361_v44 = vcombine.low %v12972_v33, %v12977_v50 }
 0x2b4   : > { %v12981_v47 = vpack.c.bf16 %v2084_v53, %v2080_v34  ;;  %v12983_v56 = vpack.c.bf16 %v2086_v0, %v2082_v51  ;;  %4214 = vmatpush2.bf16.msra.mxu0 %v10249_v57  ;;  %18382 = vst [vmem:[#allocation69_spill] sm:$0xff] %v12989_v39  ;;  %18383 = vst [vmem:[#allocation70_spill] sm:$0xff] %v12991_v32  ;;  %v1750_v11 = vadd.f32 %v1749_v16, %v12545_v52  ;;  %v2452_v12 = vld [vmem:[%s18106_s7 + $0x6e8] sm:$0xff] }
 0x2b5   : > { %v1751_v5 = vpop.f32.mrf.mxu0  ;;  %v1944_v30 = vpop.f32.mrf.mxu1  ;;  %4407 = vmatpush2.bf16.msra.mxu1 %v10377_v23  ;;  %4215 = vmatprep.subr.bf16.mxu0 %v10242_v27  ;;  %v1943_v21 = vadd.f32 %v1942_v40, %v12548_v41  ;;  %v13007_v23 = vld [vmem:[%s18106_s7 + $0x2e8] sm:$0xff]  ;;  %v1941_v27 = vadd.f32 %v1940_v61, %v12554_v26  ;;  %v10233_v53 = vcombine.low %v12958_v24, %v12967_v63 }
 0x2b6   : > { %18381 = vst [vmem:[#allocation68_spill] sm:$0xff] %v12983_v56  ;;  %v1752_v57 = vadd.f32 %v1751_v5, %v12551_v25  ;;  %v1945_v20 = vadd.f32 %v1944_v30, %v12554_v26  ;;  %3891 = vmatprep.mubr.bf16.mxu0 %v12981_v47  ;;  %4084 = vmatprep.mubr.bf16.mxu1 %v12983_v56  ;;  %v13022_v61 = vld [vmem:[%s18106_s7 + $0x6c8] sm:$0xff] }
 0x2b7   : > { %v1753_v34 = vpop.f32.mrf.mxu0  ;;  %v1946_v51 = vpop.f32.mrf.mxu1  ;;  %3892 = vmatmul.mubr.bf16.gmra.mxu0 %v12989_v39  ;;  %4085 = vmatmul.mubr.bf16.gmra.mxu1 %v12991_v32  ;;  %v13030_v24 = vld [vmem:[%s18106_s7 + $0x288] sm:$0xff]  ;;  %v10225_v33 = vcombine.low %v13002_v43, %v13007_v23  ;;  %v10226_v50 = vcombine.high %v13002_v43, %v13007_v23  ;;  %v2090_v30 = vmax.f32 %v1943_v21, 0.0  ;;  %v2087_v43 = vmax.f32 %v1748_v46, 0.0 }
 0x2b8   : > { %v1754_v0 = vadd.f32 %v1753_v34, %v12545_v52  ;;  %v1947_v3 = vadd.f32 %v1946_v51, %v12548_v41  ;;  %4216 = vmatpush2.bf16.msra.mxu0 %v10241_v18  ;;  %4408 = vmatprep.subr.bf16.mxu1 %v10370_v14  ;;  %v2091_v63 = vmax.f32 %v1752_v57, 0.0  ;;  %v2093_v18 = vmax.f32 %v1945_v20, 0.0  ;;  %v13039_v40 = vld [vmem:[%s18106_s7 + $0x2a8] sm:$0xff] }
 0x2b9   : > { %v1757_v14 = vpop.f32.mrf.mxu0  ;;  %v1950_v16 = vpop.f32.mrf.mxu1  ;;  %4409 = vmatpush2.bf16.msra.mxu1 %v10369_v17  ;;  %4217 = vmatprep.subr.bf16.mxu0 %v10234_v13  ;;  %v13044_v5 = vld [vmem:[%s18106_s7 + $0x688] sm:$0xff]  ;;  %v2088_v13 = vmax.f32 %v1750_v11, 0.0  ;;  %v2089_v23 = vmax.f32 %v1941_v27, 0.0  ;;  %v10353_v9 = vcombine.low %v13022_v61, %v2452_v12  ;;  %v10354_v48 = vcombine.high %v13022_v61, %v2452_v12 }
 0x2ba   : > { %v13049_v17 = vld [vmem:[%s18106_s7 + $0x6a8] sm:$0xff]  ;;  %v2092_v57 = vmax.f32 %v1754_v0, 0.0  ;;  %v2094_v20 = vmax.f32 %v1947_v3, 0.0  ;;  %4410 = vmatprep.subr.bf16.mxu1 %v10362_v59  ;;  %v10218_v11 = vcombine.high %v13030_v24, %v13039_v40  ;;  %v13061_v59 = vpack.c.bf16 %v2091_v63, %v2087_v43 }
 0x2bb   : > { %v1759_v34 = vpop.f32.mrf.mxu0  ;;  %v1952_v51 = vpop.f32.mrf.mxu1  ;;  %v10346_v21 = vcombine.high %v13044_v5, %v13049_v17  ;;  %v13063_v46 = vpack.c.bf16 %v2093_v18, %v2089_v23  ;;  %v13074_v63 = vld [vmem:[%s18106_s7 + $0x248] sm:$0xff]  ;;  %v1758_v18 = vadd.f32 %v1757_v14, %v12551_v25  ;;  %v10345_v14 = vcombine.low %v13044_v5, %v13049_v17 }
 0x2bc   : > { %v13053_v49 = vpack.c.bf16 %v2092_v57, %v2088_v13  ;;  %v13055_v32 = vpack.c.bf16 %v2094_v20, %v2090_v30  ;;  %4218 = vmatpush2.bf16.msra.mxu0 %v10233_v53  ;;  %18386 = vst [vmem:[#allocation73_spill] sm:$0xff] %v13061_v59  ;;  %v1760_v27 = vadd.f32 %v1759_v34, %v12545_v52  ;;  %v2436_v23 = vld [vmem:[%s18106_s7 + $0x668] sm:$0xff] }
 0x2bd   : > { %18387 = vst [vmem:[#allocation74_spill] sm:$0xff] %v13063_v46  ;;  %v1761_v0 = vpop.f32.mrf.mxu0  ;;  %v1954_v3 = vpop.f32.mrf.mxu1  ;;  %4411 = vmatpush2.bf16.msra.mxu1 %v10361_v44  ;;  %4219 = vmatprep.subr.bf16.mxu0 %v10226_v50  ;;  %v1953_v61 = vadd.f32 %v1952_v51, %v12548_v41  ;;  %v13079_v44 = vld [vmem:[%s18106_s7 + $0x268] sm:$0xff]  ;;  %v1951_v50 = vadd.f32 %v1950_v16, %v12554_v26 }
 0x2be   : > { %18384 = vst [vmem:[#allocation71_spill] sm:$0xff] %v13053_v49  ;;  %18385 = vst [vmem:[#allocation72_spill] sm:$0xff] %v13055_v32  ;;  %v1762_v53 = vadd.f32 %v1761_v0, %v12551_v25  ;;  %v1955_v12 = vadd.f32 %v1954_v3, %v12554_v26  ;;  %3901 = vmatprep.mubr.bf16.mxu0 %v13053_v49  ;;  %4094 = vmatprep.mubr.bf16.mxu1 %v13055_v32  ;;  %v2432_v16 = vld [vmem:[%s18106_s7 + $0x648] sm:$0xff] }
 0x2bf   : > { %v1763_v13 = vpop.f32.mrf.mxu0  ;;  %v1956_v30 = vpop.f32.mrf.mxu1  ;;  %3902 = vmatmul.mubr.bf16.gmra.mxu0 %v13061_v59  ;;  %4095 = vmatmul.mubr.bf16.gmra.mxu1 %v13063_v46  ;;  %v10217_v57 = vcombine.low %v13030_v24, %v13039_v40  ;;  %v13100_v24 = vld [vmem:[%s18106_s7 + $0x208] sm:$0xff]  ;;  %v10209_v5 = vcombine.low %v13074_v63, %v13079_v44  ;;  %v10210_v17 = vcombine.high %v13074_v63, %v13079_v44  ;;  %v2098_v3 = vmax.f32 %v1953_v61, 0.0 }
 0x2c0   : > { %v1764_v20 = vadd.f32 %v1763_v13, %v12545_v52  ;;  %v1957_v43 = vadd.f32 %v1956_v30, %v12548_v41  ;;  %4220 = vmatpush2.bf16.msra.mxu0 %v10225_v33  ;;  %4412 = vmatprep.subr.bf16.mxu1 %v10354_v48  ;;  %v2099_v40 = vmax.f32 %v1762_v53, 0.0  ;;  %v2101_v34 = vmax.f32 %v1955_v12, 0.0  ;;  %v2300_v51 = vld [vmem:[%s18106_s7 + $0x228] sm:$0xff] }
 0x2c1   : > { %v1767_v33 = vpop.f32.mrf.mxu0  ;;  %v1960_v48 = vpop.f32.mrf.mxu1  ;;  %4413 = vmatpush2.bf16.msra.mxu1 %v10353_v9  ;;  %4221 = vmatprep.subr.bf16.mxu0 %v10218_v11  ;;  %v13112_v0 = vld [vmem:[%s18106_s7 + $0x608] sm:$0xff]  ;;  %v2096_v11 = vmax.f32 %v1760_v27, 0.0  ;;  %v2095_v63 = vmax.f32 %v1758_v18, 0.0  ;;  %v2097_v44 = vmax.f32 %v1951_v50, 0.0  ;;  %v10337_v46 = vcombine.low %v2432_v16, %v2436_v23 }
 0x2c2   : > { %v13117_v9 = vld [vmem:[%s18106_s7 + $0x628] sm:$0xff]  ;;  %v2100_v53 = vmax.f32 %v1764_v20, 0.0  ;;  %v2102_v12 = vmax.f32 %v1957_v43, 0.0  ;;  %4414 = vmatprep.subr.bf16.mxu1 %v10346_v21  ;;  %v10338_v59 = vcombine.high %v2432_v16, %v2436_v23  ;;  %v10202_v39 = vcombine.high %v13100_v24, %v2300_v51 }
 0x2c3   : > { %v1769_v13 = vpop.f32.mrf.mxu0  ;;  %v1962_v30 = vpop.f32.mrf.mxu1  ;;  %v10330_v27 = vcombine.high %v13112_v0, %v13117_v9  ;;  %v13126_v61 = vpack.c.bf16 %v2099_v40, %v2095_v63  ;;  %v13128_v20 = vpack.c.bf16 %v2101_v34, %v2097_v44  ;;  %v1768_v23 = vadd.f32 %v1767_v33, %v12551_v25 }
 0x2c4   : > { %v13119_v32 = vpack.c.bf16 %v2100_v53, %v2096_v11  ;;  %v13121_v49 = vpack.c.bf16 %v2102_v12, %v2098_v3  ;;  %4222 = vmatpush2.bf16.msra.mxu0 %v10217_v57  ;;  %v1770_v21 = vadd.f32 %v1769_v13, %v12545_v52  ;;  %v1963_v43 = vadd.f32 %v1962_v30, %v12548_v41 }
 0x2c5   : > { %18390 = vst [vmem:[#allocation77_spill] sm:$0xff] %v13126_v61  ;;  %18391 = vst [vmem:[#allocation78_spill] sm:$0xff] %v13128_v20  ;;  %v1771_v18 = vpop.f32.mrf.mxu0  ;;  %v1964_v50 = vpop.f32.mrf.mxu1  ;;  %4415 = vmatpush2.bf16.msra.mxu1 %v10345_v14  ;;  %4223 = vmatprep.subr.bf16.mxu0 %v10210_v17  ;;  %v1961_v40 = vadd.f32 %v1960_v48, %v12554_v26  ;;  %v10201_v3 = vcombine.low %v13100_v24, %v2300_v51 }
 0x2c6   : > { %18388 = vst [vmem:[#allocation75_spill] sm:$0xff] %v13119_v32  ;;  %18389 = vst [vmem:[#allocation76_spill] sm:$0xff] %v13121_v49  ;;  %v1772_v16 = vadd.f32 %v1771_v18, %v12551_v25  ;;  %v1965_v57 = vadd.f32 %v1964_v50, %v12554_v26  ;;  %3911 = vmatprep.mubr.bf16.mxu0 %v13119_v32  ;;  %4104 = vmatprep.mubr.bf16.mxu1 %v13121_v49  ;;  %v2104_v13 = vmax.f32 %v1770_v21, 0.0 }
 0x2c7   : > { %v1773_v34 = vpop.f32.mrf.mxu0  ;;  %v1966_v11 = vpop.f32.mrf.mxu1  ;;  %3912 = vmatmul.mubr.bf16.gmra.mxu0 %v13126_v61  ;;  %4105 = vmatmul.mubr.bf16.gmra.mxu1 %v13128_v20  ;;  %v10329_v48 = vcombine.low %v13112_v0, %v13117_v9  ;;  %v10196_v44 = vcombine.high %v12635_v2, %v12640_v8  ;;  %v2106_v30 = vmax.f32 %v1963_v43, 0.0 }
 0x2c8   : > { %v1774_v14 = vadd.f32 %v1773_v34, %v12545_v52  ;;  %v1967_v17 = vadd.f32 %v1966_v11, %v12548_v41  ;;  %4224 = vmatpush2.bf16.msra.mxu0 %v10209_v5  ;;  %4416 = vmatprep.subr.bf16.mxu1 %v10338_v59  ;;  %v2107_v53 = vmax.f32 %v1772_v16, 0.0  ;;  %v2109_v12 = vmax.f32 %v1965_v57, 0.0 }
 0x2c9   : > { %v1777_v63 = vpop.f32.mrf.mxu0  ;;  %v1970_v33 = vpop.f32.mrf.mxu1  ;;  %4417 = vmatpush2.bf16.msra.mxu1 %v10337_v46  ;;  %4225 = vmatprep.subr.bf16.mxu0 %v10202_v39  ;;  %v2103_v59 = vmax.f32 %v1768_v23, 0.0  ;;  %v2105_v5 = vmax.f32 %v1961_v40, 0.0  ;;  %v10324_v39 = vcombine.high %v12679_v45, %v12684_v58 }
 0x2ca   : > { %v2108_v18 = vmax.f32 %v1774_v14, 0.0  ;;  %v2110_v50 = vmax.f32 %v1967_v17, 0.0  ;;  %4418 = vmatprep.subr.bf16.mxu1 %v10330_v27  ;;  %v1778_v34 = vadd.f32 %v1777_v63, %v12551_v25  ;;  %v1971_v11 = vadd.f32 %v1970_v33, %v12554_v26 }
 0x2cb   : > { %v1779_v24 = vpop.f32.mrf.mxu0  ;;  %v1972_v51 = vpop.f32.mrf.mxu1  ;;  %v13153_v46 = vpack.c.bf16 %v2107_v53, %v2103_v59  ;;  %v13155_v0 = vpack.c.bf16 %v2109_v12, %v2105_v5 }
 0x2cc   : > { %v13147_v16 = vpack.c.bf16 %v2108_v18, %v2104_v13  ;;  %v13149_v57 = vpack.c.bf16 %v2110_v50, %v2106_v30  ;;  %4226 = vmatpush2.bf16.msra.mxu0 %v10201_v3  ;;  %v1780_v9 = vadd.f32 %v1779_v24, %v12545_v52  ;;  %v1973_v43 = vadd.f32 %v1972_v51, %v12548_v41 }
 0x2cd   : > { %18394 = vst [vmem:[#allocation81_spill] sm:$0xff] %v13153_v46  ;;  %18395 = vst [vmem:[#allocation82_spill] sm:$0xff] %v13155_v0  ;;  %v1781_v21 = vpop.f32.mrf.mxu0  ;;  %v1974_v27 = vpop.f32.mrf.mxu1  ;;  %4419 = vmatpush2.bf16.msra.mxu1 %v10329_v48  ;;  %4581 = vmatprep.subr.bf16.mxu0 %v10196_v44  ;;  %v2111_v33 = vmax.f32 %v1778_v34, 0.0  ;;  %v2113_v59 = vmax.f32 %v1971_v11, 0.0 }
 0x2ce   : > { %18392 = vst [vmem:[#allocation79_spill] sm:$0xff] %v13147_v16  ;;  %18393 = vst [vmem:[#allocation80_spill] sm:$0xff] %v13149_v57  ;;  %v1782_v23 = vadd.f32 %v1781_v21, %v12551_v25  ;;  %v1975_v40 = vadd.f32 %v1974_v27, %v12554_v26  ;;  %3921 = vmatprep.mubr.bf16.mxu0 %v13147_v16  ;;  %4114 = vmatprep.mubr.bf16.mxu1 %v13149_v57  ;;  %v2112_v30 = vmax.f32 %v1780_v9, 0.0 }
 0x2cf   : > { %v1783_v14 = vpop.f32.mrf.mxu0  ;;  %v1976_v17 = vpop.f32.mrf.mxu1  ;;  %3922 = vmatmul.mubr.bf16.gmra.mxu0 %v13153_v46  ;;  %4115 = vmatmul.mubr.bf16.gmra.mxu1 %v13155_v0  ;;  %v2114_v18 = vmax.f32 %v1973_v43, 0.0 }
 0x2d0   : > { %v1784_v3 = vadd.f32 %v1783_v14, %v12545_v52  ;;  %v1977_v53 = vadd.f32 %v1976_v17, %v12548_v41  ;;  %4774 = vmatprep.subr.bf16.mxu1 %v10324_v39  ;;  %v2115_v12 = vmax.f32 %v1782_v23, 0.0  ;;  %v2117_v48 = vmax.f32 %v1975_v40, 0.0 }
 0x2d1   : > { %v1787_v44 = vpop.f32.mrf.mxu0  ;;  %v1980_v13 = vpop.f32.mrf.mxu1 }
 0x2d2   : > { %v2116_v63 = vmax.f32 %v1784_v3, 0.0  ;;  %v2118_v50 = vmax.f32 %v1977_v53, 0.0  ;;  %v13173_v27 = vpack.c.bf16 %v2115_v12, %v2111_v33  ;;  %v13175_v14 = vpack.c.bf16 %v2117_v48, %v2113_v59 }
 0x2d3   : > { %v1789_v5 = vpop.f32.mrf.mxu0  ;;  %v1982_v24 = vpop.f32.mrf.mxu1  ;;  %v1788_v11 = vadd.f32 %v1787_v44, %v12551_v25  ;;  %v1981_v17 = vadd.f32 %v1980_v13, %v12554_v26 }
 0x2d4   : > { %v13169_v51 = vpack.c.bf16 %v2116_v63, %v2112_v30  ;;  %v13171_v21 = vpack.c.bf16 %v2118_v50, %v2114_v18  ;;  %18398 = vst [vmem:[#allocation85_spill] sm:$0xff] %v13173_v27  ;;  %18399 = vst [vmem:[#allocation86_spill] sm:$0xff] %v13175_v14  ;;  %v1790_v39 = vadd.f32 %v1789_v5, %v12545_v52 }
 0x2d5   : > { %v1791_v23 = vpop.f32.mrf.mxu0  ;;  %v1984_v40 = vpop.f32.mrf.mxu1  ;;  %v1983_v9 = vadd.f32 %v1982_v24, %v12548_v41  ;;  %v2119_v24 = vmax.f32 %v1788_v11, 0.0  ;;  %v2121_v13 = vmax.f32 %v1981_v17, 0.0 }
 0x2d6   : > { %18396 = vst [vmem:[#allocation83_spill] sm:$0xff] %v13169_v51  ;;  %18397 = vst [vmem:[#allocation84_spill] sm:$0xff] %v13171_v21  ;;  %v1792_v43 = vadd.f32 %v1791_v23, %v12551_v25  ;;  %v1985_v34 = vadd.f32 %v1984_v40, %v12554_v26  ;;  %3931 = vmatprep.mubr.bf16.mxu0 %v13169_v51  ;;  %4124 = vmatprep.mubr.bf16.mxu1 %v13171_v21  ;;  %v2120_v33 = vmax.f32 %v1790_v39, 0.0 }
 0x2d7   : > { %v1793_v3 = vpop.f32.mrf.mxu0  ;;  %v1986_v53 = vpop.f32.mrf.mxu1  ;;  %3932 = vmatmul.mubr.bf16.gmra.mxu0 %v13173_v27  ;;  %4125 = vmatmul.mubr.bf16.gmra.mxu1 %v13175_v14  ;;  %v2122_v59 = vmax.f32 %v1983_v9, 0.0 }
 0x2d8   : > { %v1794_v12 = vadd.f32 %v1793_v3, %v12545_v52  ;;  %v1987_v48 = vadd.f32 %v1986_v53, %v12548_v41  ;;  %v2123_v30 = vmax.f32 %v1792_v43, 0.0  ;;  %v2125_v18 = vmax.f32 %v1985_v34, 0.0 }
 0x2d9   : > { %v1797_v63 = vpop.f32.mrf.mxu0  ;;  %v1990_v50 = vpop.f32.mrf.mxu1 }
 0x2da   : > { %v2124_v5 = vmax.f32 %v1794_v12, 0.0  ;;  %v2126_v44 = vmax.f32 %v1987_v48, 0.0  ;;  %v13193_v14 = vpack.c.bf16 %v2123_v30, %v2119_v24  ;;  %v13195_v3 = vpack.c.bf16 %v2125_v18, %v2121_v13 }
 0x2db   : > { %v1799_v23 = vpop.f32.mrf.mxu0  ;;  %v1992_v40 = vpop.f32.mrf.mxu1  ;;  %v1798_v17 = vadd.f32 %v1797_v63, %v12551_v25  ;;  %v1991_v12 = vadd.f32 %v1990_v50, %v12554_v26 }
 0x2dc   : > { %v13189_v21 = vpack.c.bf16 %v2124_v5, %v2120_v33  ;;  %v13191_v27 = vpack.c.bf16 %v2126_v44, %v2122_v59  ;;  %18402 = vst [vmem:[#allocation89_spill] sm:$0xff] %v13193_v14  ;;  %18403 = vst [vmem:[#allocation90_spill] sm:$0xff] %v13195_v3  ;;  %v1800_v43 = vadd.f32 %v1799_v23, %v12545_v52 }
 0x2dd   : > { %v1801_v34 = vpop.f32.mrf.mxu0  ;;  %v1994_v53 = vpop.f32.mrf.mxu1  ;;  %v1993_v39 = vadd.f32 %v1992_v40, %v12548_v41  ;;  %v2129_v50 = vmax.f32 %v1991_v12, 0.0 }
 0x2de   : > { %18400 = vst [vmem:[#allocation87_spill] sm:$0xff] %v13189_v21  ;;  %18401 = vst [vmem:[#allocation88_spill] sm:$0xff] %v13191_v27  ;;  %v1802_v9 = vadd.f32 %v1801_v34, %v12551_v25  ;;  %v1995_v11 = vadd.f32 %v1994_v53, %v12554_v26  ;;  %3941 = vmatprep.mubr.bf16.mxu0 %v13189_v21  ;;  %4134 = vmatprep.mubr.bf16.mxu1 %v13191_v27  ;;  %v2128_v13 = vmax.f32 %v1800_v43, 0.0 }
 0x2df   : > { %v1803_v48 = vpop.f32.mrf.mxu0  ;;  %v1996_v30 = vpop.f32.mrf.mxu1  ;;  %3942 = vmatmul.mubr.bf16.gmra.mxu0 %v13193_v14  ;;  %4135 = vmatmul.mubr.bf16.gmra.mxu1 %v13195_v3  ;;  %v2130_v23 = vmax.f32 %v1993_v39, 0.0  ;;  %v2127_v34 = vmax.f32 %v1798_v17, 0.0 }
 0x2e0   : > { %v1804_v18 = vadd.f32 %v1803_v48, %v12545_v52  ;;  %v1997_v33 = vadd.f32 %v1996_v30, %v12548_v41  ;;  %v2131_v59 = vmax.f32 %v1802_v9, 0.0  ;;  %v2133_v5 = vmax.f32 %v1995_v11, 0.0 }
 0x2e1   : > { %v1807_v44 = vpop.f32.mrf.mxu0  ;;  %v2000_v24 = vpop.f32.mrf.mxu1 }
 0x2e2   : > { %v2132_v40 = vmax.f32 %v1804_v18, 0.0  ;;  %v2134_v63 = vmax.f32 %v1997_v33, 0.0  ;;  %v13213_v3 = vpack.c.bf16 %v2131_v59, %v2127_v34  ;;  %v13215_v48 = vpack.c.bf16 %v2133_v5, %v2129_v50 }
 0x2e3   : > { %v1809_v53 = vpop.f32.mrf.mxu0  ;;  %v2002_v27 = vpop.f32.mrf.mxu1  ;;  %v1808_v12 = vadd.f32 %v1807_v44, %v12551_v25  ;;  %v2001_v18 = vadd.f32 %v2000_v24, %v12554_v26 }
 0x2e4   : > { %v13209_v21 = vpack.c.bf16 %v2132_v40, %v2128_v13  ;;  %v13211_v14 = vpack.c.bf16 %v2134_v63, %v2130_v23  ;;  %18406 = vst [vmem:[#allocation93_spill] sm:$0xff] %v13213_v3  ;;  %18407 = vst [vmem:[#allocation94_spill] sm:$0xff] %v13215_v48  ;;  %v1810_v9 = vadd.f32 %v1809_v53, %v12545_v52 }
 0x2e5   : > { %v1811_v11 = vpop.f32.mrf.mxu0  ;;  %v2004_v30 = vpop.f32.mrf.mxu1  ;;  %v2003_v43 = vadd.f32 %v2002_v27, %v12548_v41  ;;  %v2137_v24 = vmax.f32 %v2001_v18, 0.0 }
 0x2e6   : > { %18404 = vst [vmem:[#allocation91_spill] sm:$0xff] %v13209_v21  ;;  %18405 = vst [vmem:[#allocation92_spill] sm:$0xff] %v13211_v14  ;;  %v1812_v39 = vadd.f32 %v1811_v11, %v12551_v25  ;;  %v2005_v17 = vadd.f32 %v2004_v30, %v12554_v26  ;;  %3951 = vmatprep.mubr.bf16.mxu0 %v13209_v21  ;;  %4144 = vmatprep.mubr.bf16.mxu1 %v13211_v14  ;;  %v2136_v34 = vmax.f32 %v1810_v9, 0.0 }
 0x2e7   : > { %v1813_v33 = vpop.f32.mrf.mxu0  ;;  %v2006_v59 = vpop.f32.mrf.mxu1  ;;  %3952 = vmatmul.mubr.bf16.gmra.mxu0 %v13213_v3  ;;  %4145 = vmatmul.mubr.bf16.gmra.mxu1 %v13215_v48  ;;  %v2138_v50 = vmax.f32 %v2003_v43, 0.0  ;;  %v2135_v11 = vmax.f32 %v1808_v12, 0.0 }
 0x2e8   : > { %v1814_v27 = vadd.f32 %v1813_v33, %v12545_v52  ;;  %v2007_v5 = vadd.f32 %v2006_v59, %v12548_v41  ;;  %v2139_v13 = vmax.f32 %v1812_v39, 0.0  ;;  %v2141_v23 = vmax.f32 %v2005_v17, 0.0 }
 0x2e9   : > { %v1817_v40 = vpop.f32.mrf.mxu0  ;;  %v2010_v63 = vpop.f32.mrf.mxu1 }
 0x2ea   : > { %v2140_v53 = vmax.f32 %v1814_v27, 0.0  ;;  %v2142_v44 = vmax.f32 %v2007_v5, 0.0  ;;  %v13233_v48 = vpack.c.bf16 %v2139_v13, %v2135_v11  ;;  %v13235_v33 = vpack.c.bf16 %v2141_v23, %v2137_v24 }
 0x2eb   : > { %v1819_v30 = vpop.f32.mrf.mxu0  ;;  %v2012_v14 = vpop.f32.mrf.mxu1  ;;  %v1818_v18 = vadd.f32 %v1817_v40, %v12551_v25  ;;  %v2011_v27 = vadd.f32 %v2010_v63, %v12554_v26 }
 0x2ec   : > { %v13229_v21 = vpack.c.bf16 %v2140_v53, %v2136_v34  ;;  %v13231_v3 = vpack.c.bf16 %v2142_v44, %v2138_v50  ;;  %18410 = vst [vmem:[#allocation97_spill] sm:$0xff] %v13233_v48  ;;  %18411 = vst [vmem:[#allocation98_spill] sm:$0xff] %v13235_v33  ;;  %v1820_v39 = vadd.f32 %v1819_v30, %v12545_v52 }
 0x2ed   : > { %v1821_v17 = vpop.f32.mrf.mxu0  ;;  %v2014_v59 = vpop.f32.mrf.mxu1  ;;  %v2013_v9 = vadd.f32 %v2012_v14, %v12548_v41  ;;  %v2145_v63 = vmax.f32 %v2011_v27, 0.0 }
 0x2ee   : > { %18408 = vst [vmem:[#allocation95_spill] sm:$0xff] %v13229_v21  ;;  %18409 = vst [vmem:[#allocation96_spill] sm:$0xff] %v13231_v3  ;;  %v1822_v43 = vadd.f32 %v1821_v17, %v12551_v25  ;;  %v2015_v12 = vadd.f32 %v2014_v59, %v12554_v26  ;;  %3961 = vmatprep.mubr.bf16.mxu0 %v13229_v21  ;;  %4154 = vmatprep.mubr.bf16.mxu1 %v13231_v3  ;;  %v2144_v11 = vmax.f32 %v1820_v39, 0.0 }
 0x2ef   : > { %v1823_v5 = vpop.f32.mrf.mxu0  ;;  %v2016_v13 = vpop.f32.mrf.mxu1  ;;  %3962 = vmatmul.mubr.bf16.gmra.mxu0 %v13233_v48  ;;  %4155 = vmatmul.mubr.bf16.gmra.mxu1 %v13235_v33  ;;  %v2146_v24 = vmax.f32 %v2013_v9, 0.0  ;;  %v2143_v17 = vmax.f32 %v1818_v18, 0.0 }
 0x2f0   : > { %v1824_v14 = vadd.f32 %v1823_v5, %v12545_v52  ;;  %v2017_v23 = vadd.f32 %v2016_v13, %v12548_v41  ;;  %v2147_v34 = vmax.f32 %v1822_v43, 0.0  ;;  %v2149_v50 = vmax.f32 %v2015_v12, 0.0 }
 0x2f1   : > { %v1827_v53 = vpop.f32.mrf.mxu0  ;;  %v2020_v44 = vpop.f32.mrf.mxu1 }
 0x2f2   : > { %v2148_v30 = vmax.f32 %v1824_v14, 0.0  ;;  %v2150_v40 = vmax.f32 %v2017_v23, 0.0  ;;  %v13253_v33 = vpack.c.bf16 %v2147_v34, %v2143_v17  ;;  %v13255_v5 = vpack.c.bf16 %v2149_v50, %v2145_v63 }
 0x2f3   : > { %v1829_v59 = vpop.f32.mrf.mxu0  ;;  %v2022_v3 = vpop.f32.mrf.mxu1  ;;  %v1828_v27 = vadd.f32 %v1827_v53, %v12551_v25  ;;  %v2021_v14 = vadd.f32 %v2020_v44, %v12554_v26 }
 0x2f4   : > { %v13249_v21 = vpack.c.bf16 %v2148_v30, %v2144_v11  ;;  %v13251_v48 = vpack.c.bf16 %v2150_v40, %v2146_v24  ;;  %18414 = vst [vmem:[#allocation101_spill] sm:$0xff] %v13253_v33  ;;  %18415 = vst [vmem:[#allocation102_spill] sm:$0xff] %v13255_v5  ;;  %v1830_v43 = vadd.f32 %v1829_v59, %v12545_v52 }
 0x2f5   : > { %v1831_v12 = vpop.f32.mrf.mxu0  ;;  %v2024_v13 = vpop.f32.mrf.mxu1  ;;  %v2023_v39 = vadd.f32 %v2022_v3, %v12548_v41  ;;  %v2153_v44 = vmax.f32 %v2021_v14, 0.0 }
 0x2f6   : > { %18412 = vst [vmem:[#allocation99_spill] sm:$0xff] %v13249_v21  ;;  %18413 = vst [vmem:[#allocation100_spill] sm:$0xff] %v13251_v48  ;;  %v1832_v9 = vadd.f32 %v1831_v12, %v12551_v25  ;;  %v2025_v18 = vadd.f32 %v2024_v13, %v12554_v26  ;;  %3971 = vmatprep.mubr.bf16.mxu0 %v13249_v21  ;;  %4164 = vmatprep.mubr.bf16.mxu1 %v13251_v48  ;;  %v2152_v17 = vmax.f32 %v1830_v43, 0.0 }
 0x2f7   : > { %v1833_v23 = vpop.f32.mrf.mxu0  ;;  %v2026_v34 = vpop.f32.mrf.mxu1  ;;  %3972 = vmatmul.mubr.bf16.gmra.mxu0 %v13253_v33  ;;  %4165 = vmatmul.mubr.bf16.gmra.mxu1 %v13255_v5  ;;  %v2154_v63 = vmax.f32 %v2023_v39, 0.0  ;;  %v2151_v12 = vmax.f32 %v1828_v27, 0.0 }
 0x2f8   : > { %v1834_v3 = vadd.f32 %v1833_v23, %v12545_v52  ;;  %v2027_v50 = vadd.f32 %v2026_v34, %v12548_v41  ;;  %v2155_v11 = vmax.f32 %v1832_v9, 0.0  ;;  %v2157_v24 = vmax.f32 %v2025_v18, 0.0 }
 0x2f9   : > { %v1837_v30 = vpop.f32.mrf.mxu0  ;;  %v2030_v40 = vpop.f32.mrf.mxu1 }
 0x2fa   : > { %v2156_v59 = vmax.f32 %v1834_v3, 0.0  ;;  %v2158_v53 = vmax.f32 %v2027_v50, 0.0  ;;  %v13273_v5 = vpack.c.bf16 %v2155_v11, %v2151_v12  ;;  %v13275_v23 = vpack.c.bf16 %v2157_v24, %v2153_v44 }
 0x2fb   : > { %v1839_v13 = vpop.f32.mrf.mxu0  ;;  %v2032_v48 = vpop.f32.mrf.mxu1  ;;  %v1838_v14 = vadd.f32 %v1837_v30, %v12551_v25  ;;  %v2031_v3 = vadd.f32 %v2030_v40, %v12554_v26 }
 0x2fc   : > { %v13269_v21 = vpack.c.bf16 %v2156_v59, %v2152_v17  ;;  %v13271_v33 = vpack.c.bf16 %v2158_v53, %v2154_v63  ;;  %v1840_v9 = vadd.f32 %v1839_v13, %v12545_v52  ;;  %v2033_v43 = vadd.f32 %v2032_v48, %v12548_v41 }
 0x2fd   : > { %v1841_v18 = vpop.f32.mrf.mxu0  ;;  %v2034_v34 = vpop.f32.mrf.mxu1  ;;  %v2159_v13 = vmax.f32 %v1838_v14, 0.0 }
 0x2fe   : > { %18416 = vst [vmem:[#allocation103_spill] sm:$0xff] %v13269_v21  ;;  %18417 = vst [vmem:[#allocation104_spill] sm:$0xff] %v13271_v33  ;;  %v1842_v39 = vadd.f32 %v1841_v18, %v12551_v25  ;;  %v2035_v27 = vadd.f32 %v2034_v34, %v12554_v26  ;;  %3981 = vmatprep.mubr.bf16.mxu0 %v13269_v21  ;;  %4174 = vmatprep.mubr.bf16.mxu1 %v13271_v33  ;;  %v2160_v59 = vmax.f32 %v1840_v9, 0.0  ;;  %v2409_v9 = vld [vmem:[%s18106_s7 + $0x590] sm:$0xff] }
 0x2ff   : > { %v1843_v50 = vpop.f32.mrf.mxu0  ;;  %v2036_v11 = vpop.f32.mrf.mxu1  ;;  %3982 = vmatmul.mubr.bf16.gmra.mxu0 %v13273_v5  ;;  %4175 = vmatmul.mubr.bf16.gmra.mxu1 %v13275_v23  ;;  %v2162_v53 = vmax.f32 %v2033_v43, 0.0  ;;  %v2161_v25 = vmax.f32 %v2031_v3, 0.0  ;;  %v2413_v34 = vld [vmem:[%s18106_s7 + $0x5b0] sm:$0xff]  ;;  %v13318_v43 = vld [vmem:[%s18106_s7 + $0x1d8] sm:$0xff] }
 0x300   : > { %v1844_v48 = vadd.f32 %v1843_v50, %v12545_v52  ;;  %v2037_v24 = vadd.f32 %v2036_v11, %v12548_v41  ;;  %v2163_v17 = vmax.f32 %v1842_v39, 0.0  ;;  %v2165_v63 = vmax.f32 %v2035_v27, 0.0  ;;  %v2281_v52 = vld [vmem:[%s18106_s7 + $0x190] sm:$0xff]  ;;  %v13323_v39 = vld [vmem:[%s18106_s7 + $0x1f8] sm:$0xff] }
 0x301   : > { %v2285_v41 = vld [vmem:[%s18106_s7 + $0x1b0] sm:$0xff]  ;;  %v10316_v14 = vcombine.high %v2409_v9, %v2413_v34 }
 0x302   : > { %v2164_v12 = vmax.f32 %v1844_v48, 0.0  ;;  %v2166_v44 = vmax.f32 %v2037_v24, 0.0  ;;  %v13293_v40 = vpack.c.bf16 %v2163_v17, %v2159_v13  ;;  %v13295_v18 = vpack.c.bf16 %v2165_v63, %v2161_v25  ;;  %v2273_v3 = vld [vmem:[%s18106_s7 + $0x150] sm:$0xff] }
 0x303   : > { %v10188_v27 = vcombine.high %v2281_v52, %v2285_v41  ;;  %v2277_v11 = vld [vmem:[%s18106_s7 + $0x170] sm:$0xff]  ;;  %v18418_v17 = vcombine.low %v12635_v2, %v12640_v8  ;;  %v18419_v63 = vcombine.low %v12679_v45, %v12684_v58 }
 0x304   : > { %v13289_v30 = vpack.c.bf16 %v2164_v12, %v2160_v59  ;;  %v13291_v26 = vpack.c.bf16 %v2166_v44, %v2162_v53  ;;  %v2401_v48 = vld [vmem:[%s18106_s7 + $0x550] sm:$0xff]  ;;  %v10187_v59 = vcombine.low %v2281_v52, %v2285_v41  ;;  %v10315_v53 = vcombine.low %v2409_v9, %v2413_v34  ;;  %v13367_v34 = vld [vmem:[%s18106_s7 + $0x5d8] sm:$0xff] }
 0x305   : > { %v2405_v24 = vld [vmem:[%s18106_s7 + $0x570] sm:$0xff]  ;;  %v10180_v12 = vcombine.high %v2273_v3, %v2277_v11  ;;  %v10179_v45 = vcombine.low %v2273_v3, %v2277_v11 }
 0x306   : > { %3991 = vmatprep.mubr.bf16.mxu0 %v13289_v30  ;;  %4184 = vmatprep.mubr.bf16.mxu1 %v13291_v26  ;;  %v10308_v44 = vcombine.high %v2401_v48, %v2405_v24  ;;  %v2265_v13 = vld [vmem:[%s18106_s7 + $0x110] sm:$0xff]  ;;  %v10307_v58 = vcombine.low %v2401_v48, %v2405_v24 }
 0x307   : > { %3992 = vmatmul.mubr.bf16.gmra.mxu0 %v13293_v40  ;;  %4185 = vmatmul.mubr.bf16.gmra.mxu1 %v13295_v18  ;;  %v2269_v25 = vld [vmem:[%s18106_s7 + $0x130] sm:$0xff] }
 0x308   : > { %4227 = vmatprep.mubr.bf16.mxu0 %v12586_v60  ;;  %4420 = vmatprep.mubr.bf16.mxu1 %v12588_v38  ;;  %v2393_v2 = vld [vmem:[%s18106_s7 + $0x510] sm:$0xff]  ;;  %v10172_v52 = vcombine.high %v2265_v13, %v2269_v25  ;;  %v10171_v24 = vcombine.low %v2265_v13, %v2269_v25 }
 0x309   : > { %v2397_v8 = vld [vmem:[%s18106_s7 + $0x530] sm:$0xff] }
 0x30a   : > { %v10300_v41 = vcombine.high %v2393_v2, %v2397_v8  ;;  %v2257_v9 = vld [vmem:[%s18106_s7 + $0xd0] sm:$0xff] }
 0x30b   : > { %v2385_v3 = vld [vmem:[%s18106_s7 + $0x4d0] sm:$0xff] }
 0x30c   : > { %v2389_v11 = vld [vmem:[%s18106_s7 + $0x4f0] sm:$0xff] }
 0x30d   : > { %v2381_v13 = vld [vmem:[%s18106_s7 + $0x4b0] sm:$0xff] }
 0x30e   : > { %v2325_v48 = vld [vmem:[%s18106_s7 + $0x2f0] sm:$0xff] }
 0x30f   : > { %4228 = vmatmul.mubr.bf16.vlgmr.msra.gmra.mxu0 %v12604_v54  ;;  %4421 = vmatmul.mubr.bf16.vlgmr.msra.gmra.mxu1 %v12606_v4  ;;  %v2313_v50 = vld [vmem:[%s18106_s7 + $0x290] sm:$0xff] }
 0x310   : > { %4237 = vmatprep.mubr.bf16.mxu0 %v12690_v6  ;;  %4430 = vmatprep.mubr.bf16.mxu1 %v12692_v19 }
 0x311   : > { %4582 = vmatpush1.bf16.msra.mxu0 %v18418_v17  ;;  %4775 = vmatpush1.bf16.msra.mxu1 %v18419_v63  ;;  %v10299_v17 = vcombine.low %v2393_v2, %v2397_v8  ;;  %v10291_v2 = vcombine.low %v2385_v3, %v2389_v11 }
 0x312   : > { %4583 = vmatprep.subr.bf16.mxu0 %v10188_v27  ;;  %4776 = vmatprep.subr.bf16.mxu1 %v10316_v14  ;;  %v13372_v27 = vld [vmem:[%s18106_s7 + $0x5f8] sm:$0xff]  ;;  %v2261_v14 = vld [vmem:[%s18106_s7 + $0xf0] sm:$0xff] }
 0x313   : > { %v10164_v63 = vcombine.high %v2257_v9, %v2261_v14  ;;  %v10163_v25 = vcombine.low %v2257_v9, %v2261_v14  ;;  %v2373_v9 = vld [vmem:[%s18106_s7 + $0x470] sm:$0xff] }
 0x315   : > { %4584 = vmatpush1.bf16.msra.mxu0 %v10187_v59  ;;  %4777 = vmatpush1.bf16.msra.mxu1 %v10315_v53  ;;  %v10292_v59 = vcombine.high %v2385_v3, %v2389_v11  ;;  %v2249_v53 = vld [vmem:[%s18106_s7 + $0x90] sm:$0xff] }
 0x316   : > { %4585 = vmatprep.subr.bf16.mxu0 %v10180_v12  ;;  %4778 = vmatprep.subr.bf16.mxu1 %v10308_v44  ;;  %v2253_v12 = vld [vmem:[%s18106_s7 + $0xb0] sm:$0xff] }
 0x317   : > { %4238 = vmatmul.mubr.bf16.gmra.mxu0 %v12698_v55  ;;  %4431 = vmatmul.mubr.bf16.gmra.mxu1 %v12700_v42  ;;  %v2377_v44 = vld [vmem:[%s18106_s7 + $0x490] sm:$0xff]  ;;  %v10156_v8 = vcombine.high %v2249_v53, %v2253_v12  ;;  %v10155_v14 = vcombine.low %v2249_v53, %v2253_v12 }
 0x318   : > { %4247 = vmatprep.mubr.bf16.mxu0 %v12765_v22  ;;  %4440 = vmatprep.mubr.bf16.mxu1 %v12767_v15  ;;  %v10283_v3 = vcombine.low %v2377_v44, %v2381_v13  ;;  %v2365_v53 = vld [vmem:[%s18106_s7 + $0x430] sm:$0xff] }
 0x319   : > { %4586 = vmatpush1.bf16.msra.mxu0 %v10179_v45  ;;  %4779 = vmatpush1.bf16.msra.mxu1 %v10307_v58  ;;  %v10284_v45 = vcombine.high %v2377_v44, %v2381_v13  ;;  %v2241_v58 = vld [vmem:[%s18106_s7 + $0x50] sm:$0xff] }
 0x31a   : > { %4587 = vmatprep.subr.bf16.mxu0 %v10172_v52  ;;  %4780 = vmatprep.subr.bf16.mxu1 %v10300_v41  ;;  %v2245_v52 = vld [vmem:[%s18106_s7 + $0x70] sm:$0xff] }
 0x31b   : > { %v2369_v41 = vld [vmem:[%s18106_s7 + $0x450] sm:$0xff]  ;;  %v10148_v11 = vcombine.high %v2241_v58, %v2245_v52  ;;  %v10147_v12 = vcombine.low %v2241_v58, %v2245_v52 }
 0x31c   : > { %v10275_v44 = vcombine.low %v2369_v41, %v2373_v9  ;;  %v2485_v58 = vld [vmem:[%s18106_s7 + $0x7f0] sm:$0xff] }
 0x31d   : > { %4588 = vmatpush1.bf16.msra.mxu0 %v10171_v24  ;;  %4781 = vmatpush1.bf16.msra.mxu1 %v10299_v17  ;;  %v10276_v24 = vcombine.high %v2369_v41, %v2373_v9  ;;  %v2233_v17 = vld [vmem:[%s18106_s7 + $0x10] sm:$0xff] }
 0x31e   : > { %4589 = vmatprep.subr.bf16.mxu0 %v10164_v63  ;;  %4782 = vmatprep.subr.bf16.mxu1 %v10292_v59  ;;  %v2237_v63 = vld [vmem:[%s18106_s7 + $0x30] sm:$0xff] }
 0x31f   : > { %4248 = vmatmul.mubr.bf16.gmra.mxu0 %v12773_v29  ;;  %4441 = vmatmul.mubr.bf16.gmra.mxu1 %v12775_v35  ;;  %v2361_v59 = vld [vmem:[%s18106_s7 + $0x410] sm:$0xff]  ;;  %v10140_v13 = vcombine.high %v2233_v17, %v2237_v63  ;;  %v10139_v52 = vcombine.low %v2233_v17, %v2237_v63 }
 0x320   : > { %4257 = vmatprep.mubr.bf16.mxu0 %v12837_v37  ;;  %4450 = vmatprep.mubr.bf16.mxu1 %v12839_v31  ;;  %v10267_v41 = vcombine.low %v2361_v59, %v2365_v53  ;;  %v2477_v17 = vld [vmem:[%s18106_s7 + $0x7b0] sm:$0xff] }
 0x321   : > { %4590 = vmatpush1.bf16.msra.mxu0 %v10163_v25  ;;  %4783 = vmatpush1.bf16.msra.mxu1 %v10291_v2  ;;  %v10268_v25 = vcombine.high %v2361_v59, %v2365_v53  ;;  %v2353_v2 = vld [vmem:[%s18106_s7 + $0x3d0] sm:$0xff] }
 0x322   : > { %4591 = vmatprep.subr.bf16.mxu0 %v10156_v8  ;;  %4784 = vmatprep.subr.bf16.mxu1 %v10284_v45  ;;  %v2357_v8 = vld [vmem:[%s18106_s7 + $0x3f0] sm:$0xff] }
 0x323   : > { %v2481_v45 = vld [vmem:[%s18106_s7 + $0x7d0] sm:$0xff]  ;;  %v10260_v9 = vcombine.high %v2353_v2, %v2357_v8  ;;  %v10259_v63 = vcombine.low %v2353_v2, %v2357_v8 }
 0x324   : > { %v10387_v59 = vcombine.low %v2481_v45, %v2485_v58  ;;  %v2469_v2 = vld [vmem:[%s18106_s7 + $0x770] sm:$0xff] }
 0x325   : > { %4592 = vmatpush1.bf16.msra.mxu0 %v10155_v14  ;;  %4785 = vmatpush1.bf16.msra.mxu1 %v10283_v3  ;;  %v10388_v14 = vcombine.high %v2481_v45, %v2485_v58  ;;  %v2345_v3 = vld [vmem:[%s18106_s7 + $0x390] sm:$0xff] }
 0x326   : > { %4593 = vmatprep.subr.bf16.mxu0 %v10148_v11  ;;  %4786 = vmatprep.subr.bf16.mxu1 %v10276_v24  ;;  %v2349_v11 = vld [vmem:[%s18106_s7 + $0x3b0] sm:$0xff] }
 0x327   : > { %4258 = vmatmul.mubr.bf16.gmra.mxu0 %v12845_v7  ;;  %4451 = vmatmul.mubr.bf16.gmra.mxu1 %v12847_v28  ;;  %v2473_v24 = vld [vmem:[%s18106_s7 + $0x790] sm:$0xff]  ;;  %v10252_v53 = vcombine.high %v2345_v3, %v2349_v11  ;;  %v10251_v8 = vcombine.low %v2345_v3, %v2349_v11 }
 0x328   : > { %4267 = vmatprep.mubr.bf16.mxu0 %v12909_v1  ;;  %4460 = vmatprep.mubr.bf16.mxu1 %v12911_v62  ;;  %v10379_v45 = vcombine.low %v2473_v24, %v2477_v17  ;;  %v2461_v3 = vld [vmem:[%s18106_s7 + $0x730] sm:$0xff] }
 0x329   : > { %4594 = vmatpush1.bf16.msra.mxu0 %v10147_v12  ;;  %4787 = vmatpush1.bf16.msra.mxu1 %v10275_v44  ;;  %v10380_v12 = vcombine.high %v2473_v24, %v2477_v17  ;;  %v2337_v44 = vld [vmem:[%s18106_s7 + $0x350] sm:$0xff] }
 0x32a   : > { %4595 = vmatprep.subr.bf16.mxu0 %v10140_v13  ;;  %4788 = vmatprep.subr.bf16.mxu1 %v10268_v25  ;;  %v2341_v13 = vld [vmem:[%s18106_s7 + $0x370] sm:$0xff] }
 0x32b   : > { %v2465_v25 = vld [vmem:[%s18106_s7 + $0x750] sm:$0xff]  ;;  %v10244_v58 = vcombine.high %v2337_v44, %v2341_v13  ;;  %v10243_v11 = vcombine.low %v2337_v44, %v2341_v13 }
 0x32c   : > { %v10371_v24 = vcombine.low %v2465_v25, %v2469_v2  ;;  %v2449_v44 = vld [vmem:[%s18106_s7 + $0x6d0] sm:$0xff] }
 0x32d   : > { %4596 = vmatpush1.bf16.msra.mxu0 %v10139_v52  ;;  %4789 = vmatpush1.bf16.msra.mxu1 %v10267_v41  ;;  %v10372_v52 = vcombine.high %v2465_v25, %v2469_v2  ;;  %v2329_v41 = vld [vmem:[%s18106_s7 + $0x310] sm:$0xff]  ;;  %v18422_v25 = vld [vmem:[#allocation71_spill] sm:$0xff]  ;;  %v18423_v2 = vld [vmem:[#allocation72_spill] sm:$0xff] }
 0x32e   : > { %4597 = vmatprep.subr.bf16.mxu0 %v10260_v9  ;;  %4790 = vmatprep.subr.bf16.mxu1 %v10388_v14  ;;  %v2333_v9 = vld [vmem:[%s18106_s7 + $0x330] sm:$0xff] }
 0x32f   : > { %4268 = vmatmul.mubr.bf16.gmra.mxu0 %v12917_v10  ;;  %4461 = vmatmul.mubr.bf16.gmra.mxu1 %v12919_v36  ;;  %v2457_v14 = vld [vmem:[%s18106_s7 + $0x710] sm:$0xff]  ;;  %v10236_v17 = vcombine.high %v2329_v41, %v2333_v9 }
 0x330   : > { %4277 = vmatprep.mubr.bf16.mxu0 %v12981_v47  ;;  %4470 = vmatprep.mubr.bf16.mxu1 %v12983_v56  ;;  %v2453_v13 = vld [vmem:[%s18106_s7 + $0x6f0] sm:$0xff] }
 0x331   : > { %4598 = vmatpush2.bf16.msra.mxu0 %v10259_v63  ;;  %4791 = vmatpush2.bf16.msra.mxu1 %v10387_v59  ;;  %v10364_v63 = vcombine.high %v2457_v14, %v2461_v3  ;;  %v2321_v59 = vld [vmem:[%s18106_s7 + $0x2d0] sm:$0xff] }
 0x332   : > { %4599 = vmatprep.subr.bf16.mxu0 %v10252_v53  ;;  %4792 = vmatprep.subr.bf16.mxu1 %v10380_v12  ;;  %v18420_v53 = vld [vmem:[#allocation69_spill] sm:$0xff]  ;;  %v18421_v12 = vld [vmem:[#allocation70_spill] sm:$0xff] }
 0x335   : > { %4600 = vmatpush2.bf16.msra.mxu0 %v10251_v8  ;;  %4793 = vmatpush2.bf16.msra.mxu1 %v10379_v45  ;;  %v10235_v8 = vcombine.low %v2329_v41, %v2333_v9  ;;  %v10363_v45 = vcombine.low %v2457_v14, %v2461_v3  ;;  %v2445_v41 = vld [vmem:[%s18106_s7 + $0x6b0] sm:$0xff]  ;;  %v10227_v9 = vcombine.low %v2321_v59, %v2325_v48 }
 0x336   : > { %4601 = vmatprep.subr.bf16.mxu0 %v10244_v58  ;;  %4794 = vmatprep.subr.bf16.mxu1 %v10372_v52  ;;  %v10228_v58 = vcombine.high %v2321_v59, %v2325_v48  ;;  %v10356_v52 = vcombine.high %v2449_v44, %v2453_v13  ;;  %v10355_v14 = vcombine.low %v2449_v44, %v2453_v13  ;;  %v2433_v48 = vld [vmem:[%s18106_s7 + $0x650] sm:$0xff] }
 0x337   : > { %4278 = vmatmul.mubr.bf16.gmra.mxu0 %v18420_v53  ;;  %4471 = vmatmul.mubr.bf16.gmra.mxu1 %v18421_v12  ;;  %v2317_v12 = vld [vmem:[%s18106_s7 + $0x2b0] sm:$0xff] }
 0x338   : > { %4287 = vmatprep.mubr.bf16.mxu0 %v18422_v25  ;;  %4480 = vmatprep.mubr.bf16.mxu1 %v18423_v2  ;;  %v2441_v2 = vld [vmem:[%s18106_s7 + $0x690] sm:$0xff]  ;;  %v10220_v3 = vcombine.high %v2313_v50, %v2317_v12  ;;  %v10219_v44 = vcombine.low %v2313_v50, %v2317_v12 }
 0x339   : > { %4602 = vmatpush2.bf16.msra.mxu0 %v10243_v11  ;;  %4795 = vmatpush2.bf16.msra.mxu1 %v10371_v24  ;;  %v10348_v11 = vcombine.high %v2441_v2, %v2445_v41  ;;  %v2305_v24 = vld [vmem:[%s18106_s7 + $0x250] sm:$0xff]  ;;  %v10347_v13 = vcombine.low %v2441_v2, %v2445_v41 }
 0x33a   : > { %4603 = vmatprep.subr.bf16.mxu0 %v10236_v17  ;;  %4796 = vmatprep.subr.bf16.mxu1 %v10364_v63  ;;  %v18424_v17 = vld [vmem:[#allocation73_spill] sm:$0xff]  ;;  %v18425_v63 = vld [vmem:[#allocation74_spill] sm:$0xff] }
 0x33b   : > { %v2309_v25 = vld [vmem:[%s18106_s7 + $0x270] sm:$0xff] }
 0x33c   : > { %v2437_v59 = vld [vmem:[%s18106_s7 + $0x670] sm:$0xff]  ;;  %v10211_v12 = vcombine.low %v2305_v24, %v2309_v25 }
 0x33d   : > { %4604 = vmatpush2.bf16.msra.mxu0 %v10235_v8  ;;  %4797 = vmatpush2.bf16.msra.mxu1 %v10363_v45  ;;  %v10212_v8 = vcombine.high %v2305_v24, %v2309_v25  ;;  %v10340_v45 = vcombine.high %v2433_v48, %v2437_v59  ;;  %v2429_v50 = vld [vmem:[%s18106_s7 + $0x630] sm:$0xff]  ;;  %v10339_v2 = vcombine.low %v2433_v48, %v2437_v59 }
 0x33e   : > { %4605 = vmatprep.subr.bf16.mxu0 %v10228_v58  ;;  %4798 = vmatprep.subr.bf16.mxu1 %v10356_v52  ;;  %v2297_v58 = vld [vmem:[%s18106_s7 + $0x210] sm:$0xff]  ;;  %v10326_v24 = vcombine.high %v13367_v34, %v13372_v27 }
 0x33f   : > { %4288 = vmatmul.mubr.bf16.gmra.mxu0 %v18424_v17  ;;  %4481 = vmatmul.mubr.bf16.gmra.mxu1 %v18425_v63  ;;  %v2301_v52 = vld [vmem:[%s18106_s7 + $0x230] sm:$0xff] }
 0x340   : > { %4297 = vmatprep.mubr.bf16.mxu0 %v13119_v32  ;;  %4490 = vmatprep.mubr.bf16.mxu1 %v13121_v49  ;;  %v2425_v49 = vld [vmem:[%s18106_s7 + $0x610] sm:$0xff]  ;;  %v10204_v41 = vcombine.high %v2297_v58, %v2301_v52  ;;  %v10203_v25 = vcombine.low %v2297_v58, %v2301_v52  ;;  %v18428_v58 = vld [vmem:[#allocation84_spill] sm:$0xff] }
 0x341   : > { %4606 = vmatpush2.bf16.msra.mxu0 %v10227_v9  ;;  %4799 = vmatpush2.bf16.msra.mxu1 %v10355_v14  ;;  %v10332_v9 = vcombine.high %v2425_v49, %v2429_v50  ;;  %v2487_v14 = vld [vmem:[%s18107_s8] sm:$0xff]  ;;  %v18426_v48 = vld [vmem:[#allocation26_spill] sm:$0xff] }
 0x342   : > { %4607 = vmatprep.subr.bf16.mxu0 %v10220_v3  ;;  %4800 = vmatprep.subr.bf16.mxu1 %v10348_v11  ;;  %v10331_v3 = vcombine.low %v2425_v49, %v2429_v50  ;;  %v10198_v11 = vcombine.high %v13318_v43, %v13323_v39  ;;  %v13553_v59 = vrot.slane %v2487_v14, %v18426_v48 }
 0x345   : > { %4608 = vmatpush2.bf16.msra.mxu0 %v10219_v44  ;;  %4801 = vmatpush2.bf16.msra.mxu1 %v10347_v13  ;;  %v18427_v44 = vld [vmem:[#allocation25_spill] sm:$0xff] }
 0x346   : > { %4609 = vmatprep.subr.bf16.mxu0 %v10212_v8  ;;  %4802 = vmatprep.subr.bf16.mxu1 %v10340_v45  ;;  %v13556_v13 = vrot.slane %v2487_v14, %v18427_v44 }
 0x347   : > { %4298 = vmatmul.mubr.bf16.gmra.mxu0 %v13126_v61  ;;  %4491 = vmatmul.mubr.bf16.gmra.mxu1 %v13128_v20 }
 0x348   : > { %4307 = vmatprep.mubr.bf16.mxu0 %v13147_v16  ;;  %4500 = vmatprep.mubr.bf16.mxu1 %v13149_v57 }
 0x349   : > { %4610 = vmatpush2.bf16.msra.mxu0 %v10211_v12  ;;  %4803 = vmatpush2.bf16.msra.mxu1 %v10339_v2 }
 0x34a   : > { %4611 = vmatprep.subr.bf16.mxu0 %v10204_v41  ;;  %4804 = vmatprep.subr.bf16.mxu1 %v10332_v9 }
 0x34d   : > { %4612 = vmatpush2.bf16.msra.mxu0 %v10203_v25  ;;  %4805 = vmatpush2.bf16.msra.mxu1 %v10331_v3 }
 0x34e   : > { %4967 = vmatprep.subr.bf16.mxu0 %v10198_v11  ;;  %5160 = vmatprep.subr.bf16.mxu1 %v10326_v24 }
 0x34f   : > { %v3843_v8 = vpop.f32.mrf.mxu0  ;;  %v4036_v49 = vpop.f32.mrf.mxu1  ;;  %4308 = vmatmul.mubr.bf16.gmra.mxu0 %v13153_v46  ;;  %4501 = vmatmul.mubr.bf16.gmra.mxu1 %v13155_v0  ;;  %v18431_v46 = vld [vmem:[#allocation87_spill] sm:$0xff] }
 0x350   : > { %v3844_v45 = vadd.f32 %v3843_v8, %v13553_v59  ;;  %4317 = vmatprep.mubr.bf16.mxu0 %v13169_v51  ;;  %4510 = vmatprep.mubr.bf16.mxu1 %v18428_v58  ;;  %v18429_v51 = vld [vmem:[#allocation85_spill] sm:$0xff]  ;;  %v18430_v58 = vld [vmem:[#allocation86_spill] sm:$0xff] }
 0x351   : > { %v3845_v52 = vpop.f32.mrf.mxu0  ;;  %v4038_v50 = vpop.f32.mrf.mxu1 }
 0x352   : > { %v4037_v12 = vadd.f32 %v4036_v49, %v3844_v45  ;;  %v3846_v2 = vadd.f32 %v3845_v52, %v13556_v13 }
 0x353   : > { %v3847_v41 = vpop.f32.mrf.mxu0  ;;  %v4040_v9 = vpop.f32.mrf.mxu1 }
 0x354   : > { %v4039_v14 = vadd.f32 %v4038_v50, %v3846_v2  ;;  %v3848_v25 = vadd.f32 %v3847_v41, %v13553_v59  ;;  %v5353_v0 = vmax.f32 %v4037_v12, 0.0  ;;  %v18432_v50 = vld [vmem:[#allocation88_spill] sm:$0xff] }
 0x355   : > { %v3849_v3 = vpop.f32.mrf.mxu0  ;;  %v4042_v11 = vpop.f32.mrf.mxu1 }
 0x356   : > { %v4041_v24 = vadd.f32 %v4040_v9, %v3848_v25  ;;  %v3850_v44 = vadd.f32 %v3849_v3, %v13556_v13  ;;  %v5354_v2 = vmax.f32 %v4039_v14, 0.0 }
 0x357   : > { %v3853_v8 = vpop.f32.mrf.mxu0  ;;  %v4046_v48 = vpop.f32.mrf.mxu1  ;;  %4318 = vmatmul.mubr.bf16.gmra.mxu0 %v18429_v51  ;;  %4511 = vmatmul.mubr.bf16.gmra.mxu1 %v18430_v58 }
 0x358   : > { %v5361_v49 = vmax.f32 %v4041_v24, 0.0  ;;  %v4043_v45 = vadd.f32 %v4042_v11, %v3850_v44  ;;  %v3854_v52 = vadd.f32 %v3853_v8, %v13553_v59  ;;  %4327 = vmatprep.mubr.bf16.mxu0 %v18431_v46  ;;  %4520 = vmatprep.mubr.bf16.mxu1 %v18432_v50 }
 0x359   : > { %v3855_v41 = vpop.f32.mrf.mxu0  ;;  %v4048_v9 = vpop.f32.mrf.mxu1 }
 0x35a   : > { %v13571_v25 = vpack.c.bf16 %v5361_v49, %v5353_v0  ;;  %v5362_v3 = vmax.f32 %v4043_v45, 0.0  ;;  %v4047_v57 = vadd.f32 %v4046_v48, %v3854_v52  ;;  %v3856_v51 = vadd.f32 %v3855_v41, %v13556_v13  ;;  %v18435_v0 = vld [vmem:[#allocation89_spill] sm:$0xff]  ;;  %v18436_v49 = vld [vmem:[#allocation90_spill] sm:$0xff]  ;;  %v18437_v41 = vld [vmem:[#allocation91_spill] sm:$0xff] }
 0x35b   : > { %v3857_v16 = vpop.f32.mrf.mxu0  ;;  %v4050_v58 = vpop.f32.mrf.mxu1 }
 0x35c   : > { %18433 = vst [vmem:[#allocation73_spill] sm:$0xff] %v13571_v25  ;;  %v4049_v12 = vadd.f32 %v4048_v9, %v3856_v51  ;;  %v3858_v44 = vadd.f32 %v3857_v16, %v13553_v59  ;;  %v13575_v11 = vpack.c.bf16 %v5362_v3, %v5354_v2  ;;  %v5369_v48 = vmax.f32 %v4047_v57, 0.0  ;;  %v18438_v16 = vld [vmem:[#allocation92_spill] sm:$0xff] }
 0x35d   : > { %v3859_v24 = vpop.f32.mrf.mxu0  ;;  %v4052_v8 = vpop.f32.mrf.mxu1 }
 0x35e   : > { %18434 = vst [vmem:[#allocation105_spill] sm:$0xff] %v13575_v11  ;;  %v4051_v46 = vadd.f32 %v4050_v58, %v3858_v44  ;;  %v3860_v14 = vadd.f32 %v3859_v24, %v13556_v13  ;;  %v5370_v2 = vmax.f32 %v4049_v12, 0.0 }
 0x35f   : > { %v3863_v50 = vpop.f32.mrf.mxu0  ;;  %v4056_v20 = vpop.f32.mrf.mxu1  ;;  %4328 = vmatmul.mubr.bf16.gmra.mxu0 %v18435_v0  ;;  %4521 = vmatmul.mubr.bf16.gmra.mxu1 %v18436_v49 }
 0x360   : > { %v5377_v45 = vmax.f32 %v4051_v46, 0.0  ;;  %v4053_v52 = vadd.f32 %v4052_v8, %v3860_v14  ;;  %v3864_v51 = vadd.f32 %v3863_v50, %v13553_v59  ;;  %4337 = vmatprep.mubr.bf16.mxu0 %v18437_v41  ;;  %4530 = vmatprep.mubr.bf16.mxu1 %v18438_v16 }
 0x361   : > { %v3865_v9 = vpop.f32.mrf.mxu0  ;;  %v4058_v58 = vpop.f32.mrf.mxu1 }
 0x362   : > { %v13583_v3 = vpack.c.bf16 %v5377_v45, %v5369_v48  ;;  %v5378_v44 = vmax.f32 %v4053_v52, 0.0  ;;  %v4057_v24 = vadd.f32 %v4056_v20, %v3864_v51  ;;  %v3866_v25 = vadd.f32 %v3865_v9, %v13556_v13  ;;  %v18441_v48 = vld [vmem:[#allocation93_spill] sm:$0xff]  ;;  %v18442_v45 = vld [vmem:[#allocation94_spill] sm:$0xff]  ;;  %v18443_v9 = vld [vmem:[#allocation95_spill] sm:$0xff] }
 0x363   : > { %v3867_v11 = vpop.f32.mrf.mxu0  ;;  %v4060_v49 = vpop.f32.mrf.mxu1 }
 0x364   : > { %18439 = vst [vmem:[#allocation106_spill] sm:$0xff] %v13583_v3  ;;  %v4059_v57 = vadd.f32 %v4058_v58, %v3866_v25  ;;  %v3868_v46 = vadd.f32 %v3867_v11, %v13553_v59  ;;  %v13587_v8 = vpack.c.bf16 %v5378_v44, %v5370_v2  ;;  %v5385_v20 = vmax.f32 %v4057_v24, 0.0  ;;  %v18444_v11 = vld [vmem:[#allocation96_spill] sm:$0xff] }
 0x365   : > { %v3869_v50 = vpop.f32.mrf.mxu0  ;;  %v4062_v14 = vpop.f32.mrf.mxu1 }
 0x366   : > { %18440 = vst [vmem:[#allocation107_spill] sm:$0xff] %v13587_v8  ;;  %v4061_v41 = vadd.f32 %v4060_v49, %v3868_v46  ;;  %v3870_v12 = vadd.f32 %v3869_v50, %v13556_v13  ;;  %v5386_v2 = vmax.f32 %v4059_v57, 0.0 }
 0x367   : > { %v3873_v16 = vpop.f32.mrf.mxu0  ;;  %v4066_v0 = vpop.f32.mrf.mxu1  ;;  %4338 = vmatmul.mubr.bf16.gmra.mxu0 %v18441_v48  ;;  %4531 = vmatmul.mubr.bf16.gmra.mxu1 %v18442_v45 }
 0x368   : > { %v5393_v52 = vmax.f32 %v4061_v41, 0.0  ;;  %v4063_v51 = vadd.f32 %v4062_v14, %v3870_v12  ;;  %v3874_v25 = vadd.f32 %v3873_v16, %v13553_v59  ;;  %4347 = vmatprep.mubr.bf16.mxu0 %v18443_v9  ;;  %4540 = vmatprep.mubr.bf16.mxu1 %v18444_v11 }
 0x369   : > { %v3875_v58 = vpop.f32.mrf.mxu0  ;;  %v4068_v49 = vpop.f32.mrf.mxu1 }
 0x36a   : > { %v13595_v44 = vpack.c.bf16 %v5393_v52, %v5385_v20  ;;  %v5394_v46 = vmax.f32 %v4063_v51, 0.0  ;;  %v4067_v50 = vadd.f32 %v4066_v0, %v3874_v25  ;;  %v3876_v3 = vadd.f32 %v3875_v58, %v13556_v13  ;;  %v18447_v20 = vld [vmem:[#allocation97_spill] sm:$0xff]  ;;  %v18448_v52 = vld [vmem:[#allocation98_spill] sm:$0xff]  ;;  %v18449_v58 = vld [vmem:[#allocation99_spill] sm:$0xff] }
 0x36b   : > { %v3877_v8 = vpop.f32.mrf.mxu0  ;;  %v4070_v45 = vpop.f32.mrf.mxu1 }
 0x36c   : > { %18445 = vst [vmem:[#allocation108_spill] sm:$0xff] %v13595_v44  ;;  %v4069_v24 = vadd.f32 %v4068_v49, %v3876_v3  ;;  %v3878_v41 = vadd.f32 %v3877_v8, %v13553_v59  ;;  %v13599_v14 = vpack.c.bf16 %v5394_v46, %v5386_v2  ;;  %v5401_v0 = vmax.f32 %v4067_v50, 0.0  ;;  %v18450_v8 = vld [vmem:[#allocation100_spill] sm:$0xff] }
 0x36d   : > { %v3879_v16 = vpop.f32.mrf.mxu0  ;;  %v4072_v12 = vpop.f32.mrf.mxu1 }
 0x36e   : > { %18446 = vst [vmem:[#allocation109_spill] sm:$0xff] %v13599_v14  ;;  %v4071_v9 = vadd.f32 %v4070_v45, %v3878_v41  ;;  %v3880_v57 = vadd.f32 %v3879_v16, %v13556_v13  ;;  %v5402_v2 = vmax.f32 %v4069_v24, 0.0 }
 0x36f   : > { %v3883_v11 = vpop.f32.mrf.mxu0  ;;  %v4076_v48 = vpop.f32.mrf.mxu1  ;;  %4348 = vmatmul.mubr.bf16.gmra.mxu0 %v18447_v20  ;;  %4541 = vmatmul.mubr.bf16.gmra.mxu1 %v18448_v52 }
 0x370   : > { %v5409_v51 = vmax.f32 %v4071_v9, 0.0  ;;  %v4073_v25 = vadd.f32 %v4072_v12, %v3880_v57  ;;  %v3884_v3 = vadd.f32 %v3883_v11, %v13553_v59  ;;  %4357 = vmatprep.mubr.bf16.mxu0 %v18449_v58  ;;  %4550 = vmatprep.mubr.bf16.mxu1 %v18450_v8 }
 0x371   : > { %v3885_v49 = vpop.f32.mrf.mxu0  ;;  %v4078_v45 = vpop.f32.mrf.mxu1 }
 0x372   : > { %v13607_v46 = vpack.c.bf16 %v5409_v51, %v5401_v0  ;;  %v5410_v41 = vmax.f32 %v4073_v25, 0.0  ;;  %v4077_v16 = vadd.f32 %v4076_v48, %v3884_v3  ;;  %v3886_v44 = vadd.f32 %v3885_v49, %v13556_v13  ;;  %v18453_v0 = vld [vmem:[#allocation101_spill] sm:$0xff]  ;;  %v18454_v51 = vld [vmem:[#allocation102_spill] sm:$0xff] }
 0x373   : > { %v3887_v14 = vpop.f32.mrf.mxu0  ;;  %v4080_v52 = vpop.f32.mrf.mxu1 }
 0x374   : > { %18451 = vst [vmem:[#allocation110_spill] sm:$0xff] %v13607_v46  ;;  %v4079_v50 = vadd.f32 %v4078_v45, %v3886_v44  ;;  %v3888_v9 = vadd.f32 %v3887_v14, %v13553_v59  ;;  %v13611_v12 = vpack.c.bf16 %v5410_v41, %v5402_v2  ;;  %v5417_v48 = vmax.f32 %v4077_v16, 0.0 }
 0x375   : > { %v3889_v11 = vpop.f32.mrf.mxu0  ;;  %v4082_v57 = vpop.f32.mrf.mxu1 }
 0x376   : > { %18452 = vst [vmem:[#allocation111_spill] sm:$0xff] %v13611_v12  ;;  %v4081_v58 = vadd.f32 %v4080_v52, %v3888_v9  ;;  %v3890_v24 = vadd.f32 %v3889_v11, %v13556_v13  ;;  %v5418_v14 = vmax.f32 %v4079_v50, 0.0 }
 0x377   : > { %v3893_v8 = vpop.f32.mrf.mxu0  ;;  %v4086_v20 = vpop.f32.mrf.mxu1  ;;  %4358 = vmatmul.mubr.bf16.gmra.mxu0 %v18453_v0  ;;  %4551 = vmatmul.mubr.bf16.gmra.mxu1 %v18454_v51 }
 0x378   : > { %v5425_v25 = vmax.f32 %v4081_v58, 0.0  ;;  %v4083_v3 = vadd.f32 %v4082_v57, %v3890_v24  ;;  %v3894_v44 = vadd.f32 %v3893_v8, %v13553_v59  ;;  %4367 = vmatprep.mubr.bf16.mxu0 %v13269_v21  ;;  %4560 = vmatprep.mubr.bf16.mxu1 %v13271_v33 }
 0x379   : > { %v3895_v2 = vpop.f32.mrf.mxu0  ;;  %v4088_v52 = vpop.f32.mrf.mxu1 }
 0x37a   : > { %v13619_v49 = vpack.c.bf16 %v5425_v25, %v5417_v48  ;;  %v5426_v45 = vmax.f32 %v4083_v3, 0.0  ;;  %v4087_v41 = vadd.f32 %v4086_v20, %v3894_v44  ;;  %v3896_v9 = vadd.f32 %v3895_v2, %v13556_v13 }
 0x37b   : > { %v3897_v11 = vpop.f32.mrf.mxu0  ;;  %v4090_v46 = vpop.f32.mrf.mxu1 }
 0x37c   : > { %18455 = vst [vmem:[#allocation101_spill] sm:$0xff] %v13619_v49  ;;  %v4089_v16 = vadd.f32 %v4088_v52, %v3896_v9  ;;  %v3898_v58 = vadd.f32 %v3897_v11, %v13553_v59  ;;  %v13623_v57 = vpack.c.bf16 %v5426_v45, %v5418_v14  ;;  %v5433_v20 = vmax.f32 %v4087_v41, 0.0 }
 0x37d   : > { %v3899_v8 = vpop.f32.mrf.mxu0  ;;  %v4092_v24 = vpop.f32.mrf.mxu1 }
 0x37e   : > { %18456 = vst [vmem:[#allocation102_spill] sm:$0xff] %v13623_v57  ;;  %v4091_v12 = vadd.f32 %v4090_v46, %v3898_v58  ;;  %v3900_v50 = vadd.f32 %v3899_v8, %v13556_v13  ;;  %v5434_v44 = vmax.f32 %v4089_v16, 0.0 }
 0x37f   : > { %v3903_v33 = vpop.f32.mrf.mxu0  ;;  %v4096_v21 = vpop.f32.mrf.mxu1  ;;  %4368 = vmatmul.mubr.bf16.gmra.mxu0 %v13273_v5  ;;  %4561 = vmatmul.mubr.bf16.gmra.mxu1 %v13275_v23 }
 0x380   : > { %v5441_v48 = vmax.f32 %v4091_v12, 0.0  ;;  %v4093_v25 = vadd.f32 %v4092_v24, %v3900_v50  ;;  %v3904_v3 = vadd.f32 %v3903_v33, %v13553_v59  ;;  %4377 = vmatprep.mubr.bf16.mxu0 %v13289_v30  ;;  %4570 = vmatprep.mubr.bf16.mxu1 %v13291_v26 }
 0x381   : > { %v3905_v14 = vpop.f32.mrf.mxu0  ;;  %v4098_v46 = vpop.f32.mrf.mxu1 }
 0x382   : > { %v13631_v2 = vpack.c.bf16 %v5441_v48, %v5433_v20  ;;  %v5442_v52 = vmax.f32 %v4093_v25, 0.0  ;;  %v4097_v45 = vadd.f32 %v4096_v21, %v3904_v3  ;;  %v3906_v9 = vadd.f32 %v3905_v14, %v13556_v13 }
 0x383   : > { %v3907_v11 = vpop.f32.mrf.mxu0  ;;  %v4100_v58 = vpop.f32.mrf.mxu1 }
 0x384   : > { %18457 = vst [vmem:[#allocation112_spill] sm:$0xff] %v13631_v2  ;;  %v4099_v41 = vadd.f32 %v4098_v46, %v3906_v9  ;;  %v3908_v12 = vadd.f32 %v3907_v11, %v13553_v59  ;;  %v13635_v8 = vpack.c.bf16 %v5442_v52, %v5434_v44  ;;  %v5449_v21 = vmax.f32 %v4097_v45, 0.0  ;;  %v2282_v45 = vld [vmem:[%s18106_s7 + $0x198] sm:$0xff] }
 0x385   : > { %v3909_v33 = vpop.f32.mrf.mxu0  ;;  %v4102_v24 = vpop.f32.mrf.mxu1 }
 0x386   : > { %18458 = vst [vmem:[#allocation113_spill] sm:$0xff] %v13635_v8  ;;  %v4101_v50 = vadd.f32 %v4100_v58, %v3908_v12  ;;  %v3910_v16 = vadd.f32 %v3909_v33, %v13556_v13  ;;  %v5450_v14 = vmax.f32 %v4099_v41, 0.0  ;;  %v2410_v41 = vld [vmem:[%s18106_s7 + $0x598] sm:$0xff] }
 0x387   : > { %v3913_v49 = vpop.f32.mrf.mxu0  ;;  %v4106_v57 = vpop.f32.mrf.mxu1  ;;  %4378 = vmatmul.mubr.bf16.gmra.mxu0 %v13293_v40  ;;  %4571 = vmatmul.mubr.bf16.gmra.mxu1 %v13295_v18 }
 0x388   : > { %v5457_v20 = vmax.f32 %v4101_v50, 0.0  ;;  %v4103_v48 = vadd.f32 %v4102_v24, %v3910_v16  ;;  %v3914_v25 = vadd.f32 %v3913_v49, %v13553_v59  ;;  %4613 = vmatprep.mubr.bf16.mxu0 %v12586_v60  ;;  %4806 = vmatprep.mubr.bf16.mxu1 %v12588_v38  ;;  %v2286_v49 = vld [vmem:[%s18106_s7 + $0x1b8] sm:$0xff] }
 0x389   : > { %v13643_v3 = vpop.f32.mrf.mxu0  ;;  %v13645_v44 = vpop.f32.mrf.mxu1  ;;  %v10190_v16 = vcombine.high %v2282_v45, %v2286_v49 }
 0x38a   : > { %v13647_v46 = vpack.c.bf16 %v5457_v20, %v5449_v21  ;;  %v5458_v52 = vmax.f32 %v4103_v48, 0.0  ;;  %v4107_v9 = vadd.f32 %v4106_v57, %v3914_v25  ;;  %v2414_v57 = vld [vmem:[%s18106_s7 + $0x5b8] sm:$0xff] }
 0x38b   : > { %v3917_v11 = vpop.f32.mrf.mxu0  ;;  %v4110_v58 = vpop.f32.mrf.mxu1  ;;  %v2274_v20 = vld [vmem:[%s18106_s7 + $0x158] sm:$0xff] }
 0x38c   : > { %18459 = vst [vmem:[#allocation114_spill] sm:$0xff] %v13647_v46  ;;  %v3918_v12 = vadd.f32 %v3917_v11, %v13553_v59  ;;  %v13662_v33 = vpack.c.bf16 %v5458_v52, %v5450_v14  ;;  %v2278_v48 = vld [vmem:[%s18106_s7 + $0x178] sm:$0xff]  ;;  %v10318_v14 = vcombine.high %v2410_v41, %v2414_v57  ;;  %v5465_v52 = vmax.f32 %v4107_v9, 0.0 }
 0x38d   : > { %v13664_v24 = vpop.f32.mrf.mxu0  ;;  %v13666_v50 = vpop.f32.mrf.mxu1 }
 0x38e   : > { %18460 = vst [vmem:[#allocation115_spill] sm:$0xff] %v13662_v33  ;;  %v4111_v21 = vadd.f32 %v4110_v58, %v3918_v12  ;;  %v18461_v58 = vcombine.low %v13318_v43, %v13323_v39  ;;  %v10189_v12 = vcombine.low %v2282_v45, %v2286_v49  ;;  %v10317_v43 = vcombine.low %v2410_v41, %v2414_v57  ;;  %v2266_v39 = vld [vmem:[%s18106_s7 + $0x118] sm:$0xff] }
 0x38f   : > { %v3923_v25 = vpop.f32.mrf.mxu0  ;;  %v4116_v11 = vpop.f32.mrf.mxu1  ;;  %4614 = vmatmul.mubr.bf16.vlgmr.msra.gmra.mxu0 %v12604_v54  ;;  %4807 = vmatmul.mubr.bf16.vlgmr.msra.gmra.mxu1 %v12606_v4  ;;  %v10182_v54 = vcombine.high %v2274_v20, %v2278_v48  ;;  %v2270_v45 = vld [vmem:[%s18106_s7 + $0x138] sm:$0xff] }
 0x390   : > { %v5473_v2 = vmax.f32 %v4111_v21, 0.0  ;;  %v3924_v8 = vadd.f32 %v3923_v25, %v13553_v59  ;;  %4968 = vmatpush1.bf16.msra.mxu0 %v18461_v58  ;;  %4623 = vmatprep.mubr.bf16.mxu0 %v12690_v6  ;;  %v18462_v21 = vcombine.low %v13367_v34, %v13372_v27  ;;  %v2406_v34 = vld [vmem:[%s18106_s7 + $0x578] sm:$0xff] }
 0x391   : > { %4816 = vmatprep.mubr.bf16.mxu1 %v12692_v19  ;;  %v3925_v46 = vpop.f32.mrf.mxu0  ;;  %v4118_v33 = vpop.f32.mrf.mxu1  ;;  %4969 = vmatprep.subr.bf16.mxu0 %v10190_v16  ;;  %v13704_v41 = vld [vmem:[%s18106_s7 + $0x518] sm:$0xff] }
 0x392   : > { %v13682_v38 = vpack.c.bf16 %v5473_v2, %v5465_v52  ;;  %v4117_v4 = vadd.f32 %v4116_v11, %v3924_v8  ;;  %v3926_v9 = vadd.f32 %v3925_v46, %v13556_v13  ;;  %5161 = vmatpush1.bf16.msra.mxu1 %v18462_v21  ;;  %v2402_v2 = vld [vmem:[%s18106_s7 + $0x558] sm:$0xff]  ;;  %v10181_v46 = vcombine.low %v2274_v20, %v2278_v48 }
 0x393   : > { %v3927_v49 = vpop.f32.mrf.mxu0  ;;  %v4120_v16 = vpop.f32.mrf.mxu1  ;;  %5162 = vmatprep.subr.bf16.mxu1 %v10318_v14  ;;  %v13709_v57 = vld [vmem:[%s18106_s7 + $0x538] sm:$0xff]  ;;  %v10174_v14 = vcombine.high %v2266_v39, %v2270_v45  ;;  %v10310_v58 = vcombine.high %v2402_v2, %v2406_v34  ;;  %v10309_v21 = vcombine.low %v2402_v2, %v2406_v34 }
 0x394   : > { %v4119_v27 = vadd.f32 %v4118_v33, %v3926_v9  ;;  %v3928_v8 = vadd.f32 %v3927_v49, %v13553_v59  ;;  %4970 = vmatpush1.bf16.msra.mxu0 %v10189_v12  ;;  %v2258_v20 = vld [vmem:[%s18106_s7 + $0xd8] sm:$0xff]  ;;  %v5481_v49 = vmax.f32 %v4117_v4, 0.0 }
 0x395   : > { %v3929_v25 = vpop.f32.mrf.mxu0  ;;  %v4122_v11 = vpop.f32.mrf.mxu1  ;;  %4971 = vmatprep.subr.bf16.mxu0 %v10182_v54  ;;  %v2262_v48 = vld [vmem:[%s18106_s7 + $0xf8] sm:$0xff]  ;;  %v10173_v54 = vcombine.low %v2266_v39, %v2270_v45 }
 0x396   : > { %v4121_v52 = vadd.f32 %v4120_v16, %v3928_v8  ;;  %v3930_v33 = vadd.f32 %v3929_v25, %v13556_v13  ;;  %5163 = vmatpush1.bf16.msra.mxu1 %v10317_v43  ;;  %v10302_v43 = vcombine.high %v13704_v41, %v13709_v57  ;;  %v5482_v19 = vmax.f32 %v4119_v27, 0.0  ;;  %v2250_v34 = vld [vmem:[%s18106_s7 + $0x98] sm:$0xff] }
 0x397   : > { %v3933_v12 = vpop.f32.mrf.mxu0  ;;  %v4126_v9 = vpop.f32.mrf.mxu1  ;;  %4624 = vmatmul.mubr.bf16.gmra.mxu0 %v12698_v55  ;;  %4817 = vmatmul.mubr.bf16.gmra.mxu1 %v12700_v42  ;;  %v10166_v42 = vcombine.high %v2258_v20, %v2262_v48  ;;  %v2254_v27 = vld [vmem:[%s18106_s7 + $0xb8] sm:$0xff] }
 0x398   : > { %v5489_v16 = vmax.f32 %v4121_v52, 0.0  ;;  %v4123_v8 = vadd.f32 %v4122_v11, %v3930_v33  ;;  %v3934_v25 = vadd.f32 %v3933_v12, %v13553_v59  ;;  %4972 = vmatpush1.bf16.msra.mxu0 %v10181_v46  ;;  %4633 = vmatprep.mubr.bf16.mxu0 %v12765_v22  ;;  %v10165_v52 = vcombine.low %v2258_v20, %v2262_v48 }
 0x399   : > { %4826 = vmatprep.mubr.bf16.mxu1 %v12767_v15  ;;  %v3935_v6 = vpop.f32.mrf.mxu0  ;;  %v4128_v55 = vpop.f32.mrf.mxu1  ;;  %4973 = vmatprep.subr.bf16.mxu0 %v10174_v14  ;;  %v10158_v20 = vcombine.high %v2250_v34, %v2254_v27 }
 0x39a   : > { %v13725_v39 = vpack.c.bf16 %v5489_v16, %v5481_v49  ;;  %v5490_v45 = vmax.f32 %v4123_v8, 0.0  ;;  %v4127_v2 = vadd.f32 %v4126_v9, %v3934_v25  ;;  %v3936_v4 = vadd.f32 %v3935_v6, %v13556_v13  ;;  %5164 = vmatprep.subr.bf16.mxu1 %v10310_v58  ;;  %v2386_v6 = vld [vmem:[%s18106_s7 + $0x4d8] sm:$0xff] }
 0x39b   : > { %v3937_v46 = vpop.f32.mrf.mxu0  ;;  %v4130_v11 = vpop.f32.mrf.mxu1  ;;  %5165 = vmatpush1.bf16.msra.mxu1 %v10309_v21  ;;  %v2390_v58 = vld [vmem:[%s18106_s7 + $0x4f8] sm:$0xff] }
 0x39c   : > { %18463 = vst [vmem:[#allocation116_spill] sm:$0xff] %v13725_v39  ;;  %v4129_v14 = vadd.f32 %v4128_v55, %v3936_v4  ;;  %v3938_v33 = vadd.f32 %v3937_v46, %v13553_v59  ;;  %4974 = vmatpush1.bf16.msra.mxu0 %v10173_v54  ;;  %5166 = vmatprep.subr.bf16.mxu1 %v10302_v43  ;;  %v2242_v54 = vld [vmem:[%s18106_s7 + $0x58] sm:$0xff]  ;;  %v5497_v25 = vmax.f32 %v4127_v2, 0.0 }
 0x39d   : > { %v13741_v12 = vpack.c.bf16 %v5490_v45, %v5482_v19  ;;  %v3939_v9 = vpop.f32.mrf.mxu0  ;;  %v4132_v49 = vpop.f32.mrf.mxu1  ;;  %4975 = vmatprep.subr.bf16.mxu0 %v10166_v42  ;;  %v2246_v21 = vld [vmem:[%s18106_s7 + $0x78] sm:$0xff]  ;;  %v10301_v43 = vcombine.low %v13704_v41, %v13709_v57  ;;  %v10157_v42 = vcombine.low %v2250_v34, %v2254_v27  ;;  %v10294_v8 = vcombine.high %v2386_v6, %v2390_v58 }
 0x39e   : > { %v4131_v48 = vadd.f32 %v4130_v11, %v3938_v33  ;;  %v3940_v55 = vadd.f32 %v3939_v9, %v13556_v13  ;;  %v5498_v11 = vmax.f32 %v4129_v14, 0.0  ;;  %v10150_v33 = vcombine.high %v2242_v54, %v2246_v21  ;;  %v2238_v14 = vld [vmem:[%s18106_s7 + $0x38] sm:$0xff] }
 0x39f   : > { %18464 = vst [vmem:[#allocation117_spill] sm:$0xff] %v13741_v12  ;;  %v3943_v19 = vpop.f32.mrf.mxu0  ;;  %v4136_v16 = vpop.f32.mrf.mxu1  ;;  %4634 = vmatmul.mubr.bf16.gmra.mxu0 %v12773_v29  ;;  %4827 = vmatmul.mubr.bf16.gmra.mxu1 %v12775_v35  ;;  %v10293_v9 = vcombine.low %v2386_v6, %v2390_v58  ;;  %v2378_v6 = vld [vmem:[%s18106_s7 + $0x498] sm:$0xff] }
 0x3a0   : > { %v5505_v45 = vmax.f32 %v4131_v48, 0.0  ;;  %v4133_v4 = vadd.f32 %v4132_v49, %v3940_v55  ;;  %v3944_v46 = vadd.f32 %v3943_v19, %v13553_v59  ;;  %4976 = vmatpush1.bf16.msra.mxu0 %v10165_v52  ;;  %4643 = vmatprep.mubr.bf16.mxu0 %v12837_v37  ;;  %v2234_v52 = vld [vmem:[%s18106_s7 + $0x18] sm:$0xff]  ;;  %v10149_v19 = vcombine.low %v2242_v54, %v2246_v21 }
 0x3a1   : > { %4836 = vmatprep.mubr.bf16.mxu1 %v12839_v31  ;;  %v3945_v41 = vpop.f32.mrf.mxu0  ;;  %v4138_v57 = vpop.f32.mrf.mxu1  ;;  %4977 = vmatprep.subr.bf16.mxu0 %v10158_v20  ;;  %v2382_v58 = vld [vmem:[%s18106_s7 + $0x4b8] sm:$0xff] }
 0x3a2   : > { %v13757_v39 = vpack.c.bf16 %v5505_v45, %v5497_v25  ;;  %v5506_v34 = vmax.f32 %v4133_v4, 0.0  ;;  %v4137_v27 = vadd.f32 %v4136_v16, %v3944_v46  ;;  %v3946_v2 = vadd.f32 %v3945_v41, %v13556_v13  ;;  %5167 = vmatpush1.bf16.msra.mxu1 %v10301_v43  ;;  %v13776_v43 = vld [vmem:[%s18106_s7 + $0x458] sm:$0xff] }
 0x3a3   : > { %v3947_v49 = vpop.f32.mrf.mxu0  ;;  %v4140_v48 = vpop.f32.mrf.mxu1  ;;  %5168 = vmatprep.subr.bf16.mxu1 %v10294_v8  ;;  %v13781_v16 = vld [vmem:[%s18106_s7 + $0x478] sm:$0xff]  ;;  %v10142_v4 = vcombine.high %v2234_v52, %v2238_v14  ;;  %v10286_v41 = vcombine.high %v2378_v6, %v2382_v58 }
 0x3a4   : > { %18465 = vst [vmem:[#allocation118_spill] sm:$0xff] %v13757_v39  ;;  %v4139_v20 = vadd.f32 %v4138_v57, %v3946_v2  ;;  %v3948_v55 = vadd.f32 %v3947_v49, %v13553_v59  ;;  %4978 = vmatpush1.bf16.msra.mxu0 %v10157_v42  ;;  %v13783_v8 = vpack.c.bf16 %v5506_v34, %v5498_v11  ;;  %v2354_v54 = vld [vmem:[%s18106_s7 + $0x3d8] sm:$0xff]  ;;  %v5513_v49 = vmax.f32 %v4137_v27, 0.0 }
 0x3a5   : > { %v3949_v25 = vpop.f32.mrf.mxu0  ;;  %v4142_v45 = vpop.f32.mrf.mxu1  ;;  %4979 = vmatprep.subr.bf16.mxu0 %v10150_v33  ;;  %v2358_v21 = vld [vmem:[%s18106_s7 + $0x3f8] sm:$0xff]  ;;  %v10141_v33 = vcombine.low %v2234_v52, %v2238_v14  ;;  %v10285_v34 = vcombine.low %v2378_v6, %v2382_v58  ;;  %v10278_v2 = vcombine.high %v13776_v43, %v13781_v16 }
 0x3a6   : > { %18466 = vst [vmem:[#allocation119_spill] sm:$0xff] %v13783_v8  ;;  %v4141_v46 = vadd.f32 %v4140_v48, %v3948_v55  ;;  %v3950_v42 = vadd.f32 %v3949_v25, %v13556_v13  ;;  %5169 = vmatpush1.bf16.msra.mxu1 %v10293_v9  ;;  %v5514_v9 = vmax.f32 %v4139_v20, 0.0  ;;  %v10262_v8 = vcombine.high %v2354_v54, %v2358_v21  ;;  %v2346_v58 = vld [vmem:[%s18106_s7 + $0x398] sm:$0xff] }
 0x3a7   : > { %v3953_v57 = vpop.f32.mrf.mxu0  ;;  %v4146_v11 = vpop.f32.mrf.mxu1  ;;  %4644 = vmatmul.mubr.bf16.gmra.mxu0 %v12845_v7  ;;  %4837 = vmatmul.mubr.bf16.gmra.mxu1 %v12847_v28  ;;  %v2350_v20 = vld [vmem:[%s18106_s7 + $0x3b8] sm:$0xff] }
 0x3a8   : > { %v5521_v48 = vmax.f32 %v4141_v46, 0.0  ;;  %v4143_v55 = vadd.f32 %v4142_v45, %v3950_v42  ;;  %v3954_v25 = vadd.f32 %v3953_v57, %v13553_v59  ;;  %4980 = vmatpush1.bf16.msra.mxu0 %v10149_v19  ;;  %4653 = vmatprep.mubr.bf16.mxu0 %v12909_v1  ;;  %v10261_v46 = vcombine.low %v2354_v54, %v2358_v21  ;;  %v2366_v57 = vld [vmem:[%s18106_s7 + $0x438] sm:$0xff] }
 0x3a9   : > { %4846 = vmatprep.mubr.bf16.mxu1 %v12911_v62  ;;  %v3955_v12 = vpop.f32.mrf.mxu0  ;;  %v4148_v39 = vpop.f32.mrf.mxu1  ;;  %4981 = vmatprep.subr.bf16.mxu0 %v10142_v4  ;;  %v10254_v54 = vcombine.high %v2346_v58, %v2350_v20 }
 0x3aa   : > { %v13799_v52 = vpack.c.bf16 %v5521_v48, %v5513_v49  ;;  %v5522_v14 = vmax.f32 %v4143_v55, 0.0  ;;  %v4147_v6 = vadd.f32 %v4146_v11, %v3954_v25  ;;  %v3956_v27 = vadd.f32 %v3955_v12, %v13556_v13  ;;  %5170 = vmatprep.subr.bf16.mxu1 %v10286_v41  ;;  %v2362_v12 = vld [vmem:[%s18106_s7 + $0x418] sm:$0xff] }
 0x3ab   : > { %v3957_v19 = vpop.f32.mrf.mxu0  ;;  %v4150_v45 = vpop.f32.mrf.mxu1  ;;  %5171 = vmatpush1.bf16.msra.mxu1 %v10285_v34  ;;  %v2342_v34 = vld [vmem:[%s18106_s7 + $0x378] sm:$0xff]  ;;  %v10270_v25 = vcombine.high %v2362_v12, %v2366_v57 }
 0x3ac   : > { %18467 = vst [vmem:[#allocation120_spill] sm:$0xff] %v13799_v52  ;;  %v4149_v4 = vadd.f32 %v4148_v39, %v3956_v27  ;;  %v3958_v42 = vadd.f32 %v3957_v19, %v13553_v59  ;;  %4982 = vmatpush1.bf16.msra.mxu0 %v10141_v33  ;;  %5172 = vmatprep.subr.bf16.mxu1 %v10278_v2  ;;  %v2338_v33 = vld [vmem:[%s18106_s7 + $0x358] sm:$0xff] }
 0x3ad   : > { %v13815_v11 = vpack.c.bf16 %v5522_v14, %v5514_v9  ;;  %v3959_v41 = vpop.f32.mrf.mxu0  ;;  %v4152_v49 = vpop.f32.mrf.mxu1  ;;  %4983 = vmatprep.subr.bf16.mxu0 %v10262_v8  ;;  %v10277_v2 = vcombine.low %v13776_v43, %v13781_v16  ;;  %v10253_v8 = vcombine.low %v2346_v58, %v2350_v20  ;;  %v5529_v9 = vmax.f32 %v4147_v6, 0.0 }
 0x3ae   : > { %v4151_v21 = vadd.f32 %v4150_v45, %v3958_v42  ;;  %v3960_v39 = vadd.f32 %v3959_v41, %v13556_v13  ;;  %v5530_v45 = vmax.f32 %v4149_v4, 0.0  ;;  %v10246_v42 = vcombine.high %v2338_v33, %v2342_v34  ;;  %v2334_v4 = vld [vmem:[%s18106_s7 + $0x338] sm:$0xff] }
 0x3af   : > { %18468 = vst [vmem:[#allocation121_spill] sm:$0xff] %v13815_v11  ;;  %v3963_v48 = vpop.f32.mrf.mxu0  ;;  %v4156_v55 = vpop.f32.mrf.mxu1  ;;  %4654 = vmatmul.mubr.bf16.gmra.mxu0 %v12917_v10  ;;  %4847 = vmatmul.mubr.bf16.gmra.mxu1 %v12919_v36  ;;  %v10269_v41 = vcombine.low %v2362_v12, %v2366_v57  ;;  %v2482_v12 = vld [vmem:[%s18106_s7 + $0x7d8] sm:$0xff] }
 0x3b0   : > { %v5537_v14 = vmax.f32 %v4151_v21, 0.0  ;;  %v4153_v27 = vadd.f32 %v4152_v49, %v3960_v39  ;;  %v3964_v19 = vadd.f32 %v3963_v48, %v13553_v59  ;;  %4984 = vmatpush2.bf16.msra.mxu0 %v10261_v46  ;;  %4663 = vmatprep.mubr.bf16.mxu0 %v12981_v47  ;;  %v2330_v46 = vld [vmem:[%s18106_s7 + $0x318] sm:$0xff]  ;;  %v10245_v48 = vcombine.low %v2338_v33, %v2342_v34 }
 0x3b1   : > { %4856 = vmatprep.mubr.bf16.mxu1 %v12983_v56  ;;  %v3965_v43 = vpop.f32.mrf.mxu0  ;;  %v4158_v16 = vpop.f32.mrf.mxu1  ;;  %4985 = vmatprep.subr.bf16.mxu0 %v10254_v54  ;;  %v2486_v57 = vld [vmem:[%s18106_s7 + $0x7f8] sm:$0xff] }
 0x3b2   : > { %v13831_v52 = vpack.c.bf16 %v5537_v14, %v5529_v9  ;;  %v5538_v58 = vmax.f32 %v4153_v27, 0.0  ;;  %v4157_v20 = vadd.f32 %v4156_v55, %v3964_v19  ;;  %v3966_v6 = vadd.f32 %v3965_v43, %v13556_v13  ;;  %5173 = vmatpush1.bf16.msra.mxu1 %v10277_v2  ;;  %v13850_v2 = vld [vmem:[%s18106_s7 + $0x798] sm:$0xff] }
 0x3b3   : > { %v3967_v49 = vpop.f32.mrf.mxu0  ;;  %v4160_v21 = vpop.f32.mrf.mxu1  ;;  %5174 = vmatprep.subr.bf16.mxu1 %v10270_v25  ;;  %v13855_v55 = vld [vmem:[%s18106_s7 + $0x7b8] sm:$0xff]  ;;  %v10238_v27 = vcombine.high %v2330_v46, %v2334_v4  ;;  %v10390_v43 = vcombine.high %v2482_v12, %v2486_v57 }
 0x3b4   : > { %18469 = vst [vmem:[#allocation122_spill] sm:$0xff] %v13831_v52  ;;  %v4159_v54 = vadd.f32 %v4158_v16, %v3966_v6  ;;  %v3968_v39 = vadd.f32 %v3967_v49, %v13553_v59  ;;  %4986 = vmatpush2.bf16.msra.mxu0 %v10253_v8  ;;  %v13857_v25 = vpack.c.bf16 %v5538_v58, %v5530_v45  ;;  %v2322_v33 = vld [vmem:[%s18106_s7 + $0x2d8] sm:$0xff]  ;;  %v18471_v58 = vld [vmem:[#allocation70_spill] sm:$0xff] }
 0x3b5   : > { %v3969_v9 = vpop.f32.mrf.mxu0  ;;  %v4162_v14 = vpop.f32.mrf.mxu1  ;;  %4987 = vmatprep.subr.bf16.mxu0 %v10246_v42  ;;  %v2326_v34 = vld [vmem:[%s18106_s7 + $0x2f8] sm:$0xff]  ;;  %v10237_v42 = vcombine.low %v2330_v46, %v2334_v4  ;;  %v10389_v6 = vcombine.low %v2482_v12, %v2486_v57  ;;  %v10382_v49 = vcombine.high %v13850_v2, %v13855_v55 }
 0x3b6   : > { %18470 = vst [vmem:[#allocation123_spill] sm:$0xff] %v13857_v25  ;;  %v4161_v19 = vadd.f32 %v4160_v21, %v3968_v39  ;;  %v3970_v8 = vadd.f32 %v3969_v9, %v13556_v13  ;;  %5175 = vmatpush1.bf16.msra.mxu1 %v10269_v41  ;;  %v5545_v21 = vmax.f32 %v4157_v20, 0.0  ;;  %v18472_v52 = vld [vmem:[#allocation71_spill] sm:$0xff]  ;;  %v5546_v41 = vmax.f32 %v4159_v54, 0.0  ;;  %v18473_v25 = vld [vmem:[#allocation72_spill] sm:$0xff] }
 0x3b7   : > { %v3973_v16 = vpop.f32.mrf.mxu0  ;;  %v4166_v45 = vpop.f32.mrf.mxu1  ;;  %4664 = vmatmul.mubr.bf16.gmra.mxu0 %v18420_v53  ;;  %4857 = vmatmul.mubr.bf16.gmra.mxu1 %v18471_v58  ;;  %v10230_v58 = vcombine.high %v2322_v33, %v2326_v34  ;;  %v2314_v57 = vld [vmem:[%s18106_s7 + $0x298] sm:$0xff] }
 0x3b8   : > { %v5553_v39 = vmax.f32 %v4161_v19, 0.0  ;;  %v4163_v9 = vadd.f32 %v4162_v14, %v3970_v8  ;;  %v3974_v11 = vadd.f32 %v3973_v16, %v13553_v59  ;;  %4988 = vmatpush2.bf16.msra.mxu0 %v10245_v48  ;;  %4673 = vmatprep.mubr.bf16.mxu0 %v18472_v52  ;;  %v2318_v54 = vld [vmem:[%s18106_s7 + $0x2b8] sm:$0xff]  ;;  %v10229_v19 = vcombine.low %v2322_v33, %v2326_v34 }
 0x3b9   : > { %4866 = vmatprep.mubr.bf16.mxu1 %v18473_v25  ;;  %v3975_v56 = vpop.f32.mrf.mxu0  ;;  %v4168_v53 = vpop.f32.mrf.mxu1  ;;  %4989 = vmatprep.subr.bf16.mxu0 %v10238_v27  ;;  %v10222_v33 = vcombine.high %v2314_v57, %v2318_v54 }
 0x3ba   : > { %v13873_v46 = vpack.c.bf16 %v5553_v39, %v5545_v21  ;;  %v5554_v4 = vmax.f32 %v4163_v9, 0.0  ;;  %v4167_v12 = vadd.f32 %v4166_v45, %v3974_v11  ;;  %v3976_v20 = vadd.f32 %v3975_v56, %v13556_v13  ;;  %5176 = vmatprep.subr.bf16.mxu1 %v10390_v43  ;;  %v2466_v56 = vld [vmem:[%s18106_s7 + $0x758] sm:$0xff] }
 0x3bb   : > { %v3977_v48 = vpop.f32.mrf.mxu0  ;;  %v4170_v14 = vpop.f32.mrf.mxu1  ;;  %5177 = vmatpush2.bf16.msra.mxu1 %v10389_v6  ;;  %v2470_v11 = vld [vmem:[%s18106_s7 + $0x778] sm:$0xff]  ;;  %v10221_v9 = vcombine.low %v2314_v57, %v2318_v54 }
 0x3bc   : > { %v4169_v27 = vadd.f32 %v4168_v53, %v3976_v20  ;;  %v3978_v8 = vadd.f32 %v3977_v48, %v13553_v59  ;;  %4990 = vmatpush2.bf16.msra.mxu0 %v10237_v42  ;;  %5178 = vmatprep.subr.bf16.mxu1 %v10382_v49  ;;  %v13889_v16 = vpack.c.bf16 %v5554_v4, %v5546_v41  ;;  %v13895_v42 = vld [vmem:[%s18106_s7 + $0x258] sm:$0xff]  ;;  %v5561_v4 = vmax.f32 %v4167_v12, 0.0 }
 0x3bd   : > { %v3979_v43 = vpop.f32.mrf.mxu0  ;;  %v4172_v45 = vpop.f32.mrf.mxu1  ;;  %4991 = vmatprep.subr.bf16.mxu0 %v10230_v58  ;;  %v13900_v6 = vld [vmem:[%s18106_s7 + $0x278] sm:$0xff]  ;;  %v10381_v49 = vcombine.low %v13850_v2, %v13855_v55  ;;  %v3920_v58 = vadd.f32 %v13664_v24, %v13556_v13  ;;  %v10374_v41 = vcombine.high %v2466_v56, %v2470_v11  ;;  %v3916_v2 = vadd.f32 %v13643_v3, %v13556_v13  ;;  %v18474_v55 = vld [vmem:[#allocation76_spill] sm:$0xff] }
 0x3be   : > { %v4171_v34 = vadd.f32 %v4170_v14, %v3978_v8  ;;  %v3980_v53 = vadd.f32 %v3979_v43, %v13556_v13  ;;  %v5562_v24 = vmax.f32 %v4169_v27, 0.0  ;;  %v10214_v57 = vcombine.high %v13895_v42, %v13900_v6  ;;  %v2298_v3 = vld [vmem:[%s18106_s7 + $0x218] sm:$0xff] }
 0x3bf   : > { %v3983_v21 = vpop.f32.mrf.mxu0  ;;  %v4176_v39 = vpop.f32.mrf.mxu1  ;;  %4674 = vmatmul.mubr.bf16.gmra.mxu0 %v18424_v17  ;;  %4867 = vmatmul.mubr.bf16.gmra.mxu1 %v18425_v63  ;;  %v10373_v12 = vcombine.low %v2466_v56, %v2470_v11  ;;  %v2302_v27 = vld [vmem:[%s18106_s7 + $0x238] sm:$0xff] }
 0x3c0   : > { %v5569_v20 = vmax.f32 %v4171_v34, 0.0  ;;  %v4173_v48 = vadd.f32 %v4172_v45, %v3980_v53  ;;  %v3984_v14 = vadd.f32 %v3983_v21, %v13553_v59  ;;  %4992 = vmatpush2.bf16.msra.mxu0 %v10229_v19  ;;  %4683 = vmatprep.mubr.bf16.mxu0 %v13119_v32  ;;  %v2458_v56 = vld [vmem:[%s18106_s7 + $0x718] sm:$0xff] }
 0x3c1   : > { %4876 = vmatprep.mubr.bf16.mxu1 %v18474_v55  ;;  %v3985_v8 = vpop.f32.mrf.mxu0  ;;  %v4178_v43 = vpop.f32.mrf.mxu1  ;;  %4993 = vmatprep.subr.bf16.mxu0 %v10222_v33  ;;  %v4113_v33 = vadd.f32 %v13666_v50, %v3920_v58  ;;  %v2462_v11 = vld [vmem:[%s18106_s7 + $0x738] sm:$0xff]  ;;  %v18475_v55 = vld [vmem:[#allocation78_spill] sm:$0xff] }
 0x3c2   : > { %v13915_v54 = vpack.c.bf16 %v5569_v20, %v5561_v4  ;;  %v5570_v45 = vmax.f32 %v4173_v48, 0.0  ;;  %v4177_v34 = vadd.f32 %v4176_v39, %v3984_v14  ;;  %v3986_v19 = vadd.f32 %v3985_v8, %v13556_v13  ;;  %5179 = vmatpush2.bf16.msra.mxu1 %v10381_v49  ;;  %v13937_v50 = vld [vmem:[%s18106_s7 + $0x6d8] sm:$0xff] }
 0x3c3   : > { %v3987_v53 = vpop.f32.mrf.mxu0  ;;  %v4180_v21 = vpop.f32.mrf.mxu1  ;;  %5180 = vmatprep.subr.bf16.mxu1 %v10374_v41  ;;  %v10213_v49 = vcombine.low %v13895_v42, %v13900_v6  ;;  %v13942_v58 = vld [vmem:[%s18106_s7 + $0x6f8] sm:$0xff]  ;;  %v4109_v20 = vadd.f32 %v13645_v44, %v3916_v2  ;;  %v10366_v6 = vcombine.high %v2458_v56, %v2462_v11 }
 0x3c4   : > { %v4179_v39 = vadd.f32 %v4178_v43, %v3986_v19  ;;  %v3988_v4 = vadd.f32 %v3987_v53, %v13553_v59  ;;  %4994 = vmatpush2.bf16.msra.mxu0 %v10221_v9  ;;  %v13944_v41 = vpack.c.bf16 %v5570_v45, %v5562_v24  ;;  %v10206_v9 = vcombine.high %v2298_v3, %v2302_v27 }
 0x3c5   : > { %v3989_v48 = vpop.f32.mrf.mxu0  ;;  %v4182_v14 = vpop.f32.mrf.mxu1  ;;  %4995 = vmatprep.subr.bf16.mxu0 %v10214_v57  ;;  %v5474_v43 = vmax.f32 %v4113_v33, 0.0  ;;  %v10205_v24 = vcombine.low %v2298_v3, %v2302_v27  ;;  %v10365_v45 = vcombine.low %v2458_v56, %v2462_v11  ;;  %v10358_v44 = vcombine.high %v13937_v50, %v13942_v58 }
 0x3c6   : > { %v4181_v8 = vadd.f32 %v4180_v21, %v3988_v4  ;;  %v3990_v42 = vadd.f32 %v3989_v48, %v13556_v13  ;;  %5181 = vmatpush2.bf16.msra.mxu1 %v10373_v12  ;;  %v5577_v2 = vmax.f32 %v4177_v34, 0.0  ;;  %v18476_v12 = vld [vmem:[#allocation79_spill] sm:$0xff]  ;;  %v5466_v33 = vmax.f32 %v4109_v20, 0.0  ;;  %v18477_v48 = vld [vmem:[#allocation80_spill] sm:$0xff] }
 0x3c7   : > { %v3993_v19 = vpop.f32.mrf.mxu0  ;;  %v4186_v53 = vpop.f32.mrf.mxu1  ;;  %4684 = vmatmul.mubr.bf16.gmra.mxu0 %v13126_v61  ;;  %4877 = vmatmul.mubr.bf16.gmra.mxu1 %v18475_v55  ;;  %v5578_v4 = vmax.f32 %v4179_v39, 0.0  ;;  %v18479_v39 = vld [vmem:[#allocation60_spill] sm:$0xff] }
 0x3c8   : > { %v5585_v57 = vmax.f32 %v4181_v8, 0.0  ;;  %v4183_v32 = vadd.f32 %v4182_v14, %v3990_v42  ;;  %v3994_v21 = vadd.f32 %v3993_v19, %v13553_v59  ;;  %4996 = vmatpush2.bf16.msra.mxu0 %v10213_v49  ;;  %4693 = vmatprep.mubr.bf16.mxu0 %v18476_v12  ;;  %v5666_v8 = vpack.c.bf16 %v5474_v43, %v5466_v33  ;;  %v13961_v49 = vld [vmem:[%s18107_s8] sm:$0xff] }
 0x3c9   : > { %4886 = vmatprep.mubr.bf16.mxu1 %v18477_v48  ;;  %v3995_v61 = vpop.f32.mrf.mxu0  ;;  %v4188_v63 = vpop.f32.mrf.mxu1  ;;  %4997 = vmatprep.subr.bf16.mxu0 %v10206_v9  ;;  %18478 = vst [vmem:[#allocation71_spill] sm:$0xff] %v13961_v49  ;;  %v13965_v20 = vrot.slane %v13961_v49, %v18479_v39 }
 0x3ca   : > { %v13955_v3 = vpack.c.bf16 %v5585_v57, %v5577_v2  ;;  %v5586_v27 = vmax.f32 %v4183_v32, 0.0  ;;  %v4187_v56 = vadd.f32 %v4186_v53, %v3994_v21  ;;  %v3996_v34 = vadd.f32 %v3995_v61, %v13556_v13  ;;  %5182 = vmatprep.subr.bf16.mxu1 %v10366_v6  ;;  %v2442_v32 = vld [vmem:[%s18106_s7 + $0x698] sm:$0xff] }
 0x3cb   : > { %v3997_v11 = vpop.f32.mrf.mxu0  ;;  %v4190_v14 = vpop.f32.mrf.mxu1  ;;  %5183 = vmatpush2.bf16.msra.mxu1 %v10365_v45  ;;  %v2446_v61 = vld [vmem:[%s18106_s7 + $0x6b8] sm:$0xff]  ;;  %v10357_v53 = vcombine.low %v13937_v50, %v13942_v58  ;;  %v18482_v50 = vld [vmem:[#allocation82_spill] sm:$0xff] }
 0x3cc   : > { %v4189_v9 = vadd.f32 %v4188_v63, %v3996_v34  ;;  %v3998_v42 = vadd.f32 %v3997_v11, %v13553_v59  ;;  %4998 = vmatpush2.bf16.msra.mxu0 %v10205_v24  ;;  %5184 = vmatprep.subr.bf16.mxu1 %v10358_v44  ;;  %v13974_v6 = vpack.c.bf16 %v5586_v27, %v5578_v4  ;;  %v18480_v57 = vld [vmem:[#allocation59_spill] sm:$0xff]  ;;  %v18481_v4 = vld [vmem:[#allocation81_spill] sm:$0xff] }
 0x3cd   : > { %5737 = vmatprep.subr.bf16.mxu0 %v5666_v8  ;;  %v3999_v43 = vpop.f32.mrf.mxu0  ;;  %v4192_v19 = vpop.f32.mrf.mxu1  ;;  %v13981_v21 = vrot.slane %v13961_v49, %v18480_v57  ;;  %v10350_v63 = vcombine.high %v2442_v32, %v2446_v61  ;;  %v2434_v59 = vld [vmem:[%s18106_s7 + $0x658] sm:$0xff]  ;;  %v10349_v57 = vcombine.low %v2442_v32, %v2446_v61 }
 0x3ce   : > { %v4191_v45 = vadd.f32 %v4190_v14, %v3998_v42  ;;  %v4000_v2 = vadd.f32 %v3999_v43, %v13556_v13  ;;  %v2438_v24 = vld [vmem:[%s18106_s7 + $0x678] sm:$0xff]  ;;  %v5593_v13 = vmax.f32 %v4187_v56, 0.0  ;;  %v18484_v14 = vld [vmem:[#allocation84_spill] sm:$0xff]  ;;  %v5594_v8 = vmax.f32 %v4189_v9, 0.0 }
 0x3cf   : > { %v4229_v44 = vpop.f32.mrf.mxu0  ;;  %v4422_v33 = vpop.f32.mrf.mxu1  ;;  %4694 = vmatmul.mubr.bf16.gmra.mxu0 %v18481_v4  ;;  %4887 = vmatmul.mubr.bf16.gmra.mxu1 %v18482_v50  ;;  %v18483_v11 = vld [vmem:[#allocation83_spill] sm:$0xff]  ;;  %v10342_v39 = vcombine.high %v2434_v59, %v2438_v24 }
 0x3d0   : > { %v5601_v58 = vmax.f32 %v4191_v45, 0.0  ;;  %v4193_v27 = vadd.f32 %v4192_v19, %v4000_v2  ;;  %v4230_v34 = vadd.f32 %v4229_v44, %v13965_v20  ;;  %4703 = vmatprep.mubr.bf16.mxu0 %v18483_v11  ;;  %4896 = vmatprep.mubr.bf16.mxu1 %v18484_v14  ;;  %v2426_v2 = vld [vmem:[%s18106_s7 + $0x618] sm:$0xff]  ;;  %v18485_v14 = vld [vmem:[#allocation85_spill] sm:$0xff]  ;;  %v18486_v11 = vld [vmem:[#allocation86_spill] sm:$0xff] }
 0x3d1   : > { %v4231_v42 = vpop.f32.mrf.mxu0  ;;  %v4424_v43 = vpop.f32.mrf.mxu1  ;;  %5185 = vmatpush2.bf16.msra.mxu1 %v10357_v53  ;;  %v2430_v9 = vld [vmem:[%s18106_s7 + $0x638] sm:$0xff] }
 0x3d2   : > { %v13994_v49 = vpack.c.bf16 %v5601_v58, %v5593_v13  ;;  %v5602_v4 = vmax.f32 %v4193_v27, 0.0  ;;  %v4423_v48 = vadd.f32 %v4422_v33, %v4230_v34  ;;  %v4232_v56 = vadd.f32 %v4231_v42, %v13981_v21  ;;  %5186 = vmatprep.subr.bf16.mxu1 %v10350_v63 }
 0x3d3   : > { %v4233_v19 = vpop.f32.mrf.mxu0  ;;  %v4426_v45 = vpop.f32.mrf.mxu1  ;;  %v10341_v13 = vcombine.low %v2434_v59, %v2438_v24  ;;  %v10334_v27 = vcombine.high %v2426_v2, %v2430_v9 }
 0x3d4   : > { %v4425_v53 = vadd.f32 %v4424_v43, %v4232_v56  ;;  %v4234_v32 = vadd.f32 %v4233_v19, %v13965_v20  ;;  %v14004_v61 = vpack.c.bf16 %v5602_v4, %v5594_v8  ;;  %v5355_v43 = vmax.f32 %v4423_v48, 0.0  ;;  %v18487_v8 = vld [vmem:[#allocation87_spill] sm:$0xff] }
 0x3d5   : > { %v4235_v44 = vpop.f32.mrf.mxu0  ;;  %v4428_v33 = vpop.f32.mrf.mxu1  ;;  %5187 = vmatpush2.bf16.msra.mxu1 %v10349_v57  ;;  %v18488_v57 = vld [vmem:[#allocation88_spill] sm:$0xff] }
 0x3d6   : > { %v4427_v63 = vadd.f32 %v4426_v45, %v4234_v32  ;;  %v4236_v58 = vadd.f32 %v4235_v44, %v13981_v21  ;;  %5188 = vmatprep.subr.bf16.mxu1 %v10342_v39  ;;  %v5356_v59 = vmax.f32 %v4425_v53, 0.0  ;;  %v10333_v39 = vcombine.low %v2426_v2, %v2430_v9 }
 0x3d7   : > { %v4239_v34 = vpop.f32.mrf.mxu0  ;;  %v4432_v42 = vpop.f32.mrf.mxu1  ;;  %4704 = vmatmul.mubr.bf16.gmra.mxu0 %v18485_v14  ;;  %4897 = vmatmul.mubr.bf16.gmra.mxu1 %v18486_v11 }
 0x3d8   : > { %v5363_v56 = vmax.f32 %v4427_v63, 0.0  ;;  %v4429_v19 = vadd.f32 %v4428_v33, %v4236_v58  ;;  %v4240_v4 = vadd.f32 %v4239_v34, %v13965_v20  ;;  %4713 = vmatprep.mubr.bf16.mxu0 %v18487_v8  ;;  %4906 = vmatprep.mubr.bf16.mxu1 %v18488_v57 }
 0x3d9   : > { %v4241_v24 = vpop.f32.mrf.mxu0  ;;  %v4434_v45 = vpop.f32.mrf.mxu1  ;;  %5189 = vmatpush2.bf16.msra.mxu1 %v10341_v13 }
 0x3da   : > { %v14012_v32 = vpack.c.bf16 %v5363_v56, %v5355_v43  ;;  %v5364_v44 = vmax.f32 %v4429_v19, 0.0  ;;  %v4433_v14 = vadd.f32 %v4432_v42, %v4240_v4  ;;  %v4242_v11 = vadd.f32 %v4241_v24, %v13981_v21  ;;  %5190 = vmatprep.subr.bf16.mxu1 %v10334_v27  ;;  %v18491_v43 = vld [vmem:[#allocation89_spill] sm:$0xff]  ;;  %v18492_v42 = vld [vmem:[#allocation90_spill] sm:$0xff]  ;;  %v18493_v4 = vld [vmem:[#allocation91_spill] sm:$0xff] }
 0x3db   : > { %v4243_v48 = vpop.f32.mrf.mxu0  ;;  %v4436_v33 = vpop.f32.mrf.mxu1 }
 0x3dc   : > { %18489 = vst [vmem:[#allocation72_spill] sm:$0xff] %v14012_v32  ;;  %v4435_v63 = vadd.f32 %v4434_v45, %v4242_v11  ;;  %v4244_v58 = vadd.f32 %v4243_v48, %v13965_v20  ;;  %v14016_v34 = vpack.c.bf16 %v5364_v44, %v5356_v59  ;;  %v5371_v27 = vmax.f32 %v4433_v14, 0.0  ;;  %v18494_v59 = vld [vmem:[#allocation92_spill] sm:$0xff] }
 0x3dd   : > { %v4245_v57 = vpop.f32.mrf.mxu0  ;;  %v4438_v53 = vpop.f32.mrf.mxu1  ;;  %5191 = vmatpush2.bf16.msra.mxu1 %v10333_v39 }
 0x3de   : > { %18490 = vst [vmem:[#allocation78_spill] sm:$0xff] %v14016_v34  ;;  %v4437_v8 = vadd.f32 %v4436_v33, %v4244_v58  ;;  %v4246_v2 = vadd.f32 %v4245_v57, %v13981_v21  ;;  %v5372_v24 = vmax.f32 %v4435_v63, 0.0 }
 0x3df   : > { %v4249_v9 = vpop.f32.mrf.mxu0  ;;  %v4442_v13 = vpop.f32.mrf.mxu1  ;;  %4714 = vmatmul.mubr.bf16.gmra.mxu0 %v18491_v43  ;;  %4907 = vmatmul.mubr.bf16.gmra.mxu1 %v18492_v42 }
 0x3e0   : > { %v5379_v56 = vmax.f32 %v4437_v8, 0.0  ;;  %v4439_v19 = vadd.f32 %v4438_v53, %v4246_v2  ;;  %v4250_v11 = vadd.f32 %v4249_v9, %v13965_v20  ;;  %4723 = vmatprep.mubr.bf16.mxu0 %v18493_v4  ;;  %4916 = vmatprep.mubr.bf16.mxu1 %v18494_v59 }
 0x3e1   : > { %v4251_v45 = vpop.f32.mrf.mxu0  ;;  %v4444_v39 = vpop.f32.mrf.mxu1 }
 0x3e2   : > { %v14024_v44 = vpack.c.bf16 %v5379_v56, %v5371_v27  ;;  %v5380_v57 = vmax.f32 %v4439_v19, 0.0  ;;  %v4443_v48 = vadd.f32 %v4442_v13, %v4250_v11  ;;  %v4252_v33 = vadd.f32 %v4251_v45, %v13981_v21  ;;  %v18497_v27 = vld [vmem:[#allocation93_spill] sm:$0xff]  ;;  %v18498_v56 = vld [vmem:[#allocation94_spill] sm:$0xff] }
 0x3e3   : > { %v4253_v58 = vpop.f32.mrf.mxu0  ;;  %v4446_v32 = vpop.f32.mrf.mxu1 }
 0x3e4   : > { %18495 = vst [vmem:[#allocation79_spill] sm:$0xff] %v14024_v44  ;;  %v4445_v14 = vadd.f32 %v4444_v39, %v4252_v33  ;;  %v4254_v8 = vadd.f32 %v4253_v58, %v13965_v20  ;;  %v14028_v53 = vpack.c.bf16 %v5380_v57, %v5372_v24  ;;  %v5387_v13 = vmax.f32 %v4443_v48, 0.0  ;;  %v18499_v39 = vld [vmem:[#allocation95_spill] sm:$0xff]  ;;  %v18500_v24 = vld [vmem:[#allocation96_spill] sm:$0xff] }
 0x3e5   : > { %v4255_v2 = vpop.f32.mrf.mxu0  ;;  %v4448_v9 = vpop.f32.mrf.mxu1 }
 0x3e6   : > { %18496 = vst [vmem:[#allocation82_spill] sm:$0xff] %v14028_v53  ;;  %v4447_v34 = vadd.f32 %v4446_v32, %v4254_v8  ;;  %v4256_v63 = vadd.f32 %v4255_v2, %v13981_v21  ;;  %v5388_v57 = vmax.f32 %v4445_v14, 0.0 }
 0x3e7   : > { %v4259_v59 = vpop.f32.mrf.mxu0  ;;  %v4452_v4 = vpop.f32.mrf.mxu1  ;;  %4724 = vmatmul.mubr.bf16.gmra.mxu0 %v18497_v27  ;;  %4917 = vmatmul.mubr.bf16.gmra.mxu1 %v18498_v56 }
 0x3e8   : > { %v5395_v19 = vmax.f32 %v4447_v34, 0.0  ;;  %v4449_v11 = vadd.f32 %v4448_v9, %v4256_v63  ;;  %v4260_v45 = vadd.f32 %v4259_v59, %v13965_v20  ;;  %4733 = vmatprep.mubr.bf16.mxu0 %v18499_v39  ;;  %4926 = vmatprep.mubr.bf16.mxu1 %v18500_v24 }
 0x3e9   : > { %v4261_v33 = vpop.f32.mrf.mxu0  ;;  %v4454_v32 = vpop.f32.mrf.mxu1 }
 0x3ea   : > { %v14036_v58 = vpack.c.bf16 %v5395_v19, %v5387_v13  ;;  %v5396_v8 = vmax.f32 %v4449_v11, 0.0  ;;  %v4453_v2 = vadd.f32 %v4452_v4, %v4260_v45  ;;  %v4262_v44 = vadd.f32 %v4261_v33, %v13981_v21  ;;  %v18503_v13 = vld [vmem:[#allocation97_spill] sm:$0xff]  ;;  %v18504_v19 = vld [vmem:[#allocation98_spill] sm:$0xff]  ;;  %v18505_v33 = vld [vmem:[#allocation99_spill] sm:$0xff] }
 0x3eb   : > { %v4263_v53 = vpop.f32.mrf.mxu0  ;;  %v4456_v56 = vpop.f32.mrf.mxu1 }
 0x3ec   : > { %18501 = vst [vmem:[#allocation89_spill] sm:$0xff] %v14036_v58  ;;  %v4455_v48 = vadd.f32 %v4454_v32, %v4262_v44  ;;  %v4264_v34 = vadd.f32 %v4263_v53, %v13965_v20  ;;  %v14040_v9 = vpack.c.bf16 %v5396_v8, %v5388_v57  ;;  %v5403_v4 = vmax.f32 %v4453_v2, 0.0  ;;  %v18506_v53 = vld [vmem:[#allocation100_spill] sm:$0xff] }
 0x3ed   : > { %v4265_v59 = vpop.f32.mrf.mxu0  ;;  %v4458_v63 = vpop.f32.mrf.mxu1 }
 0x3ee   : > { %18502 = vst [vmem:[#allocation90_spill] sm:$0xff] %v14040_v9  ;;  %v4457_v39 = vadd.f32 %v4456_v56, %v4264_v34  ;;  %v4266_v14 = vadd.f32 %v4265_v59, %v13981_v21  ;;  %v5404_v57 = vmax.f32 %v4455_v48, 0.0 }
 0x3ef   : > { %v4269_v24 = vpop.f32.mrf.mxu0  ;;  %v4462_v27 = vpop.f32.mrf.mxu1  ;;  %4734 = vmatmul.mubr.bf16.gmra.mxu0 %v18503_v13  ;;  %4927 = vmatmul.mubr.bf16.gmra.mxu1 %v18504_v19 }
 0x3f0   : > { %v5411_v11 = vmax.f32 %v4457_v39, 0.0  ;;  %v4459_v45 = vadd.f32 %v4458_v63, %v4266_v14  ;;  %v4270_v44 = vadd.f32 %v4269_v24, %v13965_v20  ;;  %4743 = vmatprep.mubr.bf16.mxu0 %v18505_v33  ;;  %4936 = vmatprep.mubr.bf16.mxu1 %v18506_v53 }
 0x3f1   : > { %v4271_v32 = vpop.f32.mrf.mxu0  ;;  %v4464_v56 = vpop.f32.mrf.mxu1 }
 0x3f2   : > { %v14048_v8 = vpack.c.bf16 %v5411_v11, %v5403_v4  ;;  %v5412_v34 = vmax.f32 %v4459_v45, 0.0  ;;  %v4463_v59 = vadd.f32 %v4462_v27, %v4270_v44  ;;  %v4272_v58 = vadd.f32 %v4271_v32, %v13981_v21  ;;  %v18509_v45 = vld [vmem:[#allocation103_spill] sm:$0xff] }
 0x3f3   : > { %v4273_v9 = vpop.f32.mrf.mxu0  ;;  %v4466_v19 = vpop.f32.mrf.mxu1 }
 0x3f4   : > { %18507 = vst [vmem:[#allocation124_spill] sm:$0xff] %v14048_v8  ;;  %v4465_v2 = vadd.f32 %v4464_v56, %v4272_v58  ;;  %v4274_v39 = vadd.f32 %v4273_v9, %v13965_v20  ;;  %v14052_v63 = vpack.c.bf16 %v5412_v34, %v5404_v57  ;;  %v5419_v27 = vmax.f32 %v4463_v59, 0.0  ;;  %v18510_v9 = vld [vmem:[#allocation104_spill] sm:$0xff] }
 0x3f5   : > { %v4275_v24 = vpop.f32.mrf.mxu0  ;;  %v4468_v14 = vpop.f32.mrf.mxu1 }
 0x3f6   : > { %18508 = vst [vmem:[#allocation125_spill] sm:$0xff] %v14052_v63  ;;  %v4467_v33 = vadd.f32 %v4466_v19, %v4274_v39  ;;  %v4276_v48 = vadd.f32 %v4275_v24, %v13981_v21  ;;  %v5420_v44 = vmax.f32 %v4465_v2, 0.0 }
 0x3f7   : > { %v4279_v53 = vpop.f32.mrf.mxu0  ;;  %v4472_v13 = vpop.f32.mrf.mxu1  ;;  %4744 = vmatmul.mubr.bf16.gmra.mxu0 %v18453_v0  ;;  %4937 = vmatmul.mubr.bf16.gmra.mxu1 %v18454_v51 }
 0x3f8   : > { %v5427_v4 = vmax.f32 %v4467_v33, 0.0  ;;  %v4469_v11 = vadd.f32 %v4468_v14, %v4276_v48  ;;  %v4280_v58 = vadd.f32 %v4279_v53, %v13965_v20  ;;  %4753 = vmatprep.mubr.bf16.mxu0 %v18509_v45  ;;  %4946 = vmatprep.mubr.bf16.mxu1 %v18510_v9 }
 0x3f9   : > { %v4281_v57 = vpop.f32.mrf.mxu0  ;;  %v4474_v19 = vpop.f32.mrf.mxu1 }
 0x3fa   : > { %v14060_v32 = vpack.c.bf16 %v5427_v4, %v5419_v27  ;;  %v5428_v56 = vmax.f32 %v4469_v11, 0.0  ;;  %v4473_v34 = vadd.f32 %v4472_v13, %v4280_v58  ;;  %v4282_v39 = vadd.f32 %v4281_v57, %v13981_v21 }
 0x3fb   : > { %v4283_v24 = vpop.f32.mrf.mxu0  ;;  %v4476_v8 = vpop.f32.mrf.mxu1 }
 0x3fc   : > { %18511 = vst [vmem:[#allocation126_spill] sm:$0xff] %v14060_v32  ;;  %v4475_v59 = vadd.f32 %v4474_v19, %v4282_v39  ;;  %v4284_v33 = vadd.f32 %v4283_v24, %v13965_v20  ;;  %v14064_v14 = vpack.c.bf16 %v5428_v56, %v5420_v44  ;;  %v5435_v13 = vmax.f32 %v4473_v34, 0.0 }
 0x3fd   : > { %v4285_v53 = vpop.f32.mrf.mxu0  ;;  %v4478_v48 = vpop.f32.mrf.mxu1 }
 0x3fe   : > { %18512 = vst [vmem:[#allocation127_spill] sm:$0xff] %v14064_v14  ;;  %v4477_v63 = vadd.f32 %v4476_v8, %v4284_v33  ;;  %v4286_v2 = vadd.f32 %v4285_v53, %v13981_v21  ;;  %v5436_v58 = vmax.f32 %v4475_v59, 0.0 }
 0x3ff   : > { %v4289_v9 = vpop.f32.mrf.mxu0  ;;  %v4482_v45 = vpop.f32.mrf.mxu1  ;;  %4754 = vmatmul.mubr.bf16.gmra.mxu0 %v13273_v5  ;;  %4947 = vmatmul.mubr.bf16.gmra.mxu1 %v13275_v23 }
 0x400   : > { %v5443_v27 = vmax.f32 %v4477_v63, 0.0  ;;  %v4479_v4 = vadd.f32 %v4478_v48, %v4286_v2  ;;  %v4290_v11 = vadd.f32 %v4289_v9, %v13965_v20  ;;  %4763 = vmatprep.mubr.bf16.mxu0 %v13289_v30  ;;  %4956 = vmatprep.mubr.bf16.mxu1 %v13291_v26 }
 0x401   : > { %v4291_v44 = vpop.f32.mrf.mxu0  ;;  %v4484_v8 = vpop.f32.mrf.mxu1 }
 0x402   : > { %v14072_v57 = vpack.c.bf16 %v5443_v27, %v5435_v13  ;;  %v5444_v19 = vmax.f32 %v4479_v4, 0.0  ;;  %v4483_v56 = vadd.f32 %v4482_v45, %v4290_v11  ;;  %v4292_v39 = vadd.f32 %v4291_v44, %v13981_v21  ;;  %v18515_v11 = vld [vmem:[#allocation61_spill] sm:$0xff] }
 0x403   : > { %v4293_v24 = vpop.f32.mrf.mxu0  ;;  %v4486_v33 = vpop.f32.mrf.mxu1 }
 0x404   : > { %18513 = vst [vmem:[#allocation128_spill] sm:$0xff] %v14072_v57  ;;  %v4485_v34 = vadd.f32 %v4484_v8, %v4292_v39  ;;  %v4294_v63 = vadd.f32 %v4293_v24, %v13965_v20  ;;  %v14076_v53 = vpack.c.bf16 %v5444_v19, %v5436_v58  ;;  %v5451_v45 = vmax.f32 %v4483_v56, 0.0  ;;  %v18523_v57 = vld [vmem:[#allocation114_spill] sm:$0xff] }
 0x405   : > { %v4295_v9 = vpop.f32.mrf.mxu0  ;;  %v4488_v48 = vpop.f32.mrf.mxu1 }
 0x406   : > { %18514 = vst [vmem:[#allocation129_spill] sm:$0xff] %v14076_v53  ;;  %v4487_v2 = vadd.f32 %v4486_v33, %v4294_v63  ;;  %v4296_v59 = vadd.f32 %v4295_v9, %v13981_v21  ;;  %v5452_v8 = vmax.f32 %v4485_v34, 0.0  ;;  %v18519_v34 = vld [vmem:[#allocation63_spill] sm:$0xff] }
 0x407   : > { %v4299_v32 = vpop.f32.mrf.mxu0  ;;  %v4492_v14 = vpop.f32.mrf.mxu1  ;;  %4764 = vmatmul.mubr.bf16.gmra.mxu0 %v13293_v40  ;;  %4957 = vmatmul.mubr.bf16.gmra.mxu1 %v13295_v18 }
 0x408   : > { %v5459_v13 = vmax.f32 %v4487_v2, 0.0  ;;  %v4489_v27 = vadd.f32 %v4488_v48, %v4296_v59  ;;  %v4300_v4 = vadd.f32 %v4299_v32, %v13965_v20  ;;  %4999 = vmatprep.mubr.bf16.mxu0 %v12586_v60  ;;  %5192 = vmatprep.mubr.bf16.mxu1 %v18515_v11  ;;  %v18518_v11 = vld [vmem:[#allocation62_spill] sm:$0xff] }
 0x409   : > { %v14084_v58 = vpop.f32.mrf.mxu0  ;;  %v14086_v44 = vpop.f32.mrf.mxu1 }
 0x40a   : > { %v14088_v19 = vpack.c.bf16 %v5459_v13, %v5451_v45  ;;  %v5460_v39 = vmax.f32 %v4489_v27, 0.0  ;;  %v4493_v24 = vadd.f32 %v4492_v14, %v4300_v4  ;;  %v18520_v27 = vld [vmem:[#allocation64_spill] sm:$0xff]  ;;  %v18521_v4 = vld [vmem:[#allocation65_spill] sm:$0xff] }
 0x40b   : > { %v4303_v33 = vpop.f32.mrf.mxu0  ;;  %v4496_v63 = vpop.f32.mrf.mxu1 }
 0x40c   : > { %18516 = vst [vmem:[#allocation61_spill] sm:$0xff] %v14088_v19  ;;  %v4304_v56 = vadd.f32 %v4303_v33, %v13965_v20  ;;  %v14091_v9 = vpack.c.bf16 %v5460_v39, %v5452_v8  ;;  %v5467_v45 = vmax.f32 %v4493_v24, 0.0  ;;  %v18522_v8 = vld [vmem:[#allocation115_spill] sm:$0xff] }
 0x40d   : > { %v14093_v32 = vpop.f32.mrf.mxu0  ;;  %v14095_v60 = vpop.f32.mrf.mxu1 }
 0x40e   : > { %18517 = vst [vmem:[#allocation130_spill] sm:$0xff] %v14091_v9  ;;  %v4497_v48 = vadd.f32 %v4496_v63, %v4304_v56 }
 0x40f   : > { %v4309_v2 = vpop.f32.mrf.mxu0  ;;  %v4502_v59 = vpop.f32.mrf.mxu1  ;;  %5000 = vmatmul.mubr.bf16.vlgmr.msra.gmra.mxu0 %v18518_v11  ;;  %5193 = vmatmul.mubr.bf16.vlgmr.msra.gmra.mxu1 %v18519_v34 }
 0x410   : > { %v5475_v13 = vmax.f32 %v4497_v48, 0.0  ;;  %v4310_v14 = vadd.f32 %v4309_v2, %v13965_v20  ;;  %5738 = vmatpush1.bf16.msra.mxu0 %v13682_v38  ;;  %5009 = vmatprep.mubr.bf16.mxu0 %v18520_v27  ;;  %v18524_v38 = vld [vmem:[#allocation113_spill] sm:$0xff] }
 0x411   : > { %5202 = vmatprep.mubr.bf16.mxu1 %v18521_v4  ;;  %5739 = vmatprep.subr.bf16.mxu0 %v18522_v8  ;;  %v4311_v39 = vpop.f32.mrf.mxu0  ;;  %v4504_v33 = vpop.f32.mrf.mxu1 }
 0x412   : > { %v14104_v63 = vpack.c.bf16 %v5475_v13, %v5467_v45  ;;  %v4503_v56 = vadd.f32 %v4502_v59, %v4310_v14  ;;  %v4312_v11 = vadd.f32 %v4311_v39, %v13981_v21  ;;  %v18525_v13 = vld [vmem:[#allocation66_spill] sm:$0xff]  ;;  %v18526_v59 = vld [vmem:[#allocation67_spill] sm:$0xff] }
 0x413   : > { %v4313_v34 = vpop.f32.mrf.mxu0  ;;  %v4506_v24 = vpop.f32.mrf.mxu1 }
 0x414   : > { %v4505_v48 = vadd.f32 %v4504_v33, %v4312_v11  ;;  %v4314_v2 = vadd.f32 %v4313_v34, %v13965_v20  ;;  %5740 = vmatpush1.bf16.msra.mxu0 %v18523_v57  ;;  %v5483_v14 = vmax.f32 %v4503_v56, 0.0  ;;  %v18527_v34 = vld [vmem:[#allocation112_spill] sm:$0xff] }
 0x415   : > { %5741 = vmatprep.subr.bf16.mxu0 %v18524_v38  ;;  %v4315_v27 = vpop.f32.mrf.mxu0  ;;  %v4508_v4 = vpop.f32.mrf.mxu1 }
 0x416   : > { %v4507_v53 = vadd.f32 %v4506_v24, %v4314_v2  ;;  %v4316_v8 = vadd.f32 %v4315_v27, %v13981_v21  ;;  %v5484_v57 = vmax.f32 %v4505_v48, 0.0  ;;  %v18528_v24 = vld [vmem:[#allocation102_spill] sm:$0xff] }
 0x417   : > { %v4319_v19 = vpop.f32.mrf.mxu0  ;;  %v4512_v45 = vpop.f32.mrf.mxu1  ;;  %5010 = vmatmul.mubr.bf16.gmra.mxu0 %v18525_v13  ;;  %5203 = vmatmul.mubr.bf16.gmra.mxu1 %v18526_v59 }
 0x418   : > { %v5491_v39 = vmax.f32 %v4507_v53, 0.0  ;;  %v4509_v33 = vadd.f32 %v4508_v4, %v4316_v8  ;;  %v4320_v11 = vadd.f32 %v4319_v19, %v13965_v20  ;;  %5742 = vmatpush1.bf16.msra.mxu0 %v18527_v34  ;;  %5019 = vmatprep.mubr.bf16.mxu0 %v12765_v22  ;;  %v18530_v34 = vld [vmem:[#allocation101_spill] sm:$0xff] }
 0x419   : > { %5212 = vmatprep.mubr.bf16.mxu1 %v12767_v15  ;;  %5743 = vmatprep.subr.bf16.mxu0 %v18528_v24  ;;  %v4321_v2 = vpop.f32.mrf.mxu0  ;;  %v4514_v38 = vpop.f32.mrf.mxu1  ;;  %v18532_v15 = vld [vmem:[#allocation111_spill] sm:$0xff] }
 0x41a   : > { %v14118_v27 = vpack.c.bf16 %v5491_v39, %v5483_v14  ;;  %v5492_v13 = vmax.f32 %v4509_v33, 0.0  ;;  %v4513_v59 = vadd.f32 %v4512_v45, %v4320_v11  ;;  %v4322_v53 = vadd.f32 %v4321_v2, %v13981_v21 }
 0x41b   : > { %v4323_v56 = vpop.f32.mrf.mxu0  ;;  %v4516_v4 = vpop.f32.mrf.mxu1 }
 0x41c   : > { %18529 = vst [vmem:[#allocation62_spill] sm:$0xff] %v14118_v27  ;;  %v4515_v19 = vadd.f32 %v4514_v38, %v4322_v53  ;;  %v4324_v8 = vadd.f32 %v4323_v56, %v13965_v20  ;;  %5744 = vmatpush1.bf16.msra.mxu0 %v18530_v34  ;;  %v14123_v22 = vpack.c.bf16 %v5492_v13, %v5484_v57  ;;  %v5499_v33 = vmax.f32 %v4513_v59, 0.0  ;;  %v18533_v57 = vld [vmem:[#allocation110_spill] sm:$0xff]  ;;  %v18534_v53 = vld [vmem:[#allocation109_spill] sm:$0xff] }
 0x41d   : > { %5745 = vmatprep.subr.bf16.mxu0 %v18532_v15  ;;  %v4325_v48 = vpop.f32.mrf.mxu0  ;;  %v4518_v24 = vpop.f32.mrf.mxu1 }
 0x41e   : > { %18531 = vst [vmem:[#allocation63_spill] sm:$0xff] %v14123_v22  ;;  %v4517_v9 = vadd.f32 %v4516_v4, %v4324_v8  ;;  %v4326_v14 = vadd.f32 %v4325_v48, %v13981_v21  ;;  %v5500_v13 = vmax.f32 %v4515_v19, 0.0 }
 0x41f   : > { %v4329_v39 = vpop.f32.mrf.mxu0  ;;  %v4522_v45 = vpop.f32.mrf.mxu1  ;;  %5020 = vmatmul.mubr.bf16.gmra.mxu0 %v12773_v29  ;;  %5213 = vmatmul.mubr.bf16.gmra.mxu1 %v12775_v35 }
 0x420   : > { %v5507_v11 = vmax.f32 %v4517_v9, 0.0  ;;  %v4519_v2 = vadd.f32 %v4518_v24, %v4326_v14  ;;  %v4330_v38 = vadd.f32 %v4329_v39, %v13965_v20  ;;  %5746 = vmatpush1.bf16.msra.mxu0 %v18533_v57  ;;  %5029 = vmatprep.mubr.bf16.mxu0 %v12837_v37  ;;  %v18536_v24 = vld [vmem:[#allocation108_spill] sm:$0xff] }
 0x421   : > { %5222 = vmatprep.mubr.bf16.mxu1 %v12839_v31  ;;  %5747 = vmatprep.subr.bf16.mxu0 %v18534_v53  ;;  %v4331_v56 = vpop.f32.mrf.mxu0  ;;  %v4524_v4 = vpop.f32.mrf.mxu1  ;;  %v18538_v31 = vld [vmem:[#allocation107_spill] sm:$0xff] }
 0x422   : > { %v14134_v8 = vpack.c.bf16 %v5507_v11, %v5499_v33  ;;  %v5508_v29 = vmax.f32 %v4519_v2, 0.0  ;;  %v4523_v35 = vadd.f32 %v4522_v45, %v4330_v38  ;;  %v4332_v9 = vadd.f32 %v4331_v56, %v13981_v21 }
 0x423   : > { %v4333_v59 = vpop.f32.mrf.mxu0  ;;  %v4526_v34 = vpop.f32.mrf.mxu1 }
 0x424   : > { %18535 = vst [vmem:[#allocation64_spill] sm:$0xff] %v14134_v8  ;;  %v4525_v15 = vadd.f32 %v4524_v4, %v4332_v9  ;;  %v4334_v48 = vadd.f32 %v4333_v59, %v13965_v20  ;;  %5748 = vmatpush1.bf16.msra.mxu0 %v18536_v24  ;;  %v14139_v37 = vpack.c.bf16 %v5508_v29, %v5500_v13  ;;  %v5515_v2 = vmax.f32 %v4523_v35, 0.0  ;;  %v18539_v13 = vld [vmem:[#allocation106_spill] sm:$0xff]  ;;  %v18540_v4 = vld [vmem:[#allocation105_spill] sm:$0xff] }
 0x425   : > { %5749 = vmatprep.subr.bf16.mxu0 %v18538_v31  ;;  %v4335_v19 = vpop.f32.mrf.mxu0  ;;  %v4528_v14 = vpop.f32.mrf.mxu1 }
 0x426   : > { %18537 = vst [vmem:[#allocation65_spill] sm:$0xff] %v14139_v37  ;;  %v4527_v39 = vadd.f32 %v4526_v34, %v4334_v48  ;;  %v4336_v33 = vadd.f32 %v4335_v19, %v13981_v21  ;;  %v5516_v56 = vmax.f32 %v4525_v15, 0.0  ;;  %v18542_v19 = vld [vmem:[#allocation73_spill] sm:$0xff] }
 0x427   : > { %v4339_v11 = vpop.f32.mrf.mxu0  ;;  %v4532_v45 = vpop.f32.mrf.mxu1  ;;  %5030 = vmatmul.mubr.bf16.gmra.mxu0 %v12845_v7  ;;  %5223 = vmatmul.mubr.bf16.gmra.mxu1 %v12847_v28 }
 0x428   : > { %v5523_v38 = vmax.f32 %v4527_v39, 0.0  ;;  %v4529_v57 = vadd.f32 %v4528_v14, %v4336_v33  ;;  %v4340_v53 = vadd.f32 %v4339_v11, %v13965_v20  ;;  %5750 = vmatpush1.bf16.msra.mxu0 %v18539_v13  ;;  %5039 = vmatprep.mubr.bf16.mxu0 %v12909_v1 }
 0x429   : > { %5232 = vmatprep.mubr.bf16.mxu1 %v12911_v62  ;;  %5751 = vmatprep.subr.bf16.mxu0 %v18540_v4  ;;  %v4341_v29 = vpop.f32.mrf.mxu0  ;;  %v4534_v9 = vpop.f32.mrf.mxu1 }
 0x42a   : > { %v14150_v59 = vpack.c.bf16 %v5523_v38, %v5515_v2  ;;  %v5524_v7 = vmax.f32 %v4529_v57, 0.0  ;;  %v4533_v28 = vadd.f32 %v4532_v45, %v4340_v53  ;;  %v4342_v35 = vadd.f32 %v4341_v29, %v13981_v21  ;;  %v18544_v53 = vld [vmem:[#allocation68_spill] sm:$0xff] }
 0x42b   : > { %v4343_v34 = vpop.f32.mrf.mxu0  ;;  %v4536_v48 = vpop.f32.mrf.mxu1 }
 0x42c   : > { %18541 = vst [vmem:[#allocation115_spill] sm:$0xff] %v14150_v59  ;;  %v4535_v24 = vadd.f32 %v4534_v9, %v4342_v35  ;;  %v4344_v31 = vadd.f32 %v4343_v34, %v13965_v20  ;;  %5752 = vmatpush1.bf16.msra.mxu0 %v18542_v19  ;;  %v14155_v1 = vpack.c.bf16 %v5524_v7, %v5516_v56  ;;  %v5531_v45 = vmax.f32 %v4533_v28, 0.0  ;;  %v18547_v19 = vld [vmem:[#allocation69_spill] sm:$0xff] }
 0x42d   : > { %5753 = vmatprep.subr.bf16.mxu0 %v14004_v61  ;;  %v4345_v62 = vpop.f32.mrf.mxu0  ;;  %v4538_v15 = vpop.f32.mrf.mxu1 }
 0x42e   : > { %18543 = vst [vmem:[#allocation114_spill] sm:$0xff] %v14155_v1  ;;  %v4537_v14 = vadd.f32 %v4536_v48, %v4344_v31  ;;  %v4346_v39 = vadd.f32 %v4345_v62, %v13981_v21  ;;  %v5532_v61 = vmax.f32 %v4535_v24, 0.0  ;;  %v18548_v62 = vld [vmem:[#allocation70_spill] sm:$0xff] }
 0x42f   : > { %v4349_v33 = vpop.f32.mrf.mxu0  ;;  %v4542_v11 = vpop.f32.mrf.mxu1  ;;  %5040 = vmatmul.mubr.bf16.gmra.mxu0 %v12917_v10  ;;  %5233 = vmatmul.mubr.bf16.gmra.mxu1 %v12919_v36 }
 0x430   : > { %v5539_v2 = vmax.f32 %v4537_v14, 0.0  ;;  %v4539_v38 = vadd.f32 %v4538_v15, %v4346_v39  ;;  %v4350_v57 = vadd.f32 %v4349_v33, %v13965_v20  ;;  %5754 = vmatpush2.bf16.msra.mxu0 %v13994_v49  ;;  %5049 = vmatprep.mubr.bf16.mxu0 %v12981_v47 }
 0x431   : > { %5242 = vmatprep.mubr.bf16.mxu1 %v18544_v53  ;;  %5755 = vmatprep.subr.bf16.mxu0 %v13974_v6  ;;  %v4351_v13 = vpop.f32.mrf.mxu0  ;;  %v4544_v56 = vpop.f32.mrf.mxu1 }
 0x432   : > { %v14166_v4 = vpack.c.bf16 %v5539_v2, %v5531_v45  ;;  %v5540_v10 = vmax.f32 %v4539_v38, 0.0  ;;  %v4543_v36 = vadd.f32 %v4542_v11, %v4350_v57  ;;  %v4352_v29 = vadd.f32 %v4351_v13, %v13981_v21 }
 0x433   : > { %v4353_v9 = vpop.f32.mrf.mxu0  ;;  %v4546_v7 = vpop.f32.mrf.mxu1 }
 0x434   : > { %18545 = vst [vmem:[#allocation113_spill] sm:$0xff] %v14166_v4  ;;  %v4545_v28 = vadd.f32 %v4544_v56, %v4352_v29  ;;  %v4354_v49 = vadd.f32 %v4353_v9, %v13965_v20  ;;  %5756 = vmatpush2.bf16.msra.mxu0 %v13955_v3  ;;  %v14171_v47 = vpack.c.bf16 %v5540_v10, %v5532_v61  ;;  %v5547_v15 = vmax.f32 %v4543_v36, 0.0 }
 0x435   : > { %5757 = vmatprep.subr.bf16.mxu0 %v13944_v41  ;;  %v4355_v6 = vpop.f32.mrf.mxu0  ;;  %v4548_v35 = vpop.f32.mrf.mxu1  ;;  %v4306_v29 = vadd.f32 %v14093_v32, %v13981_v21  ;;  %v18555_v32 = vld [vmem:[#allocation76_spill] sm:$0xff]  ;;  %v18307_v4 = vmov 1065369472  }
 0x436   : > { %18546 = vst [vmem:[#allocation66_spill] sm:$0xff] %v14171_v47  ;;  %v4547_v34 = vadd.f32 %v4546_v7, %v4354_v49  ;;  %v4356_v48 = vadd.f32 %v4355_v6, %v13981_v21  ;;  %v5548_v41 = vmax.f32 %v4545_v28, 0.0  ;;  %v18552_v28 = vld [vmem:[#allocation74_spill] sm:$0xff] }
 0x437   : > { %v4359_v24 = vpop.f32.mrf.mxu0  ;;  %v4552_v31 = vpop.f32.mrf.mxu1  ;;  %5050 = vmatmul.mubr.bf16.gmra.mxu0 %v18547_v19  ;;  %5243 = vmatmul.mubr.bf16.gmra.mxu1 %v18548_v62  ;;  %v18556_v19 = vld [vmem:[#allocation121_spill] sm:$0xff] }
 0x438   : > { %v5555_v14 = vmax.f32 %v4547_v34, 0.0  ;;  %v4549_v39 = vadd.f32 %v4548_v35, %v4356_v48  ;;  %v4360_v3 = vadd.f32 %v4359_v24, %v13965_v20  ;;  %5758 = vmatpush2.bf16.msra.mxu0 %v13915_v54  ;;  %5059 = vmatprep.mubr.bf16.mxu0 %v18472_v52  ;;  %v18553_v34 = vld [vmem:[#allocation122_spill] sm:$0xff]  ;;  %v18554_v48 = vld [vmem:[#allocation75_spill] sm:$0xff]  ;;  %v4302_v24 = vadd.f32 %v14084_v58, %v13981_v21 }
 0x439   : > { %5252 = vmatprep.mubr.bf16.mxu1 %v18473_v25  ;;  %5759 = vmatprep.subr.bf16.mxu0 %v13889_v16  ;;  %v4361_v33 = vpop.f32.mrf.mxu0  ;;  %v4554_v11 = vpop.f32.mrf.mxu1  ;;  %v18551_v25 = vld [vmem:[#allocation123_spill] sm:$0xff] }
 0x43a   : > { %v14182_v45 = vpack.c.bf16 %v5555_v14, %v5547_v15  ;;  %v5556_v2 = vmax.f32 %v4549_v39, 0.0  ;;  %v4553_v38 = vadd.f32 %v4552_v31, %v4360_v3  ;;  %v4362_v57 = vadd.f32 %v4361_v33, %v13981_v21 }
 0x43b   : > { %v4363_v61 = vpop.f32.mrf.mxu0  ;;  %v4556_v53 = vpop.f32.mrf.mxu1 }
 0x43c   : > { %18549 = vst [vmem:[#allocation67_spill] sm:$0xff] %v14182_v45  ;;  %v4555_v13 = vadd.f32 %v4554_v11, %v4362_v57  ;;  %v4364_v54 = vadd.f32 %v4363_v61, %v13965_v20  ;;  %5760 = vmatpush2.bf16.msra.mxu0 %v13873_v46  ;;  %v14187_v52 = vpack.c.bf16 %v5556_v2, %v5548_v41  ;;  %v5563_v49 = vmax.f32 %v4553_v38, 0.0  ;;  %v18558_v38 = vld [vmem:[#allocation120_spill] sm:$0xff] }
 0x43d   : > { %5761 = vmatprep.subr.bf16.mxu0 %v18551_v25  ;;  %v4365_v16 = vpop.f32.mrf.mxu0  ;;  %v4558_v56 = vpop.f32.mrf.mxu1  ;;  %v4499_v41 = vadd.f32 %v14095_v60, %v4306_v29  ;;  %v4495_v61 = vadd.f32 %v14086_v44, %v4302_v24  ;;  %v18562_v29 = vld [vmem:[#allocation24_spill] sm:$0xff] }
 0x43e   : > { %18550 = vst [vmem:[#allocation112_spill] sm:$0xff] %v14187_v52  ;;  %v4557_v10 = vadd.f32 %v4556_v53, %v4364_v54  ;;  %v4366_v36 = vadd.f32 %v4365_v16, %v13981_v21  ;;  %v5564_v31 = vmax.f32 %v4555_v13, 0.0  ;;  %v18560_v53 = vld [vmem:[#allocation119_spill] sm:$0xff] }
 0x43f   : > { %v4369_v9 = vpop.f32.mrf.mxu0  ;;  %v4562_v7 = vpop.f32.mrf.mxu1  ;;  %5060 = vmatmul.mubr.bf16.gmra.mxu0 %v18424_v17  ;;  %5253 = vmatmul.mubr.bf16.gmra.mxu1 %v18552_v28 }
 0x440   : > { %v5571_v46 = vmax.f32 %v4557_v10, 0.0  ;;  %v4559_v6 = vadd.f32 %v4558_v56, %v4366_v36  ;;  %v4370_v35 = vadd.f32 %v4369_v9, %v13965_v20  ;;  %5762 = vmatpush2.bf16.msra.mxu0 %v18553_v34  ;;  %5069 = vmatprep.mubr.bf16.mxu0 %v18554_v48  ;;  %v5476_v56 = vmax.f32 %v4499_v41, 0.0  ;;  %v18561_v36 = vld [vmem:[#allocation77_spill] sm:$0xff]  ;;  %v18564_v34 = vld [vmem:[#allocation80_spill] sm:$0xff] }
 0x441   : > { %5262 = vmatprep.mubr.bf16.mxu1 %v18555_v32  ;;  %5763 = vmatprep.subr.bf16.mxu0 %v18556_v19  ;;  %v4371_v17 = vpop.f32.mrf.mxu0  ;;  %v4564_v62 = vpop.f32.mrf.mxu1  ;;  %v2507_v9 = vsub.s32 4, %v18562_v29  ;;  %v18565_v48 = vld [vmem:[#allocation117_spill] sm:$0xff] }
 0x442   : > { %v14202_v15 = vpack.c.bf16 %v5571_v46, %v5563_v49  ;;  %v5572_v14 = vmax.f32 %v4559_v6, 0.0  ;;  %v4563_v39 = vadd.f32 %v4562_v7, %v4370_v35  ;;  %v4372_v3 = vadd.f32 %v4371_v17, %v13981_v21  ;;  %v18563_v46 = vld [vmem:[#allocation118_spill] sm:$0xff] }
 0x443   : > { %v4373_v33 = vpop.f32.mrf.mxu0  ;;  %v4566_v11 = vpop.f32.mrf.mxu1  ;;  %v5468_v6 = vmax.f32 %v4495_v61, 0.0 }
 0x444   : > { %18557 = vst [vmem:[#allocation102_spill] sm:$0xff] %v14202_v15  ;;  %v4565_v2 = vadd.f32 %v4564_v62, %v4372_v3  ;;  %v4374_v58 = vadd.f32 %v4373_v33, %v13965_v20  ;;  %5764 = vmatpush2.bf16.msra.mxu0 %v18558_v38  ;;  %v14208_v57 = vpack.c.bf16 %v5572_v14, %v5564_v31  ;;  %v5579_v7 = vmax.f32 %v4563_v39, 0.0  ;;  %v18567_v33 = vld [vmem:[#allocation116_spill] sm:$0xff] }
 0x445   : > { %5765 = vmatprep.subr.bf16.mxu0 %v18560_v53  ;;  %v4375_v13 = vpop.f32.mrf.mxu0  ;;  %v4568_v54 = vpop.f32.mrf.mxu1  ;;  %v5668_v3 = vpack.c.bf16 %v5476_v56, %v5468_v6  ;;  %v18570_v56 = vld [vmem:[#allocation81_spill] sm:$0xff] }
 0x446   : > { %18559 = vst [vmem:[#allocation101_spill] sm:$0xff] %v14208_v57  ;;  %v4567_v25 = vadd.f32 %v4566_v11, %v4374_v58  ;;  %v4376_v16 = vadd.f32 %v4375_v13, %v13981_v21  ;;  %v5580_v35 = vmax.f32 %v4565_v2, 0.0  ;;  %v18568_v11 = vld [vmem:[#allocation71_spill] sm:$0xff] }
 0x447   : > { %v4379_v60 = vpop.f32.mrf.mxu0  ;;  %v4572_v10 = vpop.f32.mrf.mxu1  ;;  %5070 = vmatmul.mubr.bf16.gmra.mxu0 %v18561_v36  ;;  %5263 = vmatmul.mubr.bf16.gmra.mxu1 %v18475_v55  ;;  %v2511_v55 = vsub.s32 5, %v18562_v29  ;;  %v14228_v2 = vrot.slane %v18568_v11, %v2507_v9  ;;  %v18571_v9 = vld [vmem:[#allocation83_spill] sm:$0xff] }
 0x448   : > { %v5587_v28 = vmax.f32 %v4567_v25, 0.0  ;;  %v4569_v49 = vadd.f32 %v4568_v54, %v4376_v16  ;;  %v4380_v44 = vadd.f32 %v4379_v60, %v13965_v20  ;;  %5766 = vmatpush2.bf16.msra.mxu0 %v18563_v46  ;;  %5079 = vmatprep.mubr.bf16.mxu0 %v18476_v12 }
 0x449   : > { %5272 = vmatprep.mubr.bf16.mxu1 %v18564_v34  ;;  %5767 = vmatprep.subr.bf16.mxu0 %v18565_v48  ;;  %v4381_v24 = vpop.f32.mrf.mxu0  ;;  %v4574_v31 = vpop.f32.mrf.mxu1  ;;  %v14234_v54 = vrot.slane %v18568_v11, %v2511_v55 }
 0x44a   : > { %v14222_v32 = vpack.c.bf16 %v5587_v28, %v5579_v7  ;;  %v5588_v19 = vmax.f32 %v4569_v49, 0.0  ;;  %v4573_v17 = vadd.f32 %v4572_v10, %v4380_v44  ;;  %v4382_v62 = vadd.f32 %v4381_v24, %v13981_v21  ;;  %v18572_v7 = vld [vmem:[#allocation84_spill] sm:$0xff] }
 0x44b   : > { %v4383_v14 = vpop.f32.mrf.mxu0  ;;  %v4576_v39 = vpop.f32.mrf.mxu1 }
 0x44c   : > { %18566 = vst [vmem:[#allocation111_spill] sm:$0xff] %v14222_v32  ;;  %v4575_v12 = vadd.f32 %v4574_v31, %v4382_v62  ;;  %v4384_v41 = vadd.f32 %v4383_v14, %v13965_v20  ;;  %5768 = vmatpush2.bf16.msra.mxu0 %v18567_v33  ;;  %v14230_v58 = vpack.c.bf16 %v5588_v19, %v5580_v35  ;;  %v5595_v20 = vmax.f32 %v4573_v17, 0.0 }
 0x44d   : > { %5778 = vmatprep.subr.bf16.mxu0 %v5668_v3  ;;  %v4385_v38 = vpop.f32.mrf.mxu0  ;;  %v4578_v61 = vpop.f32.mrf.mxu1  ;;  %v18575_v3 = vld [vmem:[#allocation85_spill] sm:$0xff] }
 0x44e   : > { %18569 = vst [vmem:[#allocation110_spill] sm:$0xff] %v14230_v58  ;;  %v4577_v53 = vadd.f32 %v4576_v39, %v4384_v41  ;;  %v4386_v13 = vadd.f32 %v4385_v38, %v13981_v21  ;;  %v5596_v28 = vmax.f32 %v4575_v12, 0.0  ;;  %v18576_v12 = vld [vmem:[#allocation86_spill] sm:$0xff] }
 0x44f   : > { %v4615_v25 = vpop.f32.mrf.mxu0  ;;  %v4808_v16 = vpop.f32.mrf.mxu1  ;;  %5080 = vmatmul.mubr.bf16.gmra.mxu0 %v18570_v56  ;;  %5273 = vmatmul.mubr.bf16.gmra.mxu1 %v18482_v50 }
 0x450   : > { %v5603_v60 = vmax.f32 %v4577_v53, 0.0  ;;  %v4579_v10 = vadd.f32 %v4578_v61, %v4386_v13  ;;  %v4616_v36 = vadd.f32 %v4615_v25, %v14228_v2  ;;  %5089 = vmatprep.mubr.bf16.mxu0 %v18571_v9  ;;  %5282 = vmatprep.mubr.bf16.mxu1 %v18572_v7  ;;  %v18577_v61 = vld [vmem:[#allocation87_spill] sm:$0xff]  ;;  %v18578_v53 = vld [vmem:[#allocation88_spill] sm:$0xff] }
 0x451   : > { %v4617_v21 = vpop.f32.mrf.mxu0  ;;  %v4810_v49 = vpop.f32.mrf.mxu1 }
 0x452   : > { %v14241_v44 = vpack.c.bf16 %v5603_v60, %v5595_v20  ;;  %v5604_v46 = vmax.f32 %v4579_v10, 0.0  ;;  %v4809_v6 = vadd.f32 %v4808_v16, %v4616_v36  ;;  %v4618_v35 = vadd.f32 %v4617_v21, %v14234_v54 }
 0x453   : > { %v4619_v34 = vpop.f32.mrf.mxu0  ;;  %v4812_v50 = vpop.f32.mrf.mxu1 }
 0x454   : > { %18573 = vst [vmem:[#allocation109_spill] sm:$0xff] %v14241_v44  ;;  %v4811_v48 = vadd.f32 %v4810_v49, %v4618_v35  ;;  %v4620_v24 = vadd.f32 %v4619_v34, %v14228_v2  ;;  %v14245_v31 = vpack.c.bf16 %v5604_v46, %v5596_v28  ;;  %v5357_v41 = vmax.f32 %v4809_v6, 0.0 }
 0x455   : > { %v4621_v55 = vpop.f32.mrf.mxu0  ;;  %v4814_v19 = vpop.f32.mrf.mxu1 }
 0x456   : > { %18574 = vst [vmem:[#allocation108_spill] sm:$0xff] %v14245_v31  ;;  %v4813_v17 = vadd.f32 %v4812_v50, %v4620_v24  ;;  %v4622_v62 = vadd.f32 %v4621_v55, %v14234_v54  ;;  %v5358_v13 = vmax.f32 %v4811_v48, 0.0  ;;  %v18594_v31 = vmov 1065369472  }
 0x457   : > { %v4625_v14 = vpop.f32.mrf.mxu0  ;;  %v4818_v39 = vpop.f32.mrf.mxu1  ;;  %5090 = vmatmul.mubr.bf16.gmra.mxu0 %v18575_v3  ;;  %5283 = vmatmul.mubr.bf16.gmra.mxu1 %v18576_v12 }
 0x458   : > { %v5365_v33 = vmax.f32 %v4813_v17, 0.0  ;;  %v4815_v11 = vadd.f32 %v4814_v19, %v4622_v62  ;;  %v4626_v38 = vadd.f32 %v4625_v14, %v14228_v2  ;;  %5099 = vmatprep.mubr.bf16.mxu0 %v18577_v61  ;;  %5292 = vmatprep.mubr.bf16.mxu1 %v18578_v53  ;;  %v18581_v17 = vld [vmem:[#allocation91_spill] sm:$0xff]  ;;  %v18582_v62 = vld [vmem:[#allocation92_spill] sm:$0xff] }
 0x459   : > { %v4627_v25 = vpop.f32.mrf.mxu0  ;;  %v4820_v16 = vpop.f32.mrf.mxu1 }
 0x45a   : > { %v14253_v56 = vpack.c.bf16 %v5365_v33, %v5357_v41  ;;  %v5366_v20 = vmax.f32 %v4815_v11, 0.0  ;;  %v4819_v60 = vadd.f32 %v4818_v39, %v4626_v38  ;;  %v4628_v10 = vadd.f32 %v4627_v25, %v14234_v54  ;;  %v18584_v25 = vld [vmem:[#allocation93_spill] sm:$0xff] }
 0x45b   : > { %v4629_v36 = vpop.f32.mrf.mxu0  ;;  %v4822_v9 = vpop.f32.mrf.mxu1 }
 0x45c   : > { %18579 = vst [vmem:[#allocation107_spill] sm:$0xff] %v14253_v56  ;;  %v4821_v7 = vadd.f32 %v4820_v16, %v4628_v10  ;;  %v4630_v28 = vadd.f32 %v4629_v36, %v14228_v2  ;;  %v14257_v21 = vpack.c.bf16 %v5366_v20, %v5358_v13  ;;  %v5373_v48 = vmax.f32 %v4819_v60, 0.0  ;;  %v18585_v16 = vld [vmem:[#allocation94_spill] sm:$0xff]  ;;  %v18586_v20 = vld [vmem:[#allocation95_spill] sm:$0xff]  ;;  %v18587_v60 = vld [vmem:[#allocation96_spill] sm:$0xff] }
 0x45d   : > { %v4631_v49 = vpop.f32.mrf.mxu0  ;;  %v4824_v46 = vpop.f32.mrf.mxu1 }
 0x45e   : > { %18580 = vst [vmem:[#allocation106_spill] sm:$0xff] %v14257_v21  ;;  %v4823_v6 = vadd.f32 %v4822_v9, %v4630_v28  ;;  %v4632_v35 = vadd.f32 %v4631_v49, %v14234_v54  ;;  %v5374_v3 = vmax.f32 %v4821_v7, 0.0 }
 0x45f   : > { %v4635_v34 = vpop.f32.mrf.mxu0  ;;  %v4828_v50 = vpop.f32.mrf.mxu1  ;;  %5100 = vmatmul.mubr.bf16.gmra.mxu0 %v18491_v43  ;;  %5293 = vmatmul.mubr.bf16.gmra.mxu1 %v18492_v42 }
 0x460   : > { %v5381_v24 = vmax.f32 %v4823_v6, 0.0  ;;  %v4825_v55 = vadd.f32 %v4824_v46, %v4632_v35  ;;  %v4636_v19 = vadd.f32 %v4635_v34, %v14228_v2  ;;  %5109 = vmatprep.mubr.bf16.mxu0 %v18581_v17  ;;  %5302 = vmatprep.mubr.bf16.mxu1 %v18582_v62  ;;  %v18588_v35 = vld [vmem:[#allocation97_spill] sm:$0xff]  ;;  %v18589_v34 = vld [vmem:[#allocation98_spill] sm:$0xff] }
 0x461   : > { %v14265_v14 = vpop.f32.mrf.mxu0  ;;  %v14267_v39 = vpop.f32.mrf.mxu1 }
 0x462   : > { %v14269_v12 = vpack.c.bf16 %v5381_v24, %v5373_v48  ;;  %v5382_v41 = vmax.f32 %v4825_v55, 0.0  ;;  %v14271_v43 = vadd.f32 %v4828_v50, %v4636_v19  ;;  %v18590_v50 = vld [vmem:[#allocation99_spill] sm:$0xff]  ;;  %v18591_v48 = vld [vmem:[#allocation100_spill] sm:$0xff] }
 0x463   : > { %v14273_v42 = vpop.f32.mrf.mxu0  ;;  %v14275_v33 = vpop.f32.mrf.mxu1 }
 0x464   : > { %18583 = vst [vmem:[#allocation105_spill] sm:$0xff] %v14269_v12  ;;  %v14277_v11 = vpack.c.bf16 %v5382_v41, %v5374_v3 }
 0x465   : > { %v4641_v38 = vpop.f32.mrf.mxu0  ;;  %v14279_v61 = vpop.f32.mrf.mxu1 }
 0x466   : > { %v14334_v47 = vadd.f32 %v4641_v38, %v14234_v54 }
 0x467   : > { %v14281_v53 = vpop.f32.mrf.mxu0  ;;  %v14283_v13 = vpop.f32.mrf.mxu1  ;;  %5110 = vmatmul.mubr.bf16.gmra.mxu0 %v18584_v25  ;;  %5303 = vmatmul.mubr.bf16.gmra.mxu1 %v18585_v16  ;;  %v18592_v16 = vld [vmem:[#allocation103_spill] sm:$0xff] }
 0x468   : > { %5119 = vmatprep.mubr.bf16.mxu0 %v18586_v20  ;;  %5312 = vmatprep.mubr.bf16.mxu1 %v18587_v60  ;;  %v18593_v20 = vld [vmem:[#allocation104_spill] sm:$0xff] }
 0x469   : > { %v4647_v10 = vpop.f32.mrf.mxu0  ;;  %v14289_v36 = vpop.f32.mrf.mxu1 }
 0x46a   : > { %v14337_v45 = vadd.f32 %v4647_v10, %v14234_v54 }
 0x46b   : > { %v4649_v9 = vpop.f32.mrf.mxu0  ;;  %v14291_v7 = vpop.f32.mrf.mxu1 }
 0x46d   : > { %v4651_v28 = vpop.f32.mrf.mxu0  ;;  %v14293_v49 = vpop.f32.mrf.mxu1 }
 0x46f   : > { %v14295_v46 = vpop.f32.mrf.mxu0  ;;  %v14297_v6 = vpop.f32.mrf.mxu1  ;;  %5120 = vmatmul.mubr.bf16.gmra.mxu0 %v18588_v35  ;;  %5313 = vmatmul.mubr.bf16.gmra.mxu1 %v18589_v34 }
 0x470   : > { %5129 = vmatprep.mubr.bf16.mxu0 %v18590_v50  ;;  %5322 = vmatprep.mubr.bf16.mxu1 %v18591_v48 }
 0x471   : > { %v4657_v24 = vpop.f32.mrf.mxu0  ;;  %v14303_v55 = vpop.f32.mrf.mxu1 }
 0x473   : > { %v4659_v19 = vpop.f32.mrf.mxu0  ;;  %v14305_v17 = vpop.f32.mrf.mxu1 }
 0x474   : > { %v14348_v38 = vadd.f32 %v4659_v19, %v14228_v2 }
 0x475   : > { %v4661_v62 = vpop.f32.mrf.mxu0  ;;  %v14307_v3 = vpop.f32.mrf.mxu1 }
 0x476   : > { %v4662_v58 = vadd.f32 %v4661_v62, %v14234_v54 }
 0x477   : > { %v14309_v41 = vpop.f32.mrf.mxu0  ;;  %v14311_v25 = vpop.f32.mrf.mxu1  ;;  %5130 = vmatmul.mubr.bf16.gmra.mxu0 %v18453_v0  ;;  %5323 = vmatmul.mubr.bf16.gmra.mxu1 %v18454_v51 }
 0x478   : > { %5139 = vmatprep.mubr.bf16.mxu0 %v18592_v16  ;;  %5332 = vmatprep.mubr.bf16.mxu1 %v18593_v20 }
 0x479   : > { %v4667_v60 = vpop.f32.mrf.mxu0  ;;  %v14317_v35 = vpop.f32.mrf.mxu1 }
 0x47b   : > { %v4669_v34 = vpop.f32.mrf.mxu0  ;;  %v14319_v50 = vpop.f32.mrf.mxu1 }
 0x47d   : > { %v4671_v48 = vpop.f32.mrf.mxu0  ;;  %v4864_v27 = vpop.f32.mrf.mxu1 }
 0x47e   : > { %v4672_v10 = vadd.f32 %v4671_v48, %v14234_v54 }
 0x47f   : > { %v4675_v22 = vpop.f32.mrf.mxu0  ;;  %v14321_v8 = vpop.f32.mrf.mxu1  ;;  %5140 = vmatmul.mubr.bf16.gmra.mxu0 %v13273_v5  ;;  %5333 = vmatmul.mubr.bf16.gmra.mxu1 %v13275_v23 }
 0x480   : > { %5149 = vmatprep.mubr.bf16.mxu0 %v13289_v30  ;;  %5342 = vmatprep.mubr.bf16.mxu1 %v13291_v26  ;;  %v4676_v19 = vadd.f32 %v4675_v22, %v14228_v2 }
 0x481   : > { %v4677_v0 = vpop.f32.mrf.mxu0  ;;  %v4870_v51 = vpop.f32.mrf.mxu1 }
 0x482   : > { %v4678_v57 = vadd.f32 %v4677_v0, %v14234_v54  ;;  %v4668_v0 = vadd.f32 %v4667_v60, %v14234_v54 }
 0x483   : > { %v4679_v16 = vpop.f32.mrf.mxu0  ;;  %v4872_v20 = vpop.f32.mrf.mxu1 }
 0x485   : > { %v4681_v29 = vpop.f32.mrf.mxu0  ;;  %v4874_v37 = vpop.f32.mrf.mxu1 }
 0x486   : > { %v4682_v5 = vadd.f32 %v4681_v29, %v14234_v54  ;;  %v4658_v29 = vadd.f32 %v4657_v24, %v14234_v54 }
 0x487   : > { %v4685_v59 = vpop.f32.mrf.mxu0  ;;  %v4878_v1 = vpop.f32.mrf.mxu1  ;;  %5150 = vmatmul.mubr.bf16.gmra.mxu0 %v13293_v40  ;;  %5343 = vmatmul.mubr.bf16.gmra.mxu1 %v13295_v18  ;;  %v14340_v40 = vadd.f32 %v4649_v9, %v14228_v2  ;;  %v4680_v9 = vadd.f32 %v4679_v16, %v14228_v2 }
 0x488   : > { %5769 = vmatprep.mubr.bf16.mxu0 %v18307_v4  ;;  %5851 = vmatprep.mubr.bf16.mxu1 %v18307_v4  ;;  %v4686_v18 = vadd.f32 %v4685_v59, %v14228_v2  ;;  %v4652_v4 = vadd.f32 %v4651_v28, %v14234_v54  ;;  %v4875_v32 = vadd.f32 %v4874_v37, %v4682_v5 }
 0x489   : > { %v4687_v23 = vpop.f32.mrf.mxu0  ;;  %v4880_v30 = vpop.f32.mrf.mxu1  ;;  %v4871_v37 = vadd.f32 %v4870_v51, %v4678_v57  ;;  %v4869_v51 = vadd.f32 %v14321_v8, %v4676_v19 }
 0x48a   : > { %v4688_v26 = vadd.f32 %v4687_v23, %v14234_v54  ;;  %v4879_v44 = vadd.f32 %v4878_v1, %v4686_v18  ;;  %v5462_v62 = vmax.f32 %v4875_v32, 0.0 }
 0x48b   : > { %v4689_v52 = vpop.f32.mrf.mxu0  ;;  %v4882_v15 = vpop.f32.mrf.mxu1 }
 0x48c   : > { %v4690_v23 = vadd.f32 %v4689_v52, %v14228_v2  ;;  %v4881_v21 = vadd.f32 %v4880_v30, %v4688_v26  ;;  %v4670_v52 = vadd.f32 %v4669_v34, %v14228_v2  ;;  %v18595_v34 = vld [vmem:[#allocation130_spill] sm:$0xff] }
 0x48d   : > { %v4691_v56 = vpop.f32.mrf.mxu0  ;;  %v4884_v59 = vpop.f32.mrf.mxu1 }
 0x48e   : > { %v4883_v28 = vadd.f32 %v4882_v15, %v4690_v23  ;;  %v4692_v24 = vadd.f32 %v4691_v56, %v14234_v54  ;;  %v4865_v15 = vadd.f32 %v4864_v27, %v4672_v10  ;;  %v4873_v56 = vadd.f32 %v4872_v20, %v4680_v9 }
 0x48f   : > { %v4695_v12 = vpop.f32.mrf.mxu0  ;;  %v4888_v48 = vpop.f32.mrf.mxu1  ;;  %5770 = vmatmul.mubr.bf16.vlgmr.msra.gmra.mxu0 %v18594_v31  ;;  %v5470_v30 = vmax.f32 %v4881_v21, 0.0  ;;  %v5469_v27 = vmax.f32 %v4879_v44, 0.0  ;;  %v5454_v23 = vmax.f32 %v4871_v37, 0.0  ;;  %v18597_v21 = vld [vmem:[#allocation61_spill] sm:$0xff] }
 0x490   : > { %v4885_v16 = vadd.f32 %v4884_v59, %v4692_v24  ;;  %v4696_v5 = vadd.f32 %v4695_v12, %v14228_v2  ;;  %5779 = vmatpush1.bf16.msra.mxu0 %v14104_v63  ;;  %5810 = vmatprep.mubr.bf16.mxu0 %v18594_v31  ;;  %v5477_v60 = vmax.f32 %v4883_v28, 0.0  ;;  %v4666_v12 = vadd.f32 %v14309_v41, %v14228_v2 }
 0x491   : > { %5780 = vmatprep.subr.bf16.mxu0 %v18595_v34  ;;  %v4697_v22 = vpop.f32.mrf.mxu0  ;;  %v4890_v1 = vpop.f32.mrf.mxu1  ;;  %v4861_v63 = vadd.f32 %v14317_v35, %v4668_v0  ;;  %v4855_v28 = vadd.f32 %v14307_v3, %v4662_v58  ;;  %v4863_v24 = vadd.f32 %v14319_v50, %v4670_v52  ;;  %v5461_v41 = vmax.f32 %v4873_v56, 0.0  ;;  %v18598_v35 = vld [vmem:[#allocation129_spill] sm:$0xff] }
 0x492   : > { %v5478_v26 = vmax.f32 %v4885_v16, 0.0  ;;  %v4889_v18 = vadd.f32 %v4888_v48, %v4696_v5  ;;  %v4698_v57 = vadd.f32 %v4697_v22, %v14234_v54  ;;  %v5669_v48 = vpack.c.bf16 %v5477_v60, %v5469_v27 }
 0x493   : > { %v4699_v20 = vpop.f32.mrf.mxu0  ;;  %v4892_v32 = vpop.f32.mrf.mxu1  ;;  %v14379_v0 = vadd.f32 %v14293_v49, %v4652_v4  ;;  %v5446_v19 = vmax.f32 %v4865_v15, 0.0  ;;  %v5662_v16 = vpack.c.bf16 %v5462_v62, %v5454_v23  ;;  %v4656_v58 = vadd.f32 %v14295_v46, %v14228_v2  ;;  %v18600_v49 = vld [vmem:[#allocation128_spill] sm:$0xff] }
 0x494   : > { %v14367_v10 = vadd.f32 %v4890_v1, %v4698_v57  ;;  %v4700_v9 = vadd.f32 %v4699_v20, %v14228_v2  ;;  %5781 = vmatpush1.bf16.msra.mxu0 %v18597_v21  ;;  %v5670_v59 = vpack.c.bf16 %v5478_v26, %v5470_v30  ;;  %v4851_v3 = vadd.f32 %v14303_v55, %v4658_v29  ;;  %v18601_v29 = vld [vmem:[#allocation127_spill] sm:$0xff]  ;;  %v18604_v21 = vld [vmem:[#allocation126_spill] sm:$0xff] }
 0x495   : > { %5782 = vmatprep.subr.bf16.mxu0 %v18598_v35  ;;  %v14374_v8 = vpop.f32.mrf.mxu0  ;;  %v14376_v44 = vpop.f32.mrf.mxu1  ;;  %v4859_v50 = vadd.f32 %v14311_v25, %v4666_v12  ;;  %v5453_v52 = vmax.f32 %v4869_v51, 0.0  ;;  %v5438_v60 = vmax.f32 %v4861_v63, 0.0  ;;  %v5485_v34 = vmax.f32 %v4889_v18, 0.0 }
 0x496   : > { %18596 = vst [vmem:[#allocation73_spill] sm:$0xff] %v14367_v10  ;;  %18599 = vst [vmem:[#allocation68_spill] sm:$0xff] %v14376_v44  ;;  %v4893_v37 = vadd.f32 %v4892_v32, %v4700_v9  ;;  %5819 = vmatprep.subr.bf16.mxu1 %v5670_v59  ;;  %v4853_v15 = vadd.f32 %v14305_v17, %v14348_v38  ;;  %v5430_v46 = vmax.f32 %v4855_v28, 0.0  ;;  %v5445_v62 = vmax.f32 %v4863_v24, 0.0  ;;  %v18605_v28 = vld [vmem:[#allocation125_spill] sm:$0xff] }
 0x497   : > { %v4705_v5 = vpop.f32.mrf.mxu0  ;;  %v4898_v56 = vpop.f32.mrf.mxu1  ;;  %5820 = vmatpush1.bf16.msra.mxu1 %v5669_v48  ;;  %v5661_v55 = vpack.c.bf16 %v5461_v41, %v5453_v52  ;;  %v5654_v57 = vpack.c.bf16 %v5446_v19, %v5438_v60  ;;  %v4638_v12 = vadd.f32 %v14265_v14, %v14234_v54  ;;  %v4646_v63 = vadd.f32 %v14281_v53, %v14228_v2  ;;  %v18607_v52 = vld [vmem:[#allocation124_spill] sm:$0xff] }
 0x498   : > { %v5493_v22 = vmax.f32 %v4893_v37, 0.0  ;;  %v4706_v4 = vadd.f32 %v4705_v5, %v14228_v2  ;;  %5783 = vmatpush1.bf16.msra.mxu0 %v18600_v49  ;;  %5821 = vmatprep.subr.bf16.mxu1 %v5662_v16  ;;  %v4849_v17 = vadd.f32 %v14297_v6, %v4656_v58  ;;  %v5437_v38 = vmax.f32 %v4859_v50, 0.0  ;;  %v18608_v5 = vld [vmem:[#allocation90_spill] sm:$0xff] }
 0x499   : > { %5784 = vmatprep.subr.bf16.mxu0 %v18601_v29  ;;  %v4707_v25 = vpop.f32.mrf.mxu0  ;;  %v4900_v1 = vpop.f32.mrf.mxu1  ;;  %v4841_v20 = vadd.f32 %v14289_v36, %v14337_v45  ;;  %v5422_v32 = vmax.f32 %v4851_v3, 0.0  ;;  %v4640_v14 = vadd.f32 %v14273_v42, %v14228_v2  ;;  %v4843_v53 = vadd.f32 %v14291_v7, %v14340_v40  ;;  %v18613_v29 = vld [vmem:[#allocation82_spill] sm:$0xff] }
 0x49a   : > { %v14390_v30 = vpack.c.bf16 %v5493_v22, %v5485_v34  ;;  %v4899_v26 = vadd.f32 %v4898_v56, %v4706_v4  ;;  %v4708_v18 = vadd.f32 %v4707_v25, %v14234_v54  ;;  %v5429_v6 = vmax.f32 %v4853_v15, 0.0 }
 0x49b   : > { %v4709_v51 = vpop.f32.mrf.mxu0  ;;  %v4902_v27 = vpop.f32.mrf.mxu1  ;;  %5822 = vmatpush1.bf16.msra.mxu1 %v5661_v55  ;;  %v5653_v59 = vpack.c.bf16 %v5445_v62, %v5437_v38  ;;  %v4835_v36 = vadd.f32 %v14279_v61, %v14334_v47  ;;  %v5414_v41 = vmax.f32 %v14379_v0, 0.0  ;;  %v5646_v35 = vpack.c.bf16 %v5430_v46, %v5422_v32  ;;  %v18612_v46 = vld [vmem:[#allocation89_spill] sm:$0xff]  ;;  %v18615_v38 = vld [vmem:[#allocation78_spill] sm:$0xff] }
 0x49c   : > { %18602 = vst [vmem:[#allocation69_spill] sm:$0xff] %v14390_v30  ;;  %v14400_v23 = vadd.f32 %v4900_v1, %v4708_v18  ;;  %v4710_v9 = vadd.f32 %v4709_v51, %v14228_v2  ;;  %5785 = vmatpush1.bf16.msra.mxu0 %v18604_v21  ;;  %5823 = vmatprep.subr.bf16.mxu1 %v5654_v57  ;;  %v5421_v7 = vmax.f32 %v4849_v17, 0.0  ;;  %v5406_v16 = vmax.f32 %v4841_v20, 0.0 }
 0x49d   : > { %5786 = vmatprep.subr.bf16.mxu0 %v18605_v28  ;;  %v14409_v24 = vpop.f32.mrf.mxu0  ;;  %v14411_v45 = vpop.f32.mrf.mxu1  ;;  %v4831_v42 = vadd.f32 %v14267_v39, %v4638_v12  ;;  %v4839_v19 = vadd.f32 %v14283_v13, %v4646_v63  ;;  %v5501_v58 = vmax.f32 %v4899_v26, 0.0  ;;  %v4833_v47 = vadd.f32 %v14275_v33, %v4640_v14  ;;  %v18614_v63 = vld [vmem:[#allocation79_spill] sm:$0xff]  ;;  %v18619_v28 = vld [vmem:[#allocation109_spill] sm:$0xff] }
 0x49e   : > { %18603 = vst [vmem:[#allocation70_spill] sm:$0xff] %v14400_v23  ;;  %18606 = vst [vmem:[#allocation123_spill] sm:$0xff] %v14411_v45  ;;  %v4903_v48 = vadd.f32 %v4902_v27, %v4710_v9  ;;  %v5413_v61 = vmax.f32 %v4843_v53, 0.0  ;;  %v5645_v0 = vpack.c.bf16 %v5429_v6, %v5421_v7  ;;  %v5398_v56 = vmax.f32 %v4835_v36, 0.0  ;;  %v18617_v9 = vld [vmem:[#allocation108_spill] sm:$0xff]  ;;  %v18620_v36 = vld [vmem:[#allocation106_spill] sm:$0xff] }
 0x49f   : > { %v4715_v40 = vpop.f32.mrf.mxu0  ;;  %v4908_v37 = vpop.f32.mrf.mxu1  ;;  %5824 = vmatpush1.bf16.msra.mxu1 %v5653_v59  ;;  %v5638_v22 = vpack.c.bf16 %v5414_v41, %v5406_v16  ;;  %v5405_v4 = vmax.f32 %v4839_v19, 0.0  ;;  %v5390_v33 = vmax.f32 %v4831_v42, 0.0  ;;  %v5397_v62 = vmax.f32 %v4833_v47, 0.0  ;;  %v18618_v59 = vld [vmem:[#allocation105_spill] sm:$0xff]  ;;  %v18621_v41 = vld [vmem:[#allocation110_spill] sm:$0xff]  ;;  %v18622_v19 = vld [vmem:[#allocation107_spill] sm:$0xff] }
 0x4a0   : > { %v5509_v3 = vmax.f32 %v4903_v48, 0.0  ;;  %v4716_v50 = vadd.f32 %v4715_v40, %v14228_v2  ;;  %5787 = vmatpush1.bf16.msra.mxu0 %v18607_v52  ;;  %5825 = vmatprep.subr.bf16.mxu1 %v5646_v35  ;;  %v5389_v18 = vmax.f32 %v14271_v43, 0.0  ;;  %v18616_v43 = vld [vmem:[#allocation72_spill] sm:$0xff]  ;;  %v18623_v7 = vld [vmem:[#allocation111_spill] sm:$0xff]  ;;  %v18624_v40 = vld [vmem:[#allocation101_spill] sm:$0xff] }
 0x4a1   : > { %5788 = vmatprep.subr.bf16.mxu0 %v18608_v5  ;;  %v14422_v39 = vpop.f32.mrf.mxu0  ;;  %v14424_v13 = vpop.f32.mrf.mxu1  ;;  %v5637_v55 = vpack.c.bf16 %v5413_v61, %v5405_v4  ;;  %v5630_v26 = vpack.c.bf16 %v5398_v56, %v5390_v33  ;;  %v18626_v52 = vld [vmem:[#allocation112_spill] sm:$0xff]  ;;  %v18627_v56 = vld [vmem:[#allocation67_spill] sm:$0xff] }
 0x4a2   : > { %v14426_v60 = vpack.c.bf16 %v5509_v3, %v5501_v58  ;;  %v14428_v34 = vadd.f32 %v4908_v37, %v4716_v50  ;;  %v5629_v17 = vpack.c.bf16 %v5397_v62, %v5389_v18  ;;  %v18625_v50 = vld [vmem:[#allocation102_spill] sm:$0xff] }
 0x4a3   : > { %v14430_v49 = vpop.f32.mrf.mxu0  ;;  %v14432_v15 = vpop.f32.mrf.mxu1  ;;  %5826 = vmatpush1.bf16.msra.mxu1 %v5645_v0 }
 0x4a4   : > { %18609 = vst [vmem:[#allocation74_spill] sm:$0xff] %v14426_v60  ;;  %18610 = vst [vmem:[#allocation122_spill] sm:$0xff] %v14428_v34  ;;  %5789 = vmatpush1.bf16.msra.mxu0 %v18612_v46  ;;  %5827 = vmatprep.subr.bf16.mxu1 %v5638_v22  ;;  %v18628_v22 = vld [vmem:[#allocation66_spill] sm:$0xff] }
 0x4a5   : > { %18611 = vst [vmem:[#allocation75_spill] sm:$0xff] %v14432_v15  ;;  %5790 = vmatprep.subr.bf16.mxu0 %v18613_v29  ;;  %v14436_v25 = vpop.f32.mrf.mxu0  ;;  %v14438_v1 = vpop.f32.mrf.mxu1  ;;  %v18630_v29 = vld [vmem:[#allocation114_spill] sm:$0xff] }
 0x4a7   : > { %v14441_v57 = vpop.f32.mrf.mxu0  ;;  %v14443_v12 = vpop.f32.mrf.mxu1  ;;  %5828 = vmatpush1.bf16.msra.mxu1 %v5637_v55  ;;  %v18629_v55 = vld [vmem:[#allocation113_spill] sm:$0xff] }
 0x4a8   : > { %5791 = vmatpush1.bf16.msra.mxu0 %v18614_v63  ;;  %5829 = vmatprep.subr.bf16.mxu1 %v5630_v26 }
 0x4a9   : > { %5792 = vmatprep.subr.bf16.mxu0 %v18615_v38  ;;  %v14447_v51 = vpop.f32.mrf.mxu0  ;;  %v14449_v27 = vpop.f32.mrf.mxu1  ;;  %v18631_v38 = vld [vmem:[#allocation115_spill] sm:$0xff] }
 0x4ab   : > { %v14451_v20 = vpop.f32.mrf.mxu0  ;;  %v14453_v32 = vpop.f32.mrf.mxu1  ;;  %5830 = vmatpush1.bf16.msra.mxu1 %v5629_v17 }
 0x4ac   : > { %5793 = vmatpush1.bf16.msra.mxu0 %v18616_v43  ;;  %5831 = vmatprep.subr.bf16.mxu1 %v14277_v11  ;;  %v18632_v43 = vld [vmem:[#allocation65_spill] sm:$0xff] }
 0x4ad   : > { %5794 = vmatprep.subr.bf16.mxu0 %v18617_v9  ;;  %v4731_v21 = vpop.f32.mrf.mxu0  ;;  %v14458_v14 = vpop.f32.mrf.mxu1 }
 0x4af   : > { %v14460_v53 = vpop.f32.mrf.mxu0  ;;  %v14462_v6 = vpop.f32.mrf.mxu1  ;;  %5832 = vmatpush1.bf16.msra.mxu1 %v18618_v59 }
 0x4b0   : > { %5795 = vmatpush2.bf16.msra.mxu0 %v18619_v28  ;;  %5833 = vmatprep.subr.bf16.mxu1 %v18620_v36  ;;  %v18633_v28 = vld [vmem:[#allocation24_spill] sm:$0xff] }
 0x4b1   : > { %5796 = vmatprep.subr.bf16.mxu0 %v18621_v41  ;;  %v4737_v48 = vpop.f32.mrf.mxu0  ;;  %v14468_v35 = vpop.f32.mrf.mxu1  ;;  %v2515_v36 = vsub.s32 6, %v18633_v28  ;;  %v2519_v41 = vsub.s32 7, %v18633_v28  ;;  %v14510_v28 = vadd.f32 %v14409_v24, %v14234_v54 }
 0x4b2   : > { %v4738_v60 = vadd.f32 %v4737_v48, %v14234_v54 }
 0x4b3   : > { %v4739_v11 = vpop.f32.mrf.mxu0  ;;  %v14470_v42 = vpop.f32.mrf.mxu1  ;;  %5834 = vmatpush1.bf16.msra.mxu1 %v18622_v19 }
 0x4b4   : > { %5797 = vmatpush2.bf16.msra.mxu0 %v18623_v7 }
 0x4b5   : > { %5798 = vmatprep.subr.bf16.mxu0 %v18624_v40  ;;  %v4741_v37 = vpop.f32.mrf.mxu0  ;;  %v14475_v16 = vpop.f32.mrf.mxu1  ;;  %v18634_v40 = vld [vmem:[#allocation64_spill] sm:$0xff] }
 0x4b7   : > { %v14477_v58 = vpop.f32.mrf.mxu0  ;;  %v14479_v3 = vpop.f32.mrf.mxu1 }
 0x4b8   : > { %5799 = vmatpush2.bf16.msra.mxu0 %v18625_v50 }
 0x4b9   : > { %5800 = vmatprep.subr.bf16.mxu0 %v18626_v52  ;;  %v4747_v47 = vpop.f32.mrf.mxu0  ;;  %v14483_v61 = vpop.f32.mrf.mxu1  ;;  %v18635_v52 = vld [vmem:[#allocation63_spill] sm:$0xff] }
 0x4bb   : > { %v4749_v0 = vpop.f32.mrf.mxu0  ;;  %v14485_v5 = vpop.f32.mrf.mxu1 }
 0x4bc   : > { %5801 = vmatpush2.bf16.msra.mxu0 %v18627_v56 }
 0x4bd   : > { %5802 = vmatprep.subr.bf16.mxu0 %v18628_v22  ;;  %v4751_v4 = vpop.f32.mrf.mxu0  ;;  %v4944_v33 = vpop.f32.mrf.mxu1 }
 0x4bf   : > { %v4755_v46 = vpop.f32.mrf.mxu0  ;;  %v14489_v62 = vpop.f32.mrf.mxu1 }
 0x4c0   : > { %5803 = vmatpush2.bf16.msra.mxu0 %v18629_v55 }
 0x4c1   : > { %5804 = vmatprep.subr.bf16.mxu0 %v18630_v29  ;;  %v4757_v26 = vpop.f32.mrf.mxu0  ;;  %v4950_v18 = vpop.f32.mrf.mxu1  ;;  %v11522_v29 = vld [vmem:[%s18107_s8] sm:$0xff] }
 0x4c2   : > { %v4758_v24 = vadd.f32 %v4757_v26, %v14234_v54  ;;  %v4742_v26 = vadd.f32 %v4741_v37, %v14234_v54 }
 0x4c3   : > { %v4759_v63 = vpop.f32.mrf.mxu0  ;;  %v4952_v17 = vpop.f32.mrf.mxu1 }
 0x4c4   : > { %5805 = vmatpush2.bf16.msra.mxu0 %v18631_v38  ;;  %v14504_v38 = vrot.slane %v11522_v29, %v2515_v36  ;;  %v14523_v36 = vadd.f32 %v14451_v20, %v14228_v2  ;;  %v4740_v20 = vadd.f32 %v4739_v11, %v14228_v2 }
 0x4c5   : > { %5806 = vmatprep.subr.bf16.mxu0 %v18632_v43  ;;  %v4761_v9 = vpop.f32.mrf.mxu0  ;;  %v4954_v59 = vpop.f32.mrf.mxu1  ;;  %v14506_v43 = vrot.slane %v11522_v29, %v2519_v41  ;;  %v4732_v41 = vadd.f32 %v4731_v21, %v14234_v54 }
 0x4c6   : > { %v4762_v50 = vadd.f32 %v4761_v9, %v14234_v54  ;;  %v14514_v9 = vadd.f32 %v14436_v25, %v14234_v54  ;;  %v18636_v25 = vld [vmem:[#allocation62_spill] sm:$0xff] }
 0x4c7   : > { %v4765_v19 = vpop.f32.mrf.mxu0  ;;  %v4958_v7 = vpop.f32.mrf.mxu1 }
 0x4c8   : > { %5807 = vmatpush2.bf16.msra.mxu0 %v18634_v40  ;;  %v14518_v40 = vadd.f32 %v14447_v51, %v14234_v54  ;;  %v4752_v51 = vadd.f32 %v4751_v4, %v14234_v54  ;;  %v4955_v10 = vadd.f32 %v4954_v59, %v4762_v50  ;;  %v4951_v59 = vadd.f32 %v4950_v18, %v4758_v24 }
 0x4c9   : > { %5808 = vmatprep.subr.bf16.mxu0 %v18635_v52  ;;  %v4767_v56 = vpop.f32.mrf.mxu0  ;;  %v4960_v22 = vpop.f32.mrf.mxu1  ;;  %v4766_v52 = vadd.f32 %v4765_v19, %v14228_v2  ;;  %v4760_v19 = vadd.f32 %v4759_v63, %v14228_v2  ;;  %v4750_v63 = vadd.f32 %v4749_v0, %v14228_v2  ;;  %v4746_v0 = vadd.f32 %v14477_v58, %v14228_v2 }
 0x4ca   : > { %v4768_v55 = vadd.f32 %v4767_v56, %v14234_v54  ;;  %v5590_v37 = vmax.f32 %v4955_v10, 0.0 }
 0x4cb   : > { %v4769_v56 = vpop.f32.mrf.mxu0  ;;  %v4962_v30 = vpop.f32.mrf.mxu1  ;;  %v4959_v48 = vadd.f32 %v4958_v7, %v4766_v52 }
 0x4cc   : > { %v4770_v29 = vadd.f32 %v4769_v56, %v14228_v2  ;;  %5809 = vmatpush2.bf16.msra.mxu0 %v18636_v25  ;;  %v4961_v44 = vadd.f32 %v4960_v22, %v4768_v55  ;;  %v4748_v56 = vadd.f32 %v4747_v47, %v14234_v54  ;;  %v4756_v25 = vadd.f32 %v4755_v46, %v14228_v2 }
 0x4cd   : > { %v4771_v23 = vpop.f32.mrf.mxu0  ;;  %v4964_v34 = vpop.f32.mrf.mxu1  ;;  %v5597_v18 = vmax.f32 %v4959_v48, 0.0 }
 0x4ce   : > { %v4963_v15 = vadd.f32 %v4962_v30, %v4770_v29  ;;  %v4772_v21 = vadd.f32 %v4771_v23, %v14234_v54  ;;  %v4945_v30 = vadd.f32 %v4944_v33, %v4752_v51  ;;  %v4953_v23 = vadd.f32 %v4952_v17, %v4760_v19 }
 0x4cf   : > { %v5001_v45 = vpop.f32.mrf.mxu0  ;;  %v5194_v4 = vpop.f32.mrf.mxu1  ;;  %5811 = vmatmul.mubr.bf16.vlgmr.msra.gmra.mxu0 %v18594_v31  ;;  %v5598_v46 = vmax.f32 %v4961_v44, 0.0  ;;  %v5582_v17 = vmax.f32 %v4951_v59, 0.0  ;;  %v4935_v51 = vadd.f32 %v14475_v16, %v4742_v26  ;;  %v4943_v19 = vadd.f32 %v14485_v5, %v4750_v63 }
 0x4d0   : > { %v4965_v50 = vadd.f32 %v4964_v34, %v4772_v21  ;;  %v5002_v11 = vadd.f32 %v5001_v45, %v14504_v38  ;;  %5892 = vmatprep.mubr.bf16.mxu0 %v18594_v31  ;;  %v5605_v22 = vmax.f32 %v4963_v15, 0.0  ;;  %v4941_v34 = vadd.f32 %v14483_v61, %v4748_v56 }
 0x4d1   : > { %v5003_v47 = vpop.f32.mrf.mxu0  ;;  %v5196_v55 = vpop.f32.mrf.mxu1  ;;  %v4949_v45 = vadd.f32 %v14489_v62, %v4756_v25  ;;  %v5589_v21 = vmax.f32 %v4953_v23, 0.0  ;;  %v14556_v62 = vadd.f32 %v14458_v14, %v4732_v41  ;;  %v5574_v56 = vmax.f32 %v4945_v30, 0.0 }
 0x4d2   : > { %v5606_v7 = vmax.f32 %v4965_v50, 0.0  ;;  %v5195_v52 = vadd.f32 %v5194_v4, %v5002_v11  ;;  %v5004_v29 = vadd.f32 %v5003_v47, %v14506_v43  ;;  %v5733_v4 = vpack.c.bf16 %v5605_v22, %v5597_v18 }
 0x4d3   : > { %v5005_v24 = vpop.f32.mrf.mxu0  ;;  %v5198_v33 = vpop.f32.mrf.mxu1  ;;  %v5726_v48 = vpack.c.bf16 %v5590_v37, %v5582_v17  ;;  %v4736_v59 = vadd.f32 %v14460_v53, %v14228_v2  ;;  %v4931_v16 = vadd.f32 %v14468_v35, %v4738_v60  ;;  %v4939_v5 = vadd.f32 %v14479_v3, %v4746_v0 }
 0x4d4   : > { %v14546_v10 = vadd.f32 %v5196_v55, %v5004_v29  ;;  %v5006_v15 = vadd.f32 %v5005_v24, %v14504_v38  ;;  %v5734_v44 = vpack.c.bf16 %v5606_v7, %v5598_v46  ;;  %v5581_v26 = vmax.f32 %v4949_v45, 0.0 }
 0x4d5   : > { %v14551_v58 = vpop.f32.mrf.mxu0  ;;  %v14553_v61 = vpop.f32.mrf.mxu1  ;;  %v5566_v11 = vmax.f32 %v4941_v34, 0.0  ;;  %v5359_v23 = vmax.f32 %v5195_v52, 0.0  ;;  %v4933_v41 = vadd.f32 %v14470_v42, %v4740_v20  ;;  %v5558_v30 = vmax.f32 %v4935_v51, 0.0 }
 0x4d6   : > { %18637 = vst [vmem:[#allocation76_spill] sm:$0xff] %v14546_v10  ;;  %18638 = vst [vmem:[#allocation121_spill] sm:$0xff] %v14553_v61  ;;  %v5199_v25 = vadd.f32 %v5198_v33, %v5006_v15  ;;  %5835 = vmatprep.subr.bf16.mxu1 %v5734_v44  ;;  %v5573_v37 = vmax.f32 %v4943_v19, 0.0  ;;  %v5725_v47 = vpack.c.bf16 %v5589_v21, %v5581_v26  ;;  %v5565_v42 = vmax.f32 %v4939_v5, 0.0 }
 0x4d7   : > { %v5011_v63 = vpop.f32.mrf.mxu0  ;;  %v5204_v50 = vpop.f32.mrf.mxu1  ;;  %5836 = vmatpush2.bf16.msra.mxu1 %v5733_v4  ;;  %v5718_v46 = vpack.c.bf16 %v5574_v56, %v5566_v11  ;;  %v4718_v7 = vadd.f32 %v14422_v39, %v14234_v54  ;;  %v4726_v52 = vadd.f32 %v14441_v57, %v14228_v2  ;;  %v4929_v29 = vadd.f32 %v14462_v6, %v4736_v59 }
 0x4d8   : > { %v5367_v22 = vmax.f32 %v5199_v25, 0.0  ;;  %v5012_v14 = vadd.f32 %v5011_v63, %v14504_v38  ;;  %5837 = vmatprep.subr.bf16.mxu1 %v5726_v48  ;;  %v4921_v34 = vadd.f32 %v14449_v27, %v14518_v40  ;;  %v5550_v45 = vmax.f32 %v4931_v16, 0.0  ;;  %v18642_v48 = vld [vmem:[#allocation75_spill] sm:$0xff] }
 0x4d9   : > { %v5013_v53 = vpop.f32.mrf.mxu0  ;;  %v5206_v55 = vpop.f32.mrf.mxu1  ;;  %v4720_v39 = vadd.f32 %v14430_v49, %v14228_v2  ;;  %v4923_v57 = vadd.f32 %v14453_v32, %v14523_v36  ;;  %v5557_v6 = vmax.f32 %v4933_v41, 0.0  ;;  %v5717_v33 = vpack.c.bf16 %v5573_v37, %v5565_v42  ;;  %v18646_v37 = vld [vmem:[#allocation68_spill] sm:$0xff] }
 0x4da   : > { %v14564_v60 = vpack.c.bf16 %v5367_v22, %v5359_v23  ;;  %v5205_v35 = vadd.f32 %v5204_v50, %v5012_v14  ;;  %v5014_v3 = vadd.f32 %v5013_v53, %v14506_v43  ;;  %v4915_v27 = vadd.f32 %v14438_v1, %v14514_v9  ;;  %v18641_v9 = vld [vmem:[#allocation123_spill] sm:$0xff] }
 0x4db   : > { %v5015_v20 = vpop.f32.mrf.mxu0  ;;  %v5208_v0 = vpop.f32.mrf.mxu1  ;;  %5838 = vmatpush2.bf16.msra.mxu1 %v5725_v47  ;;  %v5542_v40 = vmax.f32 %v14556_v62, 0.0  ;;  %v5710_v51 = vpack.c.bf16 %v5558_v30, %v5550_v45  ;;  %v4702_v19 = vadd.f32 %v14374_v8, %v14234_v54  ;;  %v4911_v2 = vadd.f32 %v14424_v13, %v4718_v7 }
 0x4dc   : > { %18639 = vst [vmem:[#allocation120_spill] sm:$0xff] %v14564_v60  ;;  %v14574_v18 = vadd.f32 %v5206_v55, %v5014_v3  ;;  %v5016_v24 = vadd.f32 %v5015_v20, %v14504_v38  ;;  %5839 = vmatprep.subr.bf16.mxu1 %v5718_v46  ;;  %v4919_v49 = vadd.f32 %v14443_v12, %v4726_v52  ;;  %v5549_v32 = vmax.f32 %v4929_v29, 0.0  ;;  %v18648_v52 = vld [vmem:[#allocation70_spill] sm:$0xff] }
 0x4dd   : > { %v14581_v17 = vpop.f32.mrf.mxu0  ;;  %v14583_v15 = vpop.f32.mrf.mxu1  ;;  %v5534_v4 = vmax.f32 %v4921_v34, 0.0  ;;  %v5375_v56 = vmax.f32 %v5205_v35, 0.0  ;;  %v4905_v62 = vadd.f32 %v18641_v9, %v14510_v28  ;;  %v4913_v59 = vadd.f32 %v18642_v48, %v4720_v39  ;;  %v18647_v35 = vld [vmem:[#allocation122_spill] sm:$0xff] }
 0x4de   : > { %18640 = vst [vmem:[#allocation119_spill] sm:$0xff] %v14574_v18  ;;  %v5209_v44 = vadd.f32 %v5208_v0, %v5016_v24  ;;  %v5541_v54 = vmax.f32 %v4923_v57, 0.0  ;;  %v5709_v8 = vpack.c.bf16 %v5557_v6, %v5549_v32  ;;  %v5526_v16 = vmax.f32 %v4915_v27, 0.0  ;;  %v18649_v57 = vld [vmem:[#allocation73_spill] sm:$0xff] }
 0x4df   : > { %v5021_v36 = vpop.f32.mrf.mxu0  ;;  %v5214_v21 = vpop.f32.mrf.mxu1  ;;  %5840 = vmatpush2.bf16.msra.mxu1 %v5717_v33  ;;  %v5702_v63 = vpack.c.bf16 %v5542_v40, %v5534_v4  ;;  %v5533_v50 = vmax.f32 %v4919_v49, 0.0  ;;  %v5518_v28 = vmax.f32 %v4911_v2, 0.0  ;;  %v5525_v22 = vmax.f32 %v4913_v59, 0.0  ;;  %v10995_v2 = vld [vmem:[%s18109_s10 + $0xe4] ss:$16 sps:$4 sm:$0xff]   ;;  %v18651_v4 = vld [vmem:[#allocation69_spill] sm:$0xff] }
 0x4e0   : > { %v5383_v25 = vmax.f32 %v5209_v44, 0.0  ;;  %v5022_v1 = vadd.f32 %v5021_v36, %v14504_v38  ;;  %5841 = vmatprep.subr.bf16.mxu1 %v5710_v51  ;;  %v4895_v47 = vadd.f32 %v18646_v37, %v4702_v19  ;;  %v5510_v53 = vmax.f32 %v4905_v62, 0.0  ;;  %v18650_v19 = vld [vmem:[#allocation74_spill] sm:$0xff]  ;;  %v18652_v59 = vld [vmem:[#allocation27_spill] sm:$0xff] }
 0x4e1   : > { %v14596_v13 = vpop.f32.mrf.mxu0  ;;  %v14598_v12 = vpop.f32.mrf.mxu1  ;;  %v5701_v14 = vpack.c.bf16 %v5541_v54, %v5533_v50  ;;  %v5694_v55 = vpack.c.bf16 %v5526_v16, %v5518_v28  ;;  %v5517_v3 = vmax.f32 %v18647_v35, 0.0  ;;  %v5502_v29 = vmax.f32 %v18648_v52, 0.0  ;;  %v10996_v54 = vld [vmem:[%s18109_s10 + $0xc0] ss:$16 sps:$4 sm:$0xff]  }
 0x4e2   : > { %v14600_v5 = vpack.c.bf16 %v5383_v25, %v5375_v56  ;;  %v14602_v26 = vadd.f32 %v5214_v21, %v5022_v1  ;;  %v5494_v34 = vmax.f32 %v4895_v47, 0.0  ;;  %v5486_v6 = vmax.f32 %v18649_v57, 0.0  ;;  %v10993_v56 = vld [vmem:[%s18109_s10 + $0xe0] ss:$16 sps:$4 sm:$0xff]   ;;  %v10998_v25 = vld [vmem:[%s18109_s10 + $0xc4] ss:$16 sps:$4 sm:$0xff]  }
 0x4e3   : > { %v14604_v11 = vpop.f32.mrf.mxu0  ;;  %v14606_v23 = vpop.f32.mrf.mxu1  ;;  %5842 = vmatpush2.bf16.msra.mxu1 %v5709_v8  ;;  %v5693_v42 = vpack.c.bf16 %v5525_v22, %v5517_v3  ;;  %v5686_v45 = vpack.c.bf16 %v5510_v53, %v5502_v29  ;;  %v11001_v8 = vld [vmem:[%s18109_s10 + $0xa4] ss:$16 sps:$4 sm:$0xff]   ;;  %v10999_v22 = vld [vmem:[%s18109_s10 + $0xa0] ss:$16 sps:$4 sm:$0xff]  }
 0x4e4   : > { %18643 = vst [vmem:[#allocation77_spill] sm:$0xff] %v14600_v5  ;;  %18644 = vst [vmem:[#allocation118_spill] sm:$0xff] %v14602_v26  ;;  %5843 = vmatprep.subr.bf16.mxu1 %v5702_v63  ;;  %v5678_v40 = vpack.c.bf16 %v5494_v34, %v5486_v6  ;;  %v11002_v35 = vld [vmem:[%s18109_s10 + $0x80] ss:$16 sps:$4 sm:$0xff]   ;;  %v11007_v3 = vld [vmem:[%s18109_s10 + $0x64] ss:$16 sps:$4 sm:$0xff]  }
 0x4e5   : > { %18645 = vst [vmem:[#allocation80_spill] sm:$0xff] %v14606_v23  ;;  %v14608_v41 = vpop.f32.mrf.mxu0  ;;  %v14610_v30 = vpop.f32.mrf.mxu1  ;;  %v11010_v57 = vld [vmem:[%s18109_s10 + $0x44] ss:$16 sps:$4 sm:$0xff]  }
 0x4e7   : > { %v14614_v46 = vpop.f32.mrf.mxu0  ;;  %v14616_v7 = vpop.f32.mrf.mxu1  ;;  %5844 = vmatpush2.bf16.msra.mxu1 %v5701_v14  ;;  %v11004_v14 = vld [vmem:[%s18109_s10 + $0x84] ss:$16 sps:$4 sm:$0xff]  }
 0x4e8   : > { %5845 = vmatprep.subr.bf16.mxu1 %v5694_v55 }
 0x4e9   : > { %v14619_v20 = vpop.f32.mrf.mxu0  ;;  %v14621_v0 = vpop.f32.mrf.mxu1 }
 0x4eb   : > { %v14623_v24 = vpop.f32.mrf.mxu0  ;;  %v14625_v39 = vpop.f32.mrf.mxu1  ;;  %5846 = vmatpush2.bf16.msra.mxu1 %v5693_v42 }
 0x4ec   : > { %5847 = vmatprep.subr.bf16.mxu1 %v5686_v45  ;;  %v11005_v45 = vld [vmem:[%s18109_s10 + $0x60] ss:$16 sps:$4 sm:$0xff]  }
 0x4ed   : > { %v14628_v33 = vpop.f32.mrf.mxu0  ;;  %v14630_v27 = vpop.f32.mrf.mxu1 }
 0x4ef   : > { %v14632_v44 = vpop.f32.mrf.mxu0  ;;  %v14634_v51 = vpop.f32.mrf.mxu1  ;;  %5848 = vmatpush2.bf16.msra.mxu1 %v18650_v19 }
 0x4f0   : > { %5849 = vmatprep.subr.bf16.mxu1 %v5678_v40 }
 0x4f1   : > { %v14640_v49 = vpop.f32.mrf.mxu0  ;;  %v14642_v32 = vpop.f32.mrf.mxu1 }
 0x4f3   : > { %v14644_v36 = vpop.f32.mrf.mxu0  ;;  %v14646_v21 = vpop.f32.mrf.mxu1  ;;  %5850 = vmatpush2.bf16.msra.mxu1 %v18651_v4  ;;  %v11008_v4 = vld [vmem:[%s18109_s10 + $0x40] ss:$16 sps:$4 sm:$0xff]  }
 0x4f4   : > { %6325 = vmatprep.subr.bf16.mxu1 %v10995_v2 }
 0x4f5   : > { %v14655_v1 = vpop.f32.mrf.mxu0  ;;  %v14657_v9 = vpop.f32.mrf.mxu1 }
 0x4f6   : > { %5852 = vmatmul.mubr.bf16.vlgmr.msra.gmra.mxu1 %v18594_v31  ;;  %v5048_v18 = vadd.f32 %v14655_v1, %v14506_v43  ;;  %v11019_v1 = vld [vmem:[%s18109_s10 + $0x1e4] ss:$16 sps:$4 sm:$0xff]  }
 0x4f7   : > { %v14660_v62 = vpop.f32.mrf.mxu0  ;;  %v14662_v48 = vpop.f32.mrf.mxu1  ;;  %6326 = vmatpush1.bf16.msra.mxu1 %v10993_v56  ;;  %6357 = vmatprep.mubr.bf16.mxu1 %v18652_v59  ;;  %v11013_v56 = vld [vmem:[%s18109_s10 + $0x24] ss:$16 sps:$4 sm:$0xff]  }
 0x4f8   : > { %6327 = vmatprep.subr.bf16.mxu1 %v10998_v25 }
 0x4f9   : > { %v5053_v16 = vpop.f32.mrf.mxu0  ;;  %v14671_v63 = vpop.f32.mrf.mxu1 }
 0x4fb   : > { %v14673_v50 = vpop.f32.mrf.mxu0  ;;  %v14675_v28 = vpop.f32.mrf.mxu1  ;;  %6328 = vmatpush1.bf16.msra.mxu1 %v10996_v54 }
 0x4fc   : > { %6329 = vmatprep.subr.bf16.mxu1 %v11001_v8 }
 0x4fd   : > { %v5057_v37 = vpop.f32.mrf.mxu0  ;;  %v14683_v47 = vpop.f32.mrf.mxu1 }
 0x4fe   : > { %v5058_v31 = vadd.f32 %v5057_v37, %v14506_v43 }
 0x4ff   : > { %v5061_v53 = vpop.f32.mrf.mxu0  ;;  %v14685_v55 = vpop.f32.mrf.mxu1  ;;  %6330 = vmatpush1.bf16.msra.mxu1 %v10999_v22 }
 0x500   : > { %6331 = vmatprep.subr.bf16.mxu1 %v11004_v14  ;;  %v14709_v14 = vadd.f32 %v14581_v17, %v14506_v43  ;;  %v14725_v17 = vadd.f32 %v14623_v24, %v14504_v38  ;;  %v5062_v37 = vadd.f32 %v5061_v53, %v14504_v38 }
 0x501   : > { %v5063_v52 = vpop.f32.mrf.mxu0  ;;  %v5256_v29 = vpop.f32.mrf.mxu1 }
 0x502   : > { %v5064_v59 = vadd.f32 %v5063_v52, %v14506_v43 }
 0x503   : > { %v5065_v42 = vpop.f32.mrf.mxu0  ;;  %v5258_v34 = vpop.f32.mrf.mxu1  ;;  %6332 = vmatpush1.bf16.msra.mxu1 %v11002_v35  ;;  %v14713_v35 = vadd.f32 %v14608_v41, %v14506_v43  ;;  %v5038_v41 = vadd.f32 %v14628_v33, %v14506_v43  ;;  %v14740_v33 = vadd.f32 %v14644_v36, %v14504_v38  ;;  %v11014_v36 = vld [vmem:[%s18109_s10] ss:$16 sps:$4 sm:$0xff]  }
 0x504   : > { %6333 = vmatprep.subr.bf16.mxu1 %v11007_v3  ;;  %v14717_v3 = vadd.f32 %v14619_v20, %v14506_v43  ;;  %v5066_v24 = vadd.f32 %v5065_v42, %v14504_v38 }
 0x505   : > { %v5067_v6 = vpop.f32.mrf.mxu0  ;;  %v5260_v40 = vpop.f32.mrf.mxu1 }
 0x506   : > { %v5068_v25 = vadd.f32 %v5067_v6, %v14506_v43  ;;  %v5259_v53 = vadd.f32 %v5258_v34, %v5066_v24 }
 0x507   : > { %v5071_v19 = vpop.f32.mrf.mxu0  ;;  %v5264_v2 = vpop.f32.mrf.mxu1  ;;  %6334 = vmatpush1.bf16.msra.mxu1 %v11005_v45 }
 0x508   : > { %6335 = vmatprep.subr.bf16.mxu1 %v11010_v57  ;;  %v5072_v45 = vadd.f32 %v5071_v19, %v14504_v38  ;;  %v11016_v19 = vld [vmem:[%s18109_s10 + $0x4] ss:$16 sps:$4 sm:$0xff]   ;;  %v5261_v60 = vadd.f32 %v5260_v40, %v5068_v25  ;;  %v5056_v25 = vadd.f32 %v14673_v50, %v14504_v38 }
 0x509   : > { %v5073_v54 = vpop.f32.mrf.mxu0  ;;  %v5266_v8 = vpop.f32.mrf.mxu1 }
 0x50a   : > { %v5074_v22 = vadd.f32 %v5073_v54, %v14506_v43  ;;  %v11011_v54 = vld [vmem:[%s18109_s10 + $0x20] ss:$16 sps:$4 sm:$0xff]   ;;  %v5265_v26 = vadd.f32 %v5264_v2, %v5072_v45  ;;  %v5464_v2 = vmax.f32 %v5261_v60, 0.0 }
 0x50b   : > { %v5075_v57 = vpop.f32.mrf.mxu0  ;;  %v5268_v6 = vpop.f32.mrf.mxu1  ;;  %6336 = vmatpush1.bf16.msra.mxu1 %v11008_v4  ;;  %v5044_v4 = vadd.f32 %v14640_v49, %v14506_v43  ;;  %v5054_v49 = vadd.f32 %v5053_v16, %v14506_v43  ;;  %v5251_v16 = vadd.f32 %v14683_v47, %v5058_v31  ;;  %v11017_v60 = vld [vmem:[%s18109_s10 + $0x1e0] ss:$16 sps:$4 sm:$0xff]  }
 0x50c   : > { %v5076_v20 = vadd.f32 %v5075_v57, %v14504_v38  ;;  %6337 = vmatprep.subr.bf16.mxu1 %v11013_v56  ;;  %v5267_v52 = vadd.f32 %v5266_v8, %v5074_v22  ;;  %v5257_v8 = vadd.f32 %v5256_v29, %v5064_v59  ;;  %v5255_v29 = vadd.f32 %v14685_v55, %v5062_v37 }
 0x50d   : > { %v5077_v5 = vpop.f32.mrf.mxu0  ;;  %v5270_v10 = vpop.f32.mrf.mxu1  ;;  %v5247_v50 = vadd.f32 %v14671_v63, %v5054_v49  ;;  %v5249_v63 = vadd.f32 %v14675_v28, %v5056_v25  ;;  %v5463_v55 = vmax.f32 %v5259_v53, 0.0 }
 0x50e   : > { %v5269_v56 = vadd.f32 %v5268_v6, %v5076_v20  ;;  %v5078_v57 = vadd.f32 %v5077_v5, %v14506_v43  ;;  %v5472_v20 = vmax.f32 %v5267_v52, 0.0  ;;  %v5456_v47 = vmax.f32 %v5257_v8, 0.0 }
 0x50f   : > { %v5081_v42 = vpop.f32.mrf.mxu0  ;;  %v5274_v40 = vpop.f32.mrf.mxu1  ;;  %6338 = vmatpush1.bf16.msra.mxu1 %v11011_v54  ;;  %v5042_v8 = vadd.f32 %v14632_v44, %v14504_v38  ;;  %v5455_v28 = vmax.f32 %v5255_v29, 0.0  ;;  %v11025_v44 = vld [vmem:[%s18109_s10 + $0x1a4] ss:$16 sps:$4 sm:$0xff]  }
 0x510   : > { %v5271_v5 = vadd.f32 %v5270_v10, %v5078_v57  ;;  %v5082_v22 = vadd.f32 %v5081_v42, %v14504_v38  ;;  %6339 = vmatprep.subr.bf16.mxu1 %v11016_v19  ;;  %v5479_v45 = vmax.f32 %v5269_v56, 0.0  ;;  %v5052_v10 = vadd.f32 %v14660_v62, %v14504_v38  ;;  %v11022_v62 = vld [vmem:[%s18109_s10 + $0x1c4] ss:$16 sps:$4 sm:$0xff]  }
 0x511   : > { %v5083_v6 = vpop.f32.mrf.mxu0  ;;  %v5276_v54 = vpop.f32.mrf.mxu1  ;;  %v5471_v19 = vmax.f32 %v5265_v26, 0.0  ;;  %v14772_v26 = vadd.f32 %v14657_v9, %v5048_v18  ;;  %v14780_v42 = vadd.f32 %v14630_v27, %v5038_v41  ;;  %v5237_v18 = vadd.f32 %v14642_v32, %v5044_v4  ;;  %v11020_v27 = vld [vmem:[%s18109_s10 + $0x1c0] ss:$16 sps:$4 sm:$0xff]  }
 0x512   : > { %v5480_v61 = vmax.f32 %v5271_v5, 0.0  ;;  %v5275_v23 = vadd.f32 %v5274_v40, %v5082_v22  ;;  %v5084_v59 = vadd.f32 %v5083_v6, %v14506_v43  ;;  %v5245_v9 = vadd.f32 %v14662_v48, %v5052_v10 }
 0x513   : > { %v5085_v57 = vpop.f32.mrf.mxu0  ;;  %v5278_v31 = vpop.f32.mrf.mxu1  ;;  %6340 = vmatpush1.bf16.msra.mxu1 %v11014_v36  ;;  %v5671_v56 = vpack.c.bf16 %v5479_v45, %v5471_v19  ;;  %v5664_v36 = vpack.c.bf16 %v5464_v2, %v5456_v47  ;;  %v5440_v41 = vmax.f32 %v5247_v50, 0.0  ;;  %v5239_v32 = vadd.f32 %v14646_v21, %v14740_v33  ;;  %v11023_v19 = vld [vmem:[%s18109_s10 + $0x1a0] ss:$16 sps:$4 sm:$0xff]  }
 0x514   : > { %v14765_v34 = vadd.f32 %v5276_v54, %v5084_v59  ;;  %v5086_v24 = vadd.f32 %v5085_v57, %v14504_v38  ;;  %v5672_v52 = vpack.c.bf16 %v5480_v61, %v5472_v20  ;;  %6341 = vmatprep.subr.bf16.mxu1 %v11019_v1  ;;  %v5448_v61 = vmax.f32 %v5251_v16, 0.0 }
 0x515   : > { %v14775_v49 = vpop.f32.mrf.mxu0  ;;  %v14777_v37 = vpop.f32.mrf.mxu1  ;;  %v5487_v22 = vmax.f32 %v5275_v23, 0.0  ;;  %v5432_v48 = vmax.f32 %v14772_v26, 0.0  ;;  %v5447_v4 = vmax.f32 %v5249_v63, 0.0  ;;  %v5663_v53 = vpack.c.bf16 %v5463_v55, %v5455_v28 }
 0x516   : > { %18653 = vst [vmem:[#allocation117_spill] sm:$0xff] %v14765_v34  ;;  %18654 = vst [vmem:[#allocation116_spill] sm:$0xff] %v14777_v37  ;;  %v5279_v40 = vadd.f32 %v5278_v31, %v5086_v24  ;;  %5860 = vmatprep.subr.bf16.mxu0 %v5672_v52  ;;  %v5656_v20 = vpack.c.bf16 %v5448_v61, %v5440_v41  ;;  %v5024_v59 = vadd.f32 %v14596_v13, %v14506_v43 }
 0x517   : > { %v5091_v25 = vpop.f32.mrf.mxu0  ;;  %v5284_v5 = vpop.f32.mrf.mxu1  ;;  %5861 = vmatpush1.bf16.msra.mxu0 %v5671_v56  ;;  %6342 = vmatpush2.bf16.msra.mxu1 %v11017_v60  ;;  %v5032_v10 = vadd.f32 %v14614_v46, %v14504_v38  ;;  %v5235_v21 = vadd.f32 %v14634_v51, %v5042_v8  ;;  %v5439_v33 = vmax.f32 %v5245_v9, 0.0  ;;  %v5227_v57 = vadd.f32 %v14621_v0, %v14717_v3  ;;  %v11028_v46 = vld [vmem:[%s18109_s10 + $0x184] ss:$16 sps:$4 sm:$0xff]  }
 0x518   : > { %v5495_v1 = vmax.f32 %v5279_v40, 0.0  ;;  %v5092_v16 = vadd.f32 %v5091_v25, %v14504_v38  ;;  %5862 = vmatprep.subr.bf16.mxu0 %v5664_v36  ;;  %6343 = vmatprep.subr.bf16.mxu1 %v11022_v62  ;;  %v5424_v31 = vmax.f32 %v5237_v18, 0.0  ;;  %v5026_v51 = vadd.f32 %v14604_v11, %v14504_v38 }
 0x519   : > { %v5093_v2 = vpop.f32.mrf.mxu0  ;;  %v5286_v45 = vpop.f32.mrf.mxu1  ;;  %v5229_v47 = vadd.f32 %v14625_v39, %v14725_v17  ;;  %v5431_v24 = vmax.f32 %v5239_v32, 0.0  ;;  %v5655_v52 = vpack.c.bf16 %v5447_v4, %v5439_v33  ;;  %v5221_v62 = vadd.f32 %v14610_v30, %v14713_v35  ;;  %v11026_v30 = vld [vmem:[%s18109_s10 + $0x180] ss:$16 sps:$4 sm:$0xff]  }
 0x51a   : > { %v14796_v6 = vpack.c.bf16 %v5495_v1, %v5487_v22  ;;  %v5285_v23 = vadd.f32 %v5284_v5, %v5092_v16  ;;  %v5094_v54 = vadd.f32 %v5093_v2, %v14506_v43  ;;  %v5416_v26 = vmax.f32 %v14780_v42, 0.0 }
 0x51b   : > { %v5095_v50 = vpop.f32.mrf.mxu0  ;;  %v5288_v29 = vpop.f32.mrf.mxu1  ;;  %5863 = vmatpush1.bf16.msra.mxu0 %v5663_v53  ;;  %6344 = vmatpush2.bf16.msra.mxu1 %v11020_v27  ;;  %v5648_v55 = vpack.c.bf16 %v5432_v48, %v5424_v31  ;;  %v5008_v56 = vadd.f32 %v14551_v58, %v14506_v43  ;;  %v5217_v11 = vadd.f32 %v14598_v12, %v5024_v59  ;;  %v5423_v17 = vmax.f32 %v5235_v21, 0.0  ;;  %v11031_v58 = vld [vmem:[%s18109_s10 + $0x164] ss:$16 sps:$4 sm:$0xff]  }
 0x51c   : > { %18655 = vst [vmem:[#allocation71_spill] sm:$0xff] %v14796_v6  ;;  %v14809_v60 = vadd.f32 %v5286_v45, %v5094_v54  ;;  %v5096_v13 = vadd.f32 %v5095_v50, %v14504_v38  ;;  %5864 = vmatprep.subr.bf16.mxu0 %v5656_v20  ;;  %6345 = vmatprep.subr.bf16.mxu1 %v11025_v44  ;;  %v5408_v35 = vmax.f32 %v5227_v57, 0.0  ;;  %v5503_v42 = vmax.f32 %v5285_v23, 0.0  ;;  %v11034_v48 = vld [vmem:[%s18109_s10 + $0x144] ss:$16 sps:$4 sm:$0xff]   ;;  %v18660_v23 = vld [vmem:[#allocation121_spill] sm:$0xff] }
 0x51d   : > { %v14819_v0 = vpop.f32.mrf.mxu0  ;;  %v14821_v3 = vpop.f32.mrf.mxu1  ;;  %v5225_v39 = vadd.f32 %v14616_v7, %v5032_v10  ;;  %v5211_v12 = vadd.f32 %v14583_v15, %v14709_v14  ;;  %v18657_v7 = vld [vmem:[#allocation80_spill] sm:$0xff]  ;;  %v5415_v9 = vmax.f32 %v5229_v47, 0.0  ;;  %v5647_v28 = vpack.c.bf16 %v5431_v24, %v5423_v17  ;;  %v18661_v10 = vld [vmem:[#allocation118_spill] sm:$0xff] }
 0x51e   : > { %18656 = vst [vmem:[#allocation81_spill] sm:$0xff] %v14809_v60  ;;  %v5289_v63 = vadd.f32 %v5288_v29, %v5096_v13  ;;  %v5219_v18 = vadd.f32 %v18657_v7, %v5026_v51  ;;  %v5400_v27 = vmax.f32 %v5221_v62, 0.0  ;;  %v5640_v1 = vpack.c.bf16 %v5416_v26, %v5408_v35  ;;  %v11029_v15 = vld [vmem:[%s18109_s10 + $0x160] ss:$16 sps:$4 sm:$0xff]   ;;  %v11037_v31 = vld [vmem:[%s18109_s10 + $0x124] ss:$16 sps:$4 sm:$0xff]  }
 0x51f   : > { %v5101_v61 = vpop.f32.mrf.mxu0  ;;  %v5294_v40 = vpop.f32.mrf.mxu1  ;;  %5865 = vmatpush1.bf16.msra.mxu0 %v5655_v52  ;;  %6346 = vmatpush2.bf16.msra.mxu1 %v11023_v19  ;;  %v5407_v16 = vmax.f32 %v5225_v39, 0.0  ;;  %v5392_v14 = vmax.f32 %v5217_v11, 0.0  ;;  %v5201_v54 = vadd.f32 %v18660_v23, %v5008_v56  ;;  %v5384_v20 = vmax.f32 %v5211_v12, 0.0  ;;  %v11032_v29 = vld [vmem:[%s18109_s10 + $0x140] ss:$16 sps:$4 sm:$0xff]   ;;  %v18662_v19 = vld [vmem:[#allocation119_spill] sm:$0xff] }
 0x520   : > { %v5511_v36 = vmax.f32 %v5289_v63, 0.0  ;;  %v5102_v8 = vadd.f32 %v5101_v61, %v14504_v38  ;;  %5866 = vmatprep.subr.bf16.mxu0 %v5648_v55  ;;  %6347 = vmatprep.subr.bf16.mxu1 %v11028_v46  ;;  %v5399_v4 = vmax.f32 %v5219_v18, 0.0  ;;  %v5391_v21 = vmax.f32 %v18661_v10, 0.0  ;;  %v11035_v26 = vld [vmem:[%s18109_s10 + $0x120] ss:$16 sps:$4 sm:$0xff]  }
 0x521   : > { %v14840_v25 = vpop.f32.mrf.mxu0  ;;  %v14842_v5 = vpop.f32.mrf.mxu1  ;;  %v5639_v53 = vpack.c.bf16 %v5415_v9, %v5407_v16  ;;  %v5632_v59 = vpack.c.bf16 %v5400_v27, %v5392_v14  ;;  %v5376_v57 = vmax.f32 %v18662_v19, 0.0  ;;  %v5368_v47 = vmax.f32 %v5201_v54, 0.0  ;;  %v18663_v63 = vld [vmem:[#allocation76_spill] sm:$0xff]  ;;  %v18667_v14 = vld [vmem:[#allocation29_spill] sm:$0xff]  ;;  %v18668_v19 = vld [vmem:[#allocation30_spill] sm:$0xff] }
 0x522   : > { %v14844_v41 = vpack.c.bf16 %v5511_v36, %v5503_v42  ;;  %v14846_v22 = vadd.f32 %v5294_v40, %v5102_v8  ;;  %v5631_v13 = vpack.c.bf16 %v5399_v4, %v5391_v21  ;;  %v5360_v55 = vmax.f32 %v18663_v63, 0.0  ;;  %v11040_v56 = vld [vmem:[%s18109_s10 + $0x104] ss:$16 sps:$4 sm:$0xff]   ;;  %v11038_v35 = vld [vmem:[%s18109_s10 + $0x100] ss:$16 sps:$4 sm:$0xff]  }
 0x523   : > { %v14848_v44 = vpop.f32.mrf.mxu0  ;;  %v14850_v32 = vpop.f32.mrf.mxu1  ;;  %5867 = vmatpush1.bf16.msra.mxu0 %v5647_v28  ;;  %6348 = vmatpush2.bf16.msra.mxu1 %v11026_v30  ;;  %v5624_v24 = vpack.c.bf16 %v5384_v20, %v5376_v57  ;;  %v18664_v30 = vld [vmem:[#allocation77_spill] sm:$0xff]  ;;  %v11070_v42 = vld [vmem:[%s18108_s9 + $0xe4] ss:$16 sps:$4 sm:$0xff]   ;;  %v11068_v18 = vld [vmem:[%s18108_s9 + $0xe0] ss:$16 sps:$4 sm:$0xff]  }
 0x524   : > { %18658 = vst [vmem:[#allocation83_spill] sm:$0xff] %v14844_v41  ;;  %18659 = vst [vmem:[#allocation84_spill] sm:$0xff] %v14846_v22  ;;  %5868 = vmatprep.subr.bf16.mxu0 %v5640_v1  ;;  %6349 = vmatprep.subr.bf16.mxu1 %v11031_v58  ;;  %v5616_v17 = vpack.c.bf16 %v5368_v47, %v5360_v55  ;;  %v18665_v7 = vld [vmem:[#allocation120_spill] sm:$0xff]  ;;  %v18672_v60 = vld [vmem:[#allocation34_spill] sm:$0xff] }
 0x525   : > { %v14858_v2 = vpop.f32.mrf.mxu0  ;;  %v14860_v45 = vpop.f32.mrf.mxu1  ;;  %v11076_v9 = vld [vmem:[%s18108_s9 + $0xc4] ss:$16 sps:$4 sm:$0xff]   ;;  %v11086_v47 = vld [vmem:[%s18108_s9 + $0x80] ss:$16 sps:$4 sm:$0xff]   ;;  %v18673_v22 = vld [vmem:[#allocation35_spill] sm:$0xff] }
 0x526   : > { %v18666_v1 = vld [vmem:[#allocation28_spill] sm:$0xff] }
 0x527   : > { %v14864_v33 = vpop.f32.mrf.mxu0  ;;  %v14866_v50 = vpop.f32.mrf.mxu1  ;;  %5869 = vmatpush1.bf16.msra.mxu0 %v5639_v53  ;;  %6350 = vmatpush2.bf16.msra.mxu1 %v11029_v15  ;;  %v11082_v4 = vld [vmem:[%s18108_s9 + $0xa4] ss:$16 sps:$4 sm:$0xff]  }
 0x528   : > { %5870 = vmatprep.subr.bf16.mxu0 %v5632_v59  ;;  %6351 = vmatprep.subr.bf16.mxu1 %v11034_v48  ;;  %v11074_v48 = vld [vmem:[%s18108_s9 + $0xc0] ss:$16 sps:$4 sm:$0xff]   ;;  %v11088_v10 = vld [vmem:[%s18108_s9 + $0x84] ss:$16 sps:$4 sm:$0xff]  }
 0x529   : > { %v14875_v46 = vpop.f32.mrf.mxu0  ;;  %v14877_v51 = vpop.f32.mrf.mxu1  ;;  %v11080_v59 = vld [vmem:[%s18108_s9 + $0xa0] ss:$16 sps:$4 sm:$0xff]  }
 0x52b   : > { %v14879_v52 = vpop.f32.mrf.mxu0  ;;  %v14881_v62 = vpop.f32.mrf.mxu1  ;;  %5871 = vmatpush1.bf16.msra.mxu0 %v5631_v13  ;;  %6352 = vmatpush2.bf16.msra.mxu1 %v11032_v29  ;;  %v18669_v13 = vld [vmem:[#allocation31_spill] sm:$0xff] }
 0x52c   : > { %5872 = vmatprep.subr.bf16.mxu0 %v5624_v24  ;;  %6353 = vmatprep.subr.bf16.mxu1 %v11037_v31  ;;  %v11094_v24 = vld [vmem:[%s18108_s9 + $0x64] ss:$16 sps:$4 sm:$0xff]  }
 0x52d   : > { %v14890_v11 = vpop.f32.mrf.mxu0  ;;  %v14892_v39 = vpop.f32.mrf.mxu1 }
 0x52f   : > { %v14894_v61 = vpop.f32.mrf.mxu0  ;;  %v14896_v40 = vpop.f32.mrf.mxu1  ;;  %5873 = vmatpush1.bf16.msra.mxu0 %v18664_v30  ;;  %6354 = vmatpush2.bf16.msra.mxu1 %v11035_v26  ;;  %v11100_v30 = vld [vmem:[%s18108_s9 + $0x44] ss:$16 sps:$4 sm:$0xff]  }
 0x530   : > { %5874 = vmatprep.subr.bf16.mxu0 %v5616_v17  ;;  %6355 = vmatprep.subr.bf16.mxu1 %v11040_v56  ;;  %v11092_v17 = vld [vmem:[%s18108_s9 + $0x60] ss:$16 sps:$4 sm:$0xff]  }
 0x531   : > { %v14905_v36 = vpop.f32.mrf.mxu0  ;;  %v14907_v8 = vpop.f32.mrf.mxu1 }
 0x533   : > { %v14909_v58 = vpop.f32.mrf.mxu0  ;;  %v14911_v12 = vpop.f32.mrf.mxu1  ;;  %5875 = vmatpush1.bf16.msra.mxu0 %v18665_v7  ;;  %6356 = vmatpush2.bf16.msra.mxu1 %v11038_v35  ;;  %v18670_v7 = vld [vmem:[#allocation32_spill] sm:$0xff] }
 0x534   : > { %6871 = vmatprep.subr.bf16.mxu1 %v11070_v42 }
 0x535   : > { %v14920_v28 = vpop.f32.mrf.mxu0  ;;  %v14922_v27 = vpop.f32.mrf.mxu1 }
 0x536   : > { %6358 = vmatmul.mubr.bf16.vlgmr.msra.gmra.mxu1 %v18666_v1 }
 0x537   : > { %v14925_v16 = vpop.f32.mrf.mxu0  ;;  %v14927_v15 = vpop.f32.mrf.mxu1  ;;  %6367 = vmatprep.mubr.bf16.mxu1 %v18667_v14  ;;  %6872 = vmatpush1.bf16.msra.mxu1 %v11068_v18 }
 0x538   : > { %6873 = vmatprep.subr.bf16.mxu1 %v11076_v9 }
 0x539   : > { %v14936_v53 = vpop.f32.mrf.mxu0  ;;  %v14938_v23 = vpop.f32.mrf.mxu1 }
 0x53b   : > { %v14940_v54 = vpop.f32.mrf.mxu0  ;;  %v14942_v20 = vpop.f32.mrf.mxu1  ;;  %6874 = vmatpush1.bf16.msra.mxu1 %v11074_v48  ;;  %v18671_v48 = vld [vmem:[#allocation33_spill] sm:$0xff] }
 0x53c   : > { %6875 = vmatprep.subr.bf16.mxu1 %v11082_v4  ;;  %v11098_v4 = vld [vmem:[%s18108_s9 + $0x40] ss:$16 sps:$4 sm:$0xff]  }
 0x53d   : > { %v5137_v21 = vpop.f32.mrf.mxu0  ;;  %v14950_v29 = vpop.f32.mrf.mxu1 }
 0x53e   : > { %6368 = vmatmul.mubr.bf16.gmra.mxu1 %v18668_v19 }
 0x53f   : > { %v5141_v57 = vpop.f32.mrf.mxu0  ;;  %v14953_v31 = vpop.f32.mrf.mxu1  ;;  %6377 = vmatprep.mubr.bf16.mxu1 %v18669_v13  ;;  %6876 = vmatpush1.bf16.msra.mxu1 %v11080_v59  ;;  %v11106_v59 = vld [vmem:[%s18108_s9 + $0x24] ss:$16 sps:$4 sm:$0xff]  }
 0x540   : > { %6877 = vmatprep.subr.bf16.mxu1 %v11088_v10 }
 0x541   : > { %v5143_v26 = vpop.f32.mrf.mxu0  ;;  %v5336_v63 = vpop.f32.mrf.mxu1 }
 0x543   : > { %v5145_v55 = vpop.f32.mrf.mxu0  ;;  %v5338_v56 = vpop.f32.mrf.mxu1  ;;  %6878 = vmatpush1.bf16.msra.mxu1 %v11086_v47 }
 0x544   : > { %6879 = vmatprep.subr.bf16.mxu1 %v11094_v24 }
 0x545   : > { %v5147_v35 = vpop.f32.mrf.mxu0  ;;  %v5340_v42 = vpop.f32.mrf.mxu1 }
 0x546   : > { %6378 = vmatmul.mubr.bf16.gmra.mxu1 %v18670_v7  ;;  %v5148_v24 = vadd.f32 %v5147_v35, %v14506_v43  ;;  %v11112_v35 = vld [vmem:[%s18108_s9 + $0x4] ss:$16 sps:$4 sm:$0xff]  }
 0x547   : > { %v5151_v18 = vpop.f32.mrf.mxu0  ;;  %v5344_v9 = vpop.f32.mrf.mxu1  ;;  %6387 = vmatprep.mubr.bf16.mxu1 %v18671_v48  ;;  %6880 = vmatpush1.bf16.msra.mxu1 %v11092_v17  ;;  %v11104_v17 = vld [vmem:[%s18108_s9 + $0x20] ss:$16 sps:$4 sm:$0xff]  }
 0x548   : > { %6881 = vmatprep.subr.bf16.mxu1 %v11100_v30  ;;  %v5152_v13 = vadd.f32 %v5151_v18, %v14504_v38  ;;  %v5144_v30 = vadd.f32 %v5143_v26, %v14506_v43  ;;  %v5146_v18 = vadd.f32 %v5145_v55, %v14504_v38  ;;  %v5341_v6 = vadd.f32 %v5340_v42, %v5148_v24 }
 0x549   : > { %v5153_v10 = vpop.f32.mrf.mxu0  ;;  %v5346_v47 = vpop.f32.mrf.mxu1  ;;  %v5142_v26 = vadd.f32 %v5141_v57, %v14504_v38  ;;  %v5128_v57 = vadd.f32 %v14920_v28, %v14506_v43 }
 0x54a   : > { %v5154_v7 = vadd.f32 %v5153_v10, %v14506_v43  ;;  %v5138_v10 = vadd.f32 %v5137_v21, %v14506_v43  ;;  %v11110_v21 = vld [vmem:[%s18108_s9] ss:$16 sps:$4 sm:$0xff]   ;;  %v5337_v55 = vadd.f32 %v5336_v63, %v5144_v30  ;;  %v5339_v42 = vadd.f32 %v5338_v56, %v5146_v18 }
 0x54b   : > { %v5155_v19 = vpop.f32.mrf.mxu0  ;;  %v5348_v48 = vpop.f32.mrf.mxu1  ;;  %6882 = vmatpush1.bf16.msra.mxu1 %v11098_v4  ;;  %v5321_v18 = vadd.f32 %v14922_v27, %v5128_v57 }
 0x54c   : > { %v5156_v14 = vadd.f32 %v5155_v19, %v14504_v38  ;;  %6883 = vmatprep.subr.bf16.mxu1 %v11106_v59  ;;  %v5347_v4 = vadd.f32 %v5346_v47, %v5154_v7  ;;  %v5345_v19 = vadd.f32 %v5344_v9, %v5152_v13  ;;  %v5136_v13 = vadd.f32 %v14940_v54, %v14504_v38 }
 0x54d   : > { %v5157_v1 = vpop.f32.mrf.mxu0  ;;  %v5350_v59 = vpop.f32.mrf.mxu1  ;;  %v5592_v47 = vmax.f32 %v5341_v6, 0.0  ;;  %v5124_v54 = vadd.f32 %v14905_v36, %v14506_v43  ;;  %v5584_v56 = vmax.f32 %v5337_v55, 0.0  ;;  %v5126_v6 = vadd.f32 %v14909_v58, %v14504_v38  ;;  %v18674_v36 = vld [vmem:[#allocation36_spill] sm:$0xff] }
 0x54e   : > { %v5349_v41 = vadd.f32 %v5348_v48, %v5156_v14  ;;  %v5158_v34 = vadd.f32 %v5157_v1, %v14506_v43  ;;  %6388 = vmatmul.mubr.bf16.gmra.mxu1 %v18672_v60  ;;  %v5134_v14 = vadd.f32 %v14936_v53, %v14506_v43  ;;  %v5331_v48 = vadd.f32 %v14950_v29, %v5138_v10 }
 0x54f   : > { %6397 = vmatprep.mubr.bf16.mxu1 %v18673_v22  ;;  %6884 = vmatpush1.bf16.msra.mxu1 %v11104_v17  ;;  %v14993_v37 = vpop.f32.mrf.mxu0  ;;  %v5600_v24 = vmax.f32 %v5347_v4, 0.0  ;;  %v5132_v53 = vadd.f32 %v14925_v16, %v14504_v38  ;;  %v5599_v63 = vmax.f32 %v5345_v19, 0.0  ;;  %v5329_v29 = vadd.f32 %v14942_v20, %v5136_v13  ;;  %v18675_v20 = vld [vmem:[#allocation37_spill] sm:$0xff] }
 0x550   : > { %v5351_v1 = vadd.f32 %v5350_v59, %v5158_v34  ;;  %6885 = vmatprep.subr.bf16.mxu1 %v11112_v35  ;;  %v5607_v7 = vmax.f32 %v5349_v41, 0.0  ;;  %v5335_v34 = vadd.f32 %v14953_v31, %v5142_v26  ;;  %v5327_v41 = vadd.f32 %v14938_v23, %v5134_v14 }
 0x551   : > { %v15004_v9 = vpop.f32.mrf.mxu0  ;;  %v5591_v35 = vmax.f32 %v5339_v42, 0.0  ;;  %v5118_v31 = vadd.f32 %v14890_v11, %v14506_v43  ;;  %v5576_v4 = vmax.f32 %v5331_v48, 0.0  ;;  %v5728_v23 = vpack.c.bf16 %v5592_v47, %v5584_v56 }
 0x552   : > { %v5608_v17 = vmax.f32 %v5351_v1, 0.0  ;;  %v5735_v10 = vpack.c.bf16 %v5607_v7, %v5599_v63  ;;  %v5122_v26 = vadd.f32 %v14894_v61, %v14504_v38  ;;  %v5325_v58 = vadd.f32 %v14927_v15, %v5132_v53 }
 0x553   : > { %6886 = vmatpush1.bf16.msra.mxu1 %v11110_v21  ;;  %v5775_v28 = vpop.f32.mrf.mxu0  ;;  %v5583_v19 = vmax.f32 %v5335_v34, 0.0  ;;  %v5114_v59 = vadd.f32 %v14875_v46, %v14506_v43  ;;  %v5317_v11 = vadd.f32 %v14907_v8, %v5124_v54  ;;  %v5568_v27 = vmax.f32 %v5327_v41, 0.0  ;;  %v18677_v34 = vld [vmem:[#allocation39_spill] sm:$0xff] }
 0x554   : > { %v5736_v30 = vpack.c.bf16 %v5608_v17, %v5600_v24  ;;  %v5116_v21 = vadd.f32 %v14879_v52, %v14504_v38  ;;  %v5319_v14 = vadd.f32 %v14911_v12, %v5126_v6  ;;  %v5575_v55 = vmax.f32 %v5329_v29, 0.0  ;;  %v18676_v17 = vld [vmem:[#allocation38_spill] sm:$0xff] }
 0x555   : > { %v5776_v16 = vpop.f32.mrf.mxu0  ;;  %v5727_v61 = vpack.c.bf16 %v5591_v35, %v5583_v19  ;;  %v5108_v15 = vadd.f32 %v14858_v2, %v14506_v43  ;;  %v5311_v1 = vadd.f32 %v14892_v39, %v5118_v31  ;;  %v5560_v57 = vmax.f32 %v5321_v18, 0.0  ;;  %v18684_v19 = vld [vmem:[#allocation42_spill] sm:$0xff] }
 0x556   : > { %5876 = vmatprep.subr.bf16.mxu0 %v5736_v30  ;;  %6398 = vmatmul.mubr.bf16.gmra.mxu1 %v18674_v36  ;;  %v5720_v13 = vpack.c.bf16 %v5576_v4, %v5568_v27  ;;  %v5112_v46 = vadd.f32 %v14864_v33, %v14504_v38  ;;  %v5315_v8 = vadd.f32 %v14896_v40, %v5122_v26  ;;  %v5567_v42 = vmax.f32 %v5325_v58, 0.0  ;;  %v18680_v16 = vld [vmem:[#allocation84_spill] sm:$0xff]  ;;  %v18683_v26 = vld [vmem:[#allocation117_spill] sm:$0xff]  ;;  %v18686_v27 = vld [vmem:[#allocation43_spill] sm:$0xff] }
 0x557   : > { %5877 = vmatpush2.bf16.msra.mxu0 %v5735_v10  ;;  %6407 = vmatprep.mubr.bf16.mxu1 %v18675_v20  ;;  %v5104_v52 = vadd.f32 %v14840_v25, %v14506_v43  ;;  %v5307_v12 = vadd.f32 %v14877_v51, %v5114_v59  ;;  %v5552_v7 = vmax.f32 %v5317_v11, 0.0  ;;  %v5106_v2 = vadd.f32 %v14848_v44, %v14504_v38  ;;  %v18679_v10 = vld [vmem:[#allocation40_spill] sm:$0xff]  ;;  %v18685_v11 = vld [vmem:[#allocation83_spill] sm:$0xff] }
 0x558   : > { %5878 = vmatprep.subr.bf16.mxu0 %v5728_v23  ;;  %v5309_v39 = vadd.f32 %v14881_v62, %v5116_v21  ;;  %v5559_v48 = vmax.f32 %v5319_v14, 0.0  ;;  %v5719_v47 = vpack.c.bf16 %v5575_v55, %v5567_v42  ;;  %v5098_v33 = vadd.f32 %v14819_v0, %v14506_v43  ;;  %v11127_v21 = vld [vmem:[%s18110_s11 + $0xe4] ss:$16 sps:$4 sm:$0xff]   ;;  %v11043_v14 = vld [vmem:[%s18109_s10 + $0xec] ss:$16 sps:$4 sm:$0xff]  }
 0x559   : > { %v5301_v40 = vadd.f32 %v14860_v45, %v5108_v15  ;;  %v5544_v24 = vmax.f32 %v5311_v1, 0.0  ;;  %v5712_v25 = vpack.c.bf16 %v5560_v57, %v5552_v7  ;;  %v5305_v51 = vadd.f32 %v14866_v50, %v5112_v46  ;;  %8801 = vmatprep.subr.bf16.mxu1 %v11127_v21  ;;  %v18687_v55 = vld [vmem:[#allocation71_spill] sm:$0xff]  ;;  %v18689_v57 = vld [vmem:[#allocation44_spill] sm:$0xff]  ;;  %v18692_v7 = vld [vmem:[#allocation46_spill] sm:$0xff] }
 0x55a   : > { %v5551_v53 = vmax.f32 %v5315_v8, 0.0  ;;  %v5297_v38 = vadd.f32 %v14842_v5, %v5104_v52  ;;  %v5536_v44 = vmax.f32 %v5307_v12, 0.0  ;;  %v5299_v62 = vadd.f32 %v14850_v32, %v5106_v2  ;;  %v18678_v5 = vld [vmem:[#allocation116_spill] sm:$0xff]  ;;  %v11046_v15 = vld [vmem:[%s18109_s10 + $0xcc] ss:$16 sps:$4 sm:$0xff]  }
 0x55b   : > { %5879 = vmatpush2.bf16.msra.mxu0 %v5727_v61  ;;  %v5543_v63 = vmax.f32 %v5309_v39, 0.0  ;;  %v5088_v45 = vadd.f32 %v14775_v49, %v14506_v43  ;;  %v5291_v28 = vadd.f32 %v14821_v3, %v5098_v33  ;;  %v5528_v54 = vmax.f32 %v5301_v40, 0.0  ;;  %v18681_v43 = vld [vmem:[#allocation41_spill] sm:$0xff]  ;;  %v18691_v8 = vld [vmem:[#allocation27_spill] sm:$0xff]  ;;  %v18694_v40 = vld [vmem:[#allocation48_spill] sm:$0xff] }
 0x55c   : > { %5880 = vmatprep.subr.bf16.mxu0 %v5720_v13  ;;  %v5711_v0 = vpack.c.bf16 %v5559_v48, %v5551_v53  ;;  %v5704_v41 = vpack.c.bf16 %v5544_v24, %v5536_v44  ;;  %v5535_v50 = vmax.f32 %v5305_v51, 0.0  ;;  %v5520_v56 = vmax.f32 %v5297_v38, 0.0  ;;  %v18682_v49 = vld [vmem:[#allocation81_spill] sm:$0xff]  ;;  %v18693_v2 = vld [vmem:[#allocation47_spill] sm:$0xff]  ;;  %v18696_v44 = vld [vmem:[#allocation50_spill] sm:$0xff] }
 0x55d   : > { %v5527_v30 = vmax.f32 %v5299_v62, 0.0  ;;  %v5281_v29 = vadd.f32 %v18678_v5, %v5088_v45  ;;  %v5512_v35 = vmax.f32 %v5291_v28, 0.0  ;;  %v5519_v31 = vmax.f32 %v18680_v16, 0.0  ;;  %v11041_v61 = vld [vmem:[%s18109_s10 + $0xe8] ss:$16 sps:$4 sm:$0xff]   ;;  %v18700_v16 = vld [vmem:[#allocation54_spill] sm:$0xff] }
 0x55e   : > { %6408 = vmatmul.mubr.bf16.gmra.mxu1 %v18676_v17  ;;  %v5703_v6 = vpack.c.bf16 %v5543_v63, %v5535_v50  ;;  %v5696_v32 = vpack.c.bf16 %v5528_v54, %v5520_v56  ;;  %v5504_v3 = vmax.f32 %v18682_v49, 0.0  ;;  %v5488_v58 = vmax.f32 %v18683_v26, 0.0  ;;  %v18690_v13 = vld [vmem:[#allocation45_spill] sm:$0xff]  ;;  %v18697_v62 = vld [vmem:[#allocation51_spill] sm:$0xff] }
 0x55f   : > { %5881 = vmatpush2.bf16.msra.mxu0 %v5719_v47  ;;  %6417 = vmatprep.mubr.bf16.mxu1 %v18677_v34  ;;  %v5695_v18 = vpack.c.bf16 %v5527_v30, %v5519_v31  ;;  %v5496_v4 = vmax.f32 %v5281_v29, 0.0  ;;  %v18688_v1 = vmov 1065369472   ;;  %v11044_v46 = vld [vmem:[%s18109_s10 + $0xc8] ss:$16 sps:$4 sm:$0xff]   ;;  %v18698_v30 = vld [vmem:[#allocation52_spill] sm:$0xff] }
 0x560   : > { %5882 = vmatprep.subr.bf16.mxu0 %v5712_v25  ;;  %v5688_v23 = vpack.c.bf16 %v5512_v35, %v5504_v3  ;;  %v11049_v42 = vld [vmem:[%s18109_s10 + $0xac] ss:$16 sps:$4 sm:$0xff]   ;;  %v11047_v52 = vld [vmem:[%s18109_s10 + $0xa8] ss:$16 sps:$4 sm:$0xff]  }
 0x561   : > { %v5680_v59 = vpack.c.bf16 %v5496_v4, %v5488_v58  ;;  %v11052_v12 = vld [vmem:[%s18109_s10 + $0x8c] ss:$16 sps:$4 sm:$0xff]   ;;  %v11050_v39 = vld [vmem:[%s18109_s10 + $0x88] ss:$16 sps:$4 sm:$0xff]  }
 0x562   : > { %v11055_v48 = vld [vmem:[%s18109_s10 + $0x6c] ss:$16 sps:$4 sm:$0xff]   ;;  %v11053_v47 = vld [vmem:[%s18109_s10 + $0x68] ss:$16 sps:$4 sm:$0xff]  }
 0x563   : > { %5883 = vmatpush2.bf16.msra.mxu0 %v5711_v0  ;;  %v11058_v33 = vld [vmem:[%s18109_s10 + $0x4c] ss:$16 sps:$4 sm:$0xff]   ;;  %v11056_v25 = vld [vmem:[%s18109_s10 + $0x48] ss:$16 sps:$4 sm:$0xff]  }
 0x564   : > { %5884 = vmatprep.subr.bf16.mxu0 %v5704_v41  ;;  %v18695_v24 = vld [vmem:[#allocation49_spill] sm:$0xff]  ;;  %v18701_v31 = vld [vmem:[#allocation55_spill] sm:$0xff] }
 0x565   : > { %v11061_v51 = vld [vmem:[%s18109_s10 + $0x2c] ss:$16 sps:$4 sm:$0xff]   ;;  %v11059_v53 = vld [vmem:[%s18109_s10 + $0x28] ss:$16 sps:$4 sm:$0xff]  }
 0x566   : > { %6418 = vmatmul.mubr.bf16.gmra.mxu1 %v18679_v10  ;;  %v11064_v38 = vld [vmem:[%s18109_s10 + $0xc] ss:$16 sps:$4 sm:$0xff]   ;;  %v11062_v63 = vld [vmem:[%s18109_s10 + $0x8] ss:$16 sps:$4 sm:$0xff]  }
 0x567   : > { %5885 = vmatpush2.bf16.msra.mxu0 %v5703_v6  ;;  %6427 = vmatprep.mubr.bf16.mxu1 %v18681_v43  ;;  %v11067_v45 = vld [vmem:[%s18109_s10 + $0x1ec] ss:$16 sps:$4 sm:$0xff]   ;;  %v11065_v54 = vld [vmem:[%s18109_s10 + $0x1e8] ss:$16 sps:$4 sm:$0xff]  }
 0x568   : > { %5886 = vmatprep.subr.bf16.mxu0 %v5696_v32  ;;  %v11073_v50 = vld [vmem:[%s18109_s10 + $0x1cc] ss:$16 sps:$4 sm:$0xff]   ;;  %v11071_v5 = vld [vmem:[%s18109_s10 + $0x1c8] ss:$16 sps:$4 sm:$0xff]  }
 0x569   : > { %v18699_v6 = vld [vmem:[#allocation53_spill] sm:$0xff] }
 0x56a   : > { %v11079_v29 = vld [vmem:[%s18109_s10 + $0x1ac] ss:$16 sps:$4 sm:$0xff]   ;;  %v11077_v35 = vld [vmem:[%s18109_s10 + $0x1a8] ss:$16 sps:$4 sm:$0xff]  }
 0x56b   : > { %5887 = vmatpush2.bf16.msra.mxu0 %v5695_v18  ;;  %v11085_v32 = vld [vmem:[%s18109_s10 + $0x18c] ss:$16 sps:$4 sm:$0xff]   ;;  %v11083_v49 = vld [vmem:[%s18109_s10 + $0x188] ss:$16 sps:$4 sm:$0xff]  }
 0x56c   : > { %5888 = vmatprep.subr.bf16.mxu0 %v5688_v23  ;;  %v11091_v3 = vld [vmem:[%s18109_s10 + $0x16c] ss:$16 sps:$4 sm:$0xff]   ;;  %v11089_v18 = vld [vmem:[%s18109_s10 + $0x168] ss:$16 sps:$4 sm:$0xff]   ;;  %v18702_v23 = vld [vmem:[#allocation56_spill] sm:$0xff] }
 0x56d   : > { %v11097_v4 = vld [vmem:[%s18109_s10 + $0x14c] ss:$16 sps:$4 sm:$0xff]   ;;  %v11095_v58 = vld [vmem:[%s18109_s10 + $0x148] ss:$16 sps:$4 sm:$0xff]  }
 0x56e   : > { %6428 = vmatmul.mubr.bf16.gmra.mxu1 %v18684_v19  ;;  %v18703_v26 = vld [vmem:[#allocation57_spill] sm:$0xff] }
 0x56f   : > { %5889 = vmatpush2.bf16.msra.mxu0 %v18685_v11  ;;  %6437 = vmatprep.mubr.bf16.mxu1 %v18686_v27  ;;  %v11101_v11 = vld [vmem:[%s18109_s10 + $0x128] ss:$16 sps:$4 sm:$0xff]   ;;  %v11109_v21 = vld [vmem:[%s18109_s10 + $0x10c] ss:$16 sps:$4 sm:$0xff]  }
 0x570   : > { %5890 = vmatprep.subr.bf16.mxu0 %v5680_v59  ;;  %v11103_v59 = vld [vmem:[%s18109_s10 + $0x12c] ss:$16 sps:$4 sm:$0xff]  }
 0x573   : > { %5891 = vmatpush2.bf16.msra.mxu0 %v18687_v55  ;;  %v11107_v55 = vld [vmem:[%s18109_s10 + $0x108] ss:$16 sps:$4 sm:$0xff]  }
 0x574   : > { %6518 = vmatprep.subr.bf16.mxu0 %v11043_v14  ;;  %v18704_v14 = vld [vmem:[#allocation58_spill] sm:$0xff] }
 0x576   : > { %5893 = vmatmul.mubr.bf16.vlgmr.msra.gmra.mxu0 %v18688_v1  ;;  %6438 = vmatmul.mubr.bf16.gmra.mxu1 %v18689_v57  ;;  %v11113_v1 = vld [vmem:[%s18108_s9 + $0xe8] ss:$16 sps:$4 sm:$0xff]  }
 0x577   : > { %6447 = vmatprep.mubr.bf16.mxu1 %v18690_v13  ;;  %6519 = vmatpush1.bf16.msra.mxu0 %v11041_v61  ;;  %v18705_v61 = vmov 0  }
 0x578   : > { %6550 = vmatprep.mubr.bf16.mxu0 %v18691_v8  ;;  %6520 = vmatprep.subr.bf16.mxu0 %v11046_v15  ;;  %v11115_v15 = vld [vmem:[%s18108_s9 + $0xec] ss:$16 sps:$4 sm:$0xff]   ;;  %v11125_v8 = vld [vmem:[%s18110_s11 + $0xe0] ss:$16 sps:$4 sm:$0xff]  }
 0x57b   : > { %6521 = vmatpush1.bf16.msra.mxu0 %v11044_v46  ;;  %v11118_v46 = vld [vmem:[%s18108_s9 + $0xcc] ss:$16 sps:$4 sm:$0xff]  }
 0x57c   : > { %6522 = vmatprep.subr.bf16.mxu0 %v11049_v42  ;;  %v18706_v42 = vld [vmem:[#allocation28_spill] sm:$0xff] }
 0x57e   : > { %6448 = vmatmul.mubr.bf16.gmra.mxu1 %v18692_v7 }
 0x57f   : > { %6457 = vmatprep.mubr.bf16.mxu1 %v18693_v2  ;;  %6523 = vmatpush1.bf16.msra.mxu0 %v11047_v52  ;;  %v18707_v52 = vld [vmem:[#allocation8_spill] sm:$0xff] }
 0x580   : > { %6524 = vmatprep.subr.bf16.mxu0 %v11052_v12 }
 0x583   : > { %6525 = vmatpush1.bf16.msra.mxu0 %v11050_v39  ;;  %v11133_v39 = vld [vmem:[%s18110_s11 + $0xc4] ss:$16 sps:$4 sm:$0xff]  }
 0x584   : > { %6526 = vmatprep.subr.bf16.mxu0 %v11055_v48  ;;  %v18708_v48 = vld [vmem:[#allocation29_spill] sm:$0xff] }
 0x586   : > { %6458 = vmatmul.mubr.bf16.gmra.mxu1 %v18694_v40 }
 0x587   : > { %6467 = vmatprep.mubr.bf16.mxu1 %v18695_v24  ;;  %6527 = vmatpush1.bf16.msra.mxu0 %v11053_v47  ;;  %v11116_v47 = vld [vmem:[%s18108_s9 + $0xc8] ss:$16 sps:$4 sm:$0xff]  }
 0x588   : > { %6528 = vmatprep.subr.bf16.mxu0 %v11058_v33  ;;  %v11121_v33 = vld [vmem:[%s18108_s9 + $0xac] ss:$16 sps:$4 sm:$0xff]  }
 0x58b   : > { %6529 = vmatpush1.bf16.msra.mxu0 %v11056_v25 }
 0x58c   : > { %6530 = vmatprep.subr.bf16.mxu0 %v11061_v51  ;;  %v11131_v51 = vld [vmem:[%s18110_s11 + $0xc0] ss:$16 sps:$4 sm:$0xff]  }
 0x58e   : > { %6468 = vmatmul.mubr.bf16.gmra.mxu1 %v18696_v44 }
 0x58f   : > { %6477 = vmatprep.mubr.bf16.mxu1 %v18697_v62  ;;  %6531 = vmatpush1.bf16.msra.mxu0 %v11059_v53  ;;  %v15124_v0 = vpop.f32.mrf.mxu0 }
 0x590   : > { %6532 = vmatprep.subr.bf16.mxu0 %v11064_v38  ;;  %v11119_v38 = vld [vmem:[%s18108_s9 + $0xa8] ss:$16 sps:$4 sm:$0xff]  }
 0x591   : > { %v15129_v28 = vpop.f32.mrf.mxu0 }
 0x593   : > { %6533 = vmatpush1.bf16.msra.mxu0 %v11062_v63  ;;  %v5816_v41 = vpop.f32.mrf.mxu0 }
 0x594   : > { %6534 = vmatprep.subr.bf16.mxu0 %v11067_v45  ;;  %v11136_v45 = vld [vmem:[%s18110_s11 + $0xa4] ss:$16 sps:$4 sm:$0xff]   ;;  %v11134_v41 = vld [vmem:[%s18110_s11 + $0xa0] ss:$16 sps:$4 sm:$0xff]  }
 0x595   : > { %v5817_v56 = vpop.f32.mrf.mxu0 }
 0x596   : > { %6478 = vmatmul.mubr.bf16.gmra.mxu1 %v18698_v30  ;;  %v18710_v56 = vld [vmem:[#allocation9_spill] sm:$0xff] }
 0x597   : > { %6487 = vmatprep.mubr.bf16.mxu1 %v18699_v6  ;;  %6535 = vmatpush2.bf16.msra.mxu0 %v11065_v54  ;;  %v11124_v54 = vld [vmem:[%s18108_s9 + $0x8c] ss:$16 sps:$4 sm:$0xff]  }
 0x598   : > { %6536 = vmatprep.subr.bf16.mxu0 %v11073_v50  ;;  %v18709_v50 = vld [vmem:[#allocation30_spill] sm:$0xff] }
 0x59b   : > { %6537 = vmatpush2.bf16.msra.mxu0 %v11071_v5  ;;  %v11139_v5 = vld [vmem:[%s18110_s11 + $0x84] ss:$16 sps:$4 sm:$0xff]  }
 0x59c   : > { %6538 = vmatprep.subr.bf16.mxu0 %v11079_v29  ;;  %v18711_v29 = vld [vmem:[#allocation31_spill] sm:$0xff] }
 0x59e   : > { %6488 = vmatmul.mubr.bf16.gmra.mxu1 %v18700_v16 }
 0x59f   : > { %6497 = vmatprep.mubr.bf16.mxu1 %v18701_v31  ;;  %6539 = vmatpush2.bf16.msra.mxu0 %v11077_v35  ;;  %v11122_v35 = vld [vmem:[%s18108_s9 + $0x88] ss:$16 sps:$4 sm:$0xff]  }
 0x5a0   : > { %6540 = vmatprep.subr.bf16.mxu0 %v11085_v32  ;;  %v11130_v32 = vld [vmem:[%s18108_s9 + $0x6c] ss:$16 sps:$4 sm:$0xff]  }
 0x5a3   : > { %6541 = vmatpush2.bf16.msra.mxu0 %v11083_v49  ;;  %v11137_v49 = vld [vmem:[%s18110_s11 + $0x80] ss:$16 sps:$4 sm:$0xff]  }
 0x5a4   : > { %6542 = vmatprep.subr.bf16.mxu0 %v11091_v3  ;;  %v11128_v3 = vld [vmem:[%s18108_s9 + $0x68] ss:$16 sps:$4 sm:$0xff]  }
 0x5a6   : > { %6498 = vmatmul.mubr.bf16.gmra.mxu1 %v18702_v23 }
 0x5a7   : > { %6507 = vmatprep.mubr.bf16.mxu1 %v18703_v26  ;;  %6543 = vmatpush2.bf16.msra.mxu0 %v11089_v18  ;;  %v11142_v18 = vld [vmem:[%s18110_s11 + $0x64] ss:$16 sps:$4 sm:$0xff]  }
 0x5a8   : > { %6544 = vmatprep.subr.bf16.mxu0 %v11097_v4  ;;  %v11140_v4 = vld [vmem:[%s18110_s11 + $0x60] ss:$16 sps:$4 sm:$0xff]  }
 0x5ab   : > { %6545 = vmatpush2.bf16.msra.mxu0 %v11095_v58  ;;  %v11145_v58 = vld [vmem:[%s18108_s9 + $0x4c] ss:$16 sps:$4 sm:$0xff]  }
 0x5ac   : > { %6546 = vmatprep.subr.bf16.mxu0 %v11103_v59  ;;  %v18712_v59 = vld [vmem:[#allocation32_spill] sm:$0xff] }
 0x5ae   : > { %6508 = vmatmul.mubr.bf16.gmra.mxu1 %v18704_v14 }
 0x5af   : > { %6547 = vmatpush2.bf16.msra.mxu0 %v11101_v11  ;;  %6903 = vmatprep.mubr.bf16.mxu1 %v18705_v61  ;;  %v18713_v11 = vld [vmem:[#allocation10_spill] sm:$0xff] }
 0x5b0   : > { %6548 = vmatprep.subr.bf16.mxu0 %v11109_v21  ;;  %v11148_v21 = vld [vmem:[%s18110_s11 + $0x44] ss:$16 sps:$4 sm:$0xff]  }
 0x5b3   : > { %6549 = vmatpush2.bf16.msra.mxu0 %v11107_v55  ;;  %v18714_v55 = vld [vmem:[#allocation33_spill] sm:$0xff] }
 0x5b4   : > { %7064 = vmatprep.subr.bf16.mxu0 %v11115_v15  ;;  %v11143_v15 = vld [vmem:[%s18108_s9 + $0x48] ss:$16 sps:$4 sm:$0xff]  }
 0x5b6   : > { %6551 = vmatmul.mubr.bf16.vlgmr.msra.gmra.mxu0 %v18706_v42  ;;  %6904 = vmatmul.mubr.bf16.vlgmr.msra.gmra.mxu1 %v18707_v52  ;;  %v15198_v12 = vpop.f32.mrf.mxu1  ;;  %v11158_v42 = vld [vmem:[%s18108_s9 + $0x28] ss:$16 sps:$4 sm:$0xff]  }
 0x5b7   : > { %6560 = vmatprep.mubr.bf16.mxu0 %v18708_v48  ;;  %7065 = vmatpush1.bf16.msra.mxu0 %v11113_v1  ;;  %v11146_v1 = vld [vmem:[%s18110_s11 + $0x40] ss:$16 sps:$4 sm:$0xff]   ;;  %v11175_v48 = vld [vmem:[%s18108_s9 + $0xc] ss:$16 sps:$4 sm:$0xff]  }
 0x5b8   : > { %6913 = vmatprep.mubr.bf16.mxu1 %v18705_v61  ;;  %7066 = vmatprep.subr.bf16.mxu0 %v11118_v46  ;;  %v15211_v25 = vpop.f32.mrf.mxu1  ;;  %v11160_v46 = vld [vmem:[%s18108_s9 + $0x2c] ss:$16 sps:$4 sm:$0xff]  }
 0x5b9   : > { %8802 = vmatpush1.bf16.msra.mxu1 %v11125_v8  ;;  %v11151_v8 = vld [vmem:[%s18110_s11 + $0x24] ss:$16 sps:$4 sm:$0xff]  }
 0x5ba   : > { %v5857_v53 = vpop.f32.mrf.mxu1  ;;  %8803 = vmatprep.subr.bf16.mxu1 %v11133_v39  ;;  %v11149_v39 = vld [vmem:[%s18110_s11 + $0x20] ss:$16 sps:$4 sm:$0xff]  }
 0x5bb   : > { %7067 = vmatpush1.bf16.msra.mxu0 %v11116_v47  ;;  %v18715_v47 = vld [vmem:[#allocation11_spill] sm:$0xff]  ;;  %v11190_v53 = vld [vmem:[%s18110_s11 + $0x2e4] ss:$16 sps:$4 sm:$0xff]  }
 0x5bc   : > { %7068 = vmatprep.subr.bf16.mxu0 %v11121_v33  ;;  %v5858_v63 = vpop.f32.mrf.mxu1  ;;  %v11154_v33 = vld [vmem:[%s18110_s11 + $0x4] ss:$16 sps:$4 sm:$0xff]  }
 0x5bd   : > { %8804 = vmatpush1.bf16.msra.mxu1 %v11131_v51  ;;  %v11173_v51 = vld [vmem:[%s18108_s9 + $0x8] ss:$16 sps:$4 sm:$0xff]   ;;  %v18716_v63 = vld [vmem:[#allocation12_spill] sm:$0xff] }
 0x5be   : > { %6561 = vmatmul.mubr.bf16.gmra.mxu0 %v18709_v50  ;;  %6914 = vmatmul.mubr.bf16.gmra.mxu1 %v18710_v56  ;;  %v11169_v50 = vld [vmem:[%s18110_s11 + $0x184] ss:$16 sps:$4 sm:$0xff]  }
 0x5bf   : > { %6570 = vmatprep.mubr.bf16.mxu0 %v18711_v29  ;;  %6923 = vmatprep.mubr.bf16.mxu1 %v18705_v61  ;;  %v11170_v29 = vld [vmem:[%s18110_s11 + $0x160] ss:$16 sps:$4 sm:$0xff]  }
 0x5c0   : > { %7069 = vmatpush1.bf16.msra.mxu0 %v11119_v38  ;;  %8805 = vmatprep.subr.bf16.mxu1 %v11136_v45  ;;  %v11155_v38 = vld [vmem:[%s18110_s11 + $0x1e0] ss:$16 sps:$4 sm:$0xff]   ;;  %v11163_v45 = vld [vmem:[%s18110_s11 + $0x1c4] ss:$16 sps:$4 sm:$0xff]  }
 0x5c1   : > { %7070 = vmatprep.subr.bf16.mxu0 %v11124_v54  ;;  %8806 = vmatpush1.bf16.msra.mxu1 %v11134_v41  ;;  %v11161_v54 = vld [vmem:[%s18110_s11 + $0x1c0] ss:$16 sps:$4 sm:$0xff]  }
 0x5c2   : > { %8807 = vmatprep.subr.bf16.mxu1 %v11139_v5  ;;  %v11164_v41 = vld [vmem:[%s18110_s11 + $0x1a0] ss:$16 sps:$4 sm:$0xff]  }
 0x5c3   : > { %v11167_v5 = vld [vmem:[%s18110_s11 + $0x180] ss:$16 sps:$4 sm:$0xff]  }
 0x5c4   : > { %7071 = vmatpush1.bf16.msra.mxu0 %v11122_v35  ;;  %v11178_v35 = vld [vmem:[%s18110_s11 + $0x144] ss:$16 sps:$4 sm:$0xff]  }
 0x5c5   : > { %7072 = vmatprep.subr.bf16.mxu0 %v11130_v32  ;;  %8808 = vmatpush1.bf16.msra.mxu1 %v11137_v49  ;;  %v11176_v32 = vld [vmem:[%s18110_s11 + $0x140] ss:$16 sps:$4 sm:$0xff]  }
 0x5c6   : > { %6571 = vmatmul.mubr.bf16.gmra.mxu0 %v18712_v59  ;;  %6924 = vmatmul.mubr.bf16.gmra.mxu1 %v18713_v11  ;;  %v11179_v49 = vld [vmem:[%s18110_s11 + $0x120] ss:$16 sps:$4 sm:$0xff]  }
 0x5c7   : > { %6580 = vmatprep.mubr.bf16.mxu0 %v18714_v55  ;;  %6933 = vmatprep.mubr.bf16.mxu1 %v18705_v61 }
 0x5c8   : > { %7073 = vmatpush1.bf16.msra.mxu0 %v11128_v3  ;;  %8809 = vmatprep.subr.bf16.mxu1 %v11142_v18  ;;  %v11184_v3 = vld [vmem:[%s18110_s11 + $0x104] ss:$16 sps:$4 sm:$0xff]   ;;  %v11182_v18 = vld [vmem:[%s18110_s11 + $0x100] ss:$16 sps:$4 sm:$0xff]  }
 0x5c9   : > { %7074 = vmatprep.subr.bf16.mxu0 %v11145_v58  ;;  %8810 = vmatpush1.bf16.msra.mxu1 %v11140_v4  ;;  %v18720_v58 = vld [vmem:[#allocation16_spill] sm:$0xff] }
 0x5ca   : > { %8811 = vmatprep.subr.bf16.mxu1 %v11148_v21 }
 0x5cc   : > { %7075 = vmatpush1.bf16.msra.mxu0 %v11143_v15  ;;  %v18721_v15 = vld [vmem:[#allocation17_spill] sm:$0xff] }
 0x5cd   : > { %8812 = vmatpush1.bf16.msra.mxu1 %v11146_v1  ;;  %7076 = vmatprep.subr.bf16.mxu0 %v11160_v46 }
 0x5ce   : > { %6581 = vmatmul.mubr.bf16.gmra.mxu0 %v18672_v60  ;;  %6934 = vmatmul.mubr.bf16.gmra.mxu1 %v18715_v47  ;;  %v11152_v60 = vld [vmem:[%s18110_s11] ss:$16 sps:$4 sm:$0xff]  }
 0x5cf   : > { %6590 = vmatprep.mubr.bf16.mxu0 %v18673_v22  ;;  %6943 = vmatprep.mubr.bf16.mxu1 %v18705_v61  ;;  %v11157_v22 = vld [vmem:[%s18110_s11 + $0x1e4] ss:$16 sps:$4 sm:$0xff]  }
 0x5d0   : > { %8813 = vmatprep.subr.bf16.mxu1 %v11151_v8  ;;  %7077 = vmatpush1.bf16.msra.mxu0 %v11158_v42  ;;  %v18722_v8 = vld [vmem:[#allocation18_spill] sm:$0xff] }
 0x5d1   : > { %8814 = vmatpush1.bf16.msra.mxu1 %v11149_v39  ;;  %7078 = vmatprep.subr.bf16.mxu0 %v11175_v48  ;;  %v18723_v48 = vld [vmem:[#allocation19_spill] sm:$0xff] }
 0x5d2   : > { %8815 = vmatprep.subr.bf16.mxu1 %v11154_v33 }
 0x5d4   : > { %7079 = vmatpush1.bf16.msra.mxu0 %v11173_v51 }
 0x5d5   : > { %8816 = vmatpush1.bf16.msra.mxu1 %v11152_v60  ;;  %8842 = vmatprep.subr.bf16.mxu0 %v11190_v53  ;;  %v18724_v60 = vld [vmem:[#allocation20_spill] sm:$0xff] }
 0x5d6   : > { %6591 = vmatmul.mubr.bf16.gmra.mxu0 %v18674_v36  ;;  %6944 = vmatmul.mubr.bf16.gmra.mxu1 %v18716_v63  ;;  %v11166_v36 = vld [vmem:[%s18110_s11 + $0x1a4] ss:$16 sps:$4 sm:$0xff]  }
 0x5d7   : > { %6600 = vmatprep.mubr.bf16.mxu0 %v18675_v20  ;;  %6953 = vmatprep.mubr.bf16.mxu1 %v18705_v61  ;;  %v18717_v20 = vld [vmem:[#allocation13_spill] sm:$0xff] }
 0x5d8   : > { %8817 = vmatprep.subr.bf16.mxu1 %v11157_v22 }
 0x5d9   : > { %8818 = vmatpush2.bf16.msra.mxu1 %v11155_v38  ;;  %v18725_v38 = vld [vmem:[#allocation21_spill] sm:$0xff] }
 0x5da   : > { %8819 = vmatprep.subr.bf16.mxu1 %v11163_v45 }
 0x5dd   : > { %8820 = vmatpush2.bf16.msra.mxu1 %v11161_v54 }
 0x5de   : > { %6601 = vmatmul.mubr.bf16.gmra.mxu0 %v18676_v17  ;;  %6954 = vmatmul.mubr.bf16.gmra.mxu1 %v18717_v20  ;;  %v11172_v17 = vld [vmem:[%s18110_s11 + $0x164] ss:$16 sps:$4 sm:$0xff]  }
 0x5df   : > { %6610 = vmatprep.mubr.bf16.mxu0 %v18677_v34  ;;  %6963 = vmatprep.mubr.bf16.mxu1 %v18705_v61  ;;  %v18718_v34 = vld [vmem:[#allocation14_spill] sm:$0xff] }
 0x5e0   : > { %8821 = vmatprep.subr.bf16.mxu1 %v11166_v36  ;;  %v18729_v36 = vld [vmem:[#allocation22_spill] sm:$0xff] }
 0x5e1   : > { %8822 = vmatpush2.bf16.msra.mxu1 %v11164_v41 }
 0x5e2   : > { %8823 = vmatprep.subr.bf16.mxu1 %v11169_v50 }
 0x5e5   : > { %8824 = vmatpush2.bf16.msra.mxu1 %v11167_v5 }
 0x5e6   : > { %6611 = vmatmul.mubr.bf16.gmra.mxu0 %v18679_v10  ;;  %6964 = vmatmul.mubr.bf16.gmra.mxu1 %v18718_v34  ;;  %v11181_v10 = vld [vmem:[%s18110_s11 + $0x124] ss:$16 sps:$4 sm:$0xff]  }
 0x5e7   : > { %6620 = vmatprep.mubr.bf16.mxu0 %v18681_v43  ;;  %6973 = vmatprep.mubr.bf16.mxu1 %v18705_v61  ;;  %v18719_v43 = vld [vmem:[#allocation15_spill] sm:$0xff] }
 0x5e8   : > { %8825 = vmatprep.subr.bf16.mxu1 %v11172_v17 }
 0x5e9   : > { %8826 = vmatpush2.bf16.msra.mxu1 %v11170_v29 }
 0x5ea   : > { %8827 = vmatprep.subr.bf16.mxu1 %v11178_v35 }
 0x5ed   : > { %8828 = vmatpush2.bf16.msra.mxu1 %v11176_v32  ;;  %v11185_v32 = vld [vmem:[%s18110_s11 + $0x4e0] ss:$16 sps:$4 sm:$0xff]  }
 0x5ee   : > { %6621 = vmatmul.mubr.bf16.gmra.mxu0 %v18684_v19  ;;  %6974 = vmatmul.mubr.bf16.gmra.mxu1 %v18719_v43  ;;  %v11187_v19 = vld [vmem:[%s18110_s11 + $0x4e4] ss:$16 sps:$4 sm:$0xff]  }
 0x5ef   : > { %6630 = vmatprep.mubr.bf16.mxu0 %v18686_v27  ;;  %6983 = vmatprep.mubr.bf16.mxu1 %v18705_v61 }
 0x5f0   : > { %8829 = vmatprep.subr.bf16.mxu1 %v11181_v10 }
 0x5f1   : > { %8830 = vmatpush2.bf16.msra.mxu1 %v11179_v49 }
 0x5f2   : > { %8831 = vmatprep.subr.bf16.mxu1 %v11184_v3 }
 0x5f5   : > { %8832 = vmatpush2.bf16.msra.mxu1 %v11182_v18 }
 0x5f6   : > { %v15367_v4 = vpop.f32.mrf.mxu1  ;;  %6631 = vmatmul.mubr.bf16.gmra.mxu0 %v18689_v57  ;;  %6984 = vmatmul.mubr.bf16.gmra.mxu1 %v18720_v58 }
 0x5f7   : > { %6640 = vmatprep.mubr.bf16.mxu0 %v18690_v13  ;;  %6993 = vmatprep.mubr.bf16.mxu1 %v18705_v61 }
 0x5f8   : > { %v15373_v27 = vpop.f32.mrf.mxu1  ;;  %8883 = vmatprep.subr.bf16.mxu1 %v11187_v19 }
 0x5fa   : > { %v15375_v59 = vpop.f32.mrf.mxu1 }
 0x5fc   : > { %v15377_v21 = vpop.f32.mrf.mxu1 }
 0x5fe   : > { %v15379_v55 = vpop.f32.mrf.mxu1  ;;  %6641 = vmatmul.mubr.bf16.gmra.mxu0 %v18692_v7  ;;  %6994 = vmatmul.mubr.bf16.gmra.mxu1 %v18721_v15 }
 0x5ff   : > { %6650 = vmatprep.mubr.bf16.mxu0 %v18693_v2  ;;  %7003 = vmatprep.mubr.bf16.mxu1 %v18705_v61 }
 0x600   : > { %v15385_v57 = vpop.f32.mrf.mxu1 }
 0x602   : > { %v15387_v13 = vpop.f32.mrf.mxu1 }
 0x604   : > { %v15389_v1 = vpop.f32.mrf.mxu1 }
 0x606   : > { %v15391_v46 = vpop.f32.mrf.mxu1  ;;  %6651 = vmatmul.mubr.bf16.gmra.mxu0 %v18694_v40  ;;  %7004 = vmatmul.mubr.bf16.gmra.mxu1 %v18722_v8 }
 0x607   : > { %6660 = vmatprep.mubr.bf16.mxu0 %v18695_v24  ;;  %7013 = vmatprep.mubr.bf16.mxu1 %v18705_v61 }
 0x608   : > { %v15397_v7 = vpop.f32.mrf.mxu1 }
 0x60a   : > { %v15399_v2 = vpop.f32.mrf.mxu1 }
 0x60c   : > { %v15401_v42 = vpop.f32.mrf.mxu1 }
 0x60e   : > { %v15403_v39 = vpop.f32.mrf.mxu1  ;;  %6661 = vmatmul.mubr.bf16.gmra.mxu0 %v18696_v44  ;;  %7014 = vmatmul.mubr.bf16.gmra.mxu1 %v18723_v48 }
 0x60f   : > { %6670 = vmatprep.mubr.bf16.mxu0 %v18697_v62  ;;  %7023 = vmatprep.mubr.bf16.mxu1 %v18705_v61 }
 0x610   : > { %v15409_v40 = vpop.f32.mrf.mxu1 }
 0x612   : > { %v15411_v24 = vpop.f32.mrf.mxu1 }
 0x614   : > { %v15413_v33 = vpop.f32.mrf.mxu1 }
 0x616   : > { %v15415_v51 = vpop.f32.mrf.mxu1  ;;  %6671 = vmatmul.mubr.bf16.gmra.mxu0 %v18698_v30  ;;  %7024 = vmatmul.mubr.bf16.gmra.mxu1 %v18724_v60 }
 0x617   : > { %6680 = vmatprep.mubr.bf16.mxu0 %v18699_v6  ;;  %7033 = vmatprep.mubr.bf16.mxu1 %v18705_v61 }
 0x618   : > { %v15421_v44 = vpop.f32.mrf.mxu1 }
 0x61a   : > { %v15423_v62 = vpop.f32.mrf.mxu1 }
 0x61c   : > { %v15425_v53 = vpop.f32.mrf.mxu1 }
 0x61e   : > { %v15427_v22 = vpop.f32.mrf.mxu1  ;;  %6681 = vmatmul.mubr.bf16.gmra.mxu0 %v18700_v16  ;;  %7034 = vmatmul.mubr.bf16.gmra.mxu1 %v18725_v38 }
 0x61f   : > { %6690 = vmatprep.mubr.bf16.mxu0 %v18701_v31  ;;  %7043 = vmatprep.mubr.bf16.mxu1 %v18705_v61  ;;  %v5902_v31 = vmul.f32 0.00390625, %v15004_v9  ;;  %v5906_v9 = vmul.f32 0.00390625, %v15211_v25  ;;  %v11199_v25 = vld [vmem:[%s18110_s11 + $0x2c4] ss:$16 sps:$4 sm:$0xff]  }
 0x620   : > { %v15433_v30 = vpop.f32.mrf.mxu1 }
 0x621   : > { %v15452_v5 = vpack.c.bf16 %v5902_v31, %v5902_v31  ;;  %v15474_v49 = vpack.c.bf16 %v5906_v9, %v5906_v9  ;;  %v11191_v31 = vld [vmem:[%s18110_s11 + $0x4c0] ss:$16 sps:$4 sm:$0xff]  }
 0x622   : > { %v15435_v6 = vpop.f32.mrf.mxu1 }
 0x623   : > { %18726 = vst [vmem:[#allocation85_spill] sm:$0xff] %v15435_v6 }
 0x624   : > { %v15437_v45 = vpop.f32.mrf.mxu1 }
 0x625   : > { %18727 = vst [vmem:[#allocation86_spill] sm:$0xff] %v15437_v45 }
 0x626   : > { %v15439_v54 = vpop.f32.mrf.mxu1  ;;  %6691 = vmatmul.mubr.bf16.gmra.mxu0 %v18702_v23  ;;  %7044 = vmatmul.mubr.bf16.gmra.mxu1 %v18729_v36  ;;  %v18734_v23 = vld [vmem:[#allocation23_spill] sm:$0xff] }
 0x627   : > { %18728 = vst [vmem:[#allocation87_spill] sm:$0xff] %v15439_v54  ;;  %6700 = vmatprep.mubr.bf16.mxu0 %v18703_v26  ;;  %7053 = vmatprep.mubr.bf16.mxu1 %v18705_v61  ;;  %v5901_v26 = vmul.f32 0.00390625, %v14993_v37  ;;  %v11193_v37 = vld [vmem:[%s18110_s11 + $0x4c4] ss:$16 sps:$4 sm:$0xff]  }
 0x628   : > { %v15445_v16 = vpop.f32.mrf.mxu1 }
 0x629   : > { %18730 = vst [vmem:[#allocation88_spill] sm:$0xff] %v15445_v16  ;;  %v15472_v10 = vpack.c.bf16 %v5901_v26, %v5901_v26  ;;  %v11197_v26 = vld [vmem:[%s18110_s11 + $0x2c0] ss:$16 sps:$4 sm:$0xff]  }
 0x62a   : > { %v15448_v41 = vpop.f32.mrf.mxu1 }
 0x62b   : > { %18731 = vst [vmem:[#allocation91_spill] sm:$0xff] %v15448_v41 }
 0x62c   : > { %v15450_v50 = vpop.f32.mrf.mxu1 }
 0x62d   : > { %18732 = vst [vmem:[#allocation92_spill] sm:$0xff] %v15450_v50 }
 0x62e   : > { %v15454_v17 = vpop.f32.mrf.mxu1  ;;  %6701 = vmatmul.mubr.bf16.gmra.mxu0 %v18704_v14  ;;  %7054 = vmatmul.mubr.bf16.gmra.mxu1 %v18734_v23  ;;  %v11188_v14 = vld [vmem:[%s18110_s11 + $0x2e0] ss:$16 sps:$4 sm:$0xff]  }
 0x62f   : > { %18733 = vst [vmem:[#allocation93_spill] sm:$0xff] %v15454_v17  ;;  %8833 = vmatprep.mubr.bf16.mxu1 %v15452_v5  ;;  %7096 = vmatprep.mubr.bf16.mxu0 %v18705_v61 }
 0x630   : > { %v15462_v29 = vpop.f32.mrf.mxu1 }
 0x631   : > { %18735 = vst [vmem:[#allocation94_spill] sm:$0xff] %v15462_v29  ;;  %v11202_v29 = vld [vmem:[%s18110_s11 + $0x484] ss:$16 sps:$4 sm:$0xff]  }
 0x632   : > { %v15464_v35 = vpop.f32.mrf.mxu1 }
 0x633   : > { %18736 = vst [vmem:[#allocation95_spill] sm:$0xff] %v15464_v35 }
 0x634   : > { %v15476_v3 = vpop.f32.mrf.mxu1 }
 0x635   : > { %18737 = vst [vmem:[#allocation96_spill] sm:$0xff] %v15476_v3 }
 0x636   : > { %v15484_v18 = vpop.f32.mrf.mxu0  ;;  %v15486_v19 = vpop.f32.mrf.mxu1  ;;  %7097 = vmatmul.mubr.bf16.vlgmr.msra.gmra.mxu0 %v18707_v52  ;;  %8834 = vmatmul.mubr.bf16.vlgmr.msra.gmra.mxu1 %v15472_v10  ;;  %v11196_v52 = vld [vmem:[%s18110_s11 + $0x4a4] ss:$16 sps:$4 sm:$0xff]  }
 0x637   : > { %18738 = vst [vmem:[#allocation97_spill] sm:$0xff] %v15486_v19  ;;  %8884 = vmatpush1.bf16.msra.mxu1 %v11185_v32  ;;  %8843 = vmatpush1.bf16.msra.mxu0 %v11188_v14  ;;  %v11208_v32 = vld [vmem:[%s18110_s11 + $0x2a4] ss:$16 sps:$4 sm:$0xff]  }
 0x638   : > { %v15496_v9 = vpop.f32.mrf.mxu0  ;;  %v15498_v3 = vpop.f32.mrf.mxu1  ;;  %8885 = vmatprep.subr.bf16.mxu1 %v11193_v37  ;;  %8915 = vmatprep.mubr.bf16.mxu1 %v15474_v49  ;;  %v11194_v37 = vld [vmem:[%s18110_s11 + $0x4a0] ss:$16 sps:$4 sm:$0xff]  }
 0x639   : > { %18739 = vst [vmem:[#allocation98_spill] sm:$0xff] %v15498_v3  ;;  %7106 = vmatprep.mubr.bf16.mxu0 %v18705_v61  ;;  %8844 = vmatprep.subr.bf16.mxu0 %v11199_v25  ;;  %v11206_v25 = vld [vmem:[%s18110_s11 + $0x2a0] ss:$16 sps:$4 sm:$0xff]  }
 0x63a   : > { %v5898_v14 = vpop.f32.mrf.mxu0  ;;  %v15508_v19 = vpop.f32.mrf.mxu1 }
 0x63b   : > { %18740 = vst [vmem:[#allocation99_spill] sm:$0xff] %v15508_v19  ;;  %8886 = vmatpush1.bf16.msra.mxu1 %v11191_v31  ;;  %8845 = vmatpush1.bf16.msra.mxu0 %v11197_v26  ;;  %v11217_v31 = vld [vmem:[%s18110_s11 + $0x284] ss:$16 sps:$4 sm:$0xff]  }
 0x63c   : > { %v5899_v3 = vpop.f32.mrf.mxu0  ;;  %v15513_v35 = vpop.f32.mrf.mxu1  ;;  %8887 = vmatprep.subr.bf16.mxu1 %v11196_v52  ;;  %8846 = vmatprep.subr.bf16.mxu0 %v11208_v32  ;;  %v11205_v52 = vld [vmem:[%s18110_s11 + $0x464] ss:$16 sps:$4 sm:$0xff]   ;;  %v11215_v32 = vld [vmem:[%s18110_s11 + $0x280] ss:$16 sps:$4 sm:$0xff]  }
 0x63d   : > { %18741 = vst [vmem:[#allocation100_spill] sm:$0xff] %v15513_v35  ;;  %v11200_v3 = vld [vmem:[%s18110_s11 + $0x480] ss:$16 sps:$4 sm:$0xff]  }
 0x63e   : > { %v15524_v14 = vpop.f32.mrf.mxu1  ;;  %7107 = vmatmul.mubr.bf16.gmra.mxu0 %v18710_v56  ;;  %v11226_v56 = vld [vmem:[%s18110_s11 + $0x264] ss:$16 sps:$4 sm:$0xff]  }
 0x63f   : > { %18742 = vst [vmem:[#allocation103_spill] sm:$0xff] %v15524_v14  ;;  %8888 = vmatpush1.bf16.msra.mxu1 %v11194_v37  ;;  %7116 = vmatprep.mubr.bf16.mxu0 %v18705_v61 }
 0x640   : > { %v15531_v26 = vpop.f32.mrf.mxu1  ;;  %8889 = vmatprep.subr.bf16.mxu1 %v11202_v29  ;;  %8847 = vmatpush1.bf16.msra.mxu0 %v11206_v25  ;;  %v11203_v29 = vld [vmem:[%s18110_s11 + $0x460] ss:$16 sps:$4 sm:$0xff]   ;;  %v11211_v25 = vld [vmem:[%s18110_s11 + $0x444] ss:$16 sps:$4 sm:$0xff]  }
 0x641   : > { %18743 = vst [vmem:[#allocation104_spill] sm:$0xff] %v15531_v26  ;;  %8848 = vmatprep.subr.bf16.mxu0 %v11217_v31  ;;  %v11224_v31 = vld [vmem:[%s18110_s11 + $0x260] ss:$16 sps:$4 sm:$0xff]  }
 0x642   : > { %v15542_v37 = vpop.f32.mrf.mxu1 }
 0x643   : > { %18744 = vst [vmem:[#allocation130_spill] sm:$0xff] %v15542_v37  ;;  %8890 = vmatpush1.bf16.msra.mxu1 %v11200_v3  ;;  %v11235_v3 = vld [vmem:[%s18110_s11 + $0x244] ss:$16 sps:$4 sm:$0xff]  }
 0x644   : > { %v15547_v26 = vpop.f32.mrf.mxu1  ;;  %8891 = vmatprep.subr.bf16.mxu1 %v11205_v52  ;;  %8849 = vmatpush1.bf16.msra.mxu0 %v11215_v32  ;;  %v11209_v52 = vld [vmem:[%s18110_s11 + $0x440] ss:$16 sps:$4 sm:$0xff]  }
 0x645   : > { %18745 = vst [vmem:[#allocation61_spill] sm:$0xff] %v15547_v26  ;;  %8850 = vmatprep.subr.bf16.mxu0 %v11226_v56  ;;  %v11214_v56 = vld [vmem:[%s18110_s11 + $0x424] ss:$16 sps:$4 sm:$0xff]  }
 0x646   : > { %v15558_v37 = vpop.f32.mrf.mxu1  ;;  %7117 = vmatmul.mubr.bf16.gmra.mxu0 %v18713_v11  ;;  %v11244_v11 = vld [vmem:[%s18110_s11 + $0x224] ss:$16 sps:$4 sm:$0xff]  }
 0x647   : > { %18746 = vst [vmem:[#allocation129_spill] sm:$0xff] %v15558_v37  ;;  %8892 = vmatpush1.bf16.msra.mxu1 %v11203_v29  ;;  %7126 = vmatprep.mubr.bf16.mxu0 %v18705_v61  ;;  %v11233_v37 = vld [vmem:[%s18110_s11 + $0x240] ss:$16 sps:$4 sm:$0xff]  }
 0x648   : > { %v15565_v32 = vpop.f32.mrf.mxu1  ;;  %8893 = vmatprep.subr.bf16.mxu1 %v11211_v25  ;;  %8851 = vmatpush1.bf16.msra.mxu0 %v11224_v31  ;;  %v11212_v25 = vld [vmem:[%s18110_s11 + $0x420] ss:$16 sps:$4 sm:$0xff]   ;;  %v11220_v31 = vld [vmem:[%s18110_s11 + $0x404] ss:$16 sps:$4 sm:$0xff]  }
 0x649   : > { %18747 = vst [vmem:[#allocation128_spill] sm:$0xff] %v15565_v32  ;;  %8852 = vmatprep.subr.bf16.mxu0 %v11235_v3  ;;  %v11242_v3 = vld [vmem:[%s18110_s11 + $0x220] ss:$16 sps:$4 sm:$0xff]  }
 0x64a   : > { %v15576_v29 = vpop.f32.mrf.mxu1 }
 0x64b   : > { %18748 = vst [vmem:[#allocation127_spill] sm:$0xff] %v15576_v29  ;;  %8894 = vmatpush1.bf16.msra.mxu1 %v11209_v52  ;;  %v11253_v52 = vld [vmem:[%s18110_s11 + $0x204] ss:$16 sps:$4 sm:$0xff]  }
 0x64c   : > { %v15581_v32 = vpop.f32.mrf.mxu1  ;;  %8895 = vmatprep.subr.bf16.mxu1 %v11214_v56  ;;  %8853 = vmatpush1.bf16.msra.mxu0 %v11233_v37  ;;  %v11218_v56 = vld [vmem:[%s18110_s11 + $0x400] ss:$16 sps:$4 sm:$0xff]  }
 0x64d   : > { %18749 = vst [vmem:[#allocation126_spill] sm:$0xff] %v15581_v32  ;;  %8854 = vmatprep.subr.bf16.mxu0 %v11244_v11  ;;  %v11223_v11 = vld [vmem:[%s18110_s11 + $0x5e4] ss:$16 sps:$4 sm:$0xff]  }
 0x64e   : > { %v15592_v29 = vpop.f32.mrf.mxu1  ;;  %7127 = vmatmul.mubr.bf16.gmra.mxu0 %v18715_v47  ;;  %v11262_v47 = vld [vmem:[%s18110_s11 + $0x3e4] ss:$16 sps:$4 sm:$0xff]  }
 0x64f   : > { %18750 = vst [vmem:[#allocation125_spill] sm:$0xff] %v15592_v29  ;;  %8896 = vmatpush1.bf16.msra.mxu1 %v11212_v25  ;;  %7136 = vmatprep.mubr.bf16.mxu0 %v18705_v61  ;;  %v11251_v29 = vld [vmem:[%s18110_s11 + $0x200] ss:$16 sps:$4 sm:$0xff]  }
 0x650   : > { %v15599_v37 = vpop.f32.mrf.mxu1  ;;  %8897 = vmatprep.subr.bf16.mxu1 %v11220_v31  ;;  %8855 = vmatpush1.bf16.msra.mxu0 %v11242_v3  ;;  %v11221_v31 = vld [vmem:[%s18110_s11 + $0x5e0] ss:$16 sps:$4 sm:$0xff]   ;;  %v11229_v3 = vld [vmem:[%s18110_s11 + $0x5c4] ss:$16 sps:$4 sm:$0xff]  }
 0x651   : > { %18751 = vst [vmem:[#allocation124_spill] sm:$0xff] %v15599_v37  ;;  %8856 = vmatprep.subr.bf16.mxu0 %v11253_v52  ;;  %v11260_v52 = vld [vmem:[%s18110_s11 + $0x3e0] ss:$16 sps:$4 sm:$0xff]  }
 0x652   : > { %v15610_v25 = vpop.f32.mrf.mxu1 }
 0x653   : > { %18752 = vst [vmem:[#allocation90_spill] sm:$0xff] %v15610_v25  ;;  %8898 = vmatpush1.bf16.msra.mxu1 %v11218_v56  ;;  %v11271_v56 = vld [vmem:[%s18110_s11 + $0x3c4] ss:$16 sps:$4 sm:$0xff]  }
 0x654   : > { %v15615_v37 = vpop.f32.mrf.mxu1  ;;  %8899 = vmatprep.subr.bf16.mxu1 %v11223_v11  ;;  %8857 = vmatpush1.bf16.msra.mxu0 %v11251_v29  ;;  %v11227_v11 = vld [vmem:[%s18110_s11 + $0x5c0] ss:$16 sps:$4 sm:$0xff]  }
 0x655   : > { %18753 = vst [vmem:[#allocation89_spill] sm:$0xff] %v15615_v37  ;;  %8858 = vmatprep.subr.bf16.mxu0 %v11262_v47  ;;  %v11232_v47 = vld [vmem:[%s18110_s11 + $0x5a4] ss:$16 sps:$4 sm:$0xff]  }
 0x656   : > { %v15626_v25 = vpop.f32.mrf.mxu1  ;;  %7137 = vmatmul.mubr.bf16.gmra.mxu0 %v18716_v63  ;;  %v11280_v63 = vld [vmem:[%s18110_s11 + $0x3a4] ss:$16 sps:$4 sm:$0xff]  }
 0x657   : > { %18754 = vst [vmem:[#allocation82_spill] sm:$0xff] %v15626_v25  ;;  %8900 = vmatpush2.bf16.msra.mxu1 %v11221_v31  ;;  %7146 = vmatprep.mubr.bf16.mxu0 %v18705_v61  ;;  %v11269_v25 = vld [vmem:[%s18110_s11 + $0x3c0] ss:$16 sps:$4 sm:$0xff]  }
 0x658   : > { %v15633_v29 = vpop.f32.mrf.mxu1  ;;  %8901 = vmatprep.subr.bf16.mxu1 %v11229_v3  ;;  %8859 = vmatpush2.bf16.msra.mxu0 %v11260_v52  ;;  %v11230_v3 = vld [vmem:[%s18110_s11 + $0x5a0] ss:$16 sps:$4 sm:$0xff]   ;;  %v11238_v52 = vld [vmem:[%s18110_s11 + $0x584] ss:$16 sps:$4 sm:$0xff]  }
 0x659   : > { %18755 = vst [vmem:[#allocation79_spill] sm:$0xff] %v15633_v29  ;;  %8860 = vmatprep.subr.bf16.mxu0 %v11271_v56  ;;  %v11278_v56 = vld [vmem:[%s18110_s11 + $0x3a0] ss:$16 sps:$4 sm:$0xff]  }
 0x65a   : > { %v15644_v31 = vpop.f32.mrf.mxu1 }
 0x65b   : > { %18756 = vst [vmem:[#allocation78_spill] sm:$0xff] %v15644_v31  ;;  %8902 = vmatpush2.bf16.msra.mxu1 %v11227_v11  ;;  %v11289_v11 = vld [vmem:[%s18110_s11 + $0x384] ss:$16 sps:$4 sm:$0xff]  }
 0x65c   : > { %v15649_v29 = vpop.f32.mrf.mxu1  ;;  %8903 = vmatprep.subr.bf16.mxu1 %v11232_v47  ;;  %8861 = vmatpush2.bf16.msra.mxu0 %v11269_v25  ;;  %v11236_v47 = vld [vmem:[%s18110_s11 + $0x580] ss:$16 sps:$4 sm:$0xff]  }
 0x65d   : > { %18757 = vst [vmem:[#allocation72_spill] sm:$0xff] %v15649_v29  ;;  %8862 = vmatprep.subr.bf16.mxu0 %v11280_v63  ;;  %v11241_v63 = vld [vmem:[%s18110_s11 + $0x564] ss:$16 sps:$4 sm:$0xff]  }
 0x65e   : > { %v15660_v31 = vpop.f32.mrf.mxu1  ;;  %7147 = vmatmul.mubr.bf16.gmra.mxu0 %v18717_v20  ;;  %v11298_v20 = vld [vmem:[%s18110_s11 + $0x364] ss:$16 sps:$4 sm:$0xff]  }
 0x65f   : > { %18758 = vst [vmem:[#allocation108_spill] sm:$0xff] %v15660_v31  ;;  %8904 = vmatpush2.bf16.msra.mxu1 %v11230_v3  ;;  %7156 = vmatprep.mubr.bf16.mxu0 %v18705_v61  ;;  %v11287_v31 = vld [vmem:[%s18110_s11 + $0x380] ss:$16 sps:$4 sm:$0xff]  }
 0x660   : > { %v15667_v25 = vpop.f32.mrf.mxu1  ;;  %8905 = vmatprep.subr.bf16.mxu1 %v11238_v52  ;;  %8863 = vmatpush2.bf16.msra.mxu0 %v11278_v56  ;;  %v11239_v52 = vld [vmem:[%s18110_s11 + $0x560] ss:$16 sps:$4 sm:$0xff]   ;;  %v11247_v56 = vld [vmem:[%s18110_s11 + $0x544] ss:$16 sps:$4 sm:$0xff]  }
 0x661   : > { %18759 = vst [vmem:[#allocation105_spill] sm:$0xff] %v15667_v25  ;;  %8864 = vmatprep.subr.bf16.mxu0 %v11289_v11  ;;  %v11296_v11 = vld [vmem:[%s18110_s11 + $0x360] ss:$16 sps:$4 sm:$0xff]  }
 0x662   : > { %v15678_v3 = vpop.f32.mrf.mxu1 }
 0x663   : > { %18760 = vst [vmem:[#allocation109_spill] sm:$0xff] %v15678_v3  ;;  %8906 = vmatpush2.bf16.msra.mxu1 %v11236_v47  ;;  %v11307_v47 = vld [vmem:[%s18110_s11 + $0x344] ss:$16 sps:$4 sm:$0xff]  }
 0x664   : > { %v15683_v25 = vpop.f32.mrf.mxu1  ;;  %8907 = vmatprep.subr.bf16.mxu1 %v11241_v63  ;;  %8865 = vmatpush2.bf16.msra.mxu0 %v11287_v31  ;;  %v11245_v63 = vld [vmem:[%s18110_s11 + $0x540] ss:$16 sps:$4 sm:$0xff]  }
 0x665   : > { %18761 = vst [vmem:[#allocation106_spill] sm:$0xff] %v15683_v25  ;;  %8866 = vmatprep.subr.bf16.mxu0 %v11298_v20  ;;  %v11250_v20 = vld [vmem:[%s18110_s11 + $0x524] ss:$16 sps:$4 sm:$0xff]  }
 0x666   : > { %v15694_v3 = vpop.f32.mrf.mxu1  ;;  %7157 = vmatmul.mubr.bf16.gmra.mxu0 %v18718_v34  ;;  %v11316_v34 = vld [vmem:[%s18110_s11 + $0x324] ss:$16 sps:$4 sm:$0xff]  }
 0x667   : > { %18762 = vst [vmem:[#allocation110_spill] sm:$0xff] %v15694_v3  ;;  %8908 = vmatpush2.bf16.msra.mxu1 %v11239_v52  ;;  %7166 = vmatprep.mubr.bf16.mxu0 %v18705_v61  ;;  %v11305_v3 = vld [vmem:[%s18110_s11 + $0x340] ss:$16 sps:$4 sm:$0xff]  }
 0x668   : > { %v15701_v31 = vpop.f32.mrf.mxu1  ;;  %8909 = vmatprep.subr.bf16.mxu1 %v11247_v56  ;;  %8867 = vmatpush2.bf16.msra.mxu0 %v11296_v11  ;;  %v11248_v56 = vld [vmem:[%s18110_s11 + $0x520] ss:$16 sps:$4 sm:$0xff]   ;;  %v11256_v11 = vld [vmem:[%s18110_s11 + $0x504] ss:$16 sps:$4 sm:$0xff]  }
 0x669   : > { %18763 = vst [vmem:[#allocation107_spill] sm:$0xff] %v15701_v31  ;;  %8868 = vmatprep.subr.bf16.mxu0 %v11307_v47  ;;  %v11314_v47 = vld [vmem:[%s18110_s11 + $0x320] ss:$16 sps:$4 sm:$0xff]  }
 0x66a   : > { %v15712_v52 = vpop.f32.mrf.mxu1 }
 0x66b   : > { %18764 = vst [vmem:[#allocation111_spill] sm:$0xff] %v15712_v52  ;;  %8910 = vmatpush2.bf16.msra.mxu1 %v11245_v63  ;;  %v11325_v63 = vld [vmem:[%s18110_s11 + $0x304] ss:$16 sps:$4 sm:$0xff]  }
 0x66c   : > { %v15717_v31 = vpop.f32.mrf.mxu1  ;;  %8911 = vmatprep.subr.bf16.mxu1 %v11250_v20  ;;  %8869 = vmatpush2.bf16.msra.mxu0 %v11305_v3  ;;  %v11254_v20 = vld [vmem:[%s18110_s11 + $0x500] ss:$16 sps:$4 sm:$0xff]   ;;  %v5905_v3 = vmul.f32 0.00390625, %v15198_v12  ;;  %v11257_v12 = vld [vmem:[%s18110_s11 + $0xe8] ss:$16 sps:$4 sm:$0xff]  }
 0x66d   : > { %18765 = vst [vmem:[#allocation101_spill] sm:$0xff] %v15717_v31  ;;  %8870 = vmatprep.subr.bf16.mxu0 %v11316_v34  ;;  %v11259_v34 = vld [vmem:[%s18110_s11 + $0xec] ss:$16 sps:$4 sm:$0xff]  }
 0x66e   : > { %v15728_v52 = vpop.f32.mrf.mxu1  ;;  %7167 = vmatmul.mubr.bf16.gmra.mxu0 %v18719_v43  ;;  %v11323_v43 = vld [vmem:[%s18110_s11 + $0x300] ss:$16 sps:$4 sm:$0xff]  }
 0x66f   : > { %18766 = vst [vmem:[#allocation102_spill] sm:$0xff] %v15728_v52  ;;  %8912 = vmatpush2.bf16.msra.mxu1 %v11248_v56  ;;  %7176 = vmatprep.mubr.bf16.mxu0 %v18705_v61  ;;  %v11331_v56 = vld [vmem:[%s18110_s11 + $0x6e4] ss:$16 sps:$4 sm:$0xff]  }
 0x670   : > { %v15736_v31 = vpop.f32.mrf.mxu1  ;;  %8913 = vmatprep.subr.bf16.mxu1 %v11256_v11  ;;  %8871 = vmatpush2.bf16.msra.mxu0 %v11314_v47  ;;  %v15752_v11 = vpack.c.bf16 %v5905_v3, %v5905_v3  ;;  %v11265_v47 = vld [vmem:[%s18110_s11 + $0xcc] ss:$16 sps:$4 sm:$0xff]   ;;  %v11263_v3 = vld [vmem:[%s18110_s11 + $0xc8] ss:$16 sps:$4 sm:$0xff]  }
 0x671   : > { %18767 = vst [vmem:[#allocation112_spill] sm:$0xff] %v15736_v31  ;;  %8872 = vmatprep.subr.bf16.mxu0 %v11325_v63 }
 0x672   : > { %v15747_v52 = vpop.f32.mrf.mxu1 }
 0x673   : > { %18768 = vst [vmem:[#allocation67_spill] sm:$0xff] %v15747_v52  ;;  %8914 = vmatpush2.bf16.msra.mxu1 %v11254_v20 }
 0x674   : > { %v15754_v31 = vpop.f32.mrf.mxu1  ;;  %8965 = vmatprep.subr.bf16.mxu1 %v11259_v34  ;;  %8873 = vmatpush2.bf16.msra.mxu0 %v11323_v43  ;;  %v11268_v43 = vld [vmem:[%s18110_s11 + $0xac] ss:$16 sps:$4 sm:$0xff]  }
 0x675   : > { %18769 = vst [vmem:[#allocation66_spill] sm:$0xff] %v15754_v31  ;;  %8924 = vmatprep.subr.bf16.mxu0 %v11331_v56 }
 0x676   : > { %8916 = vmatmul.mubr.bf16.vlgmr.msra.gmra.mxu1 %v15752_v11  ;;  %v15760_v63 = vpop.f32.mrf.mxu0  ;;  %v15762_v20 = vpop.f32.mrf.mxu1  ;;  %7177 = vmatmul.mubr.bf16.gmra.mxu0 %v18720_v58 }
 0x677   : > { %18770 = vst [vmem:[#allocation113_spill] sm:$0xff] %v15760_v63  ;;  %8966 = vmatpush1.bf16.msra.mxu1 %v11257_v12  ;;  %8997 = vmatprep.mubr.bf16.mxu1 %v15452_v5  ;;  %v11266_v5 = vld [vmem:[%s18110_s11 + $0xa8] ss:$16 sps:$4 sm:$0xff]  }
 0x678   : > { %v15769_v34 = vpop.f32.mrf.mxu0  ;;  %v15771_v31 = vpop.f32.mrf.mxu1  ;;  %8967 = vmatprep.subr.bf16.mxu1 %v11265_v47  ;;  %7186 = vmatprep.mubr.bf16.mxu0 %v18705_v61  ;;  %v11274_v47 = vld [vmem:[%s18110_s11 + $0x8c] ss:$16 sps:$4 sm:$0xff]  }
 0x679   : > { %18771 = vst [vmem:[#allocation114_spill] sm:$0xff] %v15769_v34 }
 0x67a   : > { %v15777_v56 = vpop.f32.mrf.mxu0  ;;  %v15779_v58 = vpop.f32.mrf.mxu1 }
 0x67b   : > { %18772 = vst [vmem:[#allocation115_spill] sm:$0xff] %v15777_v56  ;;  %8968 = vmatpush1.bf16.msra.mxu1 %v11263_v3  ;;  %v11272_v3 = vld [vmem:[%s18110_s11 + $0x88] ss:$16 sps:$4 sm:$0xff]  }
 0x67c   : > { %v15784_v12 = vpop.f32.mrf.mxu0  ;;  %v15786_v34 = vpop.f32.mrf.mxu1  ;;  %8969 = vmatprep.subr.bf16.mxu1 %v11268_v43 }
 0x67d   : > { %18773 = vst [vmem:[#allocation65_spill] sm:$0xff] %v15784_v12 }
 0x67e   : > { %v15791_v63 = vpop.f32.mrf.mxu0  ;;  %v15793_v52 = vpop.f32.mrf.mxu1  ;;  %7187 = vmatmul.mubr.bf16.gmra.mxu0 %v18721_v15  ;;  %v11275_v15 = vld [vmem:[%s18110_s11 + $0x68] ss:$16 sps:$4 sm:$0xff]  }
 0x67f   : > { %18774 = vst [vmem:[#allocation24_spill] sm:$0xff] %v15791_v63  ;;  %8970 = vmatpush1.bf16.msra.mxu1 %v11266_v5  ;;  %7196 = vmatprep.mubr.bf16.mxu0 %v18705_v61  ;;  %v11277_v63 = vld [vmem:[%s18110_s11 + $0x6c] ss:$16 sps:$4 sm:$0xff]  }
 0x680   : > { %v15800_v12 = vpop.f32.mrf.mxu0  ;;  %v15802_v43 = vpop.f32.mrf.mxu1  ;;  %8971 = vmatprep.subr.bf16.mxu1 %v11274_v47  ;;  %v11283_v47 = vld [vmem:[%s18110_s11 + $0x4c] ss:$16 sps:$4 sm:$0xff]  }
 0x681   : > { %18775 = vst [vmem:[#allocation64_spill] sm:$0xff] %v15800_v12 }
 0x682   : > { %v15807_v56 = vpop.f32.mrf.mxu0  ;;  %v15809_v25 = vpop.f32.mrf.mxu1 }
 0x683   : > { %18776 = vst [vmem:[#allocation63_spill] sm:$0xff] %v15807_v56  ;;  %8972 = vmatpush1.bf16.msra.mxu1 %v11272_v3  ;;  %v11281_v3 = vld [vmem:[%s18110_s11 + $0x48] ss:$16 sps:$4 sm:$0xff]  }
 0x684   : > { %v15814_v5 = vpop.f32.mrf.mxu0  ;;  %v15816_v29 = vpop.f32.mrf.mxu1  ;;  %8973 = vmatprep.subr.bf16.mxu1 %v11277_v63 }
 0x685   : > { %18777 = vst [vmem:[#allocation62_spill] sm:$0xff] %v15814_v5 }
 0x686   : > { %v15821_v12 = vpop.f32.mrf.mxu0  ;;  %v15823_v37 = vpop.f32.mrf.mxu1  ;;  %7197 = vmatmul.mubr.bf16.gmra.mxu0 %v18722_v8  ;;  %v11284_v8 = vld [vmem:[%s18110_s11 + $0x28] ss:$16 sps:$4 sm:$0xff]  }
 0x687   : > { %18778 = vst [vmem:[#allocation123_spill] sm:$0xff] %v15821_v12  ;;  %8974 = vmatpush1.bf16.msra.mxu1 %v11275_v15  ;;  %7206 = vmatprep.mubr.bf16.mxu0 %v18705_v61  ;;  %v11286_v12 = vld [vmem:[%s18110_s11 + $0x2c] ss:$16 sps:$4 sm:$0xff]  }
 0x688   : > { %v15830_v5 = vpop.f32.mrf.mxu0  ;;  %v15832_v63 = vpop.f32.mrf.mxu1  ;;  %8975 = vmatprep.subr.bf16.mxu1 %v11283_v47  ;;  %v11292_v47 = vld [vmem:[%s18110_s11 + $0xc] ss:$16 sps:$4 sm:$0xff]  }
 0x689   : > { %18779 = vst [vmem:[#allocation75_spill] sm:$0xff] %v15830_v5 }
 0x68a   : > { %v15837_v56 = vpop.f32.mrf.mxu0  ;;  %v15839_v32 = vpop.f32.mrf.mxu1 }
 0x68b   : > { %18780 = vst [vmem:[#allocation68_spill] sm:$0xff] %v15837_v56  ;;  %8976 = vmatpush1.bf16.msra.mxu1 %v11281_v3  ;;  %v11290_v3 = vld [vmem:[%s18110_s11 + $0x8] ss:$16 sps:$4 sm:$0xff]  }
 0x68c   : > { %v15844_v15 = vpop.f32.mrf.mxu0  ;;  %v15846_v26 = vpop.f32.mrf.mxu1  ;;  %8977 = vmatprep.subr.bf16.mxu1 %v11286_v12 }
 0x68d   : > { %18781 = vst [vmem:[#allocation122_spill] sm:$0xff] %v15844_v15 }
 0x68e   : > { %v15851_v5 = vpop.f32.mrf.mxu0  ;;  %v15853_v14 = vpop.f32.mrf.mxu1  ;;  %7207 = vmatmul.mubr.bf16.gmra.mxu0 %v18723_v48  ;;  %v11293_v48 = vld [vmem:[%s18110_s11 + $0x1e8] ss:$16 sps:$4 sm:$0xff]  }
 0x68f   : > { %18782 = vst [vmem:[#allocation70_spill] sm:$0xff] %v15851_v5  ;;  %8978 = vmatpush1.bf16.msra.mxu1 %v11284_v8  ;;  %7216 = vmatprep.mubr.bf16.mxu0 %v18705_v61  ;;  %v11295_v5 = vld [vmem:[%s18110_s11 + $0x1ec] ss:$16 sps:$4 sm:$0xff]  }
 0x690   : > { %v15860_v15 = vpop.f32.mrf.mxu0  ;;  %v15862_v12 = vpop.f32.mrf.mxu1  ;;  %8979 = vmatprep.subr.bf16.mxu1 %v11292_v47  ;;  %v11301_v47 = vld [vmem:[%s18110_s11 + $0x1cc] ss:$16 sps:$4 sm:$0xff]  }
 0x691   : > { %18783 = vst [vmem:[#allocation73_spill] sm:$0xff] %v15860_v15 }
 0x692   : > { %v15867_v56 = vpop.f32.mrf.mxu0  ;;  %v15869_v35 = vpop.f32.mrf.mxu1 }
 0x693   : > { %18784 = vst [vmem:[#allocation74_spill] sm:$0xff] %v15867_v56  ;;  %8980 = vmatpush1.bf16.msra.mxu1 %v11290_v3  ;;  %v11299_v3 = vld [vmem:[%s18110_s11 + $0x1c8] ss:$16 sps:$4 sm:$0xff]  }
 0x694   : > { %v15874_v8 = vpop.f32.mrf.mxu0  ;;  %v15876_v19 = vpop.f32.mrf.mxu1  ;;  %8981 = vmatprep.subr.bf16.mxu1 %v11295_v5 }
 0x695   : > { %18785 = vst [vmem:[#allocation69_spill] sm:$0xff] %v15874_v8 }
 0x696   : > { %v15881_v15 = vpop.f32.mrf.mxu0  ;;  %v15883_v17 = vpop.f32.mrf.mxu1  ;;  %7217 = vmatmul.mubr.bf16.gmra.mxu0 %v18724_v60  ;;  %v11302_v60 = vld [vmem:[%s18110_s11 + $0x1a8] ss:$16 sps:$4 sm:$0xff]  }
 0x697   : > { %18786 = vst [vmem:[#allocation80_spill] sm:$0xff] %v15881_v15  ;;  %8982 = vmatpush2.bf16.msra.mxu1 %v11293_v48  ;;  %7226 = vmatprep.mubr.bf16.mxu0 %v18705_v61  ;;  %v11304_v15 = vld [vmem:[%s18110_s11 + $0x1ac] ss:$16 sps:$4 sm:$0xff]  }
 0x698   : > { %v15890_v8 = vpop.f32.mrf.mxu0  ;;  %v15892_v5 = vpop.f32.mrf.mxu1  ;;  %8983 = vmatprep.subr.bf16.mxu1 %v11301_v47  ;;  %v11310_v47 = vld [vmem:[%s18110_s11 + $0x18c] ss:$16 sps:$4 sm:$0xff]  }
 0x699   : > { %18787 = vst [vmem:[#allocation121_spill] sm:$0xff] %v15890_v8 }
 0x69a   : > { %v15897_v56 = vpop.f32.mrf.mxu0  ;;  %v15899_v50 = vpop.f32.mrf.mxu1 }
 0x69b   : > { %18788 = vst [vmem:[#allocation118_spill] sm:$0xff] %v15897_v56  ;;  %8984 = vmatpush2.bf16.msra.mxu1 %v11299_v3  ;;  %v11308_v3 = vld [vmem:[%s18110_s11 + $0x188] ss:$16 sps:$4 sm:$0xff]  }
 0x69c   : > { %v15904_v48 = vpop.f32.mrf.mxu0  ;;  %v15906_v41 = vpop.f32.mrf.mxu1  ;;  %8985 = vmatprep.subr.bf16.mxu1 %v11304_v15 }
 0x69d   : > { %18789 = vst [vmem:[#allocation119_spill] sm:$0xff] %v15904_v48 }
 0x69e   : > { %v15911_v8 = vpop.f32.mrf.mxu0  ;;  %v15913_v16 = vpop.f32.mrf.mxu1  ;;  %7227 = vmatmul.mubr.bf16.gmra.mxu0 %v18725_v38  ;;  %v11311_v38 = vld [vmem:[%s18110_s11 + $0x168] ss:$16 sps:$4 sm:$0xff]  }
 0x69f   : > { %18790 = vst [vmem:[#allocation76_spill] sm:$0xff] %v15911_v8  ;;  %8986 = vmatpush2.bf16.msra.mxu1 %v11302_v60  ;;  %7236 = vmatprep.mubr.bf16.mxu0 %v18705_v61  ;;  %v11313_v8 = vld [vmem:[%s18110_s11 + $0x16c] ss:$16 sps:$4 sm:$0xff]  }
 0x6a0   : > { %v15920_v48 = vpop.f32.mrf.mxu0  ;;  %v15922_v15 = vpop.f32.mrf.mxu1  ;;  %8987 = vmatprep.subr.bf16.mxu1 %v11310_v47  ;;  %v11319_v47 = vld [vmem:[%s18110_s11 + $0x14c] ss:$16 sps:$4 sm:$0xff]  }
 0x6a1   : > { %18791 = vst [vmem:[#allocation77_spill] sm:$0xff] %v15920_v48 }
 0x6a2   : > { %v15927_v56 = vpop.f32.mrf.mxu0  ;;  %v15929_v54 = vpop.f32.mrf.mxu1 }
 0x6a3   : > { %18792 = vst [vmem:[#allocation120_spill] sm:$0xff] %v15927_v56  ;;  %8988 = vmatpush2.bf16.msra.mxu1 %v11308_v3  ;;  %v11317_v3 = vld [vmem:[%s18110_s11 + $0x148] ss:$16 sps:$4 sm:$0xff]   ;;  %v5904_v56 = vmul.f32 0.00390625, %v15129_v28 }
 0x6a4   : > { %v15934_v60 = vpop.f32.mrf.mxu0  ;;  %v15936_v45 = vpop.f32.mrf.mxu1  ;;  %8989 = vmatprep.subr.bf16.mxu1 %v11313_v8 }
 0x6a5   : > { %18793 = vst [vmem:[#allocation34_spill] sm:$0xff] %v15934_v60 }
 0x6a6   : > { %v15941_v48 = vpop.f32.mrf.mxu0  ;;  %v15943_v6 = vpop.f32.mrf.mxu1  ;;  %7237 = vmatmul.mubr.bf16.gmra.mxu0 %v18729_v36 }
 0x6a7   : > { %18794 = vst [vmem:[#allocation35_spill] sm:$0xff] %v15941_v48  ;;  %18795 = vst [vmem:[#allocation36_spill] sm:$0xff] %v15943_v6  ;;  %8990 = vmatpush2.bf16.msra.mxu1 %v11311_v38  ;;  %7246 = vmatprep.mubr.bf16.mxu0 %v18705_v61  ;;  %v11322_v48 = vld [vmem:[%s18110_s11 + $0x12c] ss:$16 sps:$4 sm:$0xff]   ;;  %v11320_v61 = vld [vmem:[%s18110_s11 + $0x128] ss:$16 sps:$4 sm:$0xff]  }
 0x6a8   : > { %v15950_v60 = vpop.f32.mrf.mxu0  ;;  %v15952_v8 = vpop.f32.mrf.mxu1  ;;  %8991 = vmatprep.subr.bf16.mxu1 %v11319_v47  ;;  %v11328_v47 = vld [vmem:[%s18110_s11 + $0x10c] ss:$16 sps:$4 sm:$0xff]  }
 0x6a9   : > { %18796 = vst [vmem:[#allocation37_spill] sm:$0xff] %v15950_v60  ;;  %18797 = vst [vmem:[#allocation38_spill] sm:$0xff] %v15952_v8  ;;  %v15972_v8 = vpack.c.bf16 %v5904_v56, %v5904_v56  ;;  %v11334_v56 = vld [vmem:[%s18110_s11 + $0x4ec] ss:$16 sps:$4 sm:$0xff]  }
 0x6aa   : > { %v15958_v6 = vpop.f32.mrf.mxu0  ;;  %v15960_v36 = vpop.f32.mrf.mxu1 }
 0x6ab   : > { %18798 = vst [vmem:[#allocation39_spill] sm:$0xff] %v15958_v6  ;;  %8992 = vmatpush2.bf16.msra.mxu1 %v11317_v3  ;;  %v11326_v3 = vld [vmem:[%s18110_s11 + $0x108] ss:$16 sps:$4 sm:$0xff]  }
 0x6ac   : > { %v15965_v38 = vpop.f32.mrf.mxu0  ;;  %v15967_v60 = vpop.f32.mrf.mxu1  ;;  %8993 = vmatprep.subr.bf16.mxu1 %v11322_v48  ;;  %v5903_v48 = vmul.f32 0.00390625, %v15124_v0  ;;  %v11329_v0 = vld [vmem:[%s18110_s11 + $0x6e0] ss:$16 sps:$4 sm:$0xff]  }
 0x6ad   : > { %18799 = vst [vmem:[#allocation116_spill] sm:$0xff] %v15965_v38  ;;  %18800 = vst [vmem:[#allocation40_spill] sm:$0xff] %v15967_v60 }
 0x6ae   : > { %v15974_v28 = vpop.f32.mrf.mxu0  ;;  %v15976_v6 = vpop.f32.mrf.mxu1  ;;  %7247 = vmatmul.mubr.bf16.gmra.mxu0 %v18734_v23  ;;  %v5908_v23 = vmul.f32 0.00390625, %v15496_v9  ;;  %v11337_v9 = vld [vmem:[%s18110_s11 + $0x6c4] ss:$16 sps:$4 sm:$0xff]  }
 0x6af   : > { %18801 = vst [vmem:[#allocation84_spill] sm:$0xff] %v15974_v28  ;;  %18802 = vst [vmem:[#allocation41_spill] sm:$0xff] %v15976_v6  ;;  %8994 = vmatpush2.bf16.msra.mxu1 %v11320_v61  ;;  %8874 = vmatprep.mubr.bf16.mxu0 %v15972_v8 }
 0x6b0   : > { %v15984_v38 = vpop.f32.mrf.mxu0  ;;  %v15986_v60 = vpop.f32.mrf.mxu1  ;;  %8995 = vmatprep.subr.bf16.mxu1 %v11328_v47  ;;  %v16002_v47 = vpack.c.bf16 %v5903_v48, %v5903_v48 }
 0x6b1   : > { %18803 = vst [vmem:[#allocation81_spill] sm:$0xff] %v15984_v38  ;;  %18804 = vst [vmem:[#allocation117_spill] sm:$0xff] %v15986_v60  ;;  %v11332_v38 = vld [vmem:[%s18110_s11 + $0x4e8] ss:$16 sps:$4 sm:$0xff]  }
 0x6b2   : > { %v15992_v61 = vpop.f32.mrf.mxu0  ;;  %v15994_v28 = vpop.f32.mrf.mxu1 }
 0x6b3   : > { %18805 = vst [vmem:[#allocation42_spill] sm:$0xff] %v15992_v61  ;;  %18806 = vst [vmem:[#allocation83_spill] sm:$0xff] %v15994_v28  ;;  %8996 = vmatpush2.bf16.msra.mxu1 %v11326_v3  ;;  %v11340_v3 = vld [vmem:[%s18110_s11 + $0x4cc] ss:$16 sps:$4 sm:$0xff]   ;;  %v16014_v61 = vpack.c.bf16 %v5908_v23, %v5908_v23 }
 0x6b4   : > { %v16004_v60 = vpop.f32.mrf.mxu0  ;;  %v16006_v6 = vpop.f32.mrf.mxu1  ;;  %9047 = vmatprep.subr.bf16.mxu1 %v11334_v56  ;;  %v11335_v56 = vld [vmem:[%s18110_s11 + $0x6c0] ss:$16 sps:$4 sm:$0xff]  }
 0x6b5   : > { %18807 = vst [vmem:[#allocation43_spill] sm:$0xff] %v16004_v60  ;;  %18808 = vst [vmem:[#allocation71_spill] sm:$0xff] %v16006_v6  ;;  %v11338_v60 = vld [vmem:[%s18110_s11 + $0x4c8] ss:$16 sps:$4 sm:$0xff]  }
 0x6b6   : > { %8998 = vmatmul.mubr.bf16.vlgmr.msra.gmra.mxu1 %v15472_v10  ;;  %v16017_v28 = vpop.f32.mrf.mxu0  ;;  %v16019_v48 = vpop.f32.mrf.mxu1  ;;  %8875 = vmatmul.mubr.bf16.vlgmr.msra.gmra.mxu0 %v16002_v47 }
 0x6b7   : > { %18809 = vst [vmem:[#allocation44_spill] sm:$0xff] %v16017_v28  ;;  %18810 = vst [vmem:[#allocation45_spill] sm:$0xff] %v16019_v48  ;;  %8925 = vmatpush1.bf16.msra.mxu0 %v11329_v0  ;;  %9048 = vmatpush1.bf16.msra.mxu1 %v11332_v38  ;;  %v11343_v38 = vld [vmem:[%s18110_s11 + $0x6a4] ss:$16 sps:$4 sm:$0xff]   ;;  %v11346_v0 = vld [vmem:[%s18110_s11 + $0x4ac] ss:$16 sps:$4 sm:$0xff]  }
 0x6b8   : > { %9079 = vmatprep.mubr.bf16.mxu1 %v15474_v49  ;;  %8956 = vmatprep.mubr.bf16.mxu0 %v16014_v61  ;;  %v16030_v10 = vpop.f32.mrf.mxu0  ;;  %v16032_v23 = vpop.f32.mrf.mxu1  ;;  %v11341_v49 = vld [vmem:[%s18110_s11 + $0x6a0] ss:$16 sps:$4 sm:$0xff]  }
 0x6b9   : > { %18811 = vst [vmem:[#allocation27_spill] sm:$0xff] %v16030_v10  ;;  %18812 = vst [vmem:[#allocation46_spill] sm:$0xff] %v16032_v23  ;;  %8926 = vmatprep.subr.bf16.mxu0 %v11337_v9  ;;  %9049 = vmatprep.subr.bf16.mxu1 %v11340_v3  ;;  %v11344_v10 = vld [vmem:[%s18110_s11 + $0x4a8] ss:$16 sps:$4 sm:$0xff]   ;;  %v11349_v9 = vld [vmem:[%s18110_s11 + $0x684] ss:$16 sps:$4 sm:$0xff]  }
 0x6ba   : > { %v16040_v28 = vpop.f32.mrf.mxu0  ;;  %v16042_v48 = vpop.f32.mrf.mxu1 }
 0x6bb   : > { %18813 = vst [vmem:[#allocation47_spill] sm:$0xff] %v16040_v28  ;;  %8927 = vmatpush1.bf16.msra.mxu0 %v11335_v56  ;;  %9050 = vmatpush1.bf16.msra.mxu1 %v11338_v60  ;;  %v11352_v60 = vld [vmem:[%s18110_s11 + $0x48c] ss:$16 sps:$4 sm:$0xff]  }
 0x6bc   : > { %v16050_v23 = vpop.f32.mrf.mxu0  ;;  %v16052_v6 = vpop.f32.mrf.mxu1  ;;  %8928 = vmatprep.subr.bf16.mxu0 %v11343_v38  ;;  %9051 = vmatprep.subr.bf16.mxu1 %v11346_v0  ;;  %v11350_v38 = vld [vmem:[%s18110_s11 + $0x488] ss:$16 sps:$4 sm:$0xff]  }
 0x6bd   : > { %18814 = vst [vmem:[#allocation48_spill] sm:$0xff] %v16050_v23  ;;  %18815 = vst [vmem:[#allocation49_spill] sm:$0xff] %v16052_v6  ;;  %v11347_v23 = vld [vmem:[%s18110_s11 + $0x680] ss:$16 sps:$4 sm:$0xff]  }
 0x6be   : > { %v16060_v3 = vpop.f32.mrf.mxu0  ;;  %v16062_v56 = vpop.f32.mrf.mxu1 }
 0x6bf   : > { %18816 = vst [vmem:[#allocation50_spill] sm:$0xff] %v16060_v3  ;;  %18817 = vst [vmem:[#allocation51_spill] sm:$0xff] %v16062_v56  ;;  %8929 = vmatpush1.bf16.msra.mxu0 %v11341_v49  ;;  %9052 = vmatpush1.bf16.msra.mxu1 %v11344_v10  ;;  %v11355_v3 = vld [vmem:[%s18110_s11 + $0x664] ss:$16 sps:$4 sm:$0xff]   ;;  %v11358_v10 = vld [vmem:[%s18110_s11 + $0x46c] ss:$16 sps:$4 sm:$0xff]  }
 0x6c0   : > { %v16070_v0 = vpop.f32.mrf.mxu0  ;;  %v16072_v28 = vpop.f32.mrf.mxu1  ;;  %8930 = vmatprep.subr.bf16.mxu0 %v11349_v9  ;;  %9053 = vmatprep.subr.bf16.mxu1 %v11352_v60  ;;  %v11356_v9 = vld [vmem:[%s18110_s11 + $0x468] ss:$16 sps:$4 sm:$0xff]  }
 0x6c1   : > { %18818 = vst [vmem:[#allocation52_spill] sm:$0xff] %v16070_v0  ;;  %18819 = vst [vmem:[#allocation53_spill] sm:$0xff] %v16072_v28  ;;  %v11353_v0 = vld [vmem:[%s18110_s11 + $0x660] ss:$16 sps:$4 sm:$0xff]  }
 0x6c2   : > { %v16080_v49 = vpop.f32.mrf.mxu0  ;;  %v16082_v56 = vpop.f32.mrf.mxu1 }
 0x6c3   : > { %18820 = vst [vmem:[#allocation54_spill] sm:$0xff] %v16080_v49  ;;  %18821 = vst [vmem:[#allocation55_spill] sm:$0xff] %v16082_v56  ;;  %8931 = vmatpush1.bf16.msra.mxu0 %v11347_v23  ;;  %9054 = vmatpush1.bf16.msra.mxu1 %v11350_v38  ;;  %v11361_v49 = vld [vmem:[%s18110_s11 + $0x644] ss:$16 sps:$4 sm:$0xff]   ;;  %v11364_v23 = vld [vmem:[%s18110_s11 + $0x44c] ss:$16 sps:$4 sm:$0xff]  }
 0x6c4   : > { %v16090_v60 = vpop.f32.mrf.mxu0  ;;  %v16092_v28 = vpop.f32.mrf.mxu1  ;;  %8932 = vmatprep.subr.bf16.mxu0 %v11355_v3  ;;  %9055 = vmatprep.subr.bf16.mxu1 %v11358_v10  ;;  %v11362_v3 = vld [vmem:[%s18110_s11 + $0x448] ss:$16 sps:$4 sm:$0xff]  }
 0x6c5   : > { %18822 = vst [vmem:[#allocation56_spill] sm:$0xff] %v16090_v60  ;;  %18823 = vst [vmem:[#allocation57_spill] sm:$0xff] %v16092_v28  ;;  %v11359_v60 = vld [vmem:[%s18110_s11 + $0x640] ss:$16 sps:$4 sm:$0xff]  }
 0x6c6   : > { %v16100_v38 = vpop.f32.mrf.mxu0  ;;  %v16102_v56 = vpop.f32.mrf.mxu1 }
 0x6c7   : > { %18824 = vst [vmem:[#allocation58_spill] sm:$0xff] %v16100_v38  ;;  %18825 = vst [vmem:[#allocation28_spill] sm:$0xff] %v16102_v56  ;;  %8933 = vmatpush1.bf16.msra.mxu0 %v11353_v0  ;;  %9056 = vmatpush1.bf16.msra.mxu1 %v11356_v9  ;;  %v11367_v38 = vld [vmem:[%s18110_s11 + $0x624] ss:$16 sps:$4 sm:$0xff]   ;;  %v11370_v0 = vld [vmem:[%s18110_s11 + $0x42c] ss:$16 sps:$4 sm:$0xff]  }
 0x6c8   : > { %v16110_v10 = vpop.f32.mrf.mxu0  ;;  %v16112_v28 = vpop.f32.mrf.mxu1  ;;  %8934 = vmatprep.subr.bf16.mxu0 %v11361_v49  ;;  %9057 = vmatprep.subr.bf16.mxu1 %v11364_v23  ;;  %v11368_v49 = vld [vmem:[%s18110_s11 + $0x428] ss:$16 sps:$4 sm:$0xff]  }
 0x6c9   : > { %18826 = vst [vmem:[#allocation8_spill] sm:$0xff] %v16110_v10  ;;  %18827 = vst [vmem:[#allocation29_spill] sm:$0xff] %v16112_v28  ;;  %v11365_v10 = vld [vmem:[%s18110_s11 + $0x620] ss:$16 sps:$4 sm:$0xff]  }
 0x6ca   : > { %v16120_v9 = vpop.f32.mrf.mxu0  ;;  %v16122_v56 = vpop.f32.mrf.mxu1 }
 0x6cb   : > { %18828 = vst [vmem:[#allocation30_spill] sm:$0xff] %v16120_v9  ;;  %18829 = vst [vmem:[#allocation9_spill] sm:$0xff] %v16122_v56  ;;  %8935 = vmatpush1.bf16.msra.mxu0 %v11359_v60  ;;  %9058 = vmatpush1.bf16.msra.mxu1 %v11362_v3  ;;  %v11373_v9 = vld [vmem:[%s18110_s11 + $0x604] ss:$16 sps:$4 sm:$0xff]   ;;  %v11376_v60 = vld [vmem:[%s18110_s11 + $0x40c] ss:$16 sps:$4 sm:$0xff]  }
 0x6cc   : > { %v16130_v23 = vpop.f32.mrf.mxu0  ;;  %v16132_v28 = vpop.f32.mrf.mxu1  ;;  %8936 = vmatprep.subr.bf16.mxu0 %v11367_v38  ;;  %9059 = vmatprep.subr.bf16.mxu1 %v11370_v0  ;;  %v11374_v38 = vld [vmem:[%s18110_s11 + $0x408] ss:$16 sps:$4 sm:$0xff]  }
 0x6cd   : > { %18830 = vst [vmem:[#allocation31_spill] sm:$0xff] %v16130_v23  ;;  %18831 = vst [vmem:[#allocation32_spill] sm:$0xff] %v16132_v28  ;;  %v11371_v23 = vld [vmem:[%s18110_s11 + $0x600] ss:$16 sps:$4 sm:$0xff]  }
 0x6ce   : > { %v16140_v3 = vpop.f32.mrf.mxu0  ;;  %v16142_v56 = vpop.f32.mrf.mxu1 }
 0x6cf   : > { %18832 = vst [vmem:[#allocation10_spill] sm:$0xff] %v16140_v3  ;;  %18833 = vst [vmem:[#allocation33_spill] sm:$0xff] %v16142_v56  ;;  %8937 = vmatpush1.bf16.msra.mxu0 %v11365_v10  ;;  %9060 = vmatpush1.bf16.msra.mxu1 %v11368_v49  ;;  %v11379_v3 = vld [vmem:[%s18110_s11 + $0x7e4] ss:$16 sps:$4 sm:$0xff]   ;;  %v11382_v10 = vld [vmem:[%s18110_s11 + $0x5ec] ss:$16 sps:$4 sm:$0xff]  }
 0x6d0   : > { %v16150_v0 = vpop.f32.mrf.mxu0  ;;  %v16152_v28 = vpop.f32.mrf.mxu1  ;;  %8938 = vmatprep.subr.bf16.mxu0 %v11373_v9  ;;  %9061 = vmatprep.subr.bf16.mxu1 %v11376_v60  ;;  %v11380_v9 = vld [vmem:[%s18110_s11 + $0x5e8] ss:$16 sps:$4 sm:$0xff]  }
 0x6d1   : > { %18834 = vst [vmem:[#allocation11_spill] sm:$0xff] %v16150_v0  ;;  %18835 = vst [vmem:[#allocation12_spill] sm:$0xff] %v16152_v28  ;;  %v11377_v0 = vld [vmem:[%s18110_s11 + $0x7e0] ss:$16 sps:$4 sm:$0xff]  }
 0x6d2   : > { %v16160_v49 = vpop.f32.mrf.mxu0  ;;  %v16162_v56 = vpop.f32.mrf.mxu1 }
 0x6d3   : > { %18836 = vst [vmem:[#allocation13_spill] sm:$0xff] %v16160_v49  ;;  %18837 = vst [vmem:[#allocation14_spill] sm:$0xff] %v16162_v56  ;;  %8939 = vmatpush1.bf16.msra.mxu0 %v11371_v23  ;;  %9062 = vmatpush1.bf16.msra.mxu1 %v11374_v38  ;;  %v11385_v49 = vld [vmem:[%s18110_s11 + $0x7c4] ss:$16 sps:$4 sm:$0xff]   ;;  %v11388_v23 = vld [vmem:[%s18110_s11 + $0x5cc] ss:$16 sps:$4 sm:$0xff]  }
 0x6d4   : > { %v16170_v60 = vpop.f32.mrf.mxu0  ;;  %v16172_v28 = vpop.f32.mrf.mxu1  ;;  %8940 = vmatprep.subr.bf16.mxu0 %v11379_v3  ;;  %9063 = vmatprep.subr.bf16.mxu1 %v11382_v10  ;;  %v11386_v3 = vld [vmem:[%s18110_s11 + $0x5c8] ss:$16 sps:$4 sm:$0xff]  }
 0x6d5   : > { %18838 = vst [vmem:[#allocation15_spill] sm:$0xff] %v16170_v60  ;;  %18839 = vst [vmem:[#allocation16_spill] sm:$0xff] %v16172_v28  ;;  %v11383_v60 = vld [vmem:[%s18110_s11 + $0x7c0] ss:$16 sps:$4 sm:$0xff]  }
 0x6d6   : > { %v16180_v38 = vpop.f32.mrf.mxu0  ;;  %v16182_v56 = vpop.f32.mrf.mxu1 }
 0x6d7   : > { %18840 = vst [vmem:[#allocation17_spill] sm:$0xff] %v16180_v38  ;;  %18841 = vst [vmem:[#allocation18_spill] sm:$0xff] %v16182_v56  ;;  %8941 = vmatpush2.bf16.msra.mxu0 %v11377_v0  ;;  %9064 = vmatpush2.bf16.msra.mxu1 %v11380_v9  ;;  %v11391_v38 = vld [vmem:[%s18110_s11 + $0x7a4] ss:$16 sps:$4 sm:$0xff]   ;;  %v11394_v0 = vld [vmem:[%s18110_s11 + $0x5ac] ss:$16 sps:$4 sm:$0xff]  }
 0x6d8   : > { %v16190_v10 = vpop.f32.mrf.mxu0  ;;  %v16192_v28 = vpop.f32.mrf.mxu1  ;;  %8942 = vmatprep.subr.bf16.mxu0 %v11385_v49  ;;  %9065 = vmatprep.subr.bf16.mxu1 %v11388_v23  ;;  %v11392_v49 = vld [vmem:[%s18110_s11 + $0x5a8] ss:$16 sps:$4 sm:$0xff]  }
 0x6d9   : > { %18842 = vst [vmem:[#allocation19_spill] sm:$0xff] %v16190_v10  ;;  %18843 = vst [vmem:[#allocation20_spill] sm:$0xff] %v16192_v28  ;;  %v11389_v10 = vld [vmem:[%s18110_s11 + $0x7a0] ss:$16 sps:$4 sm:$0xff]  }
 0x6da   : > { %v16200_v9 = vpop.f32.mrf.mxu0  ;;  %v16202_v56 = vpop.f32.mrf.mxu1 }
 0x6db   : > { %18844 = vst [vmem:[#allocation21_spill] sm:$0xff] %v16200_v9  ;;  %18845 = vst [vmem:[#allocation22_spill] sm:$0xff] %v16202_v56  ;;  %8943 = vmatpush2.bf16.msra.mxu0 %v11383_v60  ;;  %9066 = vmatpush2.bf16.msra.mxu1 %v11386_v3  ;;  %v11397_v9 = vld [vmem:[%s18110_s11 + $0x784] ss:$16 sps:$4 sm:$0xff]   ;;  %v11400_v60 = vld [vmem:[%s18110_s11 + $0x58c] ss:$16 sps:$4 sm:$0xff]  }
 0x6dc   : > { %v16210_v23 = vpop.f32.mrf.mxu0  ;;  %v16212_v28 = vpop.f32.mrf.mxu1  ;;  %8944 = vmatprep.subr.bf16.mxu0 %v11391_v38  ;;  %9067 = vmatprep.subr.bf16.mxu1 %v11394_v0  ;;  %v11398_v38 = vld [vmem:[%s18110_s11 + $0x588] ss:$16 sps:$4 sm:$0xff]  }
 0x6dd   : > { %18846 = vst [vmem:[#allocation23_spill] sm:$0xff] %v16210_v23  ;;  %18847 = vst [vmem:[#allocation131_spill] sm:$0xff] %v16212_v28  ;;  %v11395_v23 = vld [vmem:[%s18110_s11 + $0x780] ss:$16 sps:$4 sm:$0xff]  }
 0x6de   : > { %v16220_v3 = vpop.f32.mrf.mxu0  ;;  %v16222_v56 = vpop.f32.mrf.mxu1 }
 0x6df   : > { %18848 = vst [vmem:[#allocation132_spill] sm:$0xff] %v16220_v3  ;;  %18849 = vst [vmem:[#allocation133_spill] sm:$0xff] %v16222_v56  ;;  %8945 = vmatpush2.bf16.msra.mxu0 %v11389_v10  ;;  %9068 = vmatpush2.bf16.msra.mxu1 %v11392_v49  ;;  %v11403_v3 = vld [vmem:[%s18110_s11 + $0x764] ss:$16 sps:$4 sm:$0xff]   ;;  %v11406_v10 = vld [vmem:[%s18110_s11 + $0x56c] ss:$16 sps:$4 sm:$0xff]  }
 0x6e0   : > { %v16230_v0 = vpop.f32.mrf.mxu0  ;;  %v16232_v28 = vpop.f32.mrf.mxu1  ;;  %8946 = vmatprep.subr.bf16.mxu0 %v11397_v9  ;;  %9069 = vmatprep.subr.bf16.mxu1 %v11400_v60  ;;  %v11404_v9 = vld [vmem:[%s18110_s11 + $0x568] ss:$16 sps:$4 sm:$0xff]  }
 0x6e1   : > { %18850 = vst [vmem:[#allocation134_spill] sm:$0xff] %v16230_v0  ;;  %18851 = vst [vmem:[#allocation135_spill] sm:$0xff] %v16232_v28  ;;  %v11401_v0 = vld [vmem:[%s18110_s11 + $0x760] ss:$16 sps:$4 sm:$0xff]  }
 0x6e2   : > { %v16240_v49 = vpop.f32.mrf.mxu0  ;;  %v16242_v56 = vpop.f32.mrf.mxu1 }
 0x6e3   : > { %18852 = vst [vmem:[#allocation136_spill] sm:$0xff] %v16240_v49  ;;  %18853 = vst [vmem:[#allocation137_spill] sm:$0xff] %v16242_v56  ;;  %8947 = vmatpush2.bf16.msra.mxu0 %v11395_v23  ;;  %9070 = vmatpush2.bf16.msra.mxu1 %v11398_v38  ;;  %v11409_v49 = vld [vmem:[%s18110_s11 + $0x744] ss:$16 sps:$4 sm:$0xff]   ;;  %v11412_v23 = vld [vmem:[%s18110_s11 + $0x54c] ss:$16 sps:$4 sm:$0xff]  }
 0x6e4   : > { %v16250_v60 = vpop.f32.mrf.mxu0  ;;  %v16252_v28 = vpop.f32.mrf.mxu1  ;;  %8948 = vmatprep.subr.bf16.mxu0 %v11403_v3  ;;  %9071 = vmatprep.subr.bf16.mxu1 %v11406_v10  ;;  %v11410_v3 = vld [vmem:[%s18110_s11 + $0x548] ss:$16 sps:$4 sm:$0xff]  }
 0x6e5   : > { %18854 = vst [vmem:[#allocation138_spill] sm:$0xff] %v16250_v60  ;;  %18855 = vst [vmem:[#allocation139_spill] sm:$0xff] %v16252_v28  ;;  %v11407_v60 = vld [vmem:[%s18110_s11 + $0x740] ss:$16 sps:$4 sm:$0xff]  }
 0x6e6   : > { %v16260_v38 = vpop.f32.mrf.mxu0  ;;  %v16262_v56 = vpop.f32.mrf.mxu1 }
 0x6e7   : > { %18856 = vst [vmem:[#allocation140_spill] sm:$0xff] %v16260_v38  ;;  %18857 = vst [vmem:[#allocation141_spill] sm:$0xff] %v16262_v56  ;;  %8949 = vmatpush2.bf16.msra.mxu0 %v11401_v0  ;;  %9072 = vmatpush2.bf16.msra.mxu1 %v11404_v9  ;;  %v11415_v38 = vld [vmem:[%s18110_s11 + $0x724] ss:$16 sps:$4 sm:$0xff]   ;;  %v11418_v0 = vld [vmem:[%s18110_s11 + $0x52c] ss:$16 sps:$4 sm:$0xff]  }
 0x6e8   : > { %v16270_v10 = vpop.f32.mrf.mxu0  ;;  %v16272_v28 = vpop.f32.mrf.mxu1  ;;  %8950 = vmatprep.subr.bf16.mxu0 %v11409_v49  ;;  %9073 = vmatprep.subr.bf16.mxu1 %v11412_v23  ;;  %v11416_v49 = vld [vmem:[%s18110_s11 + $0x528] ss:$16 sps:$4 sm:$0xff]  }
 0x6e9   : > { %18858 = vst [vmem:[#allocation142_spill] sm:$0xff] %v16270_v10  ;;  %18859 = vst [vmem:[#allocation143_spill] sm:$0xff] %v16272_v28  ;;  %v11413_v10 = vld [vmem:[%s18110_s11 + $0x720] ss:$16 sps:$4 sm:$0xff]  }
 0x6ea   : > { %v16280_v9 = vpop.f32.mrf.mxu0  ;;  %v16282_v56 = vpop.f32.mrf.mxu1 }
 0x6eb   : > { %18860 = vst [vmem:[#allocation144_spill] sm:$0xff] %v16280_v9  ;;  %18861 = vst [vmem:[#allocation145_spill] sm:$0xff] %v16282_v56  ;;  %8951 = vmatpush2.bf16.msra.mxu0 %v11407_v60  ;;  %9074 = vmatpush2.bf16.msra.mxu1 %v11410_v3  ;;  %v11421_v9 = vld [vmem:[%s18110_s11 + $0x704] ss:$16 sps:$4 sm:$0xff]   ;;  %v11424_v60 = vld [vmem:[%s18110_s11 + $0x50c] ss:$16 sps:$4 sm:$0xff]  }
 0x6ec   : > { %v16290_v23 = vpop.f32.mrf.mxu0  ;;  %v16292_v28 = vpop.f32.mrf.mxu1  ;;  %8952 = vmatprep.subr.bf16.mxu0 %v11415_v38  ;;  %9075 = vmatprep.subr.bf16.mxu1 %v11418_v0  ;;  %v11422_v38 = vld [vmem:[%s18110_s11 + $0x508] ss:$16 sps:$4 sm:$0xff]   ;;  %v5907_v0 = vmul.f32 0.00390625, %v15484_v18 }
 0x6ed   : > { %18862 = vst [vmem:[#allocation146_spill] sm:$0xff] %v16290_v23  ;;  %18863 = vst [vmem:[#allocation147_spill] sm:$0xff] %v16292_v28  ;;  %v11419_v23 = vld [vmem:[%s18110_s11 + $0x700] ss:$16 sps:$4 sm:$0xff]   ;;  %v11425_v18 = vld [vmem:[%s18110_s11 + $0x2e8] ss:$16 sps:$4 sm:$0xff]  }
 0x6ee   : > { %v16300_v3 = vpop.f32.mrf.mxu0  ;;  %v16302_v56 = vpop.f32.mrf.mxu1 }
 0x6ef   : > { %18864 = vst [vmem:[#allocation148_spill] sm:$0xff] %v16300_v3  ;;  %18865 = vst [vmem:[#allocation149_spill] sm:$0xff] %v16302_v56  ;;  %8953 = vmatpush2.bf16.msra.mxu0 %v11413_v10  ;;  %9076 = vmatpush2.bf16.msra.mxu1 %v11416_v49  ;;  %v11427_v10 = vld [vmem:[%s18110_s11 + $0x2ec] ss:$16 sps:$4 sm:$0xff]   ;;  %v16325_v56 = vpack.c.bf16 %v5907_v0, %v5907_v0  ;;  %v11428_v0 = vld [vmem:[%s18110_s11 + $0x2c8] ss:$16 sps:$4 sm:$0xff]  }
 0x6f0   : > { %v16311_v28 = vpop.f32.mrf.mxu0  ;;  %v16313_v6 = vpop.f32.mrf.mxu1  ;;  %8954 = vmatprep.subr.bf16.mxu0 %v11421_v9  ;;  %9077 = vmatprep.subr.bf16.mxu1 %v11424_v60  ;;  %v11430_v60 = vld [vmem:[%s18110_s11 + $0x2cc] ss:$16 sps:$4 sm:$0xff]  }
 0x6f1   : > { %18866 = vst [vmem:[#allocation150_spill] sm:$0xff] %v16311_v28  ;;  %18867 = vst [vmem:[#allocation151_spill] sm:$0xff] %v16313_v6 }
 0x6f2   : > { %v16318_v49 = vpop.f32.mrf.mxu0  ;;  %v16320_v3 = vpop.f32.mrf.mxu1 }
 0x6f3   : > { %18868 = vst [vmem:[#allocation152_spill] sm:$0xff] %v16318_v49  ;;  %18869 = vst [vmem:[#allocation153_spill] sm:$0xff] %v16320_v3  ;;  %8955 = vmatpush2.bf16.msra.mxu0 %v11419_v23  ;;  %9078 = vmatpush2.bf16.msra.mxu1 %v11422_v38 }
 0x6f4   : > { %v16327_v28 = vpop.f32.mrf.mxu0  ;;  %v16329_v9 = vpop.f32.mrf.mxu1  ;;  %9006 = vmatprep.subr.bf16.mxu0 %v11427_v10 }
 0x6f5   : > { %18870 = vst [vmem:[#allocation154_spill] sm:$0xff] %v16327_v28  ;;  %18871 = vst [vmem:[#allocation155_spill] sm:$0xff] %v16329_v9 }
 0x6f6   : > { %8957 = vmatmul.mubr.bf16.vlgmr.msra.gmra.mxu0 %v16325_v56  ;;  %9080 = vmatmul.mubr.bf16.vlgmr.msra.gmra.mxu1 %v15752_v11  ;;  %v16336_v23 = vpop.f32.mrf.mxu0  ;;  %v16338_v38 = vpop.f32.mrf.mxu1  ;;  %v11433_v11 = vld [vmem:[%s18110_s11 + $0x2ac] ss:$16 sps:$4 sm:$0xff]  }
 0x6f7   : > { %18872 = vst [vmem:[#allocation156_spill] sm:$0xff] %v16336_v23  ;;  %9007 = vmatpush1.bf16.msra.mxu0 %v11425_v18  ;;  %9038 = vmatprep.mubr.bf16.mxu0 %v15972_v8  ;;  %v11431_v8 = vld [vmem:[%s18110_s11 + $0x2a8] ss:$16 sps:$4 sm:$0xff]  }
 0x6f8   : > { %v16344_v10 = vpop.f32.mrf.mxu0  ;;  %v16346_v28 = vpop.f32.mrf.mxu1  ;;  %9008 = vmatprep.subr.bf16.mxu0 %v11430_v60  ;;  %v11436_v60 = vld [vmem:[%s18110_s11 + $0x28c] ss:$16 sps:$4 sm:$0xff]  }
 0x6f9   : > { %18873 = vst [vmem:[#allocation157_spill] sm:$0xff] %v16344_v10 }
 0x6fa   : > { %v16351_v49 = vpop.f32.mrf.mxu0  ;;  %v8839_v23 = vpop.f32.mrf.mxu1 }
 0x6fb   : > { %18874 = vst [vmem:[#allocation158_spill] sm:$0xff] %v16351_v49  ;;  %9009 = vmatpush1.bf16.msra.mxu0 %v11428_v0  ;;  %v11434_v23 = vld [vmem:[%s18110_s11 + $0x288] ss:$16 sps:$4 sm:$0xff]  }
 0x6fc   : > { %v16356_v18 = vpop.f32.mrf.mxu0  ;;  %v8840_v9 = vpop.f32.mrf.mxu1  ;;  %9010 = vmatprep.subr.bf16.mxu0 %v11433_v11  ;;  %v11437_v11 = vld [vmem:[%s18110_s11 + $0x268] ss:$16 sps:$4 sm:$0xff]  }
 0x6fd   : > { %18875 = vst [vmem:[#allocation159_spill] sm:$0xff] %v16356_v18  ;;  %v11439_v18 = vld [vmem:[%s18110_s11 + $0x26c] ss:$16 sps:$4 sm:$0xff]  }
 0x6fe   : > { %v16361_v10 = vpop.f32.mrf.mxu0 }
 0x6ff   : > { %18876 = vst [vmem:[#allocation160_spill] sm:$0xff] %v16361_v10  ;;  %9011 = vmatpush1.bf16.msra.mxu0 %v11431_v8  ;;  %v11442_v8 = vld [vmem:[%s18110_s11 + $0x24c] ss:$16 sps:$4 sm:$0xff]  }
 0x700   : > { %v16366_v0 = vpop.f32.mrf.mxu0  ;;  %9012 = vmatprep.subr.bf16.mxu0 %v11436_v60  ;;  %v11440_v60 = vld [vmem:[%s18110_s11 + $0x248] ss:$16 sps:$4 sm:$0xff]  }
 0x701   : > { %18877 = vst [vmem:[#allocation161_spill] sm:$0xff] %v16366_v0 }
 0x702   : > { %v16371_v9 = vpop.f32.mrf.mxu0 }
 0x703   : > { %18878 = vst [vmem:[#allocation162_spill] sm:$0xff] %v16371_v9  ;;  %9013 = vmatpush1.bf16.msra.mxu0 %v11434_v23  ;;  %v11445_v23 = vld [vmem:[%s18110_s11 + $0x22c] ss:$16 sps:$4 sm:$0xff]  }
 0x704   : > { %v16376_v10 = vpop.f32.mrf.mxu0  ;;  %9014 = vmatprep.subr.bf16.mxu0 %v11439_v18  ;;  %v11443_v18 = vld [vmem:[%s18110_s11 + $0x228] ss:$16 sps:$4 sm:$0xff]  }
 0x705   : > { %18879 = vst [vmem:[#allocation163_spill] sm:$0xff] %v16376_v10 }
 0x706   : > { %v16381_v0 = vpop.f32.mrf.mxu0 }
 0x707   : > { %18880 = vst [vmem:[#allocation164_spill] sm:$0xff] %v16381_v0  ;;  %9015 = vmatpush1.bf16.msra.mxu0 %v11437_v11  ;;  %v11448_v11 = vld [vmem:[%s18110_s11 + $0x20c] ss:$16 sps:$4 sm:$0xff]  }
 0x708   : > { %v16386_v9 = vpop.f32.mrf.mxu0  ;;  %9016 = vmatprep.subr.bf16.mxu0 %v11442_v8  ;;  %v11446_v8 = vld [vmem:[%s18110_s11 + $0x208] ss:$16 sps:$4 sm:$0xff]  }
 0x709   : > { %18881 = vst [vmem:[#allocation165_spill] sm:$0xff] %v16386_v9 }
 0x70a   : > { %v16391_v10 = vpop.f32.mrf.mxu0 }
 0x70b   : > { %18882 = vst [vmem:[#allocation166_spill] sm:$0xff] %v16391_v10  ;;  %9017 = vmatpush1.bf16.msra.mxu0 %v11440_v60  ;;  %v11451_v60 = vld [vmem:[%s18110_s11 + $0x3ec] ss:$16 sps:$4 sm:$0xff]  }
 0x70c   : > { %v16396_v0 = vpop.f32.mrf.mxu0  ;;  %9018 = vmatprep.subr.bf16.mxu0 %v11445_v23  ;;  %v11449_v23 = vld [vmem:[%s18110_s11 + $0x3e8] ss:$16 sps:$4 sm:$0xff]  }
 0x70d   : > { %18883 = vst [vmem:[#allocation167_spill] sm:$0xff] %v16396_v0 }
 0x70e   : > { %v16401_v9 = vpop.f32.mrf.mxu0 }
 0x70f   : > { %18884 = vst [vmem:[#allocation168_spill] sm:$0xff] %v16401_v9  ;;  %9019 = vmatpush1.bf16.msra.mxu0 %v11443_v18  ;;  %v11454_v18 = vld [vmem:[%s18110_s11 + $0x3cc] ss:$16 sps:$4 sm:$0xff]  }
 0x710   : > { %v16406_v10 = vpop.f32.mrf.mxu0  ;;  %9020 = vmatprep.subr.bf16.mxu0 %v11448_v11  ;;  %v11452_v11 = vld [vmem:[%s18110_s11 + $0x3c8] ss:$16 sps:$4 sm:$0xff]  }
 0x711   : > { %18885 = vst [vmem:[#allocation169_spill] sm:$0xff] %v16406_v10 }
 0x712   : > { %v16411_v0 = vpop.f32.mrf.mxu0 }
 0x713   : > { %18886 = vst [vmem:[#allocation170_spill] sm:$0xff] %v16411_v0  ;;  %9021 = vmatpush1.bf16.msra.mxu0 %v11446_v8  ;;  %v11457_v8 = vld [vmem:[%s18110_s11 + $0x3ac] ss:$16 sps:$4 sm:$0xff]  }
 0x714   : > { %v16416_v9 = vpop.f32.mrf.mxu0  ;;  %9022 = vmatprep.subr.bf16.mxu0 %v11451_v60  ;;  %v11455_v60 = vld [vmem:[%s18110_s11 + $0x3a8] ss:$16 sps:$4 sm:$0xff]  }
 0x715   : > { %18887 = vst [vmem:[#allocation171_spill] sm:$0xff] %v16416_v9 }
 0x716   : > { %v16421_v10 = vpop.f32.mrf.mxu0 }
 0x717   : > { %18888 = vst [vmem:[#allocation172_spill] sm:$0xff] %v16421_v10  ;;  %9023 = vmatpush2.bf16.msra.mxu0 %v11449_v23  ;;  %v11460_v23 = vld [vmem:[%s18110_s11 + $0x38c] ss:$16 sps:$4 sm:$0xff]  }
 0x718   : > { %v16426_v0 = vpop.f32.mrf.mxu0  ;;  %9024 = vmatprep.subr.bf16.mxu0 %v11454_v18  ;;  %v11458_v18 = vld [vmem:[%s18110_s11 + $0x388] ss:$16 sps:$4 sm:$0xff]  }
 0x719   : > { %18889 = vst [vmem:[#allocation173_spill] sm:$0xff] %v16426_v0 }
 0x71a   : > { %v16431_v9 = vpop.f32.mrf.mxu0 }
 0x71b   : > { %18890 = vst [vmem:[#allocation174_spill] sm:$0xff] %v16431_v9  ;;  %9025 = vmatpush2.bf16.msra.mxu0 %v11452_v11  ;;  %v11463_v11 = vld [vmem:[%s18110_s11 + $0x36c] ss:$16 sps:$4 sm:$0xff]  }
 0x71c   : > { %v16436_v10 = vpop.f32.mrf.mxu0  ;;  %9026 = vmatprep.subr.bf16.mxu0 %v11457_v8  ;;  %v11461_v8 = vld [vmem:[%s18110_s11 + $0x368] ss:$16 sps:$4 sm:$0xff]  }
 0x71d   : > { %18891 = vst [vmem:[#allocation175_spill] sm:$0xff] %v16436_v10 }
 0x71e   : > { %v16441_v0 = vpop.f32.mrf.mxu0 }
 0x71f   : > { %18892 = vst [vmem:[#allocation176_spill] sm:$0xff] %v16441_v0  ;;  %9027 = vmatpush2.bf16.msra.mxu0 %v11455_v60  ;;  %v11466_v60 = vld [vmem:[%s18110_s11 + $0x34c] ss:$16 sps:$4 sm:$0xff]  }
 0x720   : > { %v16446_v9 = vpop.f32.mrf.mxu0  ;;  %9028 = vmatprep.subr.bf16.mxu0 %v11460_v23  ;;  %v11464_v23 = vld [vmem:[%s18110_s11 + $0x348] ss:$16 sps:$4 sm:$0xff]  }
 0x721   : > { %18893 = vst [vmem:[#allocation177_spill] sm:$0xff] %v16446_v9 }
 0x722   : > { %v16451_v10 = vpop.f32.mrf.mxu0 }
 0x723   : > { %18894 = vst [vmem:[#allocation178_spill] sm:$0xff] %v16451_v10  ;;  %9029 = vmatpush2.bf16.msra.mxu0 %v11458_v18  ;;  %v11469_v18 = vld [vmem:[%s18110_s11 + $0x32c] ss:$16 sps:$4 sm:$0xff]  }
 0x724   : > { %v16456_v0 = vpop.f32.mrf.mxu0  ;;  %9030 = vmatprep.subr.bf16.mxu0 %v11463_v11  ;;  %v11467_v11 = vld [vmem:[%s18110_s11 + $0x328] ss:$16 sps:$4 sm:$0xff]  }
 0x725   : > { %18895 = vst [vmem:[#allocation179_spill] sm:$0xff] %v16456_v0 }
 0x726   : > { %v16461_v9 = vpop.f32.mrf.mxu0 }
 0x727   : > { %18896 = vst [vmem:[#allocation180_spill] sm:$0xff] %v16461_v9  ;;  %9031 = vmatpush2.bf16.msra.mxu0 %v11461_v8  ;;  %v11472_v8 = vld [vmem:[%s18110_s11 + $0x30c] ss:$16 sps:$4 sm:$0xff]  }
 0x728   : > { %v16466_v10 = vpop.f32.mrf.mxu0  ;;  %9032 = vmatprep.subr.bf16.mxu0 %v11466_v60  ;;  %v11470_v60 = vld [vmem:[%s18110_s11 + $0x308] ss:$16 sps:$4 sm:$0xff]  }
 0x729   : > { %18897 = vst [vmem:[#allocation181_spill] sm:$0xff] %v16466_v10 }
 0x72a   : > { %v16471_v0 = vpop.f32.mrf.mxu0 }
 0x72b   : > { %18898 = vst [vmem:[#allocation182_spill] sm:$0xff] %v16471_v0  ;;  %9033 = vmatpush2.bf16.msra.mxu0 %v11464_v23  ;;  %v11475_v23 = vld [vmem:[%s18110_s11 + $0x6ec] ss:$16 sps:$4 sm:$0xff]  }
 0x72c   : > { %v16476_v9 = vpop.f32.mrf.mxu0  ;;  %9034 = vmatprep.subr.bf16.mxu0 %v11469_v18  ;;  %v11473_v18 = vld [vmem:[%s18110_s11 + $0x6e8] ss:$16 sps:$4 sm:$0xff]  }
 0x72d   : > { %18899 = vst [vmem:[#allocation183_spill] sm:$0xff] %v16476_v9 }
 0x72e   : > { %v16481_v10 = vpop.f32.mrf.mxu0 }
 0x72f   : > { %18900 = vst [vmem:[#allocation184_spill] sm:$0xff] %v16481_v10  ;;  %9035 = vmatpush2.bf16.msra.mxu0 %v11467_v11  ;;  %v11478_v11 = vld [vmem:[%s18110_s11 + $0x6cc] ss:$16 sps:$4 sm:$0xff]  }
 0x730   : > { %v16486_v0 = vpop.f32.mrf.mxu0  ;;  %9036 = vmatprep.subr.bf16.mxu0 %v11472_v8 }
 0x731   : > { %18901 = vst [vmem:[#allocation185_spill] sm:$0xff] %v16486_v0 }
 0x732   : > { %v16491_v9 = vpop.f32.mrf.mxu0 }
 0x733   : > { %18902 = vst [vmem:[#allocation186_spill] sm:$0xff] %v16491_v9  ;;  %9037 = vmatpush2.bf16.msra.mxu0 %v11470_v60  ;;  %v11476_v60 = vld [vmem:[%s18110_s11 + $0x6c8] ss:$16 sps:$4 sm:$0xff]  }
 0x734   : > { %v16496_v10 = vpop.f32.mrf.mxu0  ;;  %9088 = vmatprep.subr.bf16.mxu0 %v11475_v23 }
 0x735   : > { %18903 = vst [vmem:[#allocation187_spill] sm:$0xff] %v16496_v10  ;;  %v11481_v10 = vld [vmem:[%s18110_s11 + $0x6ac] ss:$16 sps:$4 sm:$0xff]  }
 0x736   : > { %v16501_v0 = vpop.f32.mrf.mxu1  ;;  %9039 = vmatmul.mubr.bf16.vlgmr.msra.gmra.mxu0 %v16002_v47  ;;  %v16504_v8 = vpop.f32.mrf.mxu0 }
 0x737   : > { %18904 = vst [vmem:[#allocation188_spill] sm:$0xff] %v16501_v0  ;;  %18905 = vst [vmem:[#allocation189_spill] sm:$0xff] %v16504_v8  ;;  %9089 = vmatpush1.bf16.msra.mxu0 %v11473_v18  ;;  %9120 = vmatprep.mubr.bf16.mxu0 %v16014_v61  ;;  %v11479_v61 = vld [vmem:[%s18110_s11 + $0x6a8] ss:$16 sps:$4 sm:$0xff]  }
 0x738   : > { %v16510_v9 = vpop.f32.mrf.mxu1  ;;  %v16512_v23 = vpop.f32.mrf.mxu0  ;;  %9090 = vmatprep.subr.bf16.mxu0 %v11478_v11  ;;  %v11484_v11 = vld [vmem:[%s18110_s11 + $0x68c] ss:$16 sps:$4 sm:$0xff]  }
 0x739   : > { %18906 = vst [vmem:[#allocation190_spill] sm:$0xff] %v16510_v9  ;;  %18907 = vst [vmem:[#allocation191_spill] sm:$0xff] %v16512_v23 }
 0x73a   : > { %v8921_v49 = vpop.f32.mrf.mxu1  ;;  %v16517_v47 = vpop.f32.mrf.mxu0 }
 0x73b   : > { %18908 = vst [vmem:[#allocation192_spill] sm:$0xff] %v16517_v47  ;;  %9091 = vmatpush1.bf16.msra.mxu0 %v11476_v60  ;;  %v11482_v49 = vld [vmem:[%s18110_s11 + $0x688] ss:$16 sps:$4 sm:$0xff]  }
 0x73c   : > { %v8922_v18 = vpop.f32.mrf.mxu1  ;;  %v16522_v8 = vpop.f32.mrf.mxu0  ;;  %9092 = vmatprep.subr.bf16.mxu0 %v11481_v10  ;;  %v11485_v10 = vld [vmem:[%s18110_s11 + $0x668] ss:$16 sps:$4 sm:$0xff]  }
 0x73d   : > { %18909 = vst [vmem:[#allocation193_spill] sm:$0xff] %v16522_v8  ;;  %v11487_v18 = vld [vmem:[%s18110_s11 + $0x66c] ss:$16 sps:$4 sm:$0xff]  }
 0x73e   : > { %v16527_v23 = vpop.f32.mrf.mxu0 }
 0x73f   : > { %18910 = vst [vmem:[#allocation194_spill] sm:$0xff] %v16527_v23  ;;  %9093 = vmatpush1.bf16.msra.mxu0 %v11479_v61  ;;  %v11490_v61 = vld [vmem:[%s18110_s11 + $0x64c] ss:$16 sps:$4 sm:$0xff]  }
 0x740   : > { %v16532_v60 = vpop.f32.mrf.mxu0  ;;  %9094 = vmatprep.subr.bf16.mxu0 %v11484_v11  ;;  %v11488_v11 = vld [vmem:[%s18110_s11 + $0x648] ss:$16 sps:$4 sm:$0xff]  }
 0x741   : > { %18911 = vst [vmem:[#allocation195_spill] sm:$0xff] %v16532_v60 }
 0x742   : > { %v16537_v8 = vpop.f32.mrf.mxu0 }
 0x743   : > { %18912 = vst [vmem:[#allocation196_spill] sm:$0xff] %v16537_v8  ;;  %9095 = vmatpush1.bf16.msra.mxu0 %v11482_v49  ;;  %v11493_v49 = vld [vmem:[%s18110_s11 + $0x62c] ss:$16 sps:$4 sm:$0xff]  }
 0x744   : > { %v16542_v23 = vpop.f32.mrf.mxu0  ;;  %9096 = vmatprep.subr.bf16.mxu0 %v11487_v18  ;;  %v11491_v18 = vld [vmem:[%s18110_s11 + $0x628] ss:$16 sps:$4 sm:$0xff]  }
 0x745   : > { %18913 = vst [vmem:[#allocation197_spill] sm:$0xff] %v16542_v23 }
 0x746   : > { %v16547_v60 = vpop.f32.mrf.mxu0 }
 0x747   : > { %18914 = vst [vmem:[#allocation198_spill] sm:$0xff] %v16547_v60  ;;  %9097 = vmatpush1.bf16.msra.mxu0 %v11485_v10  ;;  %v11496_v10 = vld [vmem:[%s18110_s11 + $0x60c] ss:$16 sps:$4 sm:$0xff]  }
 0x748   : > { %v16552_v8 = vpop.f32.mrf.mxu0  ;;  %9098 = vmatprep.subr.bf16.mxu0 %v11490_v61  ;;  %v11494_v61 = vld [vmem:[%s18110_s11 + $0x608] ss:$16 sps:$4 sm:$0xff]  }
 0x749   : > { %18915 = vst [vmem:[#allocation199_spill] sm:$0xff] %v16552_v8 }
 0x74a   : > { %v16557_v23 = vpop.f32.mrf.mxu0 }
 0x74b   : > { %18916 = vst [vmem:[#allocation200_spill] sm:$0xff] %v16557_v23  ;;  %9099 = vmatpush1.bf16.msra.mxu0 %v11488_v11  ;;  %v11499_v11 = vld [vmem:[%s18110_s11 + $0x7ec] ss:$16 sps:$4 sm:$0xff]  }
 0x74c   : > { %v16562_v60 = vpop.f32.mrf.mxu0  ;;  %9100 = vmatprep.subr.bf16.mxu0 %v11493_v49  ;;  %v11497_v49 = vld [vmem:[%s18110_s11 + $0x7e8] ss:$16 sps:$4 sm:$0xff]  }
 0x74d   : > { %18917 = vst [vmem:[#allocation201_spill] sm:$0xff] %v16562_v60 }
 0x74e   : > { %v16567_v8 = vpop.f32.mrf.mxu0 }
 0x74f   : > { %18918 = vst [vmem:[#allocation202_spill] sm:$0xff] %v16567_v8  ;;  %9101 = vmatpush1.bf16.msra.mxu0 %v11491_v18  ;;  %v11502_v18 = vld [vmem:[%s18110_s11 + $0x7cc] ss:$16 sps:$4 sm:$0xff]  }
 0x750   : > { %v16572_v23 = vpop.f32.mrf.mxu0  ;;  %9102 = vmatprep.subr.bf16.mxu0 %v11496_v10  ;;  %v11500_v10 = vld [vmem:[%s18110_s11 + $0x7c8] ss:$16 sps:$4 sm:$0xff]  }
 0x751   : > { %18919 = vst [vmem:[#allocation203_spill] sm:$0xff] %v16572_v23 }
 0x752   : > { %v16577_v60 = vpop.f32.mrf.mxu0 }
 0x753   : > { %18920 = vst [vmem:[#allocation204_spill] sm:$0xff] %v16577_v60  ;;  %9103 = vmatpush1.bf16.msra.mxu0 %v11494_v61  ;;  %v11505_v61 = vld [vmem:[%s18110_s11 + $0x7ac] ss:$16 sps:$4 sm:$0xff]  }
 0x754   : > { %v16582_v8 = vpop.f32.mrf.mxu0  ;;  %9104 = vmatprep.subr.bf16.mxu0 %v11499_v11  ;;  %v11503_v11 = vld [vmem:[%s18110_s11 + $0x7a8] ss:$16 sps:$4 sm:$0xff]  }
 0x755   : > { %18921 = vst [vmem:[#allocation205_spill] sm:$0xff] %v16582_v8 }
 0x756   : > { %v16587_v23 = vpop.f32.mrf.mxu0 }
 0x757   : > { %18922 = vst [vmem:[#allocation206_spill] sm:$0xff] %v16587_v23  ;;  %9105 = vmatpush2.bf16.msra.mxu0 %v11497_v49  ;;  %v11508_v49 = vld [vmem:[%s18110_s11 + $0x78c] ss:$16 sps:$4 sm:$0xff]  }
 0x758   : > { %v16592_v60 = vpop.f32.mrf.mxu0  ;;  %9106 = vmatprep.subr.bf16.mxu0 %v11502_v18  ;;  %v11506_v18 = vld [vmem:[%s18110_s11 + $0x788] ss:$16 sps:$4 sm:$0xff]  }
 0x759   : > { %18923 = vst [vmem:[#allocation207_spill] sm:$0xff] %v16592_v60 }
 0x75a   : > { %v16597_v8 = vpop.f32.mrf.mxu0 }
 0x75b   : > { %18924 = vst [vmem:[#allocation208_spill] sm:$0xff] %v16597_v8  ;;  %9107 = vmatpush2.bf16.msra.mxu0 %v11500_v10  ;;  %v11511_v10 = vld [vmem:[%s18110_s11 + $0x76c] ss:$16 sps:$4 sm:$0xff]  }
 0x75c   : > { %v16602_v23 = vpop.f32.mrf.mxu0  ;;  %9108 = vmatprep.subr.bf16.mxu0 %v11505_v61  ;;  %v11509_v61 = vld [vmem:[%s18110_s11 + $0x768] ss:$16 sps:$4 sm:$0xff]  }
 0x75d   : > { %18925 = vst [vmem:[#allocation209_spill] sm:$0xff] %v16602_v23 }
 0x75e   : > { %v16607_v60 = vpop.f32.mrf.mxu0 }
 0x75f   : > { %18926 = vst [vmem:[#allocation210_spill] sm:$0xff] %v16607_v60  ;;  %9109 = vmatpush2.bf16.msra.mxu0 %v11503_v11  ;;  %v11514_v11 = vld [vmem:[%s18110_s11 + $0x74c] ss:$16 sps:$4 sm:$0xff]  }
 0x760   : > { %v16612_v8 = vpop.f32.mrf.mxu0  ;;  %9110 = vmatprep.subr.bf16.mxu0 %v11508_v49  ;;  %v11512_v49 = vld [vmem:[%s18110_s11 + $0x748] ss:$16 sps:$4 sm:$0xff]  }
 0x761   : > { %18927 = vst [vmem:[#allocation211_spill] sm:$0xff] %v16612_v8 }
 0x762   : > { %v16617_v23 = vpop.f32.mrf.mxu0 }
 0x763   : > { %18928 = vst [vmem:[#allocation212_spill] sm:$0xff] %v16617_v23  ;;  %9111 = vmatpush2.bf16.msra.mxu0 %v11506_v18  ;;  %v11517_v18 = vld [vmem:[%s18110_s11 + $0x72c] ss:$16 sps:$4 sm:$0xff]  }
 0x764   : > { %v16622_v60 = vpop.f32.mrf.mxu0  ;;  %9112 = vmatprep.subr.bf16.mxu0 %v11511_v10  ;;  %v11515_v10 = vld [vmem:[%s18110_s11 + $0x728] ss:$16 sps:$4 sm:$0xff]  }
 0x765   : > { %18929 = vst [vmem:[#allocation213_spill] sm:$0xff] %v16622_v60 }
 0x766   : > { %v16627_v8 = vpop.f32.mrf.mxu0 }
 0x767   : > { %18930 = vst [vmem:[#allocation214_spill] sm:$0xff] %v16627_v8  ;;  %9113 = vmatpush2.bf16.msra.mxu0 %v11509_v61  ;;  %v11520_v61 = vld [vmem:[%s18110_s11 + $0x70c] ss:$16 sps:$4 sm:$0xff]  }
 0x768   : > { %v16632_v23 = vpop.f32.mrf.mxu0  ;;  %9114 = vmatprep.subr.bf16.mxu0 %v11514_v11  ;;  %v11518_v11 = vld [vmem:[%s18110_s11 + $0x708] ss:$16 sps:$4 sm:$0xff]  }
 0x769   : > { %18931 = vst [vmem:[#allocation215_spill] sm:$0xff] %v16632_v23 }
 0x76a   : > { %v16637_v60 = vpop.f32.mrf.mxu0 }
 0x76b   : > { %18932 = vst [vmem:[#allocation216_spill] sm:$0xff] %v16637_v60  ;;  %9115 = vmatpush2.bf16.msra.mxu0 %v11512_v49 }
 0x76c   : > { %v16642_v8 = vpop.f32.mrf.mxu0  ;;  %9116 = vmatprep.subr.bf16.mxu0 %v11517_v18 }
 0x76d   : > { %18933 = vst [vmem:[#allocation217_spill] sm:$0xff] %v16642_v8 }
 0x76e   : > { %v16647_v23 = vpop.f32.mrf.mxu0 }
 0x76f   : > { %18934 = vst [vmem:[#allocation218_spill] sm:$0xff] %v16647_v23  ;;  %9117 = vmatpush2.bf16.msra.mxu0 %v11515_v10 }
 0x770   : > { %v16652_v60 = vpop.f32.mrf.mxu0  ;;  %9118 = vmatprep.subr.bf16.mxu0 %v11520_v61  ;;  %v16665_v61 = vadd.f32 %v15762_v20, %v15367_v4  ;;  %v16685_v4 = vadd.f32 %v15802_v43, %v15385_v57  ;;  %v16705_v57 = vadd.f32 %v15839_v32, %v15399_v2  ;;  %v16725_v2 = vadd.f32 %v15876_v19, %v15413_v33  ;;  %v18944_v19 = vld [vmem:[#allocation36_spill] sm:$0xff]  ;;  %v18956_v20 = vld [vmem:[#allocation95_spill] sm:$0xff] }
 0x771   : > { %18935 = vst [vmem:[#allocation219_spill] sm:$0xff] %v16652_v60  ;;  %v16745_v33 = vadd.f32 %v15913_v16, %v15427_v22  ;;  %v18947_v16 = vld [vmem:[#allocation91_spill] sm:$0xff]  ;;  %v18949_v32 = vld [vmem:[#allocation40_spill] sm:$0xff] }
 0x772   : > { %v16654_v49 = vpop.f32.mrf.mxu0  ;;  %v18958_v43 = vld [vmem:[#allocation96_spill] sm:$0xff] }
 0x773   : > { %18936 = vst [vmem:[#allocation220_spill] sm:$0xff] %v16654_v49  ;;  %9119 = vmatpush2.bf16.msra.mxu0 %v11518_v11  ;;  %v16669_v11 = vadd.f32 %v15771_v31, %v15373_v27  ;;  %v16689_v27 = vadd.f32 %v15809_v25, %v15387_v13  ;;  %v16709_v13 = vadd.f32 %v15846_v26, %v15401_v42  ;;  %v18948_v26 = vld [vmem:[#allocation92_spill] sm:$0xff]  ;;  %v18953_v25 = vld [vmem:[#allocation94_spill] sm:$0xff]  ;;  %v18954_v31 = vld [vmem:[#allocation117_spill] sm:$0xff] }
 0x774   : > { %v16656_v47 = vpop.f32.mrf.mxu0  ;;  %v16729_v42 = vadd.f32 %v15883_v17, %v15415_v51  ;;  %v16749_v51 = vadd.f32 %v15922_v15, %v15433_v30  ;;  %v18941_v17 = vld [vmem:[#allocation85_spill] sm:$0xff]  ;;  %v16769_v30 = vadd.f32 %v15960_v36, %v18947_v16  ;;  %v18970_v16 = vld [vmem:[#allocation103_spill] sm:$0xff]  ;;  %v18993_v49 = vld [vmem:[#allocation12_spill] sm:$0xff] }
 0x775   : > { %18937 = vst [vmem:[#allocation221_spill] sm:$0xff] %v16656_v47  ;;  %18940 = vst [vmem:[#allocation224_spill] sm:$0xff] %v16669_v11  ;;  %v16673_v47 = vadd.f32 %v15779_v58, %v15375_v59  ;;  %v16693_v59 = vadd.f32 %v15816_v29, %v15389_v1  ;;  %v16713_v1 = vadd.f32 %v15853_v14, %v15403_v39  ;;  %v18946_v14 = vld [vmem:[#allocation38_spill] sm:$0xff]  ;;  %v18952_v29 = vld [vmem:[#allocation41_spill] sm:$0xff] }
 0x776   : > { %v16658_v18 = vpop.f32.mrf.mxu1  ;;  %9121 = vmatmul.mubr.bf16.vlgmr.msra.gmra.mxu0 %v16325_v56  ;;  %v8876_v8 = vpop.f32.mrf.mxu0  ;;  %v16677_v56 = vadd.f32 %v15786_v34, %v15377_v21  ;;  %v16697_v21 = vadd.f32 %v15823_v37, %v15391_v46  ;;  %v16717_v46 = vadd.f32 %v15862_v12, %v15409_v40  ;;  %v16733_v39 = vadd.f32 %v15892_v5, %v15421_v44  ;;  %v18951_v37 = vld [vmem:[#allocation93_spill] sm:$0xff]  ;;  %v18957_v34 = vld [vmem:[#allocation83_spill] sm:$0xff] }
 0x777   : > { %18938 = vst [vmem:[#allocation222_spill] sm:$0xff] %v16658_v18  ;;  %v16737_v40 = vadd.f32 %v15899_v50, %v15423_v62  ;;  %v16753_v44 = vadd.f32 %v15929_v54, %v18941_v17  ;;  %v18943_v50 = vld [vmem:[#allocation87_spill] sm:$0xff]  ;;  %v16773_v54 = vadd.f32 %v18949_v32, %v18948_v26  ;;  %v6980_v58 = vadd.f32 %v18957_v34, %v18956_v20  ;;  %v18961_v5 = vld [vmem:[#allocation97_spill] sm:$0xff] }
 0x778   : > { %v16661_v3 = vpop.f32.mrf.mxu1  ;;  %v8878_v10 = vpop.f32.mrf.mxu0  ;;  %v18962_v15 = vld [vmem:[#allocation45_spill] sm:$0xff]  ;;  %v18971_v26 = vld [vmem:[#allocation51_spill] sm:$0xff] }
 0x779   : > { %18939 = vst [vmem:[#allocation223_spill] sm:$0xff] %v16661_v3  ;;  %18950 = vst [vmem:[#allocation85_spill] sm:$0xff] %v16773_v54  ;;  %v6986_v36 = vadd.f32 %v18962_v15, %v18961_v5  ;;  %v6996_v32 = vadd.f32 %v18971_v26, %v18970_v16  ;;  %v18977_v20 = vld [vmem:[#allocation61_spill] sm:$0xff]  ;;  %v18982_v15 = vld [vmem:[#allocation128_spill] sm:$0xff] }
 0x77a   : > { %v9003_v23 = vpop.f32.mrf.mxu1  ;;  %v8880_v6 = vpop.f32.mrf.mxu0  ;;  %v18978_v34 = vld [vmem:[#allocation57_spill] sm:$0xff]  ;;  %v18987_v16 = vld [vmem:[#allocation126_spill] sm:$0xff]  ;;  %v18988_v26 = vld [vmem:[#allocation32_spill] sm:$0xff] }
 0x77b   : > { %v16681_v6 = vadd.f32 %v15793_v52, %v15379_v55  ;;  %v16701_v55 = vadd.f32 %v15832_v63, %v15397_v7  ;;  %v16721_v7 = vadd.f32 %v15869_v35, %v15411_v24  ;;  %v16741_v24 = vadd.f32 %v15906_v41, %v15425_v53  ;;  %v18942_v35 = vld [vmem:[#allocation86_spill] sm:$0xff]  ;;  %v18945_v41 = vld [vmem:[#allocation88_spill] sm:$0xff]  ;;  %v18959_v63 = vld [vmem:[#allocation71_spill] sm:$0xff] }
 0x77c   : > { %v9004_v9 = vpop.f32.mrf.mxu1  ;;  %v8881_v0 = vpop.f32.mrf.mxu0  ;;  %v16757_v62 = vadd.f32 %v15936_v45, %v18942_v35  ;;  %v16761_v53 = vadd.f32 %v18944_v19, %v18943_v50  ;;  %v16765_v22 = vadd.f32 %v18946_v14, %v18945_v41  ;;  %v16777_v45 = vadd.f32 %v18952_v29, %v18951_v37  ;;  %v18964_v23 = vld [vmem:[#allocation46_spill] sm:$0xff]  ;;  %v18966_v35 = vld [vmem:[#allocation99_spill] sm:$0xff]  ;;  %v18967_v19 = vld [vmem:[#allocation100_spill] sm:$0xff] }
 0x77d   : > { %v16781_v52 = vadd.f32 %v18954_v31, %v18953_v25  ;;  %v16787_v12 = vadd.f32 %v18959_v63, %v18958_v43  ;;  %v8877_v0 = vadd.f32 %v8876_v8, %v16338_v38  ;;  %v18963_v9 = vld [vmem:[#allocation98_spill] sm:$0xff]  ;;  %v6990_v50 = vadd.f32 %v16042_v48, %v18966_v35  ;;  %v18968_v41 = vld [vmem:[#allocation49_spill] sm:$0xff]  ;;  %v18972_v37 = vld [vmem:[#allocation104_spill] sm:$0xff] }
 0x77e   : > { %v16794_v17 = vadd.f32 %v18964_v23, %v18963_v9  ;;  %v16800_v14 = vadd.f32 %v18968_v41, %v18967_v19  ;;  %v18973_v29 = vld [vmem:[#allocation53_spill] sm:$0xff]  ;;  %v18975_v31 = vld [vmem:[#allocation130_spill] sm:$0xff]  ;;  %v18976_v38 = vld [vmem:[#allocation55_spill] sm:$0xff]  ;;  %v16812_v43 = vadd.f32 %v18978_v34, %v18977_v20 }
 0x77f   : > { %18955 = vst [vmem:[#allocation86_spill] sm:$0xff] %v16781_v52  ;;  %18960 = vst [vmem:[#allocation87_spill] sm:$0xff] %v16787_v12  ;;  %v16806_v25 = vadd.f32 %v18973_v29, %v18972_v37  ;;  %v7000_v8 = vadd.f32 %v18976_v38, %v18975_v31  ;;  %v18980_v63 = vld [vmem:[#allocation129_spill] sm:$0xff]  ;;  %v18981_v48 = vld [vmem:[#allocation28_spill] sm:$0xff]  ;;  %v16824_v37 = vadd.f32 %v18988_v26, %v18987_v16 }
 0x780   : > { %18965 = vst [vmem:[#allocation36_spill] sm:$0xff] %v16794_v17  ;;  %18969 = vst [vmem:[#allocation88_spill] sm:$0xff] %v16800_v14  ;;  %v7006_v5 = vadd.f32 %v18981_v48, %v18980_v63  ;;  %v18983_v9 = vld [vmem:[#allocation29_spill] sm:$0xff]  ;;  %v18985_v35 = vld [vmem:[#allocation127_spill] sm:$0xff]  ;;  %v8879_v29 = vadd.f32 %v8878_v10, %v16346_v28 }
 0x781   : > { %18974 = vst [vmem:[#allocation38_spill] sm:$0xff] %v16806_v25  ;;  %18979 = vst [vmem:[#allocation91_spill] sm:$0xff] %v16812_v43  ;;  %v16818_v23 = vadd.f32 %v18983_v9, %v18982_v15  ;;  %v18986_v19 = vld [vmem:[#allocation9_spill] sm:$0xff]  ;;  %v18992_v34 = vld [vmem:[#allocation124_spill] sm:$0xff] }
 0x782   : > { %v7010_v41 = vadd.f32 %v18986_v19, %v18985_v35  ;;  %18989 = vst [vmem:[#allocation40_spill] sm:$0xff] %v16824_v37  ;;  %v18990_v31 = vld [vmem:[#allocation125_spill] sm:$0xff]  ;;  %v16831_v60 = vadd.f32 %v18993_v49, %v18992_v34  ;;  %v18995_v63 = vld [vmem:[#allocation90_spill] sm:$0xff]  ;;  %v18997_v9 = vld [vmem:[#allocation188_spill] sm:$0xff] }
 0x783   : > { %18984 = vst [vmem:[#allocation92_spill] sm:$0xff] %v16818_v23  ;;  %v18991_v38 = vld [vmem:[#allocation33_spill] sm:$0xff]  ;;  %v18996_v48 = vld [vmem:[#allocation14_spill] sm:$0xff]  ;;  %v8918_v3 = vadd.f32 %v18997_v9, %v8877_v0  ;;  %v18999_v35 = vld [vmem:[#allocation16_spill] sm:$0xff] }
 0x784   : > { %v7016_v20 = vadd.f32 %v18991_v38, %v18990_v31  ;;  %18994 = vst [vmem:[#allocation93_spill] sm:$0xff] %v16831_v60  ;;  %v7020_v15 = vadd.f32 %v18996_v48, %v18995_v63  ;;  %v18998_v18 = vld [vmem:[#allocation89_spill] sm:$0xff]  ;;  %v19001_v16 = vld [vmem:[#allocation82_spill] sm:$0xff]  ;;  %v19003_v28 = vld [vmem:[#allocation79_spill] sm:$0xff] }
 0x785   : > { %v16838_v19 = vadd.f32 %v18999_v35, %v18998_v18  ;;  %v19002_v26 = vld [vmem:[#allocation18_spill] sm:$0xff]  ;;  %v19004_v10 = vld [vmem:[#allocation20_spill] sm:$0xff]  ;;  %v19010_v48 = vld [vmem:[#allocation131_spill] sm:$0xff] }
 0x786   : > { %v7026_v11 = vadd.f32 %v19002_v26, %v19001_v16  ;;  %v16844_v37 = vadd.f32 %v19004_v10, %v19003_v28  ;;  %v19006_v31 = vld [vmem:[#allocation78_spill] sm:$0xff]  ;;  %v19009_v63 = vld [vmem:[#allocation72_spill] sm:$0xff]  ;;  %v19013_v18 = vld [vmem:[#allocation133_spill] sm:$0xff] }
 0x787   : > { %19000 = vst [vmem:[#allocation41_spill] sm:$0xff] %v16838_v19  ;;  %v19007_v38 = vld [vmem:[#allocation22_spill] sm:$0xff]  ;;  %v16852_v0 = vadd.f32 %v19010_v48, %v19009_v63  ;;  %v19012_v9 = vld [vmem:[#allocation108_spill] sm:$0xff]  ;;  %v19014_v19 = vld [vmem:[#allocation105_spill] sm:$0xff] }
 0x788   : > { %19005 = vst [vmem:[#allocation94_spill] sm:$0xff] %v16844_v37  ;;  %v7030_v49 = vadd.f32 %v19007_v38, %v19006_v31  ;;  %v7036_v35 = vadd.f32 %v19013_v18, %v19012_v9  ;;  %v19015_v23 = vld [vmem:[#allocation135_spill] sm:$0xff]  ;;  %v19017_v28 = vld [vmem:[#allocation109_spill] sm:$0xff]  ;;  %v19019_v43 = vld [vmem:[#allocation106_spill] sm:$0xff] }
 0x789   : > { %19011 = vst [vmem:[#allocation95_spill] sm:$0xff] %v16852_v0  ;;  %v16858_v16 = vadd.f32 %v19015_v23, %v19014_v19  ;;  %v19018_v10 = vld [vmem:[#allocation137_spill] sm:$0xff]  ;;  %v19020_v31 = vld [vmem:[#allocation139_spill] sm:$0xff]  ;;  %v19024_v63 = vld [vmem:[#allocation190_spill] sm:$0xff] }
 0x78a   : > { %v7040_v37 = vadd.f32 %v19018_v10, %v19017_v28  ;;  %v16864_v38 = vadd.f32 %v19020_v31, %v19019_v43  ;;  %v19023_v25 = vld [vmem:[#allocation141_spill] sm:$0xff]  ;;  %v8920_v48 = vadd.f32 %v19024_v63, %v8879_v29  ;;  %v19026_v9 = vld [vmem:[#allocation107_spill] sm:$0xff]  ;;  %v19033_v43 = vld [vmem:[#allocation26_spill] sm:$0xff] }
 0x78b   : > { %19016 = vst [vmem:[#allocation83_spill] sm:$0xff] %v16858_v16  ;;  %v19027_v18 = vld [vmem:[#allocation143_spill] sm:$0xff]  ;;  %v19030_v19 = vld [vmem:[#allocation145_spill] sm:$0xff]  ;;  %v19036_v29 = vld [vmem:[#allocation112_spill] sm:$0xff] }
 0x78c   : > { %19021 = vst [vmem:[#allocation96_spill] sm:$0xff] %v16864_v38  ;;  %v16873_v23 = vadd.f32 %v19027_v18, %v19026_v9  ;;  %v19031_v28 = vld [vmem:[#allocation101_spill] sm:$0xff]  ;;  %v19032_v10 = vld [vmem:[#allocation147_spill] sm:$0xff]  ;;  %v19034_v38 = vld [vmem:[#allocation102_spill] sm:$0xff] }
 0x78d   : > { %v16879_v16 = vadd.f32 %v19032_v10, %v19031_v28  ;;  %v19037_v63 = vld [vmem:[#allocation151_spill] sm:$0xff]  ;;  %v19039_v52 = vld [vmem:[#allocation153_spill] sm:$0xff] }
 0x78e   : > { %19028 = vst [vmem:[#allocation97_spill] sm:$0xff] %v16873_v23  ;;  %v16886_v12 = vadd.f32 %v19037_v63, %v19036_v29 }
 0x7b6   : > { %v8958_v34 = vpop.f32.mrf.mxu0  ;;  %v16848_v60 = vpop.f32.mrf.mxu1 }
 0x7b7   : > { %19008 = vst [vmem:[#allocation117_spill] sm:$0xff] %v16848_v60  ;;  %v8959_v26 = vadd.f32 %v8958_v34, %v8918_v3  ;;  %v19022_v60 = vld [vmem:[#allocation110_spill] sm:$0xff]  ;;  %v19029_v3 = vld [vmem:[#allocation111_spill] sm:$0xff] }
 0x7b8   : > { %v7046_v14 = vadd.f32 %v19023_v25, %v19022_v60  ;;  %v8960_v0 = vpop.f32.mrf.mxu0  ;;  %v16869_v17 = vpop.f32.mrf.mxu1  ;;  %v7050_v34 = vadd.f32 %v19030_v19, %v19029_v3  ;;  %v19035_v60 = vld [vmem:[#allocation149_spill] sm:$0xff] }
 0x7b9   : > { %19025 = vst [vmem:[#allocation71_spill] sm:$0xff] %v16869_v17  ;;  %v9132_v31 = vrot.slane %v8959_v26, %v19033_v43  ;;  %v7056_v25 = vadd.f32 %v19035_v60, %v19034_v38  ;;  %v19038_v17 = vld [vmem:[#allocation67_spill] sm:$0xff]  ;;  %v8961_v18 = vadd.f32 %v8960_v0, %v8920_v48 }
 0x7ba   : > { %v7060_v9 = vadd.f32 %v19039_v52, %v19038_v17  ;;  %v8962_v23 = vpop.f32.mrf.mxu0  ;;  %v9085_v54 = vpop.f32.mrf.mxu1  ;;  %v19048_v60 = vld [vmem:[#allocation155_spill] sm:$0xff] }
 0x7bb   : > { %v16891_v3 = vadd.f32 %v9132_v31, %v16673_v47  ;;  %v16894_v19 = vadd.f32 %v9132_v31, %v16681_v6  ;;  %v16897_v26 = vadd.f32 %v9132_v31, %v16689_v27  ;;  %v16900_v38 = vadd.f32 %v9132_v31, %v16697_v21 }
 0x7bc   : > { %v16903_v28 = vadd.f32 %v9132_v31, %v16705_v57  ;;  %v16906_v52 = vadd.f32 %v9132_v31, %v16713_v1  ;;  %v16909_v54 = vadd.f32 %v9132_v31, %v16721_v7  ;;  %v16912_v47 = vadd.f32 %v9132_v31, %v16729_v42  ;;  %v8963_v6 = vpop.f32.mrf.mxu0  ;;  %v9086_v17 = vpop.f32.mrf.mxu1 }
 0x7bd   : > { %v16915_v27 = vadd.f32 %v9132_v31, %v16737_v40  ;;  %v16918_v21 = vadd.f32 %v9132_v31, %v16745_v33  ;;  %v16921_v57 = vadd.f32 %v9132_v31, %v16753_v44  ;;  %v16924_v1 = vadd.f32 %v9132_v31, %v16761_v53 }
 0x7be   : > { %v16927_v7 = vadd.f32 %v9132_v31, %v16769_v30  ;;  %v16930_v42 = vadd.f32 %v9132_v31, %v16777_v45  ;;  %v16932_v0 = vadd.f32 %v9132_v31, %v6980_v58  ;;  %v16934_v48 = vadd.f32 %v9132_v31, %v6986_v36  ;;  %v16955_v58 = vld [vmem:[%s18111_s12] sm:$0xf] }
 0x7bf   : > { %19040 = vst [vmem:[#allocation45_spill] sm:$0xff] %v16918_v21  ;;  %19041 = vst [vmem:[#allocation98_spill] sm:$0xff] %v16921_v57  ;;  %v16936_v40 = vadd.f32 %v9132_v31, %v6990_v50  ;;  %v16938_v33 = vadd.f32 %v9132_v31, %v6996_v32  ;;  %v16940_v23 = vadd.f32 %v9132_v31, %v7000_v8  ;;  %v19070_v57 = vld [vmem:[#allocation83_spill] sm:$0xff] }
 0x7c0   : > { %19042 = vst [vmem:[#allocation46_spill] sm:$0xff] %v16924_v1  ;;  %19043 = vst [vmem:[#allocation99_spill] sm:$0xff] %v16927_v7  ;;  %v16942_v44 = vadd.f32 %v9132_v31, %v7006_v5  ;;  %v16944_v53 = vadd.f32 %v9132_v31, %v7010_v41  ;;  %v16946_v10 = vadd.f32 %v9132_v31, %v7016_v20  ;;  %v19065_v7 = vld [vmem:[#allocation40_spill] sm:$0xff]  ;;  %v19067_v1 = vld [vmem:[#allocation41_spill] sm:$0xff] }
 0x7c1   : > { %19044 = vst [vmem:[#allocation100_spill] sm:$0xff] %v16930_v42  ;;  %19045 = vst [vmem:[#allocation49_spill] sm:$0xff] %v16932_v0  ;;  %v16948_v30 = vadd.f32 %v9132_v31, %v7020_v15  ;;  %v16950_v45 = vadd.f32 %v9132_v31, %v7026_v11  ;;  %v16957_v36 = vadd.f32 %v9132_v31, %v7030_v49  ;;  %v19047_v15 = vld [vmem:[#allocation66_spill] sm:$0xff]  ;;  %v19064_v42 = vld [vmem:[#allocation92_spill] sm:$0xff] }
 0x7c2   : > { %19046 = vst [vmem:[#allocation103_spill] sm:$0xff] %v16955_v58  ;;  %v16959_v50 = vadd.f32 %v9132_v31, %v7036_v35  ;;  %v16961_v32 = vadd.f32 %v9132_v31, %v7040_v37  ;;  %v16963_v8 = vadd.f32 %v9132_v31, %v7046_v14  ;;  %v16965_v5 = vadd.f32 %v9132_v31, %v7050_v34  ;;  %v19049_v37 = vld [vmem:[#allocation25_spill] sm:$0xff] }
 0x7c3   : > { %v16967_v41 = vadd.f32 %v9132_v31, %v7056_v25  ;;  %v16969_v20 = vadd.f32 %v9132_v31, %v7060_v9  ;;  %v9136_v11 = vrot.slane %v8961_v18, %v19033_v43  ;;  %v7062_v29 = vadd.f32 %v19048_v60, %v19047_v15 }
 0x7c4   : > { %v9145_v49 = vadd.f32 %v9132_v31, %v16665_v61  ;;  %v16977_v35 = vrot.slane %v16955_v58, %v19033_v43  ;;  %v16981_v14 = vrot.slane %v16955_v58, %v19049_v37  ;;  %v19061_v37 = vld [vmem:[#allocation88_spill] sm:$0xff]  ;;  %v19062_v58 = vld [vmem:[#allocation38_spill] sm:$0xff] }
 0x7c5   : > { %v9150_v34 = vadd.f32 %v9136_v11, %v16677_v56  ;;  %v9154_v25 = vadd.f32 %v9136_v11, %v16685_v4  ;;  %v9158_v63 = vadd.f32 %v9136_v11, %v16693_v59  ;;  %v9162_v9 = vadd.f32 %v9136_v11, %v16701_v55 }
 0x7c6   : > { %v16988_v18 = vadd.f32 %v9136_v11, %v16709_v13  ;;  %v16991_v61 = vadd.f32 %v9136_v11, %v16717_v46  ;;  %v16994_v31 = vadd.f32 %v9136_v11, %v16725_v2  ;;  %v16997_v6 = vadd.f32 %v9136_v11, %v16733_v39  ;;  %v19054_v13 = vld [vmem:[#allocation85_spill] sm:$0xff]  ;;  %v19056_v2 = vld [vmem:[#allocation86_spill] sm:$0xff]  ;;  %v19058_v39 = vld [vmem:[#allocation87_spill] sm:$0xff] }
 0x7c7   : > { %v17000_v56 = vadd.f32 %v9136_v11, %v16741_v24  ;;  %v17003_v4 = vadd.f32 %v9136_v11, %v16749_v51  ;;  %v17006_v59 = vadd.f32 %v9136_v11, %v16757_v62  ;;  %v17009_v55 = vadd.f32 %v9136_v11, %v16765_v22  ;;  %v19060_v24 = vld [vmem:[#allocation36_spill] sm:$0xff]  ;;  %v19063_v62 = vld [vmem:[#allocation91_spill] sm:$0xff] }
 0x7c8   : > { %v17012_v46 = vadd.f32 %v9136_v11, %v19054_v13  ;;  %v17015_v17 = vadd.f32 %v9136_v11, %v19056_v2  ;;  %v17018_v15 = vadd.f32 %v9136_v11, %v19058_v39  ;;  %v9210_v60 = vadd.f32 %v9136_v11, %v19060_v24  ;;  %v19066_v13 = vld [vmem:[#allocation93_spill] sm:$0xff]  ;;  %v19069_v39 = vld [vmem:[#allocation95_spill] sm:$0xff] }
 0x7c9   : > { %19050 = vst [vmem:[#allocation51_spill] sm:$0xff] %v17000_v56  ;;  %19051 = vst [vmem:[#allocation104_spill] sm:$0xff] %v17003_v4  ;;  %v9214_v51 = vadd.f32 %v9136_v11, %v19061_v37  ;;  %v9218_v43 = vadd.f32 %v9136_v11, %v19062_v58  ;;  %v9222_v0 = vadd.f32 %v9136_v11, %v19063_v62  ;;  %v19071_v37 = vld [vmem:[#allocation96_spill] sm:$0xff]  ;;  %v19072_v58 = vld [vmem:[#allocation97_spill] sm:$0xff] }
 0x7ca   : > { %19052 = vst [vmem:[#allocation53_spill] sm:$0xff] %v17006_v59  ;;  %19053 = vst [vmem:[#allocation130_spill] sm:$0xff] %v17009_v55  ;;  %v9226_v22 = vadd.f32 %v9136_v11, %v19064_v42  ;;  %v9230_v55 = vadd.f32 %v9136_v11, %v19065_v7  ;;  %v9238_v2 = vadd.f32 %v9136_v11, %v19067_v1 }
 0x7cb   : > { %19055 = vst [vmem:[#allocation55_spill] sm:$0xff] %v17012_v46  ;;  %19057 = vst [vmem:[#allocation61_spill] sm:$0xff] %v17015_v17  ;;  %v9234_v46 = vadd.f32 %v9136_v11, %v19066_v13  ;;  %v19068_v17 = vld [vmem:[#allocation94_spill] sm:$0xff]  ;;  %v17031_v24 = vadd.f32 %v9136_v11, %v19070_v57  ;;  %v17034_v4 = vadd.f32 %v9136_v11, %v19071_v37  ;;  %v19073_v13 = vld [vmem:[#allocation224_spill] sm:$0xff] }
 0x7cc   : > { %19059 = vst [vmem:[#allocation57_spill] sm:$0xff] %v17018_v15  ;;  %v9242_v59 = vadd.f32 %v9136_v11, %v19068_v17  ;;  %v9246_v15 = vadd.f32 %v9136_v11, %v19069_v39  ;;  %v17037_v62 = vadd.f32 %v9136_v11, %v19072_v58  ;;  %v17040_v42 = vadd.f32 %v9136_v11, %v16879_v16 }
 0x7cd   : > { %v17043_v7 = vadd.f32 %v9136_v11, %v16886_v12  ;;  %v17045_v1 = vadd.f32 %v9136_v11, %v7062_v29  ;;  %v9295_v17 = vadd.f32 %v16977_v35, %v9145_v49  ;;  %v9146_v39 = vadd.f32 %v9136_v11, %v19073_v13 }
 0x7ce   : > { %v9299_v37 = vadd.f32 %v16977_v35, %v16891_v3  ;;  %v9300_v16 = vadd.f32 %v16981_v14, %v9150_v34  ;;  %v9303_v12 = vadd.f32 %v16977_v35, %v16894_v19  ;;  %v9304_v49 = vadd.f32 %v16981_v14, %v9154_v25 }
 0x7cf   : > { %v9423_v57 = vmax.f32 %v9295_v17, 0.0  ;;  %v9296_v21 = vadd.f32 %v16981_v14, %v9146_v39  ;;  %v9307_v17 = vadd.f32 %v16977_v35, %v16897_v26  ;;  %v9311_v34 = vadd.f32 %v16977_v35, %v16900_v38 }
 0x7d0   : > { %v9427_v56 = vmax.f32 %v9299_v37, 0.0  ;;  %v9428_v29 = vmax.f32 %v9300_v16, 0.0  ;;  %v9431_v11 = vmax.f32 %v9303_v12, 0.0  ;;  %v9432_v3 = vmax.f32 %v9304_v49, 0.0 }
 0x7d1   : > { %9551 = vxpose.xlu0.b32.start [1/16] %v9423_v57, 128  ;;  %v9424_v58 = vmax.f32 %v9296_v21, 0.0  ;;  %v9308_v21 = vadd.f32 %v16981_v14, %v9158_v63  ;;  %v9435_v13 = vmax.f32 %v9307_v17, 0.0  ;;  %v17063_v19 = vadd.f32 %v16977_v35, %v16934_v48  ;;  %v19074_v17 = vld [vmem:[#allocation51_spill] sm:$0xff] }
 0x7d2   : > { %v17066_v25 = vadd.f32 %v16981_v14, %v9210_v60  ;;  %v17070_v26 = vadd.f32 %v16977_v35, %v16936_v40  ;;  %v9312_v39 = vadd.f32 %v16981_v14, %v9162_v9  ;;  %v17078_v38 = vadd.f32 %v16977_v35, %v16938_v33 }
 0x7d3   : > { %9583 = vxpose.xlu1.b32.start [1/16] %v9424_v58, 128  ;;  %v9436_v63 = vmax.f32 %v9308_v21, 0.0  ;;  %v9439_v48 = vmax.f32 %v9311_v34, 0.0  ;;  %v9315_v60 = vadd.f32 %v16977_v35, %v16903_v28  ;;  %v17083_v57 = vadd.f32 %v16981_v14, %v9218_v43  ;;  %v19075_v21 = vld [vmem:[#allocation45_spill] sm:$0xff]  ;;  %v19076_v34 = vld [vmem:[#allocation104_spill] sm:$0xff] }
 0x7d4   : > { %v17087_v40 = vadd.f32 %v16977_v35, %v16940_v23  ;;  %v17094_v9 = vadd.f32 %v16977_v35, %v16942_v44  ;;  %v17097_v33 = vadd.f32 %v16981_v14, %v9226_v22  ;;  %v17101_v43 = vadd.f32 %v16977_v35, %v16944_v53 }
 0x7d5   : > { %9552 = vxpose.xlu0.b32.cont [2/16] %v9427_v56, 128  ;;  %v17073_v56 = vadd.f32 %v16981_v14, %v9214_v51  ;;  %v17090_v51 = vadd.f32 %v16981_v14, %v9222_v0  ;;  %v17104_v28 = vadd.f32 %v16981_v14, %v9230_v55  ;;  %v9440_v23 = vmax.f32 %v9312_v39, 0.0  ;;  %v19077_v39 = vld [vmem:[#allocation98_spill] sm:$0xff] }
 0x7d6   : > { %v9316_v0 = vadd.f32 %v16981_v14, %v16988_v18  ;;  %v17110_v37 = vadd.f32 %v16977_v35, %v16946_v10  ;;  %v9443_v44 = vmax.f32 %v9315_v60, 0.0  ;;  %v9319_v22 = vadd.f32 %v16977_v35, %v16906_v52 }
 0x7d7   : > { %9584 = vxpose.xlu1.b32.cont [2/16] %v9428_v29, 128  ;;  %v17115_v58 = vadd.f32 %v16981_v14, %v9234_v46  ;;  %v17119_v53 = vadd.f32 %v16977_v35, %v16948_v30  ;;  %v17122_v55 = vadd.f32 %v16981_v14, %v9238_v2  ;;  %v17126_v18 = vadd.f32 %v16977_v35, %v16950_v45 }
 0x7d8   : > { %v17129_v10 = vadd.f32 %v16981_v14, %v9242_v59  ;;  %v17133_v52 = vadd.f32 %v16977_v35, %v16957_v36  ;;  %v17136_v46 = vadd.f32 %v16981_v14, %v9246_v15  ;;  %v9444_v30 = vmax.f32 %v9316_v0, 0.0 }
 0x7d9   : > { %9553 = vxpose.xlu0.b32.cont [3/16] %v9431_v11, 128  ;;  %v9320_v2 = vadd.f32 %v16981_v14, %v16991_v61  ;;  %v17142_v16 = vadd.f32 %v16977_v35, %v16959_v50  ;;  %v9447_v45 = vmax.f32 %v9319_v22, 0.0  ;;  %v9323_v59 = vadd.f32 %v16977_v35, %v16909_v54 }
 0x7da   : > { %v17148_v12 = vadd.f32 %v16981_v14, %v17031_v24  ;;  %v17152_v36 = vadd.f32 %v16977_v35, %v16961_v32  ;;  %v17156_v61 = vadd.f32 %v16981_v14, %v17034_v4  ;;  %v17160_v50 = vadd.f32 %v16977_v35, %v16963_v8 }
 0x7db   : > { %9585 = vxpose.xlu1.b32.cont [3/16] %v9432_v3, 128  ;;  %v17164_v54 = vadd.f32 %v16981_v14, %v17037_v62  ;;  %v17168_v15 = vadd.f32 %v16977_v35, %v16965_v5  ;;  %v17172_v32 = vadd.f32 %v16981_v14, %v17040_v42  ;;  %v9448_v24 = vmax.f32 %v9320_v2, 0.0 }
 0x7dc   : > { %v9324_v4 = vadd.f32 %v16981_v14, %v16994_v31  ;;  %v17178_v8 = vadd.f32 %v16977_v35, %v16967_v41  ;;  %v9451_v29 = vmax.f32 %v9323_v59, 0.0  ;;  %v9327_v62 = vadd.f32 %v16977_v35, %v16912_v47 }
 0x7dd   : > { %9554 = vxpose.xlu0.b32.cont [4/16] %v9435_v13, 128  ;;  %v17184_v5 = vadd.f32 %v16981_v14, %v17043_v7  ;;  %v17188_v42 = vadd.f32 %v16977_v35, %v16969_v20  ;;  %v17192_v31 = vadd.f32 %v16981_v14, %v17045_v1  ;;  %v9328_v49 = vadd.f32 %v16981_v14, %v16997_v6 }
 0x7de   : > { %v9452_v41 = vmax.f32 %v9324_v4, 0.0  ;;  %v9455_v11 = vmax.f32 %v9327_v62, 0.0  ;;  %v9331_v47 = vadd.f32 %v16977_v35, %v16915_v27  ;;  %v9332_v20 = vadd.f32 %v16981_v14, %v19074_v17 }
 0x7df   : > { %9586 = vxpose.xlu1.b32.cont [4/16] %v9436_v63, 128  ;;  %v9456_v7 = vmax.f32 %v9328_v49, 0.0  ;;  %v9335_v1 = vadd.f32 %v16977_v35, %v19075_v21  ;;  %v9336_v6 = vadd.f32 %v16981_v14, %v19076_v34  ;;  %v9339_v27 = vadd.f32 %v16977_v35, %v19077_v39 }
 0x7e0   : > { %v9459_v3 = vmax.f32 %v9331_v47, 0.0  ;;  %v9460_v13 = vmax.f32 %v9332_v20, 0.0  ;;  %v19082_v47 = vld [vmem:[#allocation55_spill] sm:$0xff]  ;;  %v19083_v20 = vld [vmem:[#allocation100_spill] sm:$0xff] }
 0x7e1   : > { %9555 = vxpose.xlu0.b32.cont [5/16] %v9439_v48, 128  ;;  %v9463_v63 = vmax.f32 %v9335_v1, 0.0  ;;  %v9464_v60 = vmax.f32 %v9336_v6, 0.0  ;;  %v9467_v22 = vmax.f32 %v9339_v27, 0.0  ;;  %v19084_v1 = vld [vmem:[#allocation61_spill] sm:$0xff] }
 0x7e2   : > { %v19085_v6 = vld [vmem:[#allocation49_spill] sm:$0xff] }
 0x7e3   : > { %9587 = vxpose.xlu1.b32.cont [5/16] %v9440_v23, 128  ;;  %v19078_v23 = vld [vmem:[#allocation53_spill] sm:$0xff] }
 0x7e4   : > { %v9340_v0 = vadd.f32 %v16981_v14, %v19078_v23  ;;  %v19086_v27 = vld [vmem:[#allocation57_spill] sm:$0xff] }
 0x7e5   : > { %9556 = vxpose.xlu0.b32.cont [6/16] %v9443_v44, 128 }
 0x7e6   : > { %v9468_v59 = vmax.f32 %v9340_v0, 0.0 }
 0x7e7   : > { %9588 = vxpose.xlu1.b32.cont [6/16] %v9444_v30, 128  ;;  %v19079_v30 = vld [vmem:[#allocation46_spill] sm:$0xff] }
 0x7e8   : > { %v9343_v2 = vadd.f32 %v16977_v35, %v19079_v30  ;;  %v9488_v30 = vmax.f32 %v17066_v25, 0.0  ;;  %v9503_v25 = vmax.f32 %v17094_v9, 0.0  ;;  %v19091_v9 = vld [vmem:[#allocation115_spill] sm:$0xff] }
 0x7e9   : > { %9557 = vxpose.xlu0.b32.cont [7/16] %v9447_v45, 128 }
 0x7ea   : > { %v9471_v62 = vmax.f32 %v9343_v2, 0.0  ;;  %v9491_v2 = vmax.f32 %v17070_v26, 0.0  ;;  %v9504_v26 = vmax.f32 %v17097_v33, 0.0  ;;  %v19093_v33 = vld [vmem:[#allocation65_spill] sm:$0xff] }
 0x7eb   : > { %9589 = vxpose.xlu1.b32.cont [7/16] %v9448_v24, 128  ;;  %v19080_v24 = vld [vmem:[#allocation130_spill] sm:$0xff] }
 0x7ec   : > { %v9344_v4 = vadd.f32 %v16981_v14, %v19080_v24  ;;  %v19087_v24 = vld [vmem:[#allocation113_spill] sm:$0xff] }
 0x7ed   : > { %9558 = vxpose.xlu0.b32.cont [8/16] %v9451_v29, 128 }
 0x7ef   : > { %9590 = vxpose.xlu1.b32.cont [8/16] %v9452_v41, 128  ;;  %v19081_v41 = vld [vmem:[#allocation99_spill] sm:$0xff] }
 0x7f0   : > { %v9347_v49 = vadd.f32 %v16977_v35, %v19081_v41  ;;  %v19092_v41 = vld [vmem:[#allocation158_spill] sm:$0xff] }
 0x7f1   : > { %9559 = vxpose.xlu0.b32.cont [9/16] %v9455_v11, 128  ;;  %v9472_v11 = vmax.f32 %v9344_v4, 0.0 }
 0x7f2   : > { %v9475_v17 = vmax.f32 %v9347_v49, 0.0  ;;  %v17251_v49 = vadd.f32 %v19092_v41, %v19091_v9  ;;  %v19123_v9 = vld [vmem:[#allocation171_spill] sm:$0xff] }
 0x7f3   : > { %9591 = vxpose.xlu1.b32.cont [9/16] %v9456_v7, 128  ;;  %v9348_v7 = vadd.f32 %v16981_v14, %v19082_v47  ;;  %v19095_v47 = vld [vmem:[#allocation24_spill] sm:$0xff] }
 0x7f5   : > { %9560 = vxpose.xlu0.b32.cont [10/16] %v9459_v3, 128  ;;  %v9351_v3 = vadd.f32 %v16977_v35, %v19083_v20  ;;  %v9476_v21 = vmax.f32 %v9348_v7, 0.0  ;;  %v19098_v20 = vld [vmem:[#allocation161_spill] sm:$0xff] }
 0x7f6   : > { %v17206_v48 = vpop.f32.mrf.mxu0 }
 0x7f7   : > { %9592 = vxpose.xlu1.b32.cont [10/16] %v9460_v13, 128  ;;  %v9352_v13 = vadd.f32 %v16981_v14, %v19084_v1  ;;  %v9479_v34 = vmax.f32 %v9351_v3, 0.0  ;;  %v19101_v1 = vld [vmem:[#allocation162_spill] sm:$0xff] }
 0x7f8   : > { %v17210_v44 = vpop.f32.mrf.mxu0 }
 0x7f9   : > { %9561 = vxpose.xlu0.b32.cont [11/16] %v9463_v63, 128  ;;  %v9355_v63 = vadd.f32 %v16977_v35, %v19085_v6  ;;  %v9480_v39 = vmax.f32 %v9352_v13, 0.0  ;;  %v9492_v35 = vmax.f32 %v17073_v56, 0.0  ;;  %v9507_v56 = vmax.f32 %v17101_v43, 0.0  ;;  %v19094_v43 = vld [vmem:[#allocation159_spill] sm:$0xff]  ;;  %v19102_v13 = vld [vmem:[#allocation62_spill] sm:$0xff] }
 0x7fa   : > { %v9044_v45 = vpop.f32.mrf.mxu0 }
 0x7fb   : > { %9593 = vxpose.xlu1.b32.cont [11/16] %v9464_v60, 128  ;;  %v9356_v60 = vadd.f32 %v16981_v14, %v19086_v27  ;;  %v9483_v23 = vmax.f32 %v9355_v63, 0.0  ;;  %v9495_v45 = vmax.f32 %v17078_v38, 0.0  ;;  %v9496_v14 = vmax.f32 %v17083_v57, 0.0  ;;  %v19088_v57 = vld [vmem:[#allocation156_spill] sm:$0xff]  ;;  %v19105_v63 = vld [vmem:[#allocation123_spill] sm:$0xff] }
 0x7fc   : > { %v9045_v29 = vpop.f32.mrf.mxu0  ;;  %v9508_v38 = vmax.f32 %v17104_v28, 0.0  ;;  %v17242_v4 = vadd.f32 %v19088_v57, %v19087_v24  ;;  %v19096_v28 = vld [vmem:[#allocation160_spill] sm:$0xff]  ;;  %v19120_v57 = vld [vmem:[#allocation74_spill] sm:$0xff] }
 0x7fd   : > { %9562 = vxpose.xlu0.b32.cont [12/16] %v9467_v22, 128  ;;  %v9484_v0 = vmax.f32 %v9356_v60, 0.0  ;;  %v9487_v22 = vmax.f32 %v17063_v19, 0.0  ;;  %v9500_v19 = vmax.f32 %v17090_v51, 0.0  ;;  %v19090_v29 = vld [vmem:[#allocation157_spill] sm:$0xff]  ;;  %v9511_v51 = vmax.f32 %v17110_v37, 0.0  ;;  %v19107_v60 = vld [vmem:[#allocation75_spill] sm:$0xff] }
 0x7fe   : > { %v17259_v7 = vadd.f32 %v19096_v28, %v19095_v47  ;;  %v19126_v47 = vld [vmem:[#allocation172_spill] sm:$0xff] }
 0x7ff   : > { %9594 = vxpose.xlu1.b32.cont [12/16] %v9468_v59, 128  ;;  %v9499_v59 = vmax.f32 %v17087_v40, 0.0  ;;  %v19089_v40 = vld [vmem:[#allocation114_spill] sm:$0xff] }
 0x801   : > { %9563 = vxpose.xlu0.b32.cont [13/16] %v9471_v62, 128  ;;  %v17246_v62 = vadd.f32 %v19090_v29, %v19089_v40  ;;  %v19121_v40 = vld [vmem:[#allocation170_spill] sm:$0xff] }
 0x802   : > { %v17300_v29 = vadd.f32 %v19121_v40, %v19120_v57  ;;  %v19145_v40 = vld [vmem:[#allocation35_spill] sm:$0xff] }
 0x803   : > { %9595 = vxpose.xlu1.b32.cont [13/16] %v9472_v11, 128  ;;  %v17255_v11 = vadd.f32 %v19094_v43, %v19093_v33  ;;  %v9515_v33 = vmax.f32 %v17119_v53, 0.0  ;;  %v19125_v43 = vld [vmem:[#allocation80_spill] sm:$0xff] }
 0x804   : > { %v17309_v28 = vadd.f32 %v19126_v47, %v19125_v43  ;;  %v19148_v43 = vld [vmem:[#allocation181_spill] sm:$0xff] }
 0x805   : > { %9564 = vxpose.xlu0.b32.cont [14/16] %v9475_v17, 128  ;;  %v19097_v17 = vld [vmem:[#allocation64_spill] sm:$0xff] }
 0x806   : > { %v17263_v3 = vadd.f32 %v19098_v20, %v19097_v17  ;;  %v19127_v17 = vld [vmem:[#allocation121_spill] sm:$0xff] }
 0x807   : > { %9596 = vxpose.xlu1.b32.cont [14/16] %v9476_v21, 128  ;;  %v19100_v21 = vld [vmem:[#allocation63_spill] sm:$0xff] }
 0x808   : > { %19099 = vst [vmem:[#allocation129_spill] sm:$0xff] %v17263_v3  ;;  %v17267_v37 = vadd.f32 %v19101_v1, %v19100_v21  ;;  %v19130_v21 = vld [vmem:[#allocation118_spill] sm:$0xff] }
 0x809   : > { %9565 = vxpose.xlu0.b32.cont [15/16] %v9479_v34, 128  ;;  %v19103_v34 = vld [vmem:[#allocation163_spill] sm:$0xff]  ;;  %v19131_v1 = vld [vmem:[#allocation174_spill] sm:$0xff] }
 0x80a   : > { %v17271_v6 = vadd.f32 %v19103_v34, %v19102_v13  ;;  %v17317_v13 = vadd.f32 %v19131_v1, %v19130_v21  ;;  %v19132_v34 = vld [vmem:[#allocation119_spill] sm:$0xff]  ;;  %v9516_v1 = vmax.f32 %v17122_v55, 0.0 }
 0x80b   : > { %9597 = vxpose.xlu1.b32.cont [15/16] %v9480_v39, 128  ;;  %v19106_v39 = vld [vmem:[#allocation164_spill] sm:$0xff]  ;;  %v19163_v55 = vld [vmem:[#allocation187_spill] sm:$0xff] }
 0x80c   : > { %19104 = vst [vmem:[#allocation28_spill] sm:$0xff] %v17271_v6  ;;  %v17275_v27 = vadd.f32 %v19106_v39, %v19105_v63  ;;  %v19133_v63 = vld [vmem:[#allocation175_spill] sm:$0xff] }
 0x80d   : > { %9566 = vxpose.xlu0.b32.end [16/16] %v9483_v23, 128  ;;  %v19108_v23 = vld [vmem:[#allocation165_spill] sm:$0xff]  ;;  %v17321_v39 = vadd.f32 %v19133_v63, %v19132_v34  ;;  %v19152_v34 = vld [vmem:[#allocation116_spill] sm:$0xff]  ;;  %v19153_v63 = vld [vmem:[#allocation183_spill] sm:$0xff] }
 0x80f   : > { %9598 = vxpose.xlu1.b32.end [16/16] %v9484_v0, 128  ;;  %v17279_v0 = vadd.f32 %v19108_v23, %v19107_v60  ;;  %19134 = vst [vmem:[#allocation32_spill] sm:$0xff] %v17321_v39  ;;  %v19135_v60 = vld [vmem:[#allocation76_spill] sm:$0xff]  ;;  %v19206_v39 = vld [vmem:[#allocation17_spill] sm:$0xff] }
 0x810   : > { %v19136_v23 = vld [vmem:[#allocation176_spill] sm:$0xff] }
 0x811   : > { %9679 = vxpose.xlu0.b32.start [1/16] %v9487_v22, 128  ;;  %19109 = vst [vmem:[#allocation128_spill] sm:$0xff] %v17279_v0  ;;  %v19110_v22 = vld [vmem:[#allocation68_spill] sm:$0xff]  ;;  %v17325_v53 = vadd.f32 %v19136_v23, %v19135_v60  ;;  %v17354_v60 = vadd.f32 %v19153_v63, %v19152_v34  ;;  %v19167_v63 = vld [vmem:[#allocation27_spill] sm:$0xff] }
 0x812   : > { %v19155_v23 = vld [vmem:[#allocation84_spill] sm:$0xff] }
 0x813   : > { %9711 = vxpose.xlu1.b32.start [1/16] %v9488_v30, 128  ;;  %v19111_v30 = vld [vmem:[#allocation166_spill] sm:$0xff]  ;;  %19154 = vst [vmem:[#allocation12_spill] sm:$0xff] %v17354_v60 }
 0x814   : > { %v19175_v60 = vld [vmem:[#allocation50_spill] sm:$0xff] }
 0x815   : > { %9680 = vxpose.xlu0.b32.cont [2/16] %v9491_v2, 128  ;;  %v17283_v2 = vadd.f32 %v19111_v30, %v19110_v22  ;;  %v19137_v22 = vld [vmem:[#allocation77_spill] sm:$0xff] }
 0x816   : > { %v19138_v30 = vld [vmem:[#allocation177_spill] sm:$0xff] }
 0x817   : > { %9712 = vxpose.xlu1.b32.cont [2/16] %v9492_v35, 128  ;;  %v19112_v35 = vld [vmem:[#allocation122_spill] sm:$0xff] }
 0x819   : > { %9681 = vxpose.xlu0.b32.cont [3/16] %v9495_v45, 128  ;;  %v19113_v45 = vld [vmem:[#allocation167_spill] sm:$0xff] }
 0x81b   : > { %9713 = vxpose.xlu1.b32.cont [3/16] %v9496_v14, 128  ;;  %v17287_v14 = vadd.f32 %v19113_v45, %v19112_v35  ;;  %v17329_v35 = vadd.f32 %v19138_v30, %v19137_v22  ;;  %v19140_v45 = vld [vmem:[#allocation120_spill] sm:$0xff]  ;;  %v19157_v30 = vld [vmem:[#allocation81_spill] sm:$0xff] }
 0x81d   : > { %9682 = vxpose.xlu0.b32.cont [4/16] %v9499_v59, 128  ;;  %19114 = vst [vmem:[#allocation29_spill] sm:$0xff] %v17287_v14  ;;  %v19115_v59 = vld [vmem:[#allocation70_spill] sm:$0xff]  ;;  %19139 = vst [vmem:[#allocation125_spill] sm:$0xff] %v17329_v35  ;;  %v19198_v35 = vld [vmem:[#allocation11_spill] sm:$0xff] }
 0x81e   : > { %v19229_v14 = vld [vmem:[#allocation214_spill] sm:$0xff] }
 0x81f   : > { %9714 = vxpose.xlu1.b32.cont [4/16] %v9500_v19, 128  ;;  %v19116_v19 = vld [vmem:[#allocation168_spill] sm:$0xff] }
 0x821   : > { %9683 = vxpose.xlu0.b32.cont [5/16] %v9503_v25, 128  ;;  %v17291_v25 = vadd.f32 %v19116_v19, %v19115_v59  ;;  %v19141_v59 = vld [vmem:[#allocation178_spill] sm:$0xff] }
 0x822   : > { %v17333_v19 = vadd.f32 %v19141_v59, %v19140_v45  ;;  %v19158_v45 = vld [vmem:[#allocation185_spill] sm:$0xff] }
 0x823   : > { %9715 = vxpose.xlu1.b32.cont [5/16] %v9504_v26, 128  ;;  %v9512_v26 = vmax.f32 %v17115_v58, 0.0  ;;  %v19128_v58 = vld [vmem:[#allocation173_spill] sm:$0xff]  ;;  %v17362_v59 = vadd.f32 %v19158_v45, %v19157_v30  ;;  %v19170_v30 = vld [vmem:[#allocation47_spill] sm:$0xff]  ;;  %v19171_v45 = vld [vmem:[#allocation192_spill] sm:$0xff] }
 0x824   : > { %v17313_v20 = vadd.f32 %v19128_v58, %v19127_v17  ;;  %v19150_v17 = vld [vmem:[#allocation39_spill] sm:$0xff]  ;;  %v19151_v58 = vld [vmem:[#allocation182_spill] sm:$0xff] }
 0x825   : > { %9684 = vxpose.xlu0.b32.cont [6/16] %v9507_v56, 128  ;;  %v19117_v56 = vld [vmem:[#allocation73_spill] sm:$0xff]  ;;  %v17349_v21 = vadd.f32 %v19151_v58, %v19150_v17  ;;  %19159 = vst [vmem:[#allocation90_spill] sm:$0xff] %v17362_v59  ;;  %v19165_v17 = vld [vmem:[#allocation44_spill] sm:$0xff] }
 0x826   : > { %19129 = vst [vmem:[#allocation126_spill] sm:$0xff] %v17313_v20  ;;  %v19166_v58 = vld [vmem:[#allocation189_spill] sm:$0xff]  ;;  %v19172_v59 = vld [vmem:[#allocation48_spill] sm:$0xff] }
 0x827   : > { %9716 = vxpose.xlu1.b32.cont [6/16] %v9508_v38, 128  ;;  %v19118_v38 = vld [vmem:[#allocation169_spill] sm:$0xff]  ;;  %v17375_v34 = vadd.f32 %v19166_v58, %v19165_v17  ;;  %v19178_v17 = vld [vmem:[#allocation195_spill] sm:$0xff] }
 0x828   : > { %v17296_v24 = vadd.f32 %v19118_v38, %v19117_v56  ;;  %v19142_v56 = vld [vmem:[#allocation34_spill] sm:$0xff]  ;;  %v19143_v38 = vld [vmem:[#allocation179_spill] sm:$0xff]  ;;  %v19211_v20 = vld [vmem:[#allocation21_spill] sm:$0xff] }
 0x829   : > { %9685 = vxpose.xlu0.b32.cont [7/16] %v9511_v51, 128  ;;  %v19122_v51 = vld [vmem:[#allocation69_spill] sm:$0xff]  ;;  %v17337_v57 = vadd.f32 %v19143_v38, %v19142_v56  ;;  %v9519_v56 = vmax.f32 %v17126_v18, 0.0  ;;  %v19160_v38 = vld [vmem:[#allocation42_spill] sm:$0xff]  ;;  %v17383_v18 = vadd.f32 %v19171_v45, %v19170_v30 }
 0x82a   : > { %19119 = vst [vmem:[#allocation127_spill] sm:$0xff] %v17296_v24  ;;  %v17304_v41 = vadd.f32 %v19123_v9, %v19122_v51  ;;  %v19146_v51 = vld [vmem:[#allocation180_spill] sm:$0xff]  ;;  %v19147_v9 = vld [vmem:[#allocation37_spill] sm:$0xff] }
 0x82b   : > { %9717 = vxpose.xlu1.b32.cont [7/16] %v9512_v26, 128  ;;  %19144 = vst [vmem:[#allocation33_spill] sm:$0xff] %v17337_v57  ;;  %v17341_v26 = vadd.f32 %v19146_v51, %v19145_v40  ;;  %v17345_v47 = vadd.f32 %v19148_v43, %v19147_v9  ;;  %v19161_v40 = vld [vmem:[#allocation186_spill] sm:$0xff]  ;;  %v19162_v9 = vld [vmem:[#allocation43_spill] sm:$0xff]  ;;  %v19183_v30 = vld [vmem:[#allocation197_spill] sm:$0xff] }
 0x82c   : > { %19124 = vst [vmem:[#allocation9_spill] sm:$0xff] %v17304_v41  ;;  %v17367_v51 = vadd.f32 %v19161_v40, %v19160_v38  ;;  %v17371_v43 = vadd.f32 %v19163_v55, %v19162_v9  ;;  %v19173_v38 = vld [vmem:[#allocation193_spill] sm:$0xff]  ;;  %v19176_v9 = vld [vmem:[#allocation194_spill] sm:$0xff]  ;;  %v9527_v41 = vmax.f32 %v17142_v16, 0.0 }
 0x82d   : > { %9686 = vxpose.xlu0.b32.cont [8/16] %v9515_v33, 128  ;;  %19149 = vst [vmem:[#allocation124_spill] sm:$0xff] %v17345_v47  ;;  %v19156_v33 = vld [vmem:[#allocation184_spill] sm:$0xff]  ;;  %v17387_v40 = vadd.f32 %v19173_v38, %v19172_v59  ;;  %v17391_v55 = vadd.f32 %v19176_v9, %v19175_v60  ;;  %v19185_v47 = vld [vmem:[#allocation58_spill] sm:$0xff]  ;;  %v9520_v60 = vmax.f32 %v17129_v10, 0.0  ;;  %v19226_v24 = vld [vmem:[#allocation213_spill] sm:$0xff] }
 0x82e   : > { %v17358_v22 = vadd.f32 %v19156_v33, %v19155_v23  ;;  %19164 = vst [vmem:[#allocation14_spill] sm:$0xff] %v17371_v43  ;;  %v19168_v23 = vld [vmem:[#allocation191_spill] sm:$0xff]  ;;  %v19177_v43 = vld [vmem:[#allocation52_spill] sm:$0xff]  ;;  %v19186_v59 = vld [vmem:[#allocation198_spill] sm:$0xff] }
 0x82f   : > { %v17379_v33 = vadd.f32 %v19168_v23, %v19167_v63  ;;  %9718 = vxpose.xlu1.b32.cont [8/16] %v9516_v1, 128  ;;  %19174 = vst [vmem:[#allocation89_spill] sm:$0xff] %v17387_v40  ;;  %v17395_v58 = vadd.f32 %v19178_v17, %v19177_v43  ;;  %v19180_v63 = vld [vmem:[#allocation54_spill] sm:$0xff]  ;;  %v19181_v23 = vld [vmem:[#allocation196_spill] sm:$0xff]  ;;  %v17407_v38 = vadd.f32 %v19186_v59, %v19185_v47  ;;  %v19188_v40 = vld [vmem:[#allocation199_spill] sm:$0xff] }
 0x830   : > { %v17399_v1 = vadd.f32 %v19181_v23, %v19180_v63  ;;  %v19187_v9 = vld [vmem:[#allocation8_spill] sm:$0xff]  ;;  %v19190_v43 = vld [vmem:[#allocation30_spill] sm:$0xff]  ;;  %v19236_v16 = vld [vmem:[#allocation217_spill] sm:$0xff] }
 0x831   : > { %19169 = vst [vmem:[#allocation188_spill] sm:$0xff] %v17379_v33  ;;  %19179 = vst [vmem:[#allocation16_spill] sm:$0xff] %v17395_v58  ;;  %9687 = vxpose.xlu0.b32.cont [9/16] %v9519_v56, 128  ;;  %v19182_v33 = vld [vmem:[#allocation56_spill] sm:$0xff]  ;;  %v17412_v57 = vadd.f32 %v19188_v40, %v19187_v9  ;;  %v19192_v63 = vld [vmem:[#allocation222_spill] sm:$0xff] }
 0x832   : > { %v17403_v45 = vadd.f32 %v19183_v30, %v19182_v33  ;;  %v19191_v56 = vld [vmem:[#allocation200_spill] sm:$0xff]  ;;  %v9041_v23 = vadd.f32 %v17206_v48, %v19192_v63  ;;  %v9523_v33 = vmax.f32 %v17133_v52, 0.0  ;;  %v19193_v30 = vld [vmem:[#allocation31_spill] sm:$0xff]  ;;  %v19196_v47 = vld [vmem:[#allocation10_spill] sm:$0xff] }
 0x833   : > { %19189 = vst [vmem:[#allocation18_spill] sm:$0xff] %v17412_v57  ;;  %v17416_v17 = vadd.f32 %v19191_v56, %v19190_v43  ;;  %v19197_v59 = vld [vmem:[#allocation202_spill] sm:$0xff]  ;;  %v19199_v40 = vld [vmem:[#allocation203_spill] sm:$0xff]  ;;  %v19201_v57 = vld [vmem:[#allocation13_spill] sm:$0xff]  ;;  %9719 = vxpose.xlu1.b32.cont [9/16] %v9520_v60, 128 }
 0x834   : > { %19184 = vst [vmem:[#allocation82_spill] sm:$0xff] %v17403_v45  ;;  %v19194_v45 = vld [vmem:[#allocation201_spill] sm:$0xff]  ;;  %v17427_v10 = vadd.f32 %v19197_v59, %v19196_v47  ;;  %v17431_v9 = vadd.f32 %v19199_v40, %v19198_v35  ;;  %v19202_v43 = vld [vmem:[#allocation204_spill] sm:$0xff]  ;;  %v19203_v48 = vld [vmem:[#allocation15_spill] sm:$0xff] }
 0x835   : > { %v17423_v58 = vadd.f32 %v19194_v45, %v19193_v30  ;;  %v17435_v56 = vadd.f32 %v19202_v43, %v19201_v57  ;;  %v19204_v63 = vld [vmem:[#allocation205_spill] sm:$0xff]  ;;  %v19207_v45 = vld [vmem:[#allocation206_spill] sm:$0xff]  ;;  %v19209_v47 = vld [vmem:[#allocation207_spill] sm:$0xff]  ;;  %9688 = vxpose.xlu0.b32.cont [10/16] %v9523_v33, 128 }
 0x836   : > { %19200 = vst [vmem:[#allocation20_spill] sm:$0xff] %v17431_v9  ;;  %v17439_v52 = vadd.f32 %v19204_v63, %v19203_v48  ;;  %v17443_v30 = vadd.f32 %v19207_v45, %v19206_v39  ;;  %v19212_v35 = vld [vmem:[#allocation208_spill] sm:$0xff]  ;;  %v19213_v57 = vld [vmem:[#allocation23_spill] sm:$0xff]  ;;  %v19214_v43 = vld [vmem:[#allocation209_spill] sm:$0xff]  ;;  %v9524_v45 = vmax.f32 %v17136_v46, 0.0 }
 0x837   : > { %19195 = vst [vmem:[#allocation79_spill] sm:$0xff] %v17423_v58  ;;  %v19208_v58 = vld [vmem:[#allocation19_spill] sm:$0xff]  ;;  %v17451_v40 = vadd.f32 %v19212_v35, %v19211_v20  ;;  %v17455_v60 = vadd.f32 %v19214_v43, %v19213_v57  ;;  %v19216_v9 = vld [vmem:[#allocation132_spill] sm:$0xff]  ;;  %v19217_v48 = vld [vmem:[#allocation210_spill] sm:$0xff] }
 0x838   : > { %19205 = vst [vmem:[#allocation78_spill] sm:$0xff] %v17439_v52  ;;  %v17447_v59 = vadd.f32 %v19209_v47, %v19208_v58  ;;  %v17459_v63 = vadd.f32 %v19217_v48, %v19216_v9  ;;  %v19218_v52 = vld [vmem:[#allocation223_spill] sm:$0xff]  ;;  %v19219_v58 = vld [vmem:[#allocation134_spill] sm:$0xff]  ;;  %v19222_v20 = vld [vmem:[#allocation136_spill] sm:$0xff]  ;;  %9720 = vxpose.xlu1.b32.cont [10/16] %v9524_v45, 128 }
 0x839   : > { %19215 = vst [vmem:[#allocation72_spill] sm:$0xff] %v17455_v60  ;;  %v9043_v39 = vadd.f32 %v17210_v44, %v19218_v52  ;;  %v19220_v47 = vld [vmem:[#allocation211_spill] sm:$0xff]  ;;  %v19223_v35 = vld [vmem:[#allocation212_spill] sm:$0xff]  ;;  %v19224_v57 = vld [vmem:[#allocation117_spill] sm:$0xff]  ;;  %9689 = vxpose.xlu0.b32.cont [11/16] %v9527_v41, 128 }
 0x83a   : > { %19210 = vst [vmem:[#allocation22_spill] sm:$0xff] %v17447_v59  ;;  %v17466_v59 = vadd.f32 %v19220_v47, %v19219_v58  ;;  %v7233_v33 = vadd.f32 %v19223_v35, %v19222_v20  ;;  %v9082_v43 = vadd.f32 %v19224_v57, %v9041_v23  ;;  %v19225_v60 = vld [vmem:[#allocation138_spill] sm:$0xff]  ;;  %v19228_v48 = vld [vmem:[#allocation140_spill] sm:$0xff]  ;;  %v19231_v46 = vld [vmem:[#allocation215_spill] sm:$0xff]  ;;  %v9122_v20 = vpop.f32.mrf.mxu0 }
 0x83b   : > { %v17474_v9 = vadd.f32 %v19226_v24, %v19225_v60  ;;  %v7239_v44 = vadd.f32 %v19229_v14, %v19228_v48  ;;  %v19230_v52 = vld [vmem:[#allocation142_spill] sm:$0xff]  ;;  %v19233_v58 = vld [vmem:[#allocation144_spill] sm:$0xff] }
 0x83c   : > { %19221 = vst [vmem:[#allocation131_spill] sm:$0xff] %v17466_v59  ;;  %v17480_v0 = vadd.f32 %v19231_v46, %v19230_v52  ;;  %v19234_v47 = vld [vmem:[#allocation216_spill] sm:$0xff]  ;;  %v19235_v35 = vld [vmem:[#allocation146_spill] sm:$0xff]  ;;  %v9123_v14 = vadd.f32 %v9122_v20, %v9082_v43  ;;  %v9536_v20 = vmax.f32 %v17164_v54, 0.0 }
 0x83d   : > { %19227 = vst [vmem:[#allocation108_spill] sm:$0xff] %v17474_v9  ;;  %v7243_v59 = vadd.f32 %v19234_v47, %v19233_v58  ;;  %v17486_v6 = vadd.f32 %v19236_v16, %v19235_v35  ;;  %v19238_v23 = vld [vmem:[#allocation148_spill] sm:$0xff]  ;;  %v19239_v57 = vld [vmem:[#allocation218_spill] sm:$0xff]  ;;  %v19241_v9 = vld [vmem:[#allocation219_spill] sm:$0xff]  ;;  %v9528_v47 = vmax.f32 %v17148_v12, 0.0 }
 0x83e   : > { %19232 = vst [vmem:[#allocation133_spill] sm:$0xff] %v17480_v0  ;;  %v7249_v24 = vadd.f32 %v19239_v57, %v19238_v23  ;;  %v19240_v60 = vld [vmem:[#allocation150_spill] sm:$0xff]  ;;  %v19242_v48 = vld [vmem:[#allocation152_spill] sm:$0xff]  ;;  %v19245_v58 = vld [vmem:[#allocation221_spill] sm:$0xff]  ;;  %v9531_v23 = vmax.f32 %v17152_v36, 0.0  ;;  %v9532_v57 = vmax.f32 %v17156_v61, 0.0 }
 0x83f   : > { %19237 = vst [vmem:[#allocation105_spill] sm:$0xff] %v17486_v6  ;;  %v17492_v3 = vadd.f32 %v19241_v9, %v19240_v60  ;;  %v19243_v52 = vld [vmem:[#allocation220_spill] sm:$0xff]  ;;  %v19244_v0 = vld [vmem:[#allocation154_spill] sm:$0xff]  ;;  %v19246_v35 = vld [vmem:[#allocation71_spill] sm:$0xff]  ;;  %v9124_v6 = vpop.f32.mrf.mxu0  ;;  %v9535_v9 = vmax.f32 %v17160_v50, 0.0  ;;  %9721 = vxpose.xlu1.b32.cont [11/16] %v9528_v47, 128  ;;  %v9539_v60 = vmax.f32 %v17168_v15, 0.0 }
 0x840   : > { %v7253_v46 = vadd.f32 %v19243_v52, %v19242_v48  ;;  %v17498_v45 = vadd.f32 %v19245_v58, %v19244_v0  ;;  %v9084_v16 = vadd.f32 %v19246_v35, %v9043_v39  ;;  %v19247_v41 = vld [vmem:[#allocation26_spill] sm:$0xff]  ;;  %v19248_v52 = vld [vmem:[#allocation60_spill] sm:$0xff]  ;;  %v19249_v12 = vld [vmem:[#allocation103_spill] sm:$0xff]  ;;  %9690 = vxpose.xlu0.b32.cont [12/16] %v9531_v23, 128  ;;  %v9543_v35 = vmax.f32 %v17178_v8, 0.0 }
 0x841   : > { %v9140_v43 = vrot.slane %v9123_v14, %v19247_v41  ;;  %v9126_v48 = vpop.f32.mrf.mxu0  ;;  %v17510_v58 = vrot.slane %v19249_v12, %v19248_v52  ;;  %v19257_v23 = vld [vmem:[#allocation129_spill] sm:$0xff] }
 0x842   : > { %v9125_v0 = vadd.f32 %v9124_v6, %v9084_v16  ;;  %v19264_v48 = vld [vmem:[#allocation32_spill] sm:$0xff] }
 0x843   : > { %v9147_v36 = vadd.f32 %v9140_v43, %v17242_v4  ;;  %v17514_v61 = vadd.f32 %v9140_v43, %v17251_v49  ;;  %v17517_v50 = vadd.f32 %v9140_v43, %v17259_v7  ;;  %v17520_v39 = vadd.f32 %v9140_v43, %v17267_v37  ;;  %v9127_v49 = vpop.f32.mrf.mxu0  ;;  %9722 = vxpose.xlu1.b32.cont [12/16] %v9532_v57, 128  ;;  %v19258_v57 = vld [vmem:[#allocation28_spill] sm:$0xff] }
 0x844   : > { %v17523_v54 = vadd.f32 %v9140_v43, %v17275_v27  ;;  %v17526_v15 = vadd.f32 %v9140_v43, %v17283_v2  ;;  %v17529_v6 = vadd.f32 %v9140_v43, %v17291_v25  ;;  %v17532_v4 = vadd.f32 %v9140_v43, %v17300_v29  ;;  %9691 = vxpose.xlu0.b32.cont [13/16] %v9535_v9, 128  ;;  %v19268_v49 = vld [vmem:[#allocation33_spill] sm:$0xff] }
 0x845   : > { %v17535_v14 = vadd.f32 %v9140_v43, %v17309_v28  ;;  %v17538_v7 = vadd.f32 %v9140_v43, %v17317_v13  ;;  %v17541_v37 = vadd.f32 %v9140_v43, %v17325_v53  ;;  %v17544_v27 = vadd.f32 %v9140_v43, %v17333_v19 }
 0x846   : > { %v17547_v2 = vadd.f32 %v9140_v43, %v17341_v26  ;;  %v17550_v25 = vadd.f32 %v9140_v43, %v17349_v21  ;;  %v17553_v29 = vadd.f32 %v9140_v43, %v17358_v22  ;;  %v17556_v28 = vadd.f32 %v9140_v43, %v17367_v51 }
 0x847   : > { %19250 = vst [vmem:[#allocation135_spill] sm:$0xff] %v17541_v37  ;;  %19251 = vst [vmem:[#allocation109_spill] sm:$0xff] %v17544_v27  ;;  %v17559_v13 = vadd.f32 %v9140_v43, %v17375_v34  ;;  %v17562_v53 = vadd.f32 %v9140_v43, %v17383_v18  ;;  %v17565_v19 = vadd.f32 %v9140_v43, %v17391_v55  ;;  %9723 = vxpose.xlu1.b32.cont [13/16] %v9536_v20, 128 }
 0x848   : > { %19252 = vst [vmem:[#allocation137_spill] sm:$0xff] %v17547_v2  ;;  %19253 = vst [vmem:[#allocation106_spill] sm:$0xff] %v17550_v25  ;;  %v17568_v26 = vadd.f32 %v9140_v43, %v17399_v1  ;;  %v17571_v21 = vadd.f32 %v9140_v43, %v17407_v38  ;;  %v17574_v22 = vadd.f32 %v9140_v43, %v17416_v17  ;;  %9692 = vxpose.xlu0.b32.cont [14/16] %v9539_v60, 128  ;;  %v19262_v60 = vld [vmem:[#allocation9_spill] sm:$0xff]  ;;  %v19280_v25 = vld [vmem:[#allocation16_spill] sm:$0xff] }
 0x849   : > { %19254 = vst [vmem:[#allocation139_spill] sm:$0xff] %v17553_v29  ;;  %19255 = vst [vmem:[#allocation110_spill] sm:$0xff] %v17556_v28  ;;  %v17577_v51 = vadd.f32 %v9140_v43, %v17427_v10  ;;  %v17580_v34 = vadd.f32 %v9140_v43, %v17435_v56  ;;  %v17583_v18 = vadd.f32 %v9140_v43, %v17443_v30  ;;  %v9540_v30 = vmax.f32 %v17172_v32, 0.0 }
 0x84a   : > { %v17586_v55 = vadd.f32 %v9140_v43, %v17451_v40  ;;  %v17589_v1 = vadd.f32 %v9140_v43, %v17459_v63  ;;  %v17591_v38 = vadd.f32 %v9140_v43, %v7233_v33  ;;  %v17593_v17 = vadd.f32 %v9140_v43, %v7239_v44  ;;  %v19256_v63 = vld [vmem:[#allocation59_spill] sm:$0xff] }
 0x84b   : > { %v17595_v47 = vadd.f32 %v9140_v43, %v7243_v59  ;;  %v17597_v10 = vadd.f32 %v9140_v43, %v7249_v24  ;;  %v17599_v56 = vadd.f32 %v9140_v43, %v7253_v46  ;;  %v9144_v40 = vrot.slane %v9125_v0, %v19247_v41  ;;  %9724 = vxpose.xlu1.b32.cont [14/16] %v9540_v30, 128  ;;  %v19259_v41 = vld [vmem:[#allocation128_spill] sm:$0xff] }
 0x84c   : > { %v17607_v33 = vrot.slane %v19249_v12, %v19256_v63  ;;  %v9544_v59 = vmax.f32 %v17184_v5, 0.0  ;;  %v9547_v44 = vmax.f32 %v17188_v42, 0.0  ;;  %v9548_v24 = vmax.f32 %v17192_v31, 0.0  ;;  %v19260_v5 = vld [vmem:[#allocation29_spill] sm:$0xff]  ;;  %v19261_v42 = vld [vmem:[#allocation127_spill] sm:$0xff]  ;;  %9693 = vxpose.xlu0.b32.cont [15/16] %v9543_v35, 128  ;;  %v19270_v63 = vld [vmem:[#allocation124_spill] sm:$0xff] }
 0x84d   : > { %v9297_v46 = vadd.f32 %v17510_v58, %v9147_v36  ;;  %v9148_v32 = vadd.f32 %v9144_v40, %v17246_v62  ;;  %v9152_v16 = vadd.f32 %v9144_v40, %v17255_v11  ;;  %v9156_v8 = vadd.f32 %v9144_v40, %v19257_v23  ;;  %v19263_v62 = vld [vmem:[#allocation126_spill] sm:$0xff]  ;;  %v19266_v12 = vld [vmem:[#allocation125_spill] sm:$0xff] }
 0x84e   : > { %v17617_v9 = vadd.f32 %v9144_v40, %v19258_v57  ;;  %v17620_v43 = vadd.f32 %v9144_v40, %v19259_v41  ;;  %v17623_v20 = vadd.f32 %v9144_v40, %v19260_v5  ;;  %v17626_v31 = vadd.f32 %v9144_v40, %v19261_v42  ;;  %v19272_v57 = vld [vmem:[#allocation12_spill] sm:$0xff]  ;;  %v19274_v5 = vld [vmem:[#allocation90_spill] sm:$0xff] }
 0x84f   : > { %v17629_v0 = vadd.f32 %v9144_v40, %v19262_v60  ;;  %v17634_v11 = vadd.f32 %v9144_v40, %v19263_v62  ;;  %v17637_v52 = vadd.f32 %v9144_v40, %v19264_v48  ;;  %v17640_v36 = vadd.f32 %v9144_v40, %v19266_v12  ;;  %v19276_v60 = vld [vmem:[#allocation14_spill] sm:$0xff]  ;;  %v19278_v48 = vld [vmem:[#allocation188_spill] sm:$0xff]  ;;  %v19279_v12 = vld [vmem:[#allocation89_spill] sm:$0xff]  ;;  %9725 = vxpose.xlu1.b32.cont [15/16] %v9544_v59, 128 }
 0x850   : > { %v17643_v30 = vadd.f32 %v9144_v40, %v19268_v49  ;;  %v17646_v23 = vadd.f32 %v9144_v40, %v19270_v63  ;;  %v17649_v41 = vadd.f32 %v9144_v40, %v19272_v57  ;;  %v17652_v42 = vadd.f32 %v9144_v40, %v19274_v5  ;;  %v19281_v35 = vld [vmem:[#allocation82_spill] sm:$0xff]  ;;  %v19283_v57 = vld [vmem:[#allocation79_spill] sm:$0xff]  ;;  %v19284_v5 = vld [vmem:[#allocation20_spill] sm:$0xff]  ;;  %9694 = vxpose.xlu0.b32.end [16/16] %v9547_v44, 128 }
 0x851   : > { %19265 = vst [vmem:[#allocation141_spill] sm:$0xff] %v17637_v52  ;;  %19267 = vst [vmem:[#allocation190_spill] sm:$0xff] %v17640_v36  ;;  %v17655_v62 = vadd.f32 %v9144_v40, %v19276_v60  ;;  %v9212_v28 = vadd.f32 %v9144_v40, %v19278_v48  ;;  %v9216_v29 = vadd.f32 %v9144_v40, %v19279_v12  ;;  %v19282_v63 = vld [vmem:[#allocation18_spill] sm:$0xff]  ;;  %v9425_v44 = vmax.f32 %v9297_v46, 0.0 }
 0x852   : > { %19269 = vst [vmem:[#allocation107_spill] sm:$0xff] %v17643_v30  ;;  %19271 = vst [vmem:[#allocation143_spill] sm:$0xff] %v17646_v23  ;;  %v17660_v49 = vadd.f32 %v9144_v40, %v19280_v25  ;;  %v17663_v2 = vadd.f32 %v9144_v40, %v19281_v35  ;;  %v17666_v23 = vadd.f32 %v9144_v40, %v19282_v63  ;;  %v19285_v60 = vld [vmem:[#allocation78_spill] sm:$0xff]  ;;  %v19287_v25 = vld [vmem:[#allocation72_spill] sm:$0xff] }
 0x853   : > { %19273 = vst [vmem:[#allocation111_spill] sm:$0xff] %v17649_v41  ;;  %19275 = vst [vmem:[#allocation145_spill] sm:$0xff] %v17652_v42  ;;  %v17669_v41 = vadd.f32 %v9144_v40, %v19283_v57  ;;  %v17672_v42 = vadd.f32 %v9144_v40, %v19284_v5  ;;  %v19286_v48 = vld [vmem:[#allocation22_spill] sm:$0xff]  ;;  %v17681_v30 = vadd.f32 %v9144_v40, %v19287_v25  ;;  %v19288_v35 = vld [vmem:[#allocation131_spill] sm:$0xff]  ;;  %v9567_v57 = vpop.trf.xlu0  ;;  %9726 = vxpose.xlu1.b32.end [16/16] %v9548_v24, 128 }
 0x854   : > { %19277 = vst [vmem:[#allocation101_spill] sm:$0xff] %v17655_v62  ;;  %v17675_v62 = vadd.f32 %v9144_v40, %v19285_v60  ;;  %v17678_v12 = vadd.f32 %v9144_v40, %v19286_v48  ;;  %v17684_v27 = vadd.f32 %v9144_v40, %v19288_v35  ;;  %v19289_v63 = vld [vmem:[#allocation108_spill] sm:$0xff]  ;;  %v19290_v5 = vld [vmem:[#allocation133_spill] sm:$0xff]  ;;  %v17696_v59 = vadd.f32 %v9144_v40, %v17492_v3  ;;  %v9599_v3 = vpop.trf.xlu1 }
 0x855   : > { %v17687_v36 = vadd.f32 %v9144_v40, %v19289_v63  ;;  %v17690_v37 = vadd.f32 %v9144_v40, %v19290_v5  ;;  %v19291_v60 = vld [vmem:[#allocation105_spill] sm:$0xff]  ;;  %v17699_v48 = vadd.f32 %v9144_v40, %v17498_v45  ;;  %9807 = vst [vmem:[%s17701_s14] sm:$0xff] %v9567_v57  ;;  %v9298_v25 = vadd.f32 %v17607_v33, %v9148_v32 }
 0x856   : > { %v17693_v52 = vadd.f32 %v9144_v40, %v19291_v60  ;;  %v9301_v35 = vadd.f32 %v17510_v58, %v17514_v61  ;;  %9839 = vst [vmem:[%s17701_s14 + $0x100] sm:$0xff] %v9599_v3  ;;  %9615 = vxpose.xlu0.b32.start [1/16] %v9425_v44, 128  ;;  %v9302_v63 = vadd.f32 %v17607_v33, %v9152_v16 }
 0x857   : > { %v9426_v45 = vmax.f32 %v9298_v25, 0.0  ;;  %v9568_v40 = vpop.trf.xlu0  ;;  %v9305_v46 = vadd.f32 %v17510_v58, %v17517_v50  ;;  %v9306_v57 = vadd.f32 %v17607_v33, %v9156_v8  ;;  %v9309_v44 = vadd.f32 %v17510_v58, %v17520_v39 }
 0x858   : > { %9809 = vst [vmem:[%s17701_s14 + $0x10] sm:$0xff] %v9568_v40  ;;  %v9429_v5 = vmax.f32 %v9301_v35, 0.0  ;;  %v9600_v32 = vpop.trf.xlu1  ;;  %v9430_v24 = vmax.f32 %v9302_v63, 0.0  ;;  %v9310_v35 = vadd.f32 %v17607_v33, %v17617_v9  ;;  %v9313_v8 = vadd.f32 %v17510_v58, %v17523_v54 }
 0x859   : > { %9647 = vxpose.xlu1.b32.start [1/16] %v9426_v45, 128  ;;  %9841 = vst [vmem:[%s17701_s14 + $0x110] sm:$0xff] %v9600_v32  ;;  %v9433_v60 = vmax.f32 %v9305_v46, 0.0  ;;  %v9434_v25 = vmax.f32 %v9306_v57, 0.0  ;;  %v9437_v3 = vmax.f32 %v9309_v44, 0.0  ;;  %v17725_v39 = vadd.f32 %v17510_v58, %v17559_v13 }
 0x85a   : > { %9616 = vxpose.xlu0.b32.cont [2/16] %v9429_v5, 128  ;;  %v17728_v40 = vadd.f32 %v17607_v33, %v9212_v28  ;;  %v17733_v9 = vadd.f32 %v17510_v58, %v17562_v53  ;;  %v17736_v5 = vadd.f32 %v17607_v33, %v9216_v29  ;;  %v9438_v54 = vmax.f32 %v9310_v35, 0.0 }
 0x85b   : > { %v9569_v61 = vpop.trf.xlu0  ;;  %v9314_v13 = vadd.f32 %v17607_v33, %v17620_v43  ;;  %v17743_v28 = vadd.f32 %v17510_v58, %v17565_v19  ;;  %v9441_v46 = vmax.f32 %v9313_v8, 0.0  ;;  %v9317_v32 = vadd.f32 %v17510_v58, %v17526_v15 }
 0x85c   : > { %9811 = vst [vmem:[%s17701_s14 + $0x20] sm:$0xff] %v9569_v61  ;;  %v9601_v16 = vpop.trf.xlu1  ;;  %v17749_v53 = vadd.f32 %v17607_v33, %v17660_v49  ;;  %v17753_v29 = vadd.f32 %v17510_v58, %v17568_v26  ;;  %v17757_v43 = vadd.f32 %v17607_v33, %v17663_v2  ;;  %v17761_v19 = vadd.f32 %v17510_v58, %v17571_v21 }
 0x85d   : > { %9648 = vxpose.xlu1.b32.cont [2/16] %v9430_v24, 128  ;;  %9843 = vst [vmem:[%s17701_s14 + $0x120] sm:$0xff] %v9601_v16  ;;  %v17765_v15 = vadd.f32 %v17607_v33, %v17666_v23  ;;  %v17770_v26 = vadd.f32 %v17510_v58, %v17574_v22  ;;  %v17774_v2 = vadd.f32 %v17607_v33, %v17669_v41  ;;  %v9442_v24 = vmax.f32 %v9314_v13, 0.0 }
 0x85e   : > { %9617 = vxpose.xlu0.b32.cont [3/16] %v9433_v60, 128  ;;  %v9318_v21 = vadd.f32 %v17607_v33, %v17623_v20  ;;  %v17781_v23 = vadd.f32 %v17510_v58, %v17577_v51  ;;  %v9445_v57 = vmax.f32 %v9317_v32, 0.0  ;;  %v9321_v60 = vadd.f32 %v17510_v58, %v17529_v6  ;;  %v19292_v32 = vld [vmem:[#allocation141_spill] sm:$0xff] }
 0x85f   : > { %v9570_v50 = vpop.trf.xlu0  ;;  %v17787_v22 = vadd.f32 %v17607_v33, %v17672_v42  ;;  %v17791_v41 = vadd.f32 %v17510_v58, %v17580_v34  ;;  %v17795_v20 = vadd.f32 %v17607_v33, %v17675_v62  ;;  %v17799_v51 = vadd.f32 %v17510_v58, %v17583_v18 }
 0x860   : > { %9813 = vst [vmem:[%s17701_s14 + $0x30] sm:$0xff] %v9570_v50  ;;  %v9602_v45 = vpop.trf.xlu1  ;;  %v17803_v6 = vadd.f32 %v17607_v33, %v17678_v12  ;;  %v17808_v34 = vadd.f32 %v17510_v58, %v17586_v55  ;;  %v17812_v62 = vadd.f32 %v17607_v33, %v17681_v30  ;;  %v9446_v16 = vmax.f32 %v9318_v21, 0.0 }
 0x861   : > { %9649 = vxpose.xlu1.b32.cont [3/16] %v9434_v25, 128  ;;  %9845 = vst [vmem:[%s17701_s14 + $0x130] sm:$0xff] %v9602_v45  ;;  %v9322_v18 = vadd.f32 %v17607_v33, %v17626_v31  ;;  %v17819_v12 = vadd.f32 %v17510_v58, %v17589_v1  ;;  %v9449_v50 = vmax.f32 %v9321_v60, 0.0  ;;  %v9325_v25 = vadd.f32 %v17510_v58, %v17532_v4  ;;  %v19294_v60 = vld [vmem:[#allocation190_spill] sm:$0xff] }
 0x862   : > { %9618 = vxpose.xlu0.b32.cont [4/16] %v9437_v3, 128  ;;  %v17825_v55 = vadd.f32 %v17607_v33, %v17684_v27  ;;  %v17829_v30 = vadd.f32 %v17510_v58, %v17591_v38  ;;  %v17833_v31 = vadd.f32 %v17607_v33, %v17687_v36  ;;  %v17837_v1 = vadd.f32 %v17510_v58, %v17593_v17 }
 0x863   : > { %v9571_v63 = vpop.trf.xlu0  ;;  %v17841_v4 = vadd.f32 %v17607_v33, %v17690_v37  ;;  %v17846_v38 = vadd.f32 %v17510_v58, %v17595_v47  ;;  %v17850_v36 = vadd.f32 %v17607_v33, %v17693_v52  ;;  %v9450_v3 = vmax.f32 %v9322_v18, 0.0 }
 0x864   : > { %9815 = vst [vmem:[%s17701_s14 + $0x40] sm:$0xff] %v9571_v63  ;;  %v9603_v61 = vpop.trf.xlu1  ;;  %v9326_v17 = vadd.f32 %v17607_v33, %v17629_v0  ;;  %v17857_v37 = vadd.f32 %v17510_v58, %v17597_v10  ;;  %v9453_v8 = vmax.f32 %v9325_v25, 0.0  ;;  %v9329_v45 = vadd.f32 %v17510_v58, %v17535_v14 }
 0x865   : > { %9650 = vxpose.xlu1.b32.cont [4/16] %v9438_v54, 128  ;;  %9847 = vst [vmem:[%s17701_s14 + $0x140] sm:$0xff] %v9603_v61  ;;  %v17863_v47 = vadd.f32 %v17607_v33, %v17696_v59  ;;  %v17867_v52 = vadd.f32 %v17510_v58, %v17599_v56  ;;  %v17871_v10 = vadd.f32 %v17607_v33, %v17699_v48 }
 0x866   : > { %9619 = vxpose.xlu0.b32.cont [5/16] %v9441_v46, 128  ;;  %v9454_v14 = vmax.f32 %v9326_v17, 0.0  ;;  %v9330_v59 = vadd.f32 %v17607_v33, %v17634_v11  ;;  %v9457_v54 = vmax.f32 %v9329_v45, 0.0  ;;  %v9333_v56 = vadd.f32 %v17510_v58, %v17538_v7 }
 0x867   : > { %v9572_v49 = vpop.trf.xlu0  ;;  %v9334_v61 = vadd.f32 %v17607_v33, %v19292_v32 }
 0x868   : > { %9817 = vst [vmem:[%s17701_s14 + $0x50] sm:$0xff] %v9572_v49  ;;  %v9604_v44 = vpop.trf.xlu1  ;;  %v9458_v46 = vmax.f32 %v9330_v59, 0.0  ;;  %v9461_v49 = vmax.f32 %v9333_v56, 0.0  ;;  %v19298_v59 = vld [vmem:[#allocation143_spill] sm:$0xff] }
 0x869   : > { %9651 = vxpose.xlu1.b32.cont [5/16] %v9442_v24, 128  ;;  %9849 = vst [vmem:[%s17701_s14 + $0x150] sm:$0xff] %v9604_v44  ;;  %v19293_v24 = vld [vmem:[#allocation135_spill] sm:$0xff]  ;;  %v9338_v44 = vadd.f32 %v17607_v33, %v19294_v60 }
 0x86a   : > { %9620 = vxpose.xlu0.b32.cont [6/16] %v9445_v57, 128  ;;  %v9337_v11 = vadd.f32 %v17510_v58, %v19293_v24  ;;  %v9462_v57 = vmax.f32 %v9334_v61, 0.0 }
 0x86b   : > { %v9573_v42 = vpop.trf.xlu0 }
 0x86c   : > { %9819 = vst [vmem:[%s17701_s14 + $0x60] sm:$0xff] %v9573_v42  ;;  %v9605_v35 = vpop.trf.xlu1  ;;  %v9465_v42 = vmax.f32 %v9337_v11, 0.0 }
 0x86d   : > { %9652 = vxpose.xlu1.b32.cont [6/16] %v9446_v16, 128  ;;  %9851 = vst [vmem:[%s17701_s14 + $0x160] sm:$0xff] %v9605_v35  ;;  %v19295_v16 = vld [vmem:[#allocation109_spill] sm:$0xff]  ;;  %v9466_v35 = vmax.f32 %v9338_v44, 0.0 }
 0x86e   : > { %9621 = vxpose.xlu0.b32.cont [7/16] %v9449_v50, 128  ;;  %v9341_v18 = vadd.f32 %v17510_v58, %v19295_v16 }
 0x86f   : > { %v9574_v27 = vpop.trf.xlu0 }
 0x870   : > { %9821 = vst [vmem:[%s17701_s14 + $0x70] sm:$0xff] %v9574_v27  ;;  %v9606_v63 = vpop.trf.xlu1  ;;  %v19296_v27 = vld [vmem:[#allocation107_spill] sm:$0xff]  ;;  %v9469_v17 = vmax.f32 %v9341_v18, 0.0 }
 0x871   : > { %9653 = vxpose.xlu1.b32.cont [7/16] %v9450_v3, 128  ;;  %9853 = vst [vmem:[%s17701_s14 + $0x170] sm:$0xff] %v9606_v63  ;;  %v9342_v3 = vadd.f32 %v17607_v33, %v19296_v27 }
 0x872   : > { %9622 = vxpose.xlu0.b32.cont [8/16] %v9453_v8, 128  ;;  %v19297_v8 = vld [vmem:[#allocation137_spill] sm:$0xff] }
 0x873   : > { %v9575_v0 = vpop.trf.xlu0  ;;  %v9345_v45 = vadd.f32 %v17510_v58, %v19297_v8 }
 0x874   : > { %9823 = vst [vmem:[%s17701_s14 + $0x80] sm:$0xff] %v9575_v0  ;;  %v9607_v13 = vpop.trf.xlu1 }
 0x875   : > { %9654 = vxpose.xlu1.b32.cont [8/16] %v9454_v14, 128  ;;  %9855 = vst [vmem:[%s17701_s14 + $0x180] sm:$0xff] %v9607_v13  ;;  %v9470_v14 = vmax.f32 %v9342_v3, 0.0  ;;  %v9473_v56 = vmax.f32 %v9345_v45, 0.0  ;;  %v19299_v13 = vld [vmem:[#allocation106_spill] sm:$0xff] }
 0x876   : > { %9623 = vxpose.xlu0.b32.cont [9/16] %v9457_v54, 128  ;;  %v9346_v54 = vadd.f32 %v17607_v33, %v19298_v59 }
 0x877   : > { %v9576_v48 = vpop.trf.xlu0 }
 0x878   : > { %9825 = vst [vmem:[%s17701_s14 + $0x90] sm:$0xff] %v9576_v48  ;;  %v9608_v21 = vpop.trf.xlu1  ;;  %v9349_v48 = vadd.f32 %v17510_v58, %v19299_v13  ;;  %v9474_v61 = vmax.f32 %v9346_v54, 0.0 }
 0x879   : > { %9655 = vxpose.xlu1.b32.cont [9/16] %v9458_v46, 128  ;;  %9857 = vst [vmem:[%s17701_s14 + $0x190] sm:$0xff] %v9608_v21  ;;  %v19301_v21 = vld [vmem:[#allocation139_spill] sm:$0xff] }
 0x87a   : > { %9624 = vxpose.xlu0.b32.cont [10/16] %v9461_v49, 128  ;;  %v19300_v49 = vld [vmem:[#allocation111_spill] sm:$0xff]  ;;  %v9477_v11 = vmax.f32 %v9349_v48, 0.0 }
 0x87b   : > { %v9577_v7 = vpop.trf.xlu0  ;;  %v9350_v24 = vadd.f32 %v17607_v33, %v19300_v49 }
 0x87c   : > { %9827 = vst [vmem:[%s17701_s14 + $0xa0] sm:$0xff] %v9577_v7  ;;  %v9609_v50 = vpop.trf.xlu1  ;;  %v9353_v7 = vadd.f32 %v17510_v58, %v19301_v21  ;;  %v9509_v21 = vmax.f32 %v17770_v26, 0.0  ;;  %v9514_v26 = vmax.f32 %v17787_v22, 0.0 }
 0x87d   : > { %9656 = vxpose.xlu1.b32.cont [10/16] %v9462_v57, 128  ;;  %9859 = vst [vmem:[%s17701_s14 + $0x1a0] sm:$0xff] %v9609_v50  ;;  %v9478_v44 = vmax.f32 %v9350_v24, 0.0  ;;  %v19303_v50 = vld [vmem:[#allocation110_spill] sm:$0xff]  ;;  %v9505_v24 = vmax.f32 %v17761_v19, 0.0  ;;  %v9510_v19 = vmax.f32 %v17774_v2, 0.0 }
 0x87e   : > { %9625 = vxpose.xlu0.b32.cont [11/16] %v9465_v42, 128  ;;  %v19302_v42 = vld [vmem:[#allocation145_spill] sm:$0xff]  ;;  %v9481_v18 = vmax.f32 %v9353_v7, 0.0 }
 0x87f   : > { %v9578_v25 = vpop.trf.xlu0  ;;  %v9354_v16 = vadd.f32 %v17607_v33, %v19302_v42 }
 0x880   : > { %9829 = vst [vmem:[%s17701_s14 + $0xb0] sm:$0xff] %v9578_v25  ;;  %v9610_v63 = vpop.trf.xlu1  ;;  %v9357_v25 = vadd.f32 %v17510_v58, %v19303_v50  ;;  %v9525_v50 = vmax.f32 %v17808_v34, 0.0  ;;  %v9530_v34 = vmax.f32 %v17825_v55, 0.0 }
 0x881   : > { %9657 = vxpose.xlu1.b32.cont [11/16] %v9466_v35, 128  ;;  %9861 = vst [vmem:[%s17701_s14 + $0x1b0] sm:$0xff] %v9610_v63  ;;  %v9482_v3 = vmax.f32 %v9354_v16, 0.0  ;;  %v9521_v16 = vmax.f32 %v17799_v51, 0.0  ;;  %v9526_v51 = vmax.f32 %v17812_v62, 0.0 }
 0x882   : > { %9626 = vxpose.xlu0.b32.cont [12/16] %v9469_v17, 128  ;;  %v19304_v17 = vld [vmem:[#allocation101_spill] sm:$0xff]  ;;  %v9485_v45 = vmax.f32 %v9357_v25, 0.0 }
 0x883   : > { %v9579_v0 = vpop.trf.xlu0  ;;  %v9358_v8 = vadd.f32 %v17607_v33, %v19304_v17  ;;  %v9490_v33 = vmax.f32 %v17728_v40, 0.0 }
 0x884   : > { %9831 = vst [vmem:[%s17701_s14 + $0xc0] sm:$0xff] %v9579_v0  ;;  %v9611_v46 = vpop.trf.xlu1 }
 0x885   : > { %9658 = vxpose.xlu1.b32.cont [12/16] %v9470_v14, 128  ;;  %9863 = vst [vmem:[%s17701_s14 + $0x1c0] sm:$0xff] %v9611_v46  ;;  %v9486_v0 = vmax.f32 %v9358_v8, 0.0  ;;  %v9489_v14 = vmax.f32 %v17725_v39, 0.0  ;;  %v9494_v39 = vmax.f32 %v17736_v5, 0.0  ;;  %v9497_v46 = vmax.f32 %v17743_v28, 0.0 }
 0x886   : > { %9627 = vxpose.xlu0.b32.cont [13/16] %v9473_v56, 128  ;;  %v9493_v56 = vmax.f32 %v17733_v9, 0.0  ;;  %v9498_v9 = vmax.f32 %v17749_v53, 0.0  ;;  %v9502_v28 = vmax.f32 %v17757_v43, 0.0  ;;  %v9537_v8 = vmax.f32 %v17837_v1, 0.0 }
 0x887   : > { %v9580_v32 = vpop.trf.xlu0  ;;  %v9542_v1 = vmax.f32 %v17850_v36, 0.0 }
 0x888   : > { %9833 = vst [vmem:[%s17701_s14 + $0xd0] sm:$0xff] %v9580_v32  ;;  %v9612_v57 = vpop.trf.xlu1 }
 0x889   : > { %9659 = vxpose.xlu1.b32.cont [13/16] %v9474_v61, 128  ;;  %9865 = vst [vmem:[%s17701_s14 + $0x1d0] sm:$0xff] %v9612_v57  ;;  %v9501_v61 = vmax.f32 %v17753_v29, 0.0  ;;  %v9506_v29 = vmax.f32 %v17765_v15, 0.0  ;;  %v9513_v57 = vmax.f32 %v17781_v23, 0.0  ;;  %v9518_v23 = vmax.f32 %v17795_v20, 0.0 }
 0x88a   : > { %9628 = vxpose.xlu0.b32.cont [14/16] %v9477_v11, 128 }
 0x88b   : > { %v9581_v60 = vpop.trf.xlu0 }
 0x88c   : > { %9835 = vst [vmem:[%s17701_s14 + $0xe0] sm:$0xff] %v9581_v60  ;;  %v9613_v35 = vpop.trf.xlu1 }
 0x88d   : > { %9660 = vxpose.xlu1.b32.cont [14/16] %v9478_v44, 128  ;;  %9867 = vst [vmem:[%s17701_s14 + $0x1e0] sm:$0xff] %v9613_v35  ;;  %v9517_v44 = vmax.f32 %v17791_v41, 0.0  ;;  %v9522_v41 = vmax.f32 %v17803_v6, 0.0  ;;  %v9529_v35 = vmax.f32 %v17819_v12, 0.0  ;;  %v9534_v12 = vmax.f32 %v17833_v31, 0.0 }
 0x88e   : > { %9629 = vxpose.xlu0.b32.cont [15/16] %v9481_v18, 128 }
 0x88f   : > { %v9582_v27 = vpop.trf.xlu0 }
 0x890   : > { %9837 = vst [vmem:[%s17701_s14 + $0xf0] sm:$0xff] %v9582_v27  ;;  %v9614_v63 = vpop.trf.xlu1 }
 0x891   : > { %9661 = vxpose.xlu1.b32.cont [15/16] %v9482_v3, 128  ;;  %9869 = vst [vmem:[%s17701_s14 + $0x1f0] sm:$0xff] %v9614_v63  ;;  %v9533_v3 = vmax.f32 %v17829_v30, 0.0  ;;  %v9538_v30 = vmax.f32 %v17841_v4, 0.0  ;;  %v9541_v63 = vmax.f32 %v17846_v38, 0.0  ;;  %v9546_v38 = vmax.f32 %v17863_v47, 0.0 }
 0x892   : > { %9630 = vxpose.xlu0.b32.end [16/16] %v9485_v45, 128 }
 0x893   : > { %v9695_v58 = vpop.trf.xlu0 }
 0x894   : > { %9808 = vst [vmem:[%s17701_s14 + $0x8] sm:$0xff] %v9695_v58  ;;  %v9727_v59 = vpop.trf.xlu1 }
 0x895   : > { %9662 = vxpose.xlu1.b32.end [16/16] %v9486_v0, 128  ;;  %9840 = vst [vmem:[%s17701_s14 + $0x108] sm:$0xff] %v9727_v59  ;;  %v9545_v0 = vmax.f32 %v17857_v37, 0.0  ;;  %v9549_v59 = vmax.f32 %v17867_v52, 0.0 }
 0x896   : > { %9743 = vxpose.xlu0.b32.start [1/16] %v9489_v14, 128 }
 0x897   : > { %v9696_v54 = vpop.trf.xlu0 }
 0x898   : > { %9810 = vst [vmem:[%s17701_s14 + $0x18] sm:$0xff] %v9696_v54  ;;  %v9728_v13 = vpop.trf.xlu1  ;;  %v9550_v54 = vmax.f32 %v17871_v10, 0.0 }
 0x899   : > { %9775 = vxpose.xlu1.b32.start [1/16] %v9490_v33, 128  ;;  %9842 = vst [vmem:[%s17701_s14 + $0x118] sm:$0xff] %v9728_v13 }
 0x89a   : > { %9744 = vxpose.xlu0.b32.cont [2/16] %v9493_v56, 128 }
 0x89b   : > { %v9697_v48 = vpop.trf.xlu0 }
 0x89c   : > { %9812 = vst [vmem:[%s17701_s14 + $0x28] sm:$0xff] %v9697_v48  ;;  %v9729_v32 = vpop.trf.xlu1 }
 0x89d   : > { %9776 = vxpose.xlu1.b32.cont [2/16] %v9494_v39, 128  ;;  %9844 = vst [vmem:[%s17701_s14 + $0x128] sm:$0xff] %v9729_v32 }
 0x89e   : > { %9745 = vxpose.xlu0.b32.cont [3/16] %v9497_v46, 128 }
 0x89f   : > { %v9698_v40 = vpop.trf.xlu0 }
 0x8a0   : > { %9814 = vst [vmem:[%s17701_s14 + $0x38] sm:$0xff] %v9698_v40  ;;  %v9730_v49 = vpop.trf.xlu1 }
 0x8a1   : > { %9777 = vxpose.xlu1.b32.cont [3/16] %v9498_v9, 128  ;;  %9846 = vst [vmem:[%s17701_s14 + $0x138] sm:$0xff] %v9730_v49 }
 0x8a2   : > { %9746 = vxpose.xlu0.b32.cont [4/16] %v9501_v61, 128 }
 0x8a3   : > { %v9699_v5 = vpop.trf.xlu0 }
 0x8a4   : > { %9816 = vst [vmem:[%s17701_s14 + $0x48] sm:$0xff] %v9699_v5  ;;  %v9731_v11 = vpop.trf.xlu1 }
 0x8a5   : > { %9778 = vxpose.xlu1.b32.cont [4/16] %v9502_v28, 128  ;;  %9848 = vst [vmem:[%s17701_s14 + $0x148] sm:$0xff] %v9731_v11 }
 0x8a6   : > { %9747 = vxpose.xlu0.b32.cont [5/16] %v9505_v24, 128 }
 0x8a7   : > { %v9700_v53 = vpop.trf.xlu0 }
 0x8a8   : > { %9818 = vst [vmem:[%s17701_s14 + $0x58] sm:$0xff] %v9700_v53  ;;  %v9732_v7 = vpop.trf.xlu1 }
 0x8a9   : > { %9779 = vxpose.xlu1.b32.cont [5/16] %v9506_v29, 128  ;;  %9850 = vst [vmem:[%s17701_s14 + $0x158] sm:$0xff] %v9732_v7 }
 0x8aa   : > { %9748 = vxpose.xlu0.b32.cont [6/16] %v9509_v21, 128 }
 0x8ab   : > { %v9701_v43 = vpop.trf.xlu0 }
 0x8ac   : > { %9820 = vst [vmem:[%s17701_s14 + $0x68] sm:$0xff] %v9701_v43  ;;  %v9733_v60 = vpop.trf.xlu1 }
 0x8ad   : > { %9780 = vxpose.xlu1.b32.cont [6/16] %v9510_v19, 128  ;;  %9852 = vst [vmem:[%s17701_s14 + $0x168] sm:$0xff] %v9733_v60 }
 0x8ae   : > { %9749 = vxpose.xlu0.b32.cont [7/16] %v9513_v57, 128 }
 0x8af   : > { %v9702_v15 = vpop.trf.xlu0 }
 0x8b0   : > { %9822 = vst [vmem:[%s17701_s14 + $0x78] sm:$0xff] %v9702_v15  ;;  %v9734_v42 = vpop.trf.xlu1 }
 0x8b1   : > { %9781 = vxpose.xlu1.b32.cont [7/16] %v9514_v26, 128  ;;  %9854 = vst [vmem:[%s17701_s14 + $0x178] sm:$0xff] %v9734_v42 }
 0x8b2   : > { %9750 = vxpose.xlu0.b32.cont [8/16] %v9517_v44, 128 }
 0x8b3   : > { %v9703_v2 = vpop.trf.xlu0 }
 0x8b4   : > { %9824 = vst [vmem:[%s17701_s14 + $0x88] sm:$0xff] %v9703_v2  ;;  %v9735_v18 = vpop.trf.xlu1 }
 0x8b5   : > { %9782 = vxpose.xlu1.b32.cont [8/16] %v9518_v23, 128  ;;  %9856 = vst [vmem:[%s17701_s14 + $0x188] sm:$0xff] %v9735_v18 }
 0x8b6   : > { %9751 = vxpose.xlu0.b32.cont [9/16] %v9521_v16, 128 }
 0x8b7   : > { %v9704_v22 = vpop.trf.xlu0 }
 0x8b8   : > { %9826 = vst [vmem:[%s17701_s14 + $0x98] sm:$0xff] %v9704_v22  ;;  %v9736_v25 = vpop.trf.xlu1 }
 0x8b9   : > { %9783 = vxpose.xlu1.b32.cont [9/16] %v9522_v41, 128  ;;  %9858 = vst [vmem:[%s17701_s14 + $0x198] sm:$0xff] %v9736_v25 }
 0x8ba   : > { %9752 = vxpose.xlu0.b32.cont [10/16] %v9525_v50, 128 }
 0x8bb   : > { %v9705_v20 = vpop.trf.xlu0 }
 0x8bc   : > { %9828 = vst [vmem:[%s17701_s14 + $0xa8] sm:$0xff] %v9705_v20  ;;  %v9737_v27 = vpop.trf.xlu1 }
 0x8bd   : > { %9784 = vxpose.xlu1.b32.cont [10/16] %v9526_v51, 128  ;;  %9860 = vst [vmem:[%s17701_s14 + $0x1a8] sm:$0xff] %v9737_v27 }
 0x8be   : > { %9753 = vxpose.xlu0.b32.cont [11/16] %v9529_v35, 128 }
 0x8bf   : > { %v9706_v6 = vpop.trf.xlu0 }
 0x8c0   : > { %9830 = vst [vmem:[%s17701_s14 + $0xb8] sm:$0xff] %v9706_v6  ;;  %v9738_v17 = vpop.trf.xlu1 }
 0x8c1   : > { %9785 = vxpose.xlu1.b32.cont [11/16] %v9530_v34, 128  ;;  %9862 = vst [vmem:[%s17701_s14 + $0x1b8] sm:$0xff] %v9738_v17 }
 0x8c2   : > { %9754 = vxpose.xlu0.b32.cont [12/16] %v9533_v3, 128 }
 0x8c3   : > { %v9707_v62 = vpop.trf.xlu0 }
 0x8c4   : > { %9832 = vst [vmem:[%s17701_s14 + $0xc8] sm:$0xff] %v9707_v62  ;;  %v9739_v45 = vpop.trf.xlu1 }
 0x8c5   : > { %9786 = vxpose.xlu1.b32.cont [12/16] %v9534_v12, 128  ;;  %9864 = vst [vmem:[%s17701_s14 + $0x1c8] sm:$0xff] %v9739_v45 }
 0x8c6   : > { %9755 = vxpose.xlu0.b32.cont [13/16] %v9537_v8, 128 }
 0x8c7   : > { %v9708_v55 = vpop.trf.xlu0 }
 0x8c8   : > { %9834 = vst [vmem:[%s17701_s14 + $0xd8] sm:$0xff] %v9708_v55  ;;  %v9740_v58 = vpop.trf.xlu1 }
 0x8c9   : > { %9787 = vxpose.xlu1.b32.cont [13/16] %v9538_v30, 128  ;;  %9866 = vst [vmem:[%s17701_s14 + $0x1d8] sm:$0xff] %v9740_v58 }
 0x8ca   : > { %9756 = vxpose.xlu0.b32.cont [14/16] %v9541_v63, 128 }
 0x8cb   : > { %v9709_v31 = vpop.trf.xlu0 }
 0x8cc   : > { %9836 = vst [vmem:[%s17701_s14 + $0xe8] sm:$0xff] %v9709_v31  ;;  %v9741_v14 = vpop.trf.xlu1 }
 0x8cd   : > { %9788 = vxpose.xlu1.b32.cont [14/16] %v9542_v1, 128  ;;  %9868 = vst [vmem:[%s17701_s14 + $0x1e8] sm:$0xff] %v9741_v14 }
 0x8ce   : > { %9757 = vxpose.xlu0.b32.cont [15/16] %v9545_v0, 128 }
 0x8cf   : > { %v9710_v4 = vpop.trf.xlu0 }
 0x8d0   : > { %9838 = vst [vmem:[%s17701_s14 + $0xf8] sm:$0xff] %v9710_v4  ;;  %v9742_v36 = vpop.trf.xlu1 }
 0x8d1   : > { %9789 = vxpose.xlu1.b32.cont [15/16] %v9546_v38, 128  ;;  %9870 = vst [vmem:[%s17701_s14 + $0x1f8] sm:$0xff] %v9742_v36 }
 0x8d2   : > { %9758 = vxpose.xlu0.b32.end [16/16] %v9549_v59, 128 }
 0x8d3   : > { %v9631_v37 = vpop.trf.xlu0 }
 0x8d4   : > { %9871 = vst [vmem:[%s17701_s14 + $0x200] sm:$0xff] %v9631_v37 }
 0x8d5   : > { %9790 = vxpose.xlu1.b32.end [16/16] %v9550_v54, 128  ;;  %v9663_v33 = vpop.trf.xlu1 }
 0x8d6   : > { %9903 = vst [vmem:[%s17701_s14 + $0x300] sm:$0xff] %v9663_v33 }
 0x8d7   : > { %v9632_v47 = vpop.trf.xlu0 }
 0x8d8   : > { %9873 = vst [vmem:[%s17701_s14 + $0x210] sm:$0xff] %v9632_v47 }
 0x8d9   : > { %v9664_v52 = vpop.trf.xlu1 }
 0x8da   : > { %9905 = vst [vmem:[%s17701_s14 + $0x310] sm:$0xff] %v9664_v52 }
 0x8db   : > { %v9633_v56 = vpop.trf.xlu0 }
 0x8dc   : > { %9875 = vst [vmem:[%s17701_s14 + $0x220] sm:$0xff] %v9633_v56 }
 0x8dd   : > { %v9665_v13 = vpop.trf.xlu1 }
 0x8de   : > { %9907 = vst [vmem:[%s17701_s14 + $0x320] sm:$0xff] %v9665_v13 }
 0x8df   : > { %v9634_v10 = vpop.trf.xlu0 }
 0x8e0   : > { %9877 = vst [vmem:[%s17701_s14 + $0x230] sm:$0xff] %v9634_v10 }
 0x8e1   : > { %v9666_v48 = vpop.trf.xlu1 }
 0x8e2   : > { %9909 = vst [vmem:[%s17701_s14 + $0x330] sm:$0xff] %v9666_v48 }
 0x8e3   : > { %v9635_v39 = vpop.trf.xlu0 }
 0x8e4   : > { %9879 = vst [vmem:[%s17701_s14 + $0x240] sm:$0xff] %v9635_v39 }
 0x8e5   : > { %v9667_v46 = vpop.trf.xlu1 }
 0x8e6   : > { %9911 = vst [vmem:[%s17701_s14 + $0x340] sm:$0xff] %v9667_v46 }
 0x8e7   : > { %v9636_v32 = vpop.trf.xlu0 }
 0x8e8   : > { %9881 = vst [vmem:[%s17701_s14 + $0x250] sm:$0xff] %v9636_v32 }
 0x8e9   : > { %v9668_v40 = vpop.trf.xlu1 }
 0x8ea   : > { %9913 = vst [vmem:[%s17701_s14 + $0x350] sm:$0xff] %v9668_v40 }
 0x8eb   : > { %v9637_v9 = vpop.trf.xlu0 }
 0x8ec   : > { %9883 = vst [vmem:[%s17701_s14 + $0x260] sm:$0xff] %v9637_v9 }
 0x8ed   : > { %v9669_v61 = vpop.trf.xlu1 }
 0x8ee   : > { %9915 = vst [vmem:[%s17701_s14 + $0x360] sm:$0xff] %v9669_v61 }
 0x8ef   : > { %v9638_v49 = vpop.trf.xlu0 }
 0x8f0   : > { %9885 = vst [vmem:[%s17701_s14 + $0x270] sm:$0xff] %v9638_v49 }
 0x8f1   : > { %v9670_v5 = vpop.trf.xlu1 }
 0x8f2   : > { %9917 = vst [vmem:[%s17701_s14 + $0x370] sm:$0xff] %v9670_v5 }
 0x8f3   : > { %v9639_v28 = vpop.trf.xlu0 }
 0x8f4   : > { %9887 = vst [vmem:[%s17701_s14 + $0x280] sm:$0xff] %v9639_v28 }
 0x8f5   : > { %v9671_v24 = vpop.trf.xlu1 }
 0x8f6   : > { %9919 = vst [vmem:[%s17701_s14 + $0x380] sm:$0xff] %v9671_v24 }
 0x8f7   : > { %v9640_v11 = vpop.trf.xlu0 }
 0x8f8   : > { %9889 = vst [vmem:[%s17701_s14 + $0x290] sm:$0xff] %v9640_v11 }
 0x8f9   : > { %v9672_v53 = vpop.trf.xlu1 }
 0x8fa   : > { %9921 = vst [vmem:[%s17701_s14 + $0x390] sm:$0xff] %v9672_v53 }
 0x8fb   : > { %v9641_v29 = vpop.trf.xlu0 }
 0x8fc   : > { %9891 = vst [vmem:[%s17701_s14 + $0x2a0] sm:$0xff] %v9641_v29 }
 0x8fd   : > { %v9673_v21 = vpop.trf.xlu1 }
 0x8fe   : > { %9923 = vst [vmem:[%s17701_s14 + $0x3a0] sm:$0xff] %v9673_v21 }
 0x8ff   : > { %v9642_v7 = vpop.trf.xlu0 }
 0x900   : > { %9893 = vst [vmem:[%s17701_s14 + $0x2b0] sm:$0xff] %v9642_v7 }
 0x901   : > { %v9674_v43 = vpop.trf.xlu1 }
 0x902   : > { %9925 = vst [vmem:[%s17701_s14 + $0x3b0] sm:$0xff] %v9674_v43 }
 0x903   : > { %v9643_v19 = vpop.trf.xlu0 }
 0x904   : > { %9895 = vst [vmem:[%s17701_s14 + $0x2c0] sm:$0xff] %v9643_v19 }
 0x905   : > { %v9675_v57 = vpop.trf.xlu1 }
 0x906   : > { %9927 = vst [vmem:[%s17701_s14 + $0x3c0] sm:$0xff] %v9675_v57 }
 0x907   : > { %v9644_v60 = vpop.trf.xlu0 }
 0x908   : > { %9897 = vst [vmem:[%s17701_s14 + $0x2d0] sm:$0xff] %v9644_v60 }
 0x909   : > { %v9676_v15 = vpop.trf.xlu1 }
 0x90a   : > { %9929 = vst [vmem:[%s17701_s14 + $0x3d0] sm:$0xff] %v9676_v15 }
 0x90b   : > { %v9645_v26 = vpop.trf.xlu0 }
 0x90c   : > { %9899 = vst [vmem:[%s17701_s14 + $0x2e0] sm:$0xff] %v9645_v26 }
 0x90d   : > { %v9677_v44 = vpop.trf.xlu1 }
 0x90e   : > { %9931 = vst [vmem:[%s17701_s14 + $0x3e0] sm:$0xff] %v9677_v44 }
 0x90f   : > { %v9646_v42 = vpop.trf.xlu0 }
 0x910   : > { %9901 = vst [vmem:[%s17701_s14 + $0x2f0] sm:$0xff] %v9646_v42 }
 0x911   : > { %v9678_v2 = vpop.trf.xlu1 }
 0x912   : > { %9933 = vst [vmem:[%s17701_s14 + $0x3f0] sm:$0xff] %v9678_v2 }
 0x913   : > { %v9759_v23 = vpop.trf.xlu0 }
 0x914   : > { %9872 = vst [vmem:[%s17701_s14 + $0x208] sm:$0xff] %v9759_v23 }
 0x915   : > { %v9791_v16 = vpop.trf.xlu1 }
 0x916   : > { %9904 = vst [vmem:[%s17701_s14 + $0x308] sm:$0xff] %v9791_v16 }
 0x917   : > { %v9760_v18 = vpop.trf.xlu0 }
 0x918   : > { %9874 = vst [vmem:[%s17701_s14 + $0x218] sm:$0xff] %v9760_v18 }
 0x919   : > { %v9792_v22 = vpop.trf.xlu1 }
 0x91a   : > { %9906 = vst [vmem:[%s17701_s14 + $0x318] sm:$0xff] %v9792_v22 }
 0x91b   : > { %v9761_v41 = vpop.trf.xlu0 }
 0x91c   : > { %9876 = vst [vmem:[%s17701_s14 + $0x228] sm:$0xff] %v9761_v41 }
 0x91d   : > { %v9793_v50 = vpop.trf.xlu1 }
 0x91e   : > { %9908 = vst [vmem:[%s17701_s14 + $0x328] sm:$0xff] %v9793_v50 }
 0x91f   : > { %v9762_v25 = vpop.trf.xlu0 }
 0x920   : > { %9878 = vst [vmem:[%s17701_s14 + $0x238] sm:$0xff] %v9762_v25 }
 0x921   : > { %v9794_v20 = vpop.trf.xlu1 }
 0x922   : > { %9910 = vst [vmem:[%s17701_s14 + $0x338] sm:$0xff] %v9794_v20 }
 0x923   : > { %v9763_v51 = vpop.trf.xlu0 }
 0x924   : > { %9880 = vst [vmem:[%s17701_s14 + $0x248] sm:$0xff] %v9763_v51 }
 0x925   : > { %v9795_v35 = vpop.trf.xlu1 }
 0x926   : > { %9912 = vst [vmem:[%s17701_s14 + $0x348] sm:$0xff] %v9795_v35 }
 0x927   : > { %v9764_v27 = vpop.trf.xlu0 }
 0x928   : > { %9882 = vst [vmem:[%s17701_s14 + $0x258] sm:$0xff] %v9764_v27 }
 0x929   : > { %v9796_v6 = vpop.trf.xlu1 }
 0x92a   : > { %9914 = vst [vmem:[%s17701_s14 + $0x358] sm:$0xff] %v9796_v6 }
 0x92b   : > { %v9765_v34 = vpop.trf.xlu0 }
 0x92c   : > { %9884 = vst [vmem:[%s17701_s14 + $0x268] sm:$0xff] %v9765_v34 }
 0x92d   : > { %v9797_v3 = vpop.trf.xlu1 }
 0x92e   : > { %9916 = vst [vmem:[%s17701_s14 + $0x368] sm:$0xff] %v9797_v3 }
 0x92f   : > { %v9766_v17 = vpop.trf.xlu0 }
 0x930   : > { %9886 = vst [vmem:[%s17701_s14 + $0x278] sm:$0xff] %v9766_v17 }
 0x931   : > { %v9798_v62 = vpop.trf.xlu1 }
 0x932   : > { %9918 = vst [vmem:[%s17701_s14 + $0x378] sm:$0xff] %v9798_v62 }
 0x933   : > { %v9767_v12 = vpop.trf.xlu0 }
 0x934   : > { %9888 = vst [vmem:[%s17701_s14 + $0x288] sm:$0xff] %v9767_v12 }
 0x935   : > { %v9799_v8 = vpop.trf.xlu1 }
 0x936   : > { %9920 = vst [vmem:[%s17701_s14 + $0x388] sm:$0xff] %v9799_v8 }
 0x937   : > { %v9768_v45 = vpop.trf.xlu0 }
 0x938   : > { %9890 = vst [vmem:[%s17701_s14 + $0x298] sm:$0xff] %v9768_v45 }
 0x939   : > { %v9800_v55 = vpop.trf.xlu1 }
 0x93a   : > { %9922 = vst [vmem:[%s17701_s14 + $0x398] sm:$0xff] %v9800_v55 }
 0x93b   : > { %v9769_v30 = vpop.trf.xlu0 }
 0x93c   : > { %9892 = vst [vmem:[%s17701_s14 + $0x2a8] sm:$0xff] %v9769_v30 }
 0x93d   : > { %v9801_v63 = vpop.trf.xlu1 }
 0x93e   : > { %9924 = vst [vmem:[%s17701_s14 + $0x3a8] sm:$0xff] %v9801_v63 }
 0x93f   : > { %v9770_v58 = vpop.trf.xlu0 }
 0x940   : > { %9894 = vst [vmem:[%s17701_s14 + $0x2b8] sm:$0xff] %v9770_v58 }
 0x941   : > { %v9802_v31 = vpop.trf.xlu1 }
 0x942   : > { %9926 = vst [vmem:[%s17701_s14 + $0x3b8] sm:$0xff] %v9802_v31 }
 0x943   : > { %v9771_v1 = vpop.trf.xlu0 }
 0x944   : > { %9896 = vst [vmem:[%s17701_s14 + $0x2c8] sm:$0xff] %v9771_v1 }
 0x945   : > { %v9803_v0 = vpop.trf.xlu1 }
 0x946   : > { %9928 = vst [vmem:[%s17701_s14 + $0x3c8] sm:$0xff] %v9803_v0 }
 0x947   : > { %v9772_v14 = vpop.trf.xlu0 }
 0x948   : > { %9898 = vst [vmem:[%s17701_s14 + $0x2d8] sm:$0xff] %v9772_v14 }
 0x949   : > { %v9804_v4 = vpop.trf.xlu1 }
 0x94a   : > { %9930 = vst [vmem:[%s17701_s14 + $0x3d8] sm:$0xff] %v9804_v4 }
 0x94b   : > { %v9773_v38 = vpop.trf.xlu0 }
 0x94c   : > { %9900 = vst [vmem:[%s17701_s14 + $0x2e8] sm:$0xff] %v9773_v38 }
 0x94d   : > { %v9805_v59 = vpop.trf.xlu1 }
 0x94e   : > { %9932 = vst [vmem:[%s17701_s14 + $0x3e8] sm:$0xff] %v9805_v59 }
 0x94f   : > { %v9774_v36 = vpop.trf.xlu0 }
 0x950   : > { %9902 = vst [vmem:[%s17701_s14 + $0x2f8] sm:$0xff] %v9774_v36 }
 0x951   : > { %v9806_v37 = vpop.trf.xlu1 }
 0x952   : > { %9934 = vst [vmem:[%s17701_s14 + $0x3f8] sm:$0xff] %v9806_v37 }
 0x953   : > { %11536 = shalt.err (!%p11533_p3)
}
 0x954   : > { %s11537_s15 = scalar_lea.hbm %s18052_s27, 16384  ;;  %s11541_s22 = scalar_lea.hbm %s18112_s13, 32768 }
 0x955   : > { %p11538_p4 = scmp.ne.s32.totalorder %s18052_s27, %s11537_s15  ;;  %p11542_p9 = scmp.lt.s32.totalorder %s18052_s27, %s18112_s13 }
 0x956   : > { %p11543_p10 = scmp.lt.s32.totalorder %s11541_s22, %s11537_s15 }
 0x957   : > { %p11539_p7 = pnand %p11538_p4, %p11698_p5 }
 0x958   : > { %p11544_p11 = por %p11543_p10, %p11542_p9 }
 0x959   : > { %p11540_p8 = pneg %p11539_p7 }
 0x95b   : > { %p11545_p12 = pnand %p11544_p11, %p11540_p8 }
 0x95d   : > { %11548 = shalt.err (!%p11545_p12)
}
 0x95e   : > { %s11588_s29 = smov 256   ;;  %s11589_s30 = smov 16  }
 0x95f   : > { %10810 = dma.vmem_to_hbm [thread:$0]  (%p11698_p5), %s18054_s21, 16384, %s18052_s27, %s18059_s17, %s11588_s29, %s11588_s29, %s11589_s30  }
 0x960 PF: > { %p10816_p13 = scmp.ge.s32.totalorder %s11583_s28, 2  ;;  %s9964_s16 = sand.u32 1, %s11571_s25  }
 0x961   : > { %s9965_s15 = scalar_lea.sflag [#allocation3], %s9964_s16 }
 0x962   : > { %p10813_p0 = pnand %p10816_p13, %p11702_p6 }
 0x964   : > { %p10814_p1 = pneg %p10813_p0 }
 0x966   : > { %11566 = dma.done.wait (%p10814_p1), %s9965_s15, 16384  }
 0x967   : > { %11568 = vsyncadd (%p10814_p1), %s9965_s15, 4294950912  ;;  %s19305_s28 = sld [smem:[#allocation6_spill]]  ;;  %s19308_s25 = smov %s11575_s26 }
 0x968   : > { %s19306_s14 = sld [smem:[#allocation5_spill]] }
 0x969   : > { %s19307_s27 = sld [smem:[#allocation7_spill]] }
 0x96d   : > { %p23_p2 = scmp.ge.s32.totalorder %s19305_s28, 4  }
 0x96e   : > { %s19309_s26 = smov %s19306_s14 }
 0x96f   :  { %25 = sbr.rel (!%p23_p2) target bundleno = 3 (0x3), region = 107 }
 0x974   :  { %9970 = vsyncpa [#allocation3], 1 }
 0x975   :  { %9972 = vsyncpa [#allocation3 + $0x1], 1 }

</bundles_post_ra>
